<compile_context>
chip_gen: v5e
topology: v5e:2x2
jax: 0.10.0
libtpu: 0.0.40
codegen_flags: <defaults>
</compile_context>

<pallas_src>
import functools

import jax
import jax.numpy as jnp
from jax.experimental import pallas as pl
from jax.experimental.pallas import tpu as pltpu

FACTORS = [1, 1, 1, 1, 1 / 2, 1 / 4, 1 / 8, 1 / 16, 1 / 32]
_NEG_SLOPE = 0.2
_TM = 512                                # M tile for the fused matmul
_VMEM_LIMIT = 32 * 1024 * 1024           # safe on v5e/v6e/v7x


# ----------------------------------------------------------------------------
# Pallas kernels
# ----------------------------------------------------------------------------
def _mm_kernel(x_ref, w_ref, b_ref, o_ref, *, act):
    # x: [TM, K] bf16, w: [K, Cout] bf16, b: [1, Cout] f32
    acc = jnp.dot(x_ref[...], w_ref[...], preferred_element_type=jnp.float32)
    acc = acc + b_ref[...]
    if act == "leaky":
        acc = jnp.where(acc > 0, acc, _NEG_SLOPE * acc)
    o_ref[...] = acc.astype(o_ref.dtype)


def _mm_fade_kernel(x_ref, w_ref, b_ref, f_ref, a_ref, o_ref, *, act):
    # Same as _mm_kernel but with a fused fade-in epilogue:
    #   o = alpha * f + (1 - alpha) * act(x @ w + b)
    acc = jnp.dot(x_ref[...], w_ref[...], preferred_element_type=jnp.float32)
    acc = acc + b_ref[...]
    if act == "leaky":
        acc = jnp.where(acc > 0, acc, _NEG_SLOPE * acc)
    a = a_ref[...]                                   # [1, 1] broadcast
    o_ref[...] = (a * f_ref[...] + (1.0 - a) * acc).astype(o_ref.dtype)


def _conv3x3_kernel(x_ref, w_ref, b_ref, o_ref, *, M, Wp, act):
    # x: [1, rows, Cin] flattened padded image; w: [9, Cin, Cout]; b: [1, Cout]
    # Output row m = i*Wp + j reads input rows m + ky*Wp + kx  (shifted contiguous slices),
    # so the 3x3 conv is 9 matmuls on slices of the SAME resident activation (no im2col).
    cout = o_ref.shape[2]
    acc = jnp.zeros((M, cout), jnp.float32)
    for ky in range(3):
        for kx in range(3):
            off = ky * Wp + kx
            acc = acc + jnp.dot(x_ref[0, off:off + M, :], w_ref[ky * 3 + kx, :, :],
                                preferred_element_type=jnp.float32)
    acc = acc + b_ref[...]
    if act == "leaky":
        acc = jnp.where(acc > 0, acc, _NEG_SLOPE * acc)
    o_ref[0, :, :] = acc.astype(o_ref.dtype)


# ----------------------------------------------------------------------------
# Kernel wrappers
# ----------------------------------------------------------------------------
def fused_matmul(x, w, b, *, act="none", fade_other=None, alpha=None):
    """[M, K] @ [K, Cout] + bias (+LeakyReLU) (+fade-in), tiled over M."""
    M, K = x.shape
    Nout = w.shape[1]
    x = x.astype(jnp.bfloat16)
    w = w.astype(jnp.bfloat16)
    b2 = jnp.asarray(b, jnp.float32).reshape(1, Nout)

    if M <= _TM:
        tm, grid_m, m_pad = M, 1, M
    else:
        tm = _TM
        m_pad = -(-M // tm) * tm
        grid_m = m_pad // tm
        if m_pad != M:
            x = jnp.pad(x, ((0, m_pad - M), (0, 0)))

    in_specs = [pl.BlockSpec((tm, K), lambda i: (i, 0)),
                pl.BlockSpec((K, Nout), lambda i: (0, 0)),
                pl.BlockSpec((1, Nout), lambda i: (0, 0))]
    args = [x, w, b2]
    if fade_other is not None:
        f = jnp.asarray(fade_other, jnp.float32)
        if m_pad != M:
            f = jnp.pad(f, ((0, m_pad - M), (0, 0)))
        a_arr = jnp.asarray(alpha, jnp.float32).reshape(1, 1)
        in_specs += [pl.BlockSpec((tm, Nout), lambda i: (i, 0)),
                     pl.BlockSpec((1, 1), lambda i: (0, 0))]
        args += [f, a_arr]
        kernel = functools.partial(_mm_fade_kernel, act=act)
    else:
        kernel = functools.partial(_mm_kernel, act=act)

    out = pl.pallas_call(
        kernel,
        grid=(grid_m,),
        in_specs=in_specs,
        out_specs=pl.BlockSpec((tm, Nout), lambda i: (i, 0)),
        out_shape=jax.ShapeDtypeStruct((m_pad, Nout), jnp.float32),
        compiler_params=pltpu.CompilerParams(
            dimension_semantics=("parallel",),
            vmem_limit_bytes=_VMEM_LIMIT),
    )(*args)
    return out[:M] if m_pad != M else out


def conv3x3_direct(x_nhwc, w_taps, b, *, act):
    """3x3, stride 1, pad 1 conv via the direct 9-tap shifted-slice kernel."""
    N, H, W, C = x_nhwc.shape
    cout = w_taps.shape[-1]
    Hp, Wp = H + 2, W + 2
    xp = jnp.pad(x_nhwc, ((0, 0), (1, 1), (1, 1), (0, 0))).reshape(N, Hp * Wp, C)
    rows = -(-(Hp * Wp + 2) // 8) * 8            # +2 halo rows for the (2,2) tap, 8-aligned
    xp = jnp.pad(xp, ((0, 0), (0, rows - Hp * Wp), (0, 0))).astype(jnp.float32)
    M = H * Wp
    kernel = functools.partial(_conv3x3_kernel, M=M, Wp=Wp, act=act)
    out = pl.pallas_call(
        kernel,
        grid=(N,),
        in_specs=[pl.BlockSpec((1, rows, C), lambda n: (n, 0, 0)),
                  pl.BlockSpec((9, C, cout), lambda n: (0, 0, 0)),
                  pl.BlockSpec((1, cout), lambda n: (0, 0))],
        out_specs=pl.BlockSpec((1, M, cout), lambda n: (n, 0, 0)),
        out_shape=jax.ShapeDtypeStruct((N, M, cout), jnp.float32),
        compiler_params=pltpu.CompilerParams(
            dimension_semantics=("parallel",),
            vmem_limit_bytes=_VMEM_LIMIT),
    )(xp, w_taps.astype(jnp.float32),
      jnp.asarray(b, jnp.float32).reshape(1, cout))
    return out.reshape(N, H, Wp, cout)[:, :, :W, :]


# ----------------------------------------------------------------------------
# Layer helpers (weight-scale folding, layout plumbing)
# ----------------------------------------------------------------------------
def ws_conv1x1(x_nhwc, w_oihw, b, *, act="none", fade_other=None, alpha=None):
    cout, cin = w_oihw.shape[0], w_oihw.shape[1]
    N, H, W, _ = x_nhwc.shape
    scale = (2.0 / cin) ** 0.5                               # WSConv gain=2, k=1
    w2 = jnp.transpose(w_oihw[:, :, 0, 0], (1, 0)) * scale   # [Cin, Cout], scale folded
    f = None if fade_other is None else fade_other.reshape(N * H * W, cout)
    out = fused_matmul(x_nhwc.reshape(N * H * W, cin), w2, b, act=act,
                       fade_other=f, alpha=alpha)
    return out.reshape(N, H, W, cout)


def ws_conv3x3(x_nhwc, w_oihw, b, *, act="none"):
    cout, cin = w_oihw.shape[0], w_oihw.shape[1]
    scale = (2.0 / (cin * 9)) ** 0.5
    w_taps = (jnp.transpose(w_oihw, (2, 3, 1, 0)) * scale).reshape(9, cin, cout)
    return conv3x3_direct(x_nhwc, w_taps, b, act=act)


def ws_conv4x4_valid(x_nhwc, w_oihw, b, *, act="none"):
    # 4x4 kernel on a 4x4 map, padding 0 -> one output position: flatten + matmul.
    cout, cin, kh, kw = w_oihw.shape
    N, H, W, C = x_nhwc.shape
    scale = (2.0 / (cin * kh * kw)) ** 0.5
    w2 = (jnp.transpose(w_oihw, (2, 3, 1, 0)) * scale).reshape(kh * kw * cin, cout)
    out = fused_matmul(x_nhwc.reshape(N, H * W * C), w2, b, act=act)
    return out.reshape(N, 1, 1, cout)


def conv_transpose2x2_s2_p2(x_nhwc, w_iohw, b, *, act="leaky"):
    # nn.ConvTranspose2d(k=2, s=2, p=2): each input pixel emits a 2x2 block, then crop 2.
    # All 4 taps are fused into ONE matmul ([M, Cin] @ [Cin, 4*Cout]); interleave/crop in JAX.
    cin, cout = w_iohw.shape[0], w_iohw.shape[1]
    N, H, W, _ = x_nhwc.shape
    w_big = jnp.transpose(w_iohw, (0, 2, 3, 1)).reshape(cin, 4 * cout)   # (dy,dx,cout)
    b_big = jnp.tile(jnp.asarray(b, jnp.float32), 4)
    out = fused_matmul(x_nhwc.reshape(N * H * W, cin), w_big, b_big, act=act)
    out = out.reshape(N, H, W, 2, 2, cout)
    out = jnp.transpose(out, (0, 1, 3, 2, 4, 5)).reshape(N, 2 * H, 2 * W, cout)
    return out[:, 2:-2, 2:-2, :]


def avg_pool2(x):                      # NHWC 2x2 average pool, stride 2
    N, H, W, C = x.shape
    return x.reshape(N, H // 2, 2, W // 2, 2, C).mean(axis=(2, 4))


def minibatch_std(x):                  # NHWC; torch.std is Bessel-corrected (ddof=1)
    std = jnp.std(x, axis=0, ddof=1).mean()
    stat = jnp.full((x.shape[0], x.shape[1], x.shape[2], 1), std, x.dtype)
    return jnp.concatenate([x, stat], axis=-1)


# ----------------------------------------------------------------------------
# Discriminator_C forward
# ----------------------------------------------------------------------------
def _final_head(params, out_nhwc):
    h = ws_conv3x3(out_nhwc, params["final_c1_w"], params["final_c1_b"], act="leaky")
    h = ws_conv4x4_valid(h, params["final_c2_w"], params["final_c2_b"], act="leaky")
    h = ws_conv1x1(h, params["final_c3_w"], params["final_c3_b"], act="none")
    return h.reshape(h.shape[0], -1)


def discriminator_c_forward(params, x_nchw, alpha, steps, labels):
    # x: [N, img_ch, R, R] NCHW; labels: int [N, Hl, Wl] in [0, 4); output [N, 1]
    n_blocks = len(params["prog"])                       # 8
    x = jnp.transpose(x_nchw, (0, 2, 3, 1))              # NHWC

    # label path: Embedding -> WSConv1x1(4->img_ch) -> ConvTranspose(2,2,2) -> LeakyReLU
    emb = params["label_emb"][labels]                    # [N, Hl, Wl, 4]
    c = ws_conv1x1(emb, params["init_label_ws_w"], params["init_label_ws_b"], act="none")
    c = conv_transpose2x2_s2_p2(c, params["init_label_ct_w"], params["init_label_ct_b"],
                                act="leaky")

    x = jnp.concatenate([x, c], axis=-1)                 # torch.cat([x, c], 1)
    x = ws_conv1x1(x, params["init_concat_w"], params["init_concat_b"], act="none")

    cur_step = n_blocks - steps
    out = ws_conv1x1(x, params["rgb"][cur_step]["w"], params["rgb"][cur_step]["b"],
                     act="leaky")
    if steps == 0:
        out = minibatch_std(out)
        return _final_head(params, out)

    # out path: ConvBlock (no pixelnorm) -> avg pool
    blk = params["prog"][cur_step]
    h = ws_conv3x3(out, blk["c1_w"], blk["c1_b"], act="leaky")
    h = ws_conv3x3(h, blk["c2_w"], blk["c2_b"], act="leaky")
    out = avg_pool2(h)

    # downscaled path fused with fade-in:  alpha*out + (1-alpha)*leaky(rgb(avg_pool(x)))
    xd = avg_pool2(x)
    out = ws_conv1x1(xd, params["rgb"][cur_step + 1]["w"], params["rgb"][cur_step + 1]["b"],
                     act="leaky", fade_other=out, alpha=alpha)

    for step in range(cur_step + 1, n_blocks):
        blk = params["prog"][step]
        out = ws_conv3x3(out, blk["c1_w"], blk["c1_b"], act="leaky")
        out = ws_conv3x3(out, blk["c2_w"], blk["c2_b"], act="leaky")
        out = avg_pool2(out)

    out = minibatch_std(out)
    return _final_head(params, out)


# ----------------------------------------------------------------------------
# Deterministic parameter init (shapes follow the PyTorch __init__)
# ----------------------------------------------------------------------------
def init_params(key, in_channels, img_channels):
    n_blocks = len(FACTORS) - 1
    ki = iter(jax.random.split(key, 64))
    nrm = lambda shape, s=1.0: s * jax.random.normal(next(ki), shape, jnp.float32)
    zeros = lambda n: jnp.zeros((n,), jnp.float32)
    p = {
        "label_emb": nrm((4, 4)),
        "init_label_ws_w": nrm((img_channels, 4, 1, 1)),
        "init_label_ws_b": zeros(img_channels),
        "init_label_ct_w": nrm((img_channels, img_channels, 2, 2), 0.25),
        "init_label_ct_b": nrm((img_channels,), 0.1),
        "init_concat_w": nrm((img_channels, 2 * img_channels, 1, 1)),
        "init_concat_b": zeros(img_channels),
        "final_c1_w": nrm((in_channels, in_channels + 1, 3, 3)),
        "final_c1_b": zeros(in_channels),
        "final_c2_w": nrm((in_channels, in_channels, 4, 4)),
        "final_c2_b": zeros(in_channels),
        "final_c3_w": nrm((1, in_channels, 1, 1)),
        "final_c3_b": zeros(1),
    }
    prog, rgb = [], []
    for j in range(n_blocks):                     # mirrors: for i in range(8, 0, -1)
        i = n_blocks - j
        conv_in = int(in_channels * FACTORS[i])
        conv_out = int(in_channels * FACTORS[i - 1])
        prog.append({"c1_w": nrm((conv_out, conv_in, 3, 3)), "c1_b": zeros(conv_out),
                     "c2_w": nrm((conv_out, conv_out, 3, 3)), "c2_b": zeros(conv_out)})
        rgb.append({"w": nrm((conv_in, img_channels, 1, 1)), "b": zeros(conv_in)})
    rgb.append({"w": nrm((in_channels, img_channels, 1, 1)),   # initial_rgb
                "b": zeros(in_channels)})
    p["prog"], p["rgb"] = prog, rgb
    return p


if __name__ == "__main__":
    key = jax.random.PRNGKey(0)
    kx, kl, kp = jax.random.split(key, 3)

    N, IN_CH, IMG_CH, STEPS, ALPHA = 2, 32, 13, 2, 0.5
    R = 4 * (2 ** STEPS)          # image resolution 16
    HL = R // 2 + 2               # ConvTranspose(k=2,s=2,p=2): 2*HL - 4 == R

    x = jax.random.normal(kx, (N, IMG_CH, R, R), jnp.float32)     # image (NCHW)
    labels = jax.random.randint(kl, (N, HL, HL), 0, 4)            # label map (ints)
    params = init_params(kp, IN_CH, IMG_CH)

    fwd = jax.jit(discriminator_c_forward, static_argnames=("steps",))
    out = fwd(params, x, jnp.float32(ALPHA), steps=STEPS, labels=labels)
    out = jax.block_until_ready(out)

    assert out.shape == (N, 1), f"bad shape {out.shape} != {(N, 1)}"
    assert bool(jnp.all(jnp.isfinite(out)))
    print("KERNEL_OK")
</pallas_src>

<mosaic_0001>
module attributes {stable_mosaic.version = 11 : i64} {
  func.func @_mm_kernel(%arg0: i32, %arg1: memref<200x4xbf16, #tpu.memory_space<vmem>>, %arg2: memref<4x13xbf16, #tpu.memory_space<vmem>>, %arg3: memref<1x13xf32, #tpu.memory_space<vmem>>, %arg4: memref<200x13xf32, #tpu.memory_space<vmem>>) attributes {dimension_semantics = [#tpu.dimension_semantics<parallel>], iteration_bounds = array<i64: 1>, scalar_prefetch = 0 : i64, scratch_operands = 0 : i64, tpu.core_type = #tpu.core_type<tc>, window_params = [{transform_indices = @transform_0, window_bounds = array<i64: 200, 4>}, {pipeline_mode = #tpu.pipeline_mode<synchronous>, transform_indices = @transform_1, window_bounds = array<i64: 4, 13>}, {pipeline_mode = #tpu.pipeline_mode<synchronous>, transform_indices = @transform_2, window_bounds = array<i64: 1, 13>}, {transform_indices = @transform_3, window_bounds = array<i64: 200, 13>}]} {
    %c0 = arith.constant 0 : index
    %c0_0 = arith.constant 0 : index
    %0 = vector.load %arg1[%c0, %c0_0] : memref<200x4xbf16, #tpu.memory_space<vmem>>, vector<200x4xbf16>
    %c0_1 = arith.constant 0 : index
    %c0_2 = arith.constant 0 : index
    %1 = vector.load %arg2[%c0_1, %c0_2] : memref<4x13xbf16, #tpu.memory_space<vmem>>, vector<4x13xbf16>
    %cst = arith.constant dense<0.000000e+00> : vector<200x13xf32>
    %2 = tpu.matmul %0, %1, %cst {dimension_numbers = #tpu.dot_dimension_numbers<[1], [0], [0], [1], [0, 0, 1, 1], [], []>} : vector<200x4xbf16>, vector<4x13xbf16>, vector<200x13xf32> -> vector<200x13xf32>
    %c0_3 = arith.constant 0 : index
    %c0_4 = arith.constant 0 : index
    %3 = vector.load %arg3[%c0_3, %c0_4] : memref<1x13xf32, #tpu.memory_space<vmem>>, vector<1x13xf32>
    %4 = vector.broadcast %3 : vector<1x13xf32> to vector<200x13xf32>
    %5 = arith.addf %2, %4 : vector<200x13xf32>
    %c0_5 = arith.constant 0 : index
    %c0_6 = arith.constant 0 : index
    %6 = vector.load %arg4[%c0_5, %c0_6] : memref<200x13xf32, #tpu.memory_space<vmem>>, vector<200x13xf32>
    tpu.vector_store %arg4[%c0_5, %c0_6], %5 {strides = array<i32>} : memref<200x13xf32, #tpu.memory_space<vmem>>, vector<200x13xf32>,
    return
  }
  func.func @transform_0(%arg0: i32) -> (i32, i32) {
    %c0_i32 = arith.constant 0 : i32
    %c0_i32_0 = arith.constant 0 : i32
    return %arg0, %c0_i32 : i32, i32
  }
  func.func @transform_1(%arg0: i32) -> (i32, i32) {
    %c0_i32 = arith.constant 0 : i32
    %c0_i32_0 = arith.constant 0 : i32
    %c0_i32_1 = arith.constant 0 : i32
    return %c0_i32, %c0_i32_0 : i32, i32
  }
  func.func @transform_2(%arg0: i32) -> (i32, i32) {
    %c0_i32 = arith.constant 0 : i32
    %c0_i32_0 = arith.constant 0 : i32
    %c0_i32_1 = arith.constant 0 : i32
    return %c0_i32, %c0_i32_0 : i32, i32
  }
  func.func @transform_3(%arg0: i32) -> (i32, i32) {
    %c0_i32 = arith.constant 0 : i32
    %c0_i32_0 = arith.constant 0 : i32
    return %arg0, %c0_i32 : i32, i32
  }
}

module attributes {stable_mosaic.version = 11 : i64} {
  func.func @_mm_kernel(%arg0: i32, %arg1: memref<200x13xbf16, #tpu.memory_space<vmem>>, %arg2: memref<13x52xbf16, #tpu.memory_space<vmem>>, %arg3: memref<1x52xf32, #tpu.memory_space<vmem>>, %arg4: memref<200x52xf32, #tpu.memory_space<vmem>>) attributes {dimension_semantics = [#tpu.dimension_semantics<parallel>], iteration_bounds = array<i64: 1>, scalar_prefetch = 0 : i64, scratch_operands = 0 : i64, tpu.core_type = #tpu.core_type<tc>, window_params = [{transform_indices = @transform_0, window_bounds = array<i64: 200, 13>}, {pipeline_mode = #tpu.pipeline_mode<synchronous>, transform_indices = @transform_1, window_bounds = array<i64: 13, 52>}, {pipeline_mode = #tpu.pipeline_mode<synchronous>, transform_indices = @transform_2, window_bounds = array<i64: 1, 52>}, {transform_indices = @transform_3, window_bounds = array<i64: 200, 52>}]} {
    %c0 = arith.constant 0 : index
    %c0_0 = arith.constant 0 : index
    %0 = vector.load %arg1[%c0, %c0_0] : memref<200x13xbf16, #tpu.memory_space<vmem>>, vector<200x13xbf16>
    %c0_1 = arith.constant 0 : index
    %c0_2 = arith.constant 0 : index
    %1 = vector.load %arg2[%c0_1, %c0_2] : memref<13x52xbf16, #tpu.memory_space<vmem>>, vector<13x52xbf16>
    %cst = arith.constant dense<0.000000e+00> : vector<200x52xf32>
    %2 = tpu.matmul %0, %1, %cst {dimension_numbers = #tpu.dot_dimension_numbers<[1], [0], [0], [1], [0, 0, 1, 1], [], []>} : vector<200x13xbf16>, vector<13x52xbf16>, vector<200x52xf32> -> vector<200x52xf32>
    %c0_3 = arith.constant 0 : index
    %c0_4 = arith.constant 0 : index
    %3 = vector.load %arg3[%c0_3, %c0_4] : memref<1x52xf32, #tpu.memory_space<vmem>>, vector<1x52xf32>
    %4 = vector.broadcast %3 : vector<1x52xf32> to vector<200x52xf32>
    %5 = arith.addf %2, %4 : vector<200x52xf32>
    %cst_5 = arith.constant 0.000000e+00 : f32
    %6 = vector.broadcast %cst_5 : f32 to vector<200x52xf32>
    %7 = arith.cmpf ogt, %5, %6 : vector<200x52xf32>
    %cst_6 = arith.constant 2.000000e-01 : f32
    %8 = vector.broadcast %cst_6 : f32 to vector<200x52xf32>
    %9 = arith.mulf %8, %5 : vector<200x52xf32>
    %10 = arith.select %7, %5, %9 : vector<200x52xi1>, vector<200x52xf32>
    %c0_7 = arith.constant 0 : index
    %c0_8 = arith.constant 0 : index
    %11 = vector.load %arg4[%c0_7, %c0_8] : memref<200x52xf32, #tpu.memory_space<vmem>>, vector<200x52xf32>
    tpu.vector_store %arg4[%c0_7, %c0_8], %10 {strides = array<i32>} : memref<200x52xf32, #tpu.memory_space<vmem>>, vector<200x52xf32>,
    return
  }
  func.func @transform_0(%arg0: i32) -> (i32, i32) {
    %c0_i32 = arith.constant 0 : i32
    %c0_i32_0 = arith.constant 0 : i32
    return %arg0, %c0_i32 : i32, i32
  }
  func.func @transform_1(%arg0: i32) -> (i32, i32) {
    %c0_i32 = arith.constant 0 : i32
    %c0_i32_0 = arith.constant 0 : i32
    %c0_i32_1 = arith.constant 0 : i32
    return %c0_i32, %c0_i32_0 : i32, i32
  }
  func.func @transform_2(%arg0: i32) -> (i32, i32) {
    %c0_i32 = arith.constant 0 : i32
    %c0_i32_0 = arith.constant 0 : i32
    %c0_i32_1 = arith.constant 0 : i32
    return %c0_i32, %c0_i32_0 : i32, i32
  }
  func.func @transform_3(%arg0: i32) -> (i32, i32) {
    %c0_i32 = arith.constant 0 : i32
    %c0_i32_0 = arith.constant 0 : i32
    return %arg0, %c0_i32 : i32, i32
  }
}

module attributes {stable_mosaic.version = 11 : i64} {
  func.func @_mm_kernel(%arg0: i32, %arg1: memref<512x26xbf16, #tpu.memory_space<vmem>>, %arg2: memref<26x13xbf16, #tpu.memory_space<vmem>>, %arg3: memref<1x13xf32, #tpu.memory_space<vmem>>, %arg4: memref<512x13xf32, #tpu.memory_space<vmem>>) attributes {dimension_semantics = [#tpu.dimension_semantics<parallel>], iteration_bounds = array<i64: 1>, scalar_prefetch = 0 : i64, scratch_operands = 0 : i64, tpu.core_type = #tpu.core_type<tc>, window_params = [{transform_indices = @transform_0, window_bounds = array<i64: 512, 26>}, {pipeline_mode = #tpu.pipeline_mode<synchronous>, transform_indices = @transform_1, window_bounds = array<i64: 26, 13>}, {pipeline_mode = #tpu.pipeline_mode<synchronous>, transform_indices = @transform_2, window_bounds = array<i64: 1, 13>}, {transform_indices = @transform_3, window_bounds = array<i64: 512, 13>}]} {
    %c0 = arith.constant 0 : index
    %c0_0 = arith.constant 0 : index
    %0 = vector.load %arg1[%c0, %c0_0] : memref<512x26xbf16, #tpu.memory_space<vmem>>, vector<512x26xbf16>
    %c0_1 = arith.constant 0 : index
    %c0_2 = arith.constant 0 : index
    %1 = vector.load %arg2[%c0_1, %c0_2] : memref<26x13xbf16, #tpu.memory_space<vmem>>, vector<26x13xbf16>
    %cst = arith.constant dense<0.000000e+00> : vector<512x13xf32>
    %2 = tpu.matmul %0, %1, %cst {dimension_numbers = #tpu.dot_dimension_numbers<[1], [0], [0], [1], [0, 0, 1, 1], [], []>} : vector<512x26xbf16>, vector<26x13xbf16>, vector<512x13xf32> -> vector<512x13xf32>
    %c0_3 = arith.constant 0 : index
    %c0_4 = arith.constant 0 : index
    %3 = vector.load %arg3[%c0_3, %c0_4] : memref<1x13xf32, #tpu.memory_space<vmem>>, vector<1x13xf32>
    %4 = vector.broadcast %3 : vector<1x13xf32> to vector<512x13xf32>
    %5 = arith.addf %2, %4 : vector<512x13xf32>
    %c0_5 = arith.constant 0 : index
    %c0_6 = arith.constant 0 : index
    %6 = vector.load %arg4[%c0_5, %c0_6] : memref<512x13xf32, #tpu.memory_space<vmem>>, vector<512x13xf32>
    tpu.vector_store %arg4[%c0_5, %c0_6], %5 {strides = array<i32>} : memref<512x13xf32, #tpu.memory_space<vmem>>, vector<512x13xf32>,
    return
  }
  func.func @transform_0(%arg0: i32) -> (i32, i32) {
    %c0_i32 = arith.constant 0 : i32
    %c0_i32_0 = arith.constant 0 : i32
    return %arg0, %c0_i32 : i32, i32
  }
  func.func @transform_1(%arg0: i32) -> (i32, i32) {
    %c0_i32 = arith.constant 0 : i32
    %c0_i32_0 = arith.constant 0 : i32
    %c0_i32_1 = arith.constant 0 : i32
    return %c0_i32, %c0_i32_0 : i32, i32
  }
  func.func @transform_2(%arg0: i32) -> (i32, i32) {
    %c0_i32 = arith.constant 0 : i32
    %c0_i32_0 = arith.constant 0 : i32
    %c0_i32_1 = arith.constant 0 : i32
    return %c0_i32, %c0_i32_0 : i32, i32
  }
  func.func @transform_3(%arg0: i32) -> (i32, i32) {
    %c0_i32 = arith.constant 0 : i32
    %c0_i32_0 = arith.constant 0 : i32
    return %arg0, %c0_i32 : i32, i32
  }
}

module attributes {stable_mosaic.version = 11 : i64} {
  func.func @_mm_kernel(%arg0: i32, %arg1: memref<512x13xbf16, #tpu.memory_space<vmem>>, %arg2: memref<13x32xbf16, #tpu.memory_space<vmem>>, %arg3: memref<1x32xf32, #tpu.memory_space<vmem>>, %arg4: memref<512x32xf32, #tpu.memory_space<vmem>>) attributes {dimension_semantics = [#tpu.dimension_semantics<parallel>], iteration_bounds = array<i64: 1>, scalar_prefetch = 0 : i64, scratch_operands = 0 : i64, tpu.core_type = #tpu.core_type<tc>, window_params = [{transform_indices = @transform_0, window_bounds = array<i64: 512, 13>}, {pipeline_mode = #tpu.pipeline_mode<synchronous>, transform_indices = @transform_1, window_bounds = array<i64: 13, 32>}, {pipeline_mode = #tpu.pipeline_mode<synchronous>, transform_indices = @transform_2, window_bounds = array<i64: 1, 32>}, {transform_indices = @transform_3, window_bounds = array<i64: 512, 32>}]} {
    %c0 = arith.constant 0 : index
    %c0_0 = arith.constant 0 : index
    %0 = vector.load %arg1[%c0, %c0_0] : memref<512x13xbf16, #tpu.memory_space<vmem>>, vector<512x13xbf16>
    %c0_1 = arith.constant 0 : index
    %c0_2 = arith.constant 0 : index
    %1 = vector.load %arg2[%c0_1, %c0_2] : memref<13x32xbf16, #tpu.memory_space<vmem>>, vector<13x32xbf16>
    %cst = arith.constant dense<0.000000e+00> : vector<512x32xf32>
    %2 = tpu.matmul %0, %1, %cst {dimension_numbers = #tpu.dot_dimension_numbers<[1], [0], [0], [1], [0, 0, 1, 1], [], []>} : vector<512x13xbf16>, vector<13x32xbf16>, vector<512x32xf32> -> vector<512x32xf32>
    %c0_3 = arith.constant 0 : index
    %c0_4 = arith.constant 0 : index
    %3 = vector.load %arg3[%c0_3, %c0_4] : memref<1x32xf32, #tpu.memory_space<vmem>>, vector<1x32xf32>
    %4 = vector.broadcast %3 : vector<1x32xf32> to vector<512x32xf32>
    %5 = arith.addf %2, %4 : vector<512x32xf32>
    %cst_5 = arith.constant 0.000000e+00 : f32
    %6 = vector.broadcast %cst_5 : f32 to vector<512x32xf32>
    %7 = arith.cmpf ogt, %5, %6 : vector<512x32xf32>
    %cst_6 = arith.constant 2.000000e-01 : f32
    %8 = vector.broadcast %cst_6 : f32 to vector<512x32xf32>
    %9 = arith.mulf %8, %5 : vector<512x32xf32>
    %10 = arith.select %7, %5, %9 : vector<512x32xi1>, vector<512x32xf32>
    %c0_7 = arith.constant 0 : index
    %c0_8 = arith.constant 0 : index
    %11 = vector.load %arg4[%c0_7, %c0_8] : memref<512x32xf32, #tpu.memory_space<vmem>>, vector<512x32xf32>
    tpu.vector_store %arg4[%c0_7, %c0_8], %10 {strides = array<i32>} : memref<512x32xf32, #tpu.memory_space<vmem>>, vector<512x32xf32>,
    return
  }
  func.func @transform_0(%arg0: i32) -> (i32, i32) {
    %c0_i32 = arith.constant 0 : i32
    %c0_i32_0 = arith.constant 0 : i32
    return %arg0, %c0_i32 : i32, i32
  }
  func.func @transform_1(%arg0: i32) -> (i32, i32) {
    %c0_i32 = arith.constant 0 : i32
    %c0_i32_0 = arith.constant 0 : i32
    %c0_i32_1 = arith.constant 0 : i32
    return %c0_i32, %c0_i32_0 : i32, i32
  }
  func.func @transform_2(%arg0: i32) -> (i32, i32) {
    %c0_i32 = arith.constant 0 : i32
    %c0_i32_0 = arith.constant 0 : i32
    %c0_i32_1 = arith.constant 0 : i32
    return %c0_i32, %c0_i32_0 : i32, i32
  }
  func.func @transform_3(%arg0: i32) -> (i32, i32) {
    %c0_i32 = arith.constant 0 : i32
    %c0_i32_0 = arith.constant 0 : i32
    return %arg0, %c0_i32 : i32, i32
  }
}

module attributes {stable_mosaic.version = 11 : i64} {
  func.func @_conv3x3_kernel(%arg0: i32, %arg1: memref<1x328x32xf32, #tpu.memory_space<vmem>>, %arg2: memref<9x32x32xf32, #tpu.memory_space<vmem>>, %arg3: memref<1x32xf32, #tpu.memory_space<vmem>>, %arg4: memref<1x288x32xf32, #tpu.memory_space<vmem>>) attributes {dimension_semantics = [#tpu.dimension_semantics<parallel>], iteration_bounds = array<i64: 2>, scalar_prefetch = 0 : i64, scratch_operands = 0 : i64, tpu.core_type = #tpu.core_type<tc>, window_params = [{transform_indices = @transform_0, window_bounds = array<i64: 1, 328, 32>}, {pipeline_mode = #tpu.pipeline_mode<synchronous>, transform_indices = @transform_1, window_bounds = array<i64: 9, 32, 32>}, {pipeline_mode = #tpu.pipeline_mode<synchronous>, transform_indices = @transform_2, window_bounds = array<i64: 1, 32>}, {transform_indices = @transform_3, window_bounds = array<i64: 1, 288, 32>}]} {
    %cst = arith.constant 0.000000e+00 : f32
    %0 = vector.broadcast %cst : f32 to vector<288x32xf32>
    %c0 = arith.constant 0 : index
    %c0_0 = arith.constant 0 : index
    %c0_1 = arith.constant 0 : index
    %1 = vector.load %arg1[%c0, %c0_0, %c0_1] : memref<1x328x32xf32, #tpu.memory_space<vmem>>, vector<1x288x32xf32>
    %2 = vector.shape_cast %1 : vector<1x288x32xf32> to vector<288x32xf32>
    %c0_2 = arith.constant 0 : index
    %c0_3 = arith.constant 0 : index
    %c0_4 = arith.constant 0 : index
    %3 = vector.load %arg2[%c0_2, %c0_3, %c0_4] : memref<9x32x32xf32, #tpu.memory_space<vmem>>, vector<1x32x32xf32>
    %4 = vector.shape_cast %3 : vector<1x32x32xf32> to vector<32x32xf32>
    %cst_5 = arith.constant dense<0.000000e+00> : vector<288x32xf32>
    %5 = tpu.matmul %2, %4, %cst_5 {dimension_numbers = #tpu.dot_dimension_numbers<[1], [0], [0], [1], [0, 0, 1, 1], [], []>} : vector<288x32xf32>, vector<32x32xf32>, vector<288x32xf32> -> vector<288x32xf32>
    %6 = arith.addf %0, %5 : vector<288x32xf32>
    %c0_6 = arith.constant 0 : index
    %c1 = arith.constant 1 : index
    %c0_7 = arith.constant 0 : index
    %7 = vector.load %arg1[%c0_6, %c1, %c0_7] : memref<1x328x32xf32, #tpu.memory_space<vmem>>, vector<1x288x32xf32>
    %8 = vector.shape_cast %7 : vector<1x288x32xf32> to vector<288x32xf32>
    %c1_8 = arith.constant 1 : index
    %c0_9 = arith.constant 0 : index
    %c0_10 = arith.constant 0 : index
    %9 = vector.load %arg2[%c1_8, %c0_9, %c0_10] : memref<9x32x32xf32, #tpu.memory_space<vmem>>, vector<1x32x32xf32>
    %10 = vector.shape_cast %9 : vector<1x32x32xf32> to vector<32x32xf32>
    %cst_11 = arith.constant dense<0.000000e+00> : vector<288x32xf32>
    %11 = tpu.matmul %8, %10, %cst_11 {dimension_numbers = #tpu.dot_dimension_numbers<[1], [0], [0], [1], [0, 0, 1, 1], [], []>} : vector<288x32xf32>, vector<32x32xf32>, vector<288x32xf32> -> vector<288x32xf32>
    %12 = arith.addf %6, %11 : vector<288x32xf32>
    %c0_12 = arith.constant 0 : index
    %c2 = arith.constant 2 : index
    %c0_13 = arith.constant 0 : index
    %13 = vector.load %arg1[%c0_12, %c2, %c0_13] : memref<1x328x32xf32, #tpu.memory_space<vmem>>, vector<1x288x32xf32>
    %14 = vector.shape_cast %13 : vector<1x288x32xf32> to vector<288x32xf32>
    %c2_14 = arith.constant 2 : index
    %c0_15 = arith.constant 0 : index
    %c0_16 = arith.constant 0 : index
    %15 = vector.load %arg2[%c2_14, %c0_15, %c0_16] : memref<9x32x32xf32, #tpu.memory_space<vmem>>, vector<1x32x32xf32>
    %16 = vector.shape_cast %15 : vector<1x32x32xf32> to vector<32x32xf32>
    %cst_17 = arith.constant dense<0.000000e+00> : vector<288x32xf32>
    %17 = tpu.matmul %14, %16, %cst_17 {dimension_numbers = #tpu.dot_dimension_numbers<[1], [0], [0], [1], [0, 0, 1, 1], [], []>} : vector<288x32xf32>, vector<32x32xf32>, vector<288x32xf32> -> vector<288x32xf32>
    %18 = arith.addf %12, %17 : vector<288x32xf32>
    %c0_18 = arith.constant 0 : index
    %c18 = arith.constant 18 : index
    %c0_19 = arith.constant 0 : index
    %19 = vector.load %arg1[%c0_18, %c18, %c0_19] : memref<1x328x32xf32, #tpu.memory_space<vmem>>, vector<1x288x32xf32>
    %20 = vector.shape_cast %19 : vector<1x288x32xf32> to vector<288x32xf32>
    %c3 = arith.constant 3 : index
    %c0_20 = arith.constant 0 : index
    %c0_21 = arith.constant 0 : index
    %21 = vector.load %arg2[%c3, %c0_20, %c0_21] : memref<9x32x32xf32, #tpu.memory_space<vmem>>, vector<1x32x32xf32>
    %22 = vector.shape_cast %21 : vector<1x32x32xf32> to vector<32x32xf32>
    %cst_22 = arith.constant dense<0.000000e+00> : vector<288x32xf32>
    %23 = tpu.matmul %20, %22, %cst_22 {dimension_numbers = #tpu.dot_dimension_numbers<[1], [0], [0], [1], [0, 0, 1, 1], [], []>} : vector<288x32xf32>, vector<32x32xf32>, vector<288x32xf32> -> vector<288x32xf32>
    %24 = arith.addf %18, %23 : vector<288x32xf32>
    %c0_23 = arith.constant 0 : index
    %c19 = arith.constant 19 : index
    %c0_24 = arith.constant 0 : index
    %25 = vector.load %arg1[%c0_23, %c19, %c0_24] : memref<1x328x32xf32, #tpu.memory_space<vmem>>, vector<1x288x32xf32>
    %26 = vector.shape_cast %25 : vector<1x288x32xf32> to vector<288x32xf32>
    %c4 = arith.constant 4 : index
    %c0_25 = arith.constant 0 : index
    %c0_26 = arith.constant 0 : index
    %27 = vector.load %arg2[%c4, %c0_25, %c0_26] : memref<9x32x32xf32, #tpu.memory_space<vmem>>, vector<1x32x32xf32>
    %28 = vector.shape_cast %27 : vector<1x32x32xf32> to vector<32x32xf32>
    %cst_27 = arith.constant dense<0.000000e+00> : vector<288x32xf32>
    %29 = tpu.matmul %26, %28, %cst_27 {dimension_numbers = #tpu.dot_dimension_numbers<[1], [0], [0], [1], [0, 0, 1, 1], [], []>} : vector<288x32xf32>, vector<32x32xf32>, vector<288x32xf32> -> vector<288x32xf32>
    %30 = arith.addf %24, %29 : vector<288x32xf32>
    %c0_28 = arith.constant 0 : index
    %c20 = arith.constant 20 : index
    %c0_29 = arith.constant 0 : index
    %31 = vector.load %arg1[%c0_28, %c20, %c0_29] : memref<1x328x32xf32, #tpu.memory_space<vmem>>, vector<1x288x32xf32>
    %32 = vector.shape_cast %31 : vector<1x288x32xf32> to vector<288x32xf32>
    %c5 = arith.constant 5 : index
    %c0_30 = arith.constant 0 : index
    %c0_31 = arith.constant 0 : index
    %33 = vector.load %arg2[%c5, %c0_30, %c0_31] : memref<9x32x32xf32, #tpu.memory_space<vmem>>, vector<1x32x32xf32>
    %34 = vector.shape_cast %33 : vector<1x32x32xf32> to vector<32x32xf32>
    %cst_32 = arith.constant dense<0.000000e+00> : vector<288x32xf32>
    %35 = tpu.matmul %32, %34, %cst_32 {dimension_numbers = #tpu.dot_dimension_numbers<[1], [0], [0], [1], [0, 0, 1, 1], [], []>} : vector<288x32xf32>, vector<32x32xf32>, vector<288x32xf32> -> vector<288x32xf32>
    %36 = arith.addf %30, %35 : vector<288x32xf32>
    %c0_33 = arith.constant 0 : index
    %c36 = arith.constant 36 : index
    %c0_34 = arith.constant 0 : index
    %37 = vector.load %arg1[%c0_33, %c36, %c0_34] : memref<1x328x32xf32, #tpu.memory_space<vmem>>, vector<1x288x32xf32>
    %38 = vector.shape_cast %37 : vector<1x288x32xf32> to vector<288x32xf32>
    %c6 = arith.constant 6 : index
    %c0_35 = arith.constant 0 : index
    %c0_36 = arith.constant 0 : index
    %39 = vector.load %arg2[%c6, %c0_35, %c0_36] : memref<9x32x32xf32, #tpu.memory_space<vmem>>, vector<1x32x32xf32>
    %40 = vector.shape_cast %39 : vector<1x32x32xf32> to vector<32x32xf32>
    %cst_37 = arith.constant dense<0.000000e+00> : vector<288x32xf32>
    %41 = tpu.matmul %38, %40, %cst_37 {dimension_numbers = #tpu.dot_dimension_numbers<[1], [0], [0], [1], [0, 0, 1, 1], [], []>} : vector<288x32xf32>, vector<32x32xf32>, vector<288x32xf32> -> vector<288x32xf32>
    %42 = arith.addf %36, %41 : vector<288x32xf32>
    %c0_38 = arith.constant 0 : index
    %c37 = arith.constant 37 : index
    %c0_39 = arith.constant 0 : index
    %43 = vector.load %arg1[%c0_38, %c37, %c0_39] : memref<1x328x32xf32, #tpu.memory_space<vmem>>, vector<1x288x32xf32>
    %44 = vector.shape_cast %43 : vector<1x288x32xf32> to vector<288x32xf32>
    %c7 = arith.constant 7 : index
    %c0_40 = arith.constant 0 : index
    %c0_41 = arith.constant 0 : index
    %45 = vector.load %arg2[%c7, %c0_40, %c0_41] : memref<9x32x32xf32, #tpu.memory_space<vmem>>, vector<1x32x32xf32>
    %46 = vector.shape_cast %45 : vector<1x32x32xf32> to vector<32x32xf32>
    %cst_42 = arith.constant dense<0.000000e+00> : vector<288x32xf32>
    %47 = tpu.matmul %44, %46, %cst_42 {dimension_numbers = #tpu.dot_dimension_numbers<[1], [0], [0], [1], [0, 0, 1, 1], [], []>} : vector<288x32xf32>, vector<32x32xf32>, vector<288x32xf32> -> vector<288x32xf32>
    %48 = arith.addf %42, %47 : vector<288x32xf32>
    %c0_43 = arith.constant 0 : index
    %c38 = arith.constant 38 : index
    %c0_44 = arith.constant 0 : index
    %49 = vector.load %arg1[%c0_43, %c38, %c0_44] : memref<1x328x32xf32, #tpu.memory_space<vmem>>, vector<1x288x32xf32>
    %50 = vector.shape_cast %49 : vector<1x288x32xf32> to vector<288x32xf32>
    %c8 = arith.constant 8 : index
    %c0_45 = arith.constant 0 : index
    %c0_46 = arith.constant 0 : index
    %51 = vector.load %arg2[%c8, %c0_45, %c0_46] : memref<9x32x32xf32, #tpu.memory_space<vmem>>, vector<1x32x32xf32>
    %52 = vector.shape_cast %51 : vector<1x32x32xf32> to vector<32x32xf32>
    %cst_47 = arith.constant dense<0.000000e+00> : vector<288x32xf32>
    %53 = tpu.matmul %50, %52, %cst_47 {dimension_numbers = #tpu.dot_dimension_numbers<[1], [0], [0], [1], [0, 0, 1, 1], [], []>} : vector<288x32xf32>, vector<32x32xf32>, vector<288x32xf32> -> vector<288x32xf32>
    %54 = arith.addf %48, %53 : vector<288x32xf32>
    %c0_48 = arith.constant 0 : index
    %c0_49 = arith.constant 0 : index
    %55 = vector.load %arg3[%c0_48, %c0_49] : memref<1x32xf32, #tpu.memory_space<vmem>>, vector<1x32xf32>
    %56 = vector.broadcast %55 : vector<1x32xf32> to vector<288x32xf32>
    %57 = arith.addf %54, %56 : vector<288x32xf32>
    %cst_50 = arith.constant 0.000000e+00 : f32
    %58 = vector.broadcast %cst_50 : f32 to vector<288x32xf32>
    %59 = arith.cmpf ogt, %57, %58 : vector<288x32xf32>
    %cst_51 = arith.constant 2.000000e-01 : f32
    %60 = vector.broadcast %cst_51 : f32 to vector<288x32xf32>
    %61 = arith.mulf %60, %57 : vector<288x32xf32>
    %62 = arith.select %59, %57, %61 : vector<288x32xi1>, vector<288x32xf32>
    %c0_52 = arith.constant 0 : index
    %c0_53 = arith.constant 0 : index
    %c0_54 = arith.constant 0 : index
    %63 = vector.load %arg4[%c0_52, %c0_53, %c0_54] : memref<1x288x32xf32, #tpu.memory_space<vmem>>, vector<1x288x32xf32>
    %64 = vector.shape_cast %63 : vector<1x288x32xf32> to vector<288x32xf32>
    %65 = vector.shape_cast %62 : vector<288x32xf32> to vector<1x288x32xf32>
    tpu.vector_store %arg4[%c0_52, %c0_53, %c0_54], %65 {strides = array<i32>} : memref<1x288x32xf32, #tpu.memory_space<vmem>>, vector<1x288x32xf32>,
    return
  }
  func.func @transform_0(%arg0: i32) -> (i32, i32, i32) {
    %c0_i32 = arith.constant 0 : i32
    %c0_i32_0 = arith.constant 0 : i32
    %c0_i32_1 = arith.constant 0 : i32
    return %arg0, %c0_i32, %c0_i32_0 : i32, i32, i32
  }
  func.func @transform_1(%arg0: i32) -> (i32, i32, i32) {
    %c0_i32 = arith.constant 0 : i32
    %c0_i32_0 = arith.constant 0 : i32
    %c0_i32_1 = arith.constant 0 : i32
    %c0_i32_2 = arith.constant 0 : i32
    return %c0_i32, %c0_i32_0, %c0_i32_1 : i32, i32, i32
  }
  func.func @transform_2(%arg0: i32) -> (i32, i32) {
    %c0_i32 = arith.constant 0 : i32
    %c0_i32_0 = arith.constant 0 : i32
    %c0_i32_1 = arith.constant 0 : i32
    return %c0_i32, %c0_i32_0 : i32, i32
  }
  func.func @transform_3(%arg0: i32) -> (i32, i32, i32) {
    %c0_i32 = arith.constant 0 : i32
    %c0_i32_0 = arith.constant 0 : i32
    %c0_i32_1 = arith.constant 0 : i32
    return %arg0, %c0_i32, %c0_i32_0 : i32, i32, i32
  }
}

module attributes {stable_mosaic.version = 11 : i64} {
  func.func @_mm_fade_kernel(%arg0: i32, %arg1: memref<128x13xbf16, #tpu.memory_space<vmem>>, %arg2: memref<13x32xbf16, #tpu.memory_space<vmem>>, %arg3: memref<1x32xf32, #tpu.memory_space<vmem>>, %arg4: memref<128x32xf32, #tpu.memory_space<vmem>>, %arg5: memref<1x1xf32, #tpu.memory_space<vmem>>, %arg6: memref<128x32xf32, #tpu.memory_space<vmem>>) attributes {dimension_semantics = [#tpu.dimension_semantics<parallel>], iteration_bounds = array<i64: 1>, scalar_prefetch = 0 : i64, scratch_operands = 0 : i64, tpu.core_type = #tpu.core_type<tc>, window_params = [{transform_indices = @transform_0, window_bounds = array<i64: 128, 13>}, {pipeline_mode = #tpu.pipeline_mode<synchronous>, transform_indices = @transform_1, window_bounds = array<i64: 13, 32>}, {pipeline_mode = #tpu.pipeline_mode<synchronous>, transform_indices = @transform_2, window_bounds = array<i64: 1, 32>}, {transform_indices = @transform_3, window_bounds = array<i64: 128, 32>}, {pipeline_mode = #tpu.pipeline_mode<synchronous>, transform_indices = @transform_4, window_bounds = array<i64: 1, 1>}, {transform_indices = @transform_5, window_bounds = array<i64: 128, 32>}]} {
    %c0 = arith.constant 0 : index
    %c0_0 = arith.constant 0 : index
    %0 = vector.load %arg1[%c0, %c0_0] : memref<128x13xbf16, #tpu.memory_space<vmem>>, vector<128x13xbf16>
    %c0_1 = arith.constant 0 : index
    %c0_2 = arith.constant 0 : index
    %1 = vector.load %arg2[%c0_1, %c0_2] : memref<13x32xbf16, #tpu.memory_space<vmem>>, vector<13x32xbf16>
    %cst = arith.constant dense<0.000000e+00> : vector<128x32xf32>
    %2 = tpu.matmul %0, %1, %cst {dimension_numbers = #tpu.dot_dimension_numbers<[1], [0], [0], [1], [0, 0, 1, 1], [], []>} : vector<128x13xbf16>, vector<13x32xbf16>, vector<128x32xf32> -> vector<128x32xf32>
    %c0_3 = arith.constant 0 : index
    %c0_4 = arith.constant 0 : index
    %3 = vector.load %arg3[%c0_3, %c0_4] : memref<1x32xf32, #tpu.memory_space<vmem>>, vector<1x32xf32>
    %4 = vector.broadcast %3 : vector<1x32xf32> to vector<128x32xf32>
    %5 = arith.addf %2, %4 : vector<128x32xf32>
    %cst_5 = arith.constant 0.000000e+00 : f32
    %6 = vector.broadcast %cst_5 : f32 to vector<128x32xf32>
    %7 = arith.cmpf ogt, %5, %6 : vector<128x32xf32>
    %cst_6 = arith.constant 2.000000e-01 : f32
    %8 = vector.broadcast %cst_6 : f32 to vector<128x32xf32>
    %9 = arith.mulf %8, %5 : vector<128x32xf32>
    %10 = arith.select %7, %5, %9 : vector<128x32xi1>, vector<128x32xf32>
    %c0_7 = arith.constant 0 : index
    %c0_8 = arith.constant 0 : index
    %11 = vector.load %arg5[%c0_7, %c0_8] : memref<1x1xf32, #tpu.memory_space<vmem>>, vector<1x1xf32>
    %c0_9 = arith.constant 0 : index
    %c0_10 = arith.constant 0 : index
    %12 = vector.load %arg4[%c0_9, %c0_10] : memref<128x32xf32, #tpu.memory_space<vmem>>, vector<128x32xf32>
    %13 = vector.broadcast %11 : vector<1x1xf32> to vector<128x32xf32>
    %14 = arith.mulf %13, %12 : vector<128x32xf32>
    %cst_11 = arith.constant 1.000000e+00 : f32
    %15 = vector.broadcast %cst_11 : f32 to vector<1x1xf32>
    %16 = arith.subf %15, %11 : vector<1x1xf32>
    %17 = vector.broadcast %16 : vector<1x1xf32> to vector<128x32xf32>
    %18 = arith.mulf %17, %10 : vector<128x32xf32>
    %19 = arith.addf %14, %18 : vector<128x32xf32>
    %c0_12 = arith.constant 0 : index
    %c0_13 = arith.constant 0 : index
    %20 = vector.load %arg6[%c0_12, %c0_13] : memref<128x32xf32, #tpu.memory_space<vmem>>, vector<128x32xf32>
    tpu.vector_store %arg6[%c0_12, %c0_13], %19 {strides = array<i32>} : memref<128x32xf32, #tpu.memory_space<vmem>>, vector<128x32xf32>,
    return
  }
  func.func @transform_0(%arg0: i32) -> (i32, i32) {
    %c0_i32 = arith.constant 0 : i32
    %c0_i32_0 = arith.constant 0 : i32
    return %arg0, %c0_i32 : i32, i32
  }
  func.func @transform_1(%arg0: i32) -> (i32, i32) {
    %c0_i32 = arith.constant 0 : i32
    %c0_i32_0 = arith.constant 0 : i32
    %c0_i32_1 = arith.constant 0 : i32
    return %c0_i32, %c0_i32_0 : i32, i32
  }
  func.func @transform_2(%arg0: i32) -> (i32, i32) {
    %c0_i32 = arith.constant 0 : i32
    %c0_i32_0 = arith.constant 0 : i32
    %c0_i32_1 = arith.constant 0 : i32
    return %c0_i32, %c0_i32_0 : i32, i32
  }
  func.func @transform_3(%arg0: i32) -> (i32, i32) {
    %c0_i32 = arith.constant 0 : i32
    %c0_i32_0 = arith.constant 0 : i32
    return %arg0, %c0_i32 : i32, i32
  }
  func.func @transform_4(%arg0: i32) -> (i32, i32) {
    %c0_i32 = arith.constant 0 : i32
    %c0_i32_0 = arith.constant 0 : i32
    %c0_i32_1 = arith.constant 0 : i32
    return %c0_i32, %c0_i32_0 : i32, i32
  }
  func.func @transform_5(%arg0: i32) -> (i32, i32) {
    %c0_i32 = arith.constant 0 : i32
    %c0_i32_0 = arith.constant 0 : i32
    return %arg0, %c0_i32 : i32, i32
  }
}

module attributes {stable_mosaic.version = 11 : i64} {
  func.func @_conv3x3_kernel(%arg0: i32, %arg1: memref<1x104x32xf32, #tpu.memory_space<vmem>>, %arg2: memref<9x32x32xf32, #tpu.memory_space<vmem>>, %arg3: memref<1x32xf32, #tpu.memory_space<vmem>>, %arg4: memref<1x80x32xf32, #tpu.memory_space<vmem>>) attributes {dimension_semantics = [#tpu.dimension_semantics<parallel>], iteration_bounds = array<i64: 2>, scalar_prefetch = 0 : i64, scratch_operands = 0 : i64, tpu.core_type = #tpu.core_type<tc>, window_params = [{transform_indices = @transform_0, window_bounds = array<i64: 1, 104, 32>}, {pipeline_mode = #tpu.pipeline_mode<synchronous>, transform_indices = @transform_1, window_bounds = array<i64: 9, 32, 32>}, {pipeline_mode = #tpu.pipeline_mode<synchronous>, transform_indices = @transform_2, window_bounds = array<i64: 1, 32>}, {transform_indices = @transform_3, window_bounds = array<i64: 1, 80, 32>}]} {
    %cst = arith.constant 0.000000e+00 : f32
    %0 = vector.broadcast %cst : f32 to vector<80x32xf32>
    %c0 = arith.constant 0 : index
    %c0_0 = arith.constant 0 : index
    %c0_1 = arith.constant 0 : index
    %1 = vector.load %arg1[%c0, %c0_0, %c0_1] : memref<1x104x32xf32, #tpu.memory_space<vmem>>, vector<1x80x32xf32>
    %2 = vector.shape_cast %1 : vector<1x80x32xf32> to vector<80x32xf32>
    %c0_2 = arith.constant 0 : index
    %c0_3 = arith.constant 0 : index
    %c0_4 = arith.constant 0 : index
    %3 = vector.load %arg2[%c0_2, %c0_3, %c0_4] : memref<9x32x32xf32, #tpu.memory_space<vmem>>, vector<1x32x32xf32>
    %4 = vector.shape_cast %3 : vector<1x32x32xf32> to vector<32x32xf32>
    %cst_5 = arith.constant dense<0.000000e+00> : vector<80x32xf32>
    %5 = tpu.matmul %2, %4, %cst_5 {dimension_numbers = #tpu.dot_dimension_numbers<[1], [0], [0], [1], [0, 0, 1, 1], [], []>} : vector<80x32xf32>, vector<32x32xf32>, vector<80x32xf32> -> vector<80x32xf32>
    %6 = arith.addf %0, %5 : vector<80x32xf32>
    %c0_6 = arith.constant 0 : index
    %c1 = arith.constant 1 : index
    %c0_7 = arith.constant 0 : index
    %7 = vector.load %arg1[%c0_6, %c1, %c0_7] : memref<1x104x32xf32, #tpu.memory_space<vmem>>, vector<1x80x32xf32>
    %8 = vector.shape_cast %7 : vector<1x80x32xf32> to vector<80x32xf32>
    %c1_8 = arith.constant 1 : index
    %c0_9 = arith.constant 0 : index
    %c0_10 = arith.constant 0 : index
    %9 = vector.load %arg2[%c1_8, %c0_9, %c0_10] : memref<9x32x32xf32, #tpu.memory_space<vmem>>, vector<1x32x32xf32>
    %10 = vector.shape_cast %9 : vector<1x32x32xf32> to vector<32x32xf32>
    %cst_11 = arith.constant dense<0.000000e+00> : vector<80x32xf32>
    %11 = tpu.matmul %8, %10, %cst_11 {dimension_numbers = #tpu.dot_dimension_numbers<[1], [0], [0], [1], [0, 0, 1, 1], [], []>} : vector<80x32xf32>, vector<32x32xf32>, vector<80x32xf32> -> vector<80x32xf32>
    %12 = arith.addf %6, %11 : vector<80x32xf32>
    %c0_12 = arith.constant 0 : index
    %c2 = arith.constant 2 : index
    %c0_13 = arith.constant 0 : index
    %13 = vector.load %arg1[%c0_12, %c2, %c0_13] : memref<1x104x32xf32, #tpu.memory_space<vmem>>, vector<1x80x32xf32>
    %14 = vector.shape_cast %13 : vector<1x80x32xf32> to vector<80x32xf32>
    %c2_14 = arith.constant 2 : index
    %c0_15 = arith.constant 0 : index
    %c0_16 = arith.constant 0 : index
    %15 = vector.load %arg2[%c2_14, %c0_15, %c0_16] : memref<9x32x32xf32, #tpu.memory_space<vmem>>, vector<1x32x32xf32>
    %16 = vector.shape_cast %15 : vector<1x32x32xf32> to vector<32x32xf32>
    %cst_17 = arith.constant dense<0.000000e+00> : vector<80x32xf32>
    %17 = tpu.matmul %14, %16, %cst_17 {dimension_numbers = #tpu.dot_dimension_numbers<[1], [0], [0], [1], [0, 0, 1, 1], [], []>} : vector<80x32xf32>, vector<32x32xf32>, vector<80x32xf32> -> vector<80x32xf32>
    %18 = arith.addf %12, %17 : vector<80x32xf32>
    %c0_18 = arith.constant 0 : index
    %c10 = arith.constant 10 : index
    %c0_19 = arith.constant 0 : index
    %19 = vector.load %arg1[%c0_18, %c10, %c0_19] : memref<1x104x32xf32, #tpu.memory_space<vmem>>, vector<1x80x32xf32>
    %20 = vector.shape_cast %19 : vector<1x80x32xf32> to vector<80x32xf32>
    %c3 = arith.constant 3 : index
    %c0_20 = arith.constant 0 : index
    %c0_21 = arith.constant 0 : index
    %21 = vector.load %arg2[%c3, %c0_20, %c0_21] : memref<9x32x32xf32, #tpu.memory_space<vmem>>, vector<1x32x32xf32>
    %22 = vector.shape_cast %21 : vector<1x32x32xf32> to vector<32x32xf32>
    %cst_22 = arith.constant dense<0.000000e+00> : vector<80x32xf32>
    %23 = tpu.matmul %20, %22, %cst_22 {dimension_numbers = #tpu.dot_dimension_numbers<[1], [0], [0], [1], [0, 0, 1, 1], [], []>} : vector<80x32xf32>, vector<32x32xf32>, vector<80x32xf32> -> vector<80x32xf32>
    %24 = arith.addf %18, %23 : vector<80x32xf32>
    %c0_23 = arith.constant 0 : index
    %c11 = arith.constant 11 : index
    %c0_24 = arith.constant 0 : index
    %25 = vector.load %arg1[%c0_23, %c11, %c0_24] : memref<1x104x32xf32, #tpu.memory_space<vmem>>, vector<1x80x32xf32>
    %26 = vector.shape_cast %25 : vector<1x80x32xf32> to vector<80x32xf32>
    %c4 = arith.constant 4 : index
    %c0_25 = arith.constant 0 : index
    %c0_26 = arith.constant 0 : index
    %27 = vector.load %arg2[%c4, %c0_25, %c0_26] : memref<9x32x32xf32, #tpu.memory_space<vmem>>, vector<1x32x32xf32>
    %28 = vector.shape_cast %27 : vector<1x32x32xf32> to vector<32x32xf32>
    %cst_27 = arith.constant dense<0.000000e+00> : vector<80x32xf32>
    %29 = tpu.matmul %26, %28, %cst_27 {dimension_numbers = #tpu.dot_dimension_numbers<[1], [0], [0], [1], [0, 0, 1, 1], [], []>} : vector<80x32xf32>, vector<32x32xf32>, vector<80x32xf32> -> vector<80x32xf32>
    %30 = arith.addf %24, %29 : vector<80x32xf32>
    %c0_28 = arith.constant 0 : index
    %c12 = arith.constant 12 : index
    %c0_29 = arith.constant 0 : index
    %31 = vector.load %arg1[%c0_28, %c12, %c0_29] : memref<1x104x32xf32, #tpu.memory_space<vmem>>, vector<1x80x32xf32>
    %32 = vector.shape_cast %31 : vector<1x80x32xf32> to vector<80x32xf32>
    %c5 = arith.constant 5 : index
    %c0_30 = arith.constant 0 : index
    %c0_31 = arith.constant 0 : index
    %33 = vector.load %arg2[%c5, %c0_30, %c0_31] : memref<9x32x32xf32, #tpu.memory_space<vmem>>, vector<1x32x32xf32>
    %34 = vector.shape_cast %33 : vector<1x32x32xf32> to vector<32x32xf32>
    %cst_32 = arith.constant dense<0.000000e+00> : vector<80x32xf32>
    %35 = tpu.matmul %32, %34, %cst_32 {dimension_numbers = #tpu.dot_dimension_numbers<[1], [0], [0], [1], [0, 0, 1, 1], [], []>} : vector<80x32xf32>, vector<32x32xf32>, vector<80x32xf32> -> vector<80x32xf32>
    %36 = arith.addf %30, %35 : vector<80x32xf32>
    %c0_33 = arith.constant 0 : index
    %c20 = arith.constant 20 : index
    %c0_34 = arith.constant 0 : index
    %37 = vector.load %arg1[%c0_33, %c20, %c0_34] : memref<1x104x32xf32, #tpu.memory_space<vmem>>, vector<1x80x32xf32>
    %38 = vector.shape_cast %37 : vector<1x80x32xf32> to vector<80x32xf32>
    %c6 = arith.constant 6 : index
    %c0_35 = arith.constant 0 : index
    %c0_36 = arith.constant 0 : index
    %39 = vector.load %arg2[%c6, %c0_35, %c0_36] : memref<9x32x32xf32, #tpu.memory_space<vmem>>, vector<1x32x32xf32>
    %40 = vector.shape_cast %39 : vector<1x32x32xf32> to vector<32x32xf32>
    %cst_37 = arith.constant dense<0.000000e+00> : vector<80x32xf32>
    %41 = tpu.matmul %38, %40, %cst_37 {dimension_numbers = #tpu.dot_dimension_numbers<[1], [0], [0], [1], [0, 0, 1, 1], [], []>} : vector<80x32xf32>, vector<32x32xf32>, vector<80x32xf32> -> vector<80x32xf32>
    %42 = arith.addf %36, %41 : vector<80x32xf32>
    %c0_38 = arith.constant 0 : index
    %c21 = arith.constant 21 : index
    %c0_39 = arith.constant 0 : index
    %43 = vector.load %arg1[%c0_38, %c21, %c0_39] : memref<1x104x32xf32, #tpu.memory_space<vmem>>, vector<1x80x32xf32>
    %44 = vector.shape_cast %43 : vector<1x80x32xf32> to vector<80x32xf32>
    %c7 = arith.constant 7 : index
    %c0_40 = arith.constant 0 : index
    %c0_41 = arith.constant 0 : index
    %45 = vector.load %arg2[%c7, %c0_40, %c0_41] : memref<9x32x32xf32, #tpu.memory_space<vmem>>, vector<1x32x32xf32>
    %46 = vector.shape_cast %45 : vector<1x32x32xf32> to vector<32x32xf32>
    %cst_42 = arith.constant dense<0.000000e+00> : vector<80x32xf32>
    %47 = tpu.matmul %44, %46, %cst_42 {dimension_numbers = #tpu.dot_dimension_numbers<[1], [0], [0], [1], [0, 0, 1, 1], [], []>} : vector<80x32xf32>, vector<32x32xf32>, vector<80x32xf32> -> vector<80x32xf32>
    %48 = arith.addf %42, %47 : vector<80x32xf32>
    %c0_43 = arith.constant 0 : index
    %c22 = arith.constant 22 : index
    %c0_44 = arith.constant 0 : index
    %49 = vector.load %arg1[%c0_43, %c22, %c0_44] : memref<1x104x32xf32, #tpu.memory_space<vmem>>, vector<1x80x32xf32>
    %50 = vector.shape_cast %49 : vector<1x80x32xf32> to vector<80x32xf32>
    %c8 = arith.constant 8 : index
    %c0_45 = arith.constant 0 : index
    %c0_46 = arith.constant 0 : index
    %51 = vector.load %arg2[%c8, %c0_45, %c0_46] : memref<9x32x32xf32, #tpu.memory_space<vmem>>, vector<1x32x32xf32>
    %52 = vector.shape_cast %51 : vector<1x32x32xf32> to vector<32x32xf32>
    %cst_47 = arith.constant dense<0.000000e+00> : vector<80x32xf32>
    %53 = tpu.matmul %50, %52, %cst_47 {dimension_numbers = #tpu.dot_dimension_numbers<[1], [0], [0], [1], [0, 0, 1, 1], [], []>} : vector<80x32xf32>, vector<32x32xf32>, vector<80x32xf32> -> vector<80x32xf32>
    %54 = arith.addf %48, %53 : vector<80x32xf32>
    %c0_48 = arith.constant 0 : index
    %c0_49 = arith.constant 0 : index
    %55 = vector.load %arg3[%c0_48, %c0_49] : memref<1x32xf32, #tpu.memory_space<vmem>>, vector<1x32xf32>
    %56 = vector.broadcast %55 : vector<1x32xf32> to vector<80x32xf32>
    %57 = arith.addf %54, %56 : vector<80x32xf32>
    %cst_50 = arith.constant 0.000000e+00 : f32
    %58 = vector.broadcast %cst_50 : f32 to vector<80x32xf32>
    %59 = arith.cmpf ogt, %57, %58 : vector<80x32xf32>
    %cst_51 = arith.constant 2.000000e-01 : f32
    %60 = vector.broadcast %cst_51 : f32 to vector<80x32xf32>
    %61 = arith.mulf %60, %57 : vector<80x32xf32>
    %62 = arith.select %59, %57, %61 : vector<80x32xi1>, vector<80x32xf32>
    %c0_52 = arith.constant 0 : index
    %c0_53 = arith.constant 0 : index
    %c0_54 = arith.constant 0 : index
    %63 = vector.load %arg4[%c0_52, %c0_53, %c0_54] : memref<1x80x32xf32, #tpu.memory_space<vmem>>, vector<1x80x32xf32>
    %64 = vector.shape_cast %63 : vector<1x80x32xf32> to vector<80x32xf32>
    %65 = vector.shape_cast %62 : vector<80x32xf32> to vector<1x80x32xf32>
    tpu.vector_store %arg4[%c0_52, %c0_53, %c0_54], %65 {strides = array<i32>} : memref<1x80x32xf32, #tpu.memory_space<vmem>>, vector<1x80x32xf32>,
    return
  }
  func.func @transform_0(%arg0: i32) -> (i32, i32, i32) {
    %c0_i32 = arith.constant 0 : i32
    %c0_i32_0 = arith.constant 0 : i32
    %c0_i32_1 = arith.constant 0 : i32
    return %arg0, %c0_i32, %c0_i32_0 : i32, i32, i32
  }
  func.func @transform_1(%arg0: i32) -> (i32, i32, i32) {
    %c0_i32 = arith.constant 0 : i32
    %c0_i32_0 = arith.constant 0 : i32
    %c0_i32_1 = arith.constant 0 : i32
    %c0_i32_2 = arith.constant 0 : i32
    return %c0_i32, %c0_i32_0, %c0_i32_1 : i32, i32, i32
  }
  func.func @transform_2(%arg0: i32) -> (i32, i32) {
    %c0_i32 = arith.constant 0 : i32
    %c0_i32_0 = arith.constant 0 : i32
    %c0_i32_1 = arith.constant 0 : i32
    return %c0_i32, %c0_i32_0 : i32, i32
  }
  func.func @transform_3(%arg0: i32) -> (i32, i32, i32) {
    %c0_i32 = arith.constant 0 : i32
    %c0_i32_0 = arith.constant 0 : i32
    %c0_i32_1 = arith.constant 0 : i32
    return %arg0, %c0_i32, %c0_i32_0 : i32, i32, i32
  }
}

module attributes {stable_mosaic.version = 11 : i64} {
  func.func @_conv3x3_kernel(%arg0: i32, %arg1: memref<1x40x33xf32, #tpu.memory_space<vmem>>, %arg2: memref<9x33x32xf32, #tpu.memory_space<vmem>>, %arg3: memref<1x32xf32, #tpu.memory_space<vmem>>, %arg4: memref<1x24x32xf32, #tpu.memory_space<vmem>>) attributes {dimension_semantics = [#tpu.dimension_semantics<parallel>], iteration_bounds = array<i64: 2>, scalar_prefetch = 0 : i64, scratch_operands = 0 : i64, tpu.core_type = #tpu.core_type<tc>, window_params = [{transform_indices = @transform_0, window_bounds = array<i64: 1, 40, 33>}, {pipeline_mode = #tpu.pipeline_mode<synchronous>, transform_indices = @transform_1, window_bounds = array<i64: 9, 33, 32>}, {pipeline_mode = #tpu.pipeline_mode<synchronous>, transform_indices = @transform_2, window_bounds = array<i64: 1, 32>}, {transform_indices = @transform_3, window_bounds = array<i64: 1, 24, 32>}]} {
    %cst = arith.constant 0.000000e+00 : f32
    %0 = vector.broadcast %cst : f32 to vector<24x32xf32>
    %c0 = arith.constant 0 : index
    %c0_0 = arith.constant 0 : index
    %c0_1 = arith.constant 0 : index
    %1 = vector.load %arg1[%c0, %c0_0, %c0_1] : memref<1x40x33xf32, #tpu.memory_space<vmem>>, vector<1x24x33xf32>
    %2 = vector.shape_cast %1 : vector<1x24x33xf32> to vector<24x33xf32>
    %c0_2 = arith.constant 0 : index
    %c0_3 = arith.constant 0 : index
    %c0_4 = arith.constant 0 : index
    %3 = vector.load %arg2[%c0_2, %c0_3, %c0_4] : memref<9x33x32xf32, #tpu.memory_space<vmem>>, vector<1x33x32xf32>
    %4 = vector.shape_cast %3 : vector<1x33x32xf32> to vector<33x32xf32>
    %cst_5 = arith.constant dense<0.000000e+00> : vector<24x32xf32>
    %5 = tpu.matmul %2, %4, %cst_5 {dimension_numbers = #tpu.dot_dimension_numbers<[1], [0], [0], [1], [0, 0, 1, 1], [], []>} : vector<24x33xf32>, vector<33x32xf32>, vector<24x32xf32> -> vector<24x32xf32>
    %6 = arith.addf %0, %5 : vector<24x32xf32>
    %c0_6 = arith.constant 0 : index
    %c1 = arith.constant 1 : index
    %c0_7 = arith.constant 0 : index
    %7 = vector.load %arg1[%c0_6, %c1, %c0_7] : memref<1x40x33xf32, #tpu.memory_space<vmem>>, vector<1x24x33xf32>
    %8 = vector.shape_cast %7 : vector<1x24x33xf32> to vector<24x33xf32>
    %c1_8 = arith.constant 1 : index
    %c0_9 = arith.constant 0 : index
    %c0_10 = arith.constant 0 : index
    %9 = vector.load %arg2[%c1_8, %c0_9, %c0_10] : memref<9x33x32xf32, #tpu.memory_space<vmem>>, vector<1x33x32xf32>
    %10 = vector.shape_cast %9 : vector<1x33x32xf32> to vector<33x32xf32>
    %cst_11 = arith.constant dense<0.000000e+00> : vector<24x32xf32>
    %11 = tpu.matmul %8, %10, %cst_11 {dimension_numbers = #tpu.dot_dimension_numbers<[1], [0], [0], [1], [0, 0, 1, 1], [], []>} : vector<24x33xf32>, vector<33x32xf32>, vector<24x32xf32> -> vector<24x32xf32>
    %12 = arith.addf %6, %11 : vector<24x32xf32>
    %c0_12 = arith.constant 0 : index
    %c2 = arith.constant 2 : index
    %c0_13 = arith.constant 0 : index
    %13 = vector.load %arg1[%c0_12, %c2, %c0_13] : memref<1x40x33xf32, #tpu.memory_space<vmem>>, vector<1x24x33xf32>
    %14 = vector.shape_cast %13 : vector<1x24x33xf32> to vector<24x33xf32>
    %c2_14 = arith.constant 2 : index
    %c0_15 = arith.constant 0 : index
    %c0_16 = arith.constant 0 : index
    %15 = vector.load %arg2[%c2_14, %c0_15, %c0_16] : memref<9x33x32xf32, #tpu.memory_space<vmem>>, vector<1x33x32xf32>
    %16 = vector.shape_cast %15 : vector<1x33x32xf32> to vector<33x32xf32>
    %cst_17 = arith.constant dense<0.000000e+00> : vector<24x32xf32>
    %17 = tpu.matmul %14, %16, %cst_17 {dimension_numbers = #tpu.dot_dimension_numbers<[1], [0], [0], [1], [0, 0, 1, 1], [], []>} : vector<24x33xf32>, vector<33x32xf32>, vector<24x32xf32> -> vector<24x32xf32>
    %18 = arith.addf %12, %17 : vector<24x32xf32>
    %c0_18 = arith.constant 0 : index
    %c6 = arith.constant 6 : index
    %c0_19 = arith.constant 0 : index
    %19 = vector.load %arg1[%c0_18, %c6, %c0_19] : memref<1x40x33xf32, #tpu.memory_space<vmem>>, vector<1x24x33xf32>
    %20 = vector.shape_cast %19 : vector<1x24x33xf32> to vector<24x33xf32>
    %c3 = arith.constant 3 : index
    %c0_20 = arith.constant 0 : index
    %c0_21 = arith.constant 0 : index
    %21 = vector.load %arg2[%c3, %c0_20, %c0_21] : memref<9x33x32xf32, #tpu.memory_space<vmem>>, vector<1x33x32xf32>
    %22 = vector.shape_cast %21 : vector<1x33x32xf32> to vector<33x32xf32>
    %cst_22 = arith.constant dense<0.000000e+00> : vector<24x32xf32>
    %23 = tpu.matmul %20, %22, %cst_22 {dimension_numbers = #tpu.dot_dimension_numbers<[1], [0], [0], [1], [0, 0, 1, 1], [], []>} : vector<24x33xf32>, vector<33x32xf32>, vector<24x32xf32> -> vector<24x32xf32>
    %24 = arith.addf %18, %23 : vector<24x32xf32>
    %c0_23 = arith.constant 0 : index
    %c7 = arith.constant 7 : index
    %c0_24 = arith.constant 0 : index
    %25 = vector.load %arg1[%c0_23, %c7, %c0_24] : memref<1x40x33xf32, #tpu.memory_space<vmem>>, vector<1x24x33xf32>
    %26 = vector.shape_cast %25 : vector<1x24x33xf32> to vector<24x33xf32>
    %c4 = arith.constant 4 : index
    %c0_25 = arith.constant 0 : index
    %c0_26 = arith.constant 0 : index
    %27 = vector.load %arg2[%c4, %c0_25, %c0_26] : memref<9x33x32xf32, #tpu.memory_space<vmem>>, vector<1x33x32xf32>
    %28 = vector.shape_cast %27 : vector<1x33x32xf32> to vector<33x32xf32>
    %cst_27 = arith.constant dense<0.000000e+00> : vector<24x32xf32>
    %29 = tpu.matmul %26, %28, %cst_27 {dimension_numbers = #tpu.dot_dimension_numbers<[1], [0], [0], [1], [0, 0, 1, 1], [], []>} : vector<24x33xf32>, vector<33x32xf32>, vector<24x32xf32> -> vector<24x32xf32>
    %30 = arith.addf %24, %29 : vector<24x32xf32>
    %c0_28 = arith.constant 0 : index
    %c8 = arith.constant 8 : index
    %c0_29 = arith.constant 0 : index
    %31 = vector.load %arg1[%c0_28, %c8, %c0_29] : memref<1x40x33xf32, #tpu.memory_space<vmem>>, vector<1x24x33xf32>
    %32 = vector.shape_cast %31 : vector<1x24x33xf32> to vector<24x33xf32>
    %c5 = arith.constant 5 : index
    %c0_30 = arith.constant 0 : index
    %c0_31 = arith.constant 0 : index
    %33 = vector.load %arg2[%c5, %c0_30, %c0_31] : memref<9x33x32xf32, #tpu.memory_space<vmem>>, vector<1x33x32xf32>
    %34 = vector.shape_cast %33 : vector<1x33x32xf32> to vector<33x32xf32>
    %cst_32 = arith.constant dense<0.000000e+00> : vector<24x32xf32>
    %35 = tpu.matmul %32, %34, %cst_32 {dimension_numbers = #tpu.dot_dimension_numbers<[1], [0], [0], [1], [0, 0, 1, 1], [], []>} : vector<24x33xf32>, vector<33x32xf32>, vector<24x32xf32> -> vector<24x32xf32>
    %36 = arith.addf %30, %35 : vector<24x32xf32>
    %c0_33 = arith.constant 0 : index
    %c12 = arith.constant 12 : index
    %c0_34 = arith.constant 0 : index
    %37 = vector.load %arg1[%c0_33, %c12, %c0_34] : memref<1x40x33xf32, #tpu.memory_space<vmem>>, vector<1x24x33xf32>
    %38 = vector.shape_cast %37 : vector<1x24x33xf32> to vector<24x33xf32>
    %c6_35 = arith.constant 6 : index
    %c0_36 = arith.constant 0 : index
    %c0_37 = arith.constant 0 : index
    %39 = vector.load %arg2[%c6_35, %c0_36, %c0_37] : memref<9x33x32xf32, #tpu.memory_space<vmem>>, vector<1x33x32xf32>
    %40 = vector.shape_cast %39 : vector<1x33x32xf32> to vector<33x32xf32>
    %cst_38 = arith.constant dense<0.000000e+00> : vector<24x32xf32>
    %41 = tpu.matmul %38, %40, %cst_38 {dimension_numbers = #tpu.dot_dimension_numbers<[1], [0], [0], [1], [0, 0, 1, 1], [], []>} : vector<24x33xf32>, vector<33x32xf32>, vector<24x32xf32> -> vector<24x32xf32>
    %42 = arith.addf %36, %41 : vector<24x32xf32>
    %c0_39 = arith.constant 0 : index
    %c13 = arith.constant 13 : index
    %c0_40 = arith.constant 0 : index
    %43 = vector.load %arg1[%c0_39, %c13, %c0_40] : memref<1x40x33xf32, #tpu.memory_space<vmem>>, vector<1x24x33xf32>
    %44 = vector.shape_cast %43 : vector<1x24x33xf32> to vector<24x33xf32>
    %c7_41 = arith.constant 7 : index
    %c0_42 = arith.constant 0 : index
    %c0_43 = arith.constant 0 : index
    %45 = vector.load %arg2[%c7_41, %c0_42, %c0_43] : memref<9x33x32xf32, #tpu.memory_space<vmem>>, vector<1x33x32xf32>
    %46 = vector.shape_cast %45 : vector<1x33x32xf32> to vector<33x32xf32>
    %cst_44 = arith.constant dense<0.000000e+00> : vector<24x32xf32>
    %47 = tpu.matmul %44, %46, %cst_44 {dimension_numbers = #tpu.dot_dimension_numbers<[1], [0], [0], [1], [0, 0, 1, 1], [], []>} : vector<24x33xf32>, vector<33x32xf32>, vector<24x32xf32> -> vector<24x32xf32>
    %48 = arith.addf %42, %47 : vector<24x32xf32>
    %c0_45 = arith.constant 0 : index
    %c14 = arith.constant 14 : index
    %c0_46 = arith.constant 0 : index
    %49 = vector.load %arg1[%c0_45, %c14, %c0_46] : memref<1x40x33xf32, #tpu.memory_space<vmem>>, vector<1x24x33xf32>
    %50 = vector.shape_cast %49 : vector<1x24x33xf32> to vector<24x33xf32>
    %c8_47 = arith.constant 8 : index
    %c0_48 = arith.constant 0 : index
    %c0_49 = arith.constant 0 : index
    %51 = vector.load %arg2[%c8_47, %c0_48, %c0_49] : memref<9x33x32xf32, #tpu.memory_space<vmem>>, vector<1x33x32xf32>
    %52 = vector.shape_cast %51 : vector<1x33x32xf32> to vector<33x32xf32>
    %cst_50 = arith.constant dense<0.000000e+00> : vector<24x32xf32>
    %53 = tpu.matmul %50, %52, %cst_50 {dimension_numbers = #tpu.dot_dimension_numbers<[1], [0], [0], [1], [0, 0, 1, 1], [], []>} : vector<24x33xf32>, vector<33x32xf32>, vector<24x32xf32> -> vector<24x32xf32>
    %54 = arith.addf %48, %53 : vector<24x32xf32>
    %c0_51 = arith.constant 0 : index
    %c0_52 = arith.constant 0 : index
    %55 = vector.load %arg3[%c0_51, %c0_52] : memref<1x32xf32, #tpu.memory_space<vmem>>, vector<1x32xf32>
    %56 = vector.broadcast %55 : vector<1x32xf32> to vector<24x32xf32>
    %57 = arith.addf %54, %56 : vector<24x32xf32>
    %cst_53 = arith.constant 0.000000e+00 : f32
    %58 = vector.broadcast %cst_53 : f32 to vector<24x32xf32>
    %59 = arith.cmpf ogt, %57, %58 : vector<24x32xf32>
    %cst_54 = arith.constant 2.000000e-01 : f32
    %60 = vector.broadcast %cst_54 : f32 to vector<24x32xf32>
    %61 = arith.mulf %60, %57 : vector<24x32xf32>
    %62 = arith.select %59, %57, %61 : vector<24x32xi1>, vector<24x32xf32>
    %c0_55 = arith.constant 0 : index
    %c0_56 = arith.constant 0 : index
    %c0_57 = arith.constant 0 : index
    %63 = vector.load %arg4[%c0_55, %c0_56, %c0_57] : memref<1x24x32xf32, #tpu.memory_space<vmem>>, vector<1x24x32xf32>
    %64 = vector.shape_cast %63 : vector<1x24x32xf32> to vector<24x32xf32>
    %65 = vector.shape_cast %62 : vector<24x32xf32> to vector<1x24x32xf32>
    tpu.vector_store %arg4[%c0_55, %c0_56, %c0_57], %65 {strides = array<i32>} : memref<1x24x32xf32, #tpu.memory_space<vmem>>, vector<1x24x32xf32>,
    return
  }
  func.func @transform_0(%arg0: i32) -> (i32, i32, i32) {
    %c0_i32 = arith.constant 0 : i32
    %c0_i32_0 = arith.constant 0 : i32
    %c0_i32_1 = arith.constant 0 : i32
    return %arg0, %c0_i32, %c0_i32_0 : i32, i32, i32
  }
  func.func @transform_1(%arg0: i32) -> (i32, i32, i32) {
    %c0_i32 = arith.constant 0 : i32
    %c0_i32_0 = arith.constant 0 : i32
    %c0_i32_1 = arith.constant 0 : i32
    %c0_i32_2 = arith.constant 0 : i32
    return %c0_i32, %c0_i32_0, %c0_i32_1 : i32, i32, i32
  }
  func.func @transform_2(%arg0: i32) -> (i32, i32) {
    %c0_i32 = arith.constant 0 : i32
    %c0_i32_0 = arith.constant 0 : i32
    %c0_i32_1 = arith.constant 0 : i32
    return %c0_i32, %c0_i32_0 : i32, i32
  }
  func.func @transform_3(%arg0: i32) -> (i32, i32, i32) {
    %c0_i32 = arith.constant 0 : i32
    %c0_i32_0 = arith.constant 0 : i32
    %c0_i32_1 = arith.constant 0 : i32
    return %arg0, %c0_i32, %c0_i32_0 : i32, i32, i32
  }
}

module attributes {stable_mosaic.version = 11 : i64} {
  func.func @_mm_kernel(%arg0: i32, %arg1: memref<2x512xbf16, #tpu.memory_space<vmem>>, %arg2: memref<512x32xbf16, #tpu.memory_space<vmem>>, %arg3: memref<1x32xf32, #tpu.memory_space<vmem>>, %arg4: memref<2x32xf32, #tpu.memory_space<vmem>>) attributes {dimension_semantics = [#tpu.dimension_semantics<parallel>], iteration_bounds = array<i64: 1>, scalar_prefetch = 0 : i64, scratch_operands = 0 : i64, tpu.core_type = #tpu.core_type<tc>, window_params = [{transform_indices = @transform_0, window_bounds = array<i64: 2, 512>}, {pipeline_mode = #tpu.pipeline_mode<synchronous>, transform_indices = @transform_1, window_bounds = array<i64: 512, 32>}, {pipeline_mode = #tpu.pipeline_mode<synchronous>, transform_indices = @transform_2, window_bounds = array<i64: 1, 32>}, {transform_indices = @transform_3, window_bounds = array<i64: 2, 32>}]} {
    %c0 = arith.constant 0 : index
    %c0_0 = arith.constant 0 : index
    %0 = vector.load %arg1[%c0, %c0_0] : memref<2x512xbf16, #tpu.memory_space<vmem>>, vector<2x512xbf16>
    %c0_1 = arith.constant 0 : index
    %c0_2 = arith.constant 0 : index
    %1 = vector.load %arg2[%c0_1, %c0_2] : memref<512x32xbf16, #tpu.memory_space<vmem>>, vector<512x32xbf16>
    %cst = arith.constant dense<0.000000e+00> : vector<2x32xf32>
    %2 = tpu.matmul %0, %1, %cst {dimension_numbers = #tpu.dot_dimension_numbers<[1], [0], [0], [1], [0, 0, 1, 1], [], []>} : vector<2x512xbf16>, vector<512x32xbf16>, vector<2x32xf32> -> vector<2x32xf32>
    %c0_3 = arith.constant 0 : index
    %c0_4 = arith.constant 0 : index
    %3 = vector.load %arg3[%c0_3, %c0_4] : memref<1x32xf32, #tpu.memory_space<vmem>>, vector<1x32xf32>
    %4 = vector.broadcast %3 : vector<1x32xf32> to vector<2x32xf32>
    %5 = arith.addf %2, %4 : vector<2x32xf32>
    %cst_5 = arith.constant 0.000000e+00 : f32
    %6 = vector.broadcast %cst_5 : f32 to vector<2x32xf32>
    %7 = arith.cmpf ogt, %5, %6 : vector<2x32xf32>
    %cst_6 = arith.constant 2.000000e-01 : f32
    %8 = vector.broadcast %cst_6 : f32 to vector<2x32xf32>
    %9 = arith.mulf %8, %5 : vector<2x32xf32>
    %10 = arith.select %7, %5, %9 : vector<2x32xi1>, vector<2x32xf32>
    %c0_7 = arith.constant 0 : index
    %c0_8 = arith.constant 0 : index
    %11 = vector.load %arg4[%c0_7, %c0_8] : memref<2x32xf32, #tpu.memory_space<vmem>>, vector<2x32xf32>
    tpu.vector_store %arg4[%c0_7, %c0_8], %10 {strides = array<i32>} : memref<2x32xf32, #tpu.memory_space<vmem>>, vector<2x32xf32>,
    return
  }
  func.func @transform_0(%arg0: i32) -> (i32, i32) {
    %c0_i32 = arith.constant 0 : i32
    %c0_i32_0 = arith.constant 0 : i32
    return %arg0, %c0_i32 : i32, i32
  }
  func.func @transform_1(%arg0: i32) -> (i32, i32) {
    %c0_i32 = arith.constant 0 : i32
    %c0_i32_0 = arith.constant 0 : i32
    %c0_i32_1 = arith.constant 0 : i32
    return %c0_i32, %c0_i32_0 : i32, i32
  }
  func.func @transform_2(%arg0: i32) -> (i32, i32) {
    %c0_i32 = arith.constant 0 : i32
    %c0_i32_0 = arith.constant 0 : i32
    %c0_i32_1 = arith.constant 0 : i32
    return %c0_i32, %c0_i32_0 : i32, i32
  }
  func.func @transform_3(%arg0: i32) -> (i32, i32) {
    %c0_i32 = arith.constant 0 : i32
    %c0_i32_0 = arith.constant 0 : i32
    return %arg0, %c0_i32 : i32, i32
  }
}

module attributes {stable_mosaic.version = 11 : i64} {
  func.func @_mm_kernel(%arg0: i32, %arg1: memref<2x32xbf16, #tpu.memory_space<vmem>>, %arg2: memref<32x1xbf16, #tpu.memory_space<vmem>>, %arg3: memref<1x1xf32, #tpu.memory_space<vmem>>, %arg4: memref<2x1xf32, #tpu.memory_space<vmem>>) attributes {dimension_semantics = [#tpu.dimension_semantics<parallel>], iteration_bounds = array<i64: 1>, scalar_prefetch = 0 : i64, scratch_operands = 0 : i64, tpu.core_type = #tpu.core_type<tc>, window_params = [{transform_indices = @transform_0, window_bounds = array<i64: 2, 32>}, {pipeline_mode = #tpu.pipeline_mode<synchronous>, transform_indices = @transform_1, window_bounds = array<i64: 32, 1>}, {pipeline_mode = #tpu.pipeline_mode<synchronous>, transform_indices = @transform_2, window_bounds = array<i64: 1, 1>}, {transform_indices = @transform_3, window_bounds = array<i64: 2, 1>}]} {
    %c0 = arith.constant 0 : index
    %c0_0 = arith.constant 0 : index
    %0 = vector.load %arg1[%c0, %c0_0] : memref<2x32xbf16, #tpu.memory_space<vmem>>, vector<2x32xbf16>
    %c0_1 = arith.constant 0 : index
    %c0_2 = arith.constant 0 : index
    %1 = vector.load %arg2[%c0_1, %c0_2] : memref<32x1xbf16, #tpu.memory_space<vmem>>, vector<32x1xbf16>
    %cst = arith.constant dense<0.000000e+00> : vector<2x1xf32>
    %2 = tpu.matmul %0, %1, %cst {dimension_numbers = #tpu.dot_dimension_numbers<[1], [0], [0], [1], [0, 0, 1, 1], [], []>} : vector<2x32xbf16>, vector<32x1xbf16>, vector<2x1xf32> -> vector<2x1xf32>
    %c0_3 = arith.constant 0 : index
    %c0_4 = arith.constant 0 : index
    %3 = vector.load %arg3[%c0_3, %c0_4] : memref<1x1xf32, #tpu.memory_space<vmem>>, vector<1x1xf32>
    %4 = vector.broadcast %3 : vector<1x1xf32> to vector<2x1xf32>
    %5 = arith.addf %2, %4 : vector<2x1xf32>
    %c0_5 = arith.constant 0 : index
    %c0_6 = arith.constant 0 : index
    %6 = vector.load %arg4[%c0_5, %c0_6] : memref<2x1xf32, #tpu.memory_space<vmem>>, vector<2x1xf32>
    tpu.vector_store %arg4[%c0_5, %c0_6], %5 {strides = array<i32>} : memref<2x1xf32, #tpu.memory_space<vmem>>, vector<2x1xf32>,
    return
  }
  func.func @transform_0(%arg0: i32) -> (i32, i32) {
    %c0_i32 = arith.constant 0 : i32
    %c0_i32_0 = arith.constant 0 : i32
    return %arg0, %c0_i32 : i32, i32
  }
  func.func @transform_1(%arg0: i32) -> (i32, i32) {
    %c0_i32 = arith.constant 0 : i32
    %c0_i32_0 = arith.constant 0 : i32
    %c0_i32_1 = arith.constant 0 : i32
    return %c0_i32, %c0_i32_0 : i32, i32
  }
  func.func @transform_2(%arg0: i32) -> (i32, i32) {
    %c0_i32 = arith.constant 0 : i32
    %c0_i32_0 = arith.constant 0 : i32
    %c0_i32_1 = arith.constant 0 : i32
    return %c0_i32, %c0_i32_0 : i32, i32
  }
  func.func @transform_3(%arg0: i32) -> (i32, i32) {
    %c0_i32 = arith.constant 0 : i32
    %c0_i32_0 = arith.constant 0 : i32
    return %arg0, %c0_i32 : i32, i32
  }
}

</mosaic_0001>

<bundles_post_ra>
// kernel: tile.8
= control target key start
LH: loop header
LB: loop body
LE: loop exit
PB: predicated region body
PF: predicated region fallthrough
CT: control target
= control target key end

     0   :  { %s22_s0 = inlined_call_operand.vmem [shape: f32[13], index: 0, kind: input, shape index: {}]   ;;  %s23_s1 = inlined_call_operand.vmem [shape: f32[4,13], index: 1, kind: output, shape index: {}]  }
   0x1   :  { %v4_v0 = vld [vmem:[%s22_s0] ss:$0 sm:$0xff] }
   0x2   :  { %5 = vst [vmem:[%s23_s1] sm:$0xf] %v4_v0 }

// kernel: tile.9
= control target key start
LH: loop header
LB: loop body
LE: loop exit
PB: predicated region body
PF: predicated region fallthrough
CT: control target
= control target key end

     0   :  { %s37_s8 = smov 13   ;;  %s38_s9 = smov 26   ;;  %vm7_vm0 = vcmask 105472   ;;  %vm13_vm1 = vcmask 425272   ;;  %vm19_vm2 = vcmask 318672   ;;  %vm25_vm3 = vcmask 212072   ;;  %s55_s0 = inlined_call_operand.vmem [shape: f32[4,13], index: 0, kind: input, shape index: {}]   ;;  %s56_s1 = inlined_call_operand.vmem [shape: f32[1,52], index: 1, kind: output, shape index: {}]  }
   0x1   :  { %v4_v0 = vld [vmem:[%s55_s0] sm:$0xf]  ;;  %s36_s0 = smov 39  }
   0x2   :  { %5 = vst [vmem:[#allocation1] sm:$0xf] %v4_v0 }
   0x9   :  { %v10_v1 = vld [vmem:[#allocation1 + $0x3] sm:$0x1]   ;;  %v22_v2 = vld [vmem:[#allocation1 + $0x1] sm:$0x1]   ;;  %v16_v3 = vld [vmem:[#allocation1 + $0x2] sm:$0x1]  }
   0xa   :  { %11 = vrot.lane.b32.xlu0 %v10_v1, %s36_s0  ;;  %23 = vrot.lane.b32.xlu1 %v22_v2, %s37_s8  ;;  %v6_v4 = vld [vmem:[#allocation1] sm:$0x1]  }
   0xb   :  { %8 = vst.msk [vmem:[#allocation0] sm:$0x1] %vm7_vm0, %v6_v4  }
  0x12   :  { %17 = vrot.lane.b32.xlu0 %v16_v3, %s38_s9 }
  0x7c   :  { %v12_v5 = vpop.permute.xlu0 %11   ;;  %v24_v6 = vpop.permute.xlu1 %23  }
  0x7d   :  { %14 = vst.msk [vmem:[#allocation0] sm:$0x1] %vm13_vm1, %v12_v5  }
  0x84   :  { %v18_v7 = vpop.permute.xlu0 %17  }
  0x85   :  { %20 = vst.msk [vmem:[#allocation0] sm:$0x1] %vm19_vm2, %v18_v7  }
  0x86   :  { %26 = vst.msk [vmem:[#allocation0] sm:$0x1] %vm25_vm3, %v24_v6  }
  0x8d   :  { %v29_v8 = vld [vmem:[#allocation0] sm:$0x1] }
  0x8e   :  { %32 = vst [vmem:[%s56_s1] sm:$0x1] %v29_v8 }

// kernel: discriminator_c_forward.13
= control target key start
LH: loop header
LB: loop body
LE: loop exit
PB: predicated region body
PF: predicated region fallthrough
CT: control target
= control target key end

     0   :  { %vm154_vm0 = vcmask 1045504   ;;  %vm155_vm1 = vcmask 1046528   ;;  %v422_v2 = vmov 65535   ;;  %vm114_vm2 = vcmask 105472   ;;  %s631_s1 = inlined_call_operand.vmem [shape: bf16[13,52], index: 1, kind: input, shape index: {}]   ;;  %s632_s0 = inlined_call_operand.vmem [shape: bf16[200,13], index: 0, kind: input, shape index: {}]   ;;  %s633_s2 = inlined_call_operand.vmem [shape: f32[1,52], index: 2, kind: input, shape index: {}]   ;;  %s634_s3 = inlined_call_operand.vmem [shape: f32[200,52], index: 3, kind: output, shape index: {}]  }
   0x1   :  { %v389_v0 = vld [vmem:[%s631_s1] sm:$0xf]  ;;  %v416_v1 = vld [vmem:[%s631_s1] sm:$0x70]  ;;  %v156_v3 = vsel %vm154_vm0, 4294967295, %v422_v2  ;;  %v413_v9 = vld [vmem:[%s632_s0 + $0x48] sm:$0xff] }
   0x2   :  { %v390_v4 = vor.u32 %v416_v1, %v389_v0  ;;  %v157_v5 = vsel %vm155_vm1, %v156_v3, 0  ;;  %v404_v7 = vld [vmem:[%s632_s0] sm:$0xff]  ;;  %v405_v11 = vld [vmem:[%s632_s0 + $0x8] sm:$0xff]  ;;  %v414_v13 = vld [vmem:[%s632_s0 + $0x50] sm:$0xff]  ;;  %vm309_vm3 = vcmask 424960  }
   0x3   :  { %v408_v8 = vld [vmem:[%s632_s0 + $0x20] sm:$0xff]  ;;  %v409_v12 = vld [vmem:[%s632_s0 + $0x28] sm:$0xff]  ;;  %v406_v14 = vld [vmem:[%s632_s0 + $0x10] sm:$0xff] }
   0x4   :  { %v159_v6 = vand.u32 %v390_v4, %v157_v5  ;;  %v412_v10 = vld [vmem:[%s632_s0 + $0x40] sm:$0xff]  ;;  %v410_v15 = vld [vmem:[%s632_s0 + $0x30] sm:$0xff]  ;;  %v415_v16 = vld [vmem:[%s632_s0 + $0x58] sm:$0xff] }
   0x5   :  { %v39_v17 = vld [vmem:[%s632_s0 + $0x60] sm:$0xf]  ;;  %v407_v19 = vld [vmem:[%s632_s0 + $0x18] sm:$0xff] }
   0x6   :  { %168 = vmatpush.bf16.msra.mxu0 %v159_v6  ;;  %417 = vmatpush.bf16.msra.mxu1 %v159_v6  ;;  %v95_v18 = vunpack.c.l.b16 %v39_v17  ;;  %v411_v20 = vld [vmem:[%s632_s0 + $0x38] sm:$0xff]  ;;  %v504_v22 = vld [vmem:[%s633_s2] ss:$0 sm:$0xff] }
   0x7   :  { %419 = vmatpush.bf16.msra.mxu3 %v159_v6  ;;  %418 = vmatpush.bf16.msra.mxu2 %v159_v6 }
   0x8   :  { %v108_v21 = vpack.c.b16 %v95_v18, %v95_v18 }
   0x9   :  { %391 = vmatmul.msk.bf16.vlgmr.msra.gmra.mxu0 %vm114_vm2, %v404_v7  ;;  %395 = vmatmul.msk.bf16.vlgmr.msra.gmra.mxu1 %vm114_vm2, %v408_v8 }
   0xa   :  { %400 = vmatmul.msk.bf16.vlgmr.msra.gmra.mxu3 %vm114_vm2, %v413_v9  ;;  %399 = vmatmul.msk.bf16.vlgmr.msra.gmra.mxu2 %vm114_vm2, %v412_v10 }
  0x19   :  { %392 = vmatmul.msk.bf16.gmra.mxu0 %vm114_vm2, %v405_v11  ;;  %396 = vmatmul.msk.bf16.gmra.mxu1 %vm114_vm2, %v409_v12 }
  0x1a   :  { %401 = vmatmul.msk.bf16.gmra.mxu3 %vm114_vm2, %v414_v13 }
  0x29   :  { %393 = vmatmul.msk.bf16.gmra.mxu0 %vm114_vm2, %v406_v14  ;;  %397 = vmatmul.msk.bf16.gmra.mxu1 %vm114_vm2, %v410_v15 }
  0x2a   :  { %402 = vmatmul.msk.bf16.gmra.mxu3 %vm114_vm2, %v415_v16 }
  0x39   :  { %394 = vmatmul.msk.bf16.gmra.mxu0 %vm114_vm2, %v407_v19  ;;  %398 = vmatmul.msk.bf16.gmra.mxu1 %vm114_vm2, %v411_v20 }
  0x3a   :  { %403 = vmatmul.msk.bf16.gmra.mxu3 %vm114_vm2, %v108_v21 }
  0x86   :  { %v170_v23 = vpop.f32.mrf.mxu0  ;;  %v190_v24 = vpop.f32.mrf.mxu1 }
  0x87   :  { %v171_v25 = vadd.f32 %v504_v22, %v170_v23  ;;  %v191_v26 = vadd.f32 %v504_v22, %v190_v24 }
  0x89   :  { %vm234_vm4 = vcmp.gt.f32.partialorder %v171_v25, 0.0  ;;  %v259_v27 = vmul.f32 0.2, %v171_v25  ;;  %vm242_vm5 = vcmp.gt.f32.partialorder %v191_v26, 0.0  ;;  %v267_v28 = vmul.f32 0.2, %v191_v26 }
  0x8b   :  { %v284_v29 = vsel %vm234_vm4, %v171_v25, %v259_v27  ;;  %v292_v30 = vsel %vm242_vm5, %v191_v26, %v267_v28 }
  0x8c   :  { %310 = vst.msk [vmem:[%s634_s3] sm:$0xff] %vm309_vm3, %v284_v29 }
  0x8d   :  { %318 = vst.msk [vmem:[%s634_s3 + $0x40] sm:$0xff] %vm309_vm3, %v292_v30  ;;  %v215_v31 = vpop.f32.mrf.mxu3  ;;  %v210_v32 = vpop.f32.mrf.mxu2 }
  0x8e   :  { %v216_v33 = vadd.f32 %v504_v22, %v215_v31  ;;  %v172_v34 = vpop.f32.mrf.mxu0  ;;  %v192_v35 = vpop.f32.mrf.mxu1  ;;  %v211_v36 = vadd.f32 %v504_v22, %v210_v32 }
  0x8f   :  { %v173_v37 = vadd.f32 %v504_v22, %v172_v34  ;;  %v193_v38 = vadd.f32 %v504_v22, %v192_v35 }
  0x90   :  { %vm252_vm6 = vcmp.gt.f32.partialorder %v216_v33, 0.0  ;;  %v277_v39 = vmul.f32 0.2, %v216_v33  ;;  %vm250_vm7 = vcmp.gt.f32.partialorder %v211_v36, 0.0  ;;  %v275_v40 = vmul.f32 0.2, %v211_v36 }
  0x91   :  { %vm235_vm8 = vcmp.gt.f32.partialorder %v173_v37, 0.0  ;;  %v260_v41 = vmul.f32 0.2, %v173_v37  ;;  %vm243_vm9 = vcmp.gt.f32.partialorder %v193_v38, 0.0  ;;  %v268_v42 = vmul.f32 0.2, %v193_v38 }
  0x92   :  { %v302_v43 = vsel %vm252_vm6, %v216_v33, %v277_v39  ;;  %v300_v46 = vsel %vm250_vm7, %v211_v36, %v275_v40 }
  0x93   :  { %328 = vst.msk [vmem:[%s634_s3 + $0x90] sm:$0xff] %vm309_vm3, %v302_v43  ;;  %v285_v44 = vsel %vm235_vm8, %v173_v37, %v260_v41  ;;  %v293_v45 = vsel %vm243_vm9, %v193_v38, %v268_v42 }
  0x94   :  { %311 = vst.msk [vmem:[%s634_s3 + $0x8] sm:$0xff] %vm309_vm3, %v285_v44 }
  0x95   :  { %319 = vst.msk [vmem:[%s634_s3 + $0x48] sm:$0xff] %vm309_vm3, %v293_v45  ;;  %v217_v47 = vpop.f32.mrf.mxu3  ;;  %v212_v48 = vpop.f32.mrf.mxu2 }
  0x96   :  { %v218_v49 = vadd.f32 %v504_v22, %v217_v47  ;;  %v175_v50 = vpop.f32.mrf.mxu0  ;;  %v195_v51 = vpop.f32.mrf.mxu1  ;;  %326 = vst.msk [vmem:[%s634_s3 + $0x80] sm:$0xff] %vm309_vm3, %v300_v46  ;;  %v213_v52 = vadd.f32 %v504_v22, %v212_v48 }
  0x97   :  { %v176_v53 = vadd.f32 %v504_v22, %v175_v50  ;;  %v196_v54 = vadd.f32 %v504_v22, %v195_v51 }
  0x98   :  { %vm253_vm10 = vcmp.gt.f32.partialorder %v218_v49, 0.0  ;;  %v278_v55 = vmul.f32 0.2, %v218_v49  ;;  %vm251_vm11 = vcmp.gt.f32.partialorder %v213_v52, 0.0  ;;  %v276_v56 = vmul.f32 0.2, %v213_v52 }
  0x99   :  { %vm236_vm12 = vcmp.gt.f32.partialorder %v176_v53, 0.0  ;;  %v261_v57 = vmul.f32 0.2, %v176_v53  ;;  %vm244_vm13 = vcmp.gt.f32.partialorder %v196_v54, 0.0  ;;  %v269_v58 = vmul.f32 0.2, %v196_v54 }
  0x9a   :  { %v303_v59 = vsel %vm253_vm10, %v218_v49, %v278_v55  ;;  %v301_v62 = vsel %vm251_vm11, %v213_v52, %v276_v56 }
  0x9b   :  { %329 = vst.msk [vmem:[%s634_s3 + $0x98] sm:$0xff] %vm309_vm3, %v303_v59  ;;  %v286_v60 = vsel %vm236_vm12, %v176_v53, %v261_v57  ;;  %v294_v61 = vsel %vm244_vm13, %v196_v54, %v269_v58 }
  0x9c   :  { %312 = vst.msk [vmem:[%s634_s3 + $0x10] sm:$0xff] %vm309_vm3, %v286_v60 }
  0x9d   :  { %320 = vst.msk [vmem:[%s634_s3 + $0x50] sm:$0xff] %vm309_vm3, %v294_v61  ;;  %v220_v63 = vpop.f32.mrf.mxu3 }
  0x9e   :  { %v221_v0 = vadd.f32 %v504_v22, %v220_v63  ;;  %v177_v1 = vpop.f32.mrf.mxu0  ;;  %v197_v2 = vpop.f32.mrf.mxu1  ;;  %327 = vst.msk [vmem:[%s634_s3 + $0x88] sm:$0xff] %vm309_vm3, %v301_v62 }
  0x9f   :  { %v178_v3 = vadd.f32 %v504_v22, %v177_v1  ;;  %v198_v4 = vadd.f32 %v504_v22, %v197_v2 }
  0xa0   :  { %vm254_vm14 = vcmp.gt.f32.partialorder %v221_v0, 0.0  ;;  %v279_v5 = vmul.f32 0.2, %v221_v0 }
  0xa1   :  { %vm237_vm15 = vcmp.gt.f32.partialorder %v178_v3, 0.0  ;;  %v262_v6 = vmul.f32 0.2, %v178_v3  ;;  %vm245_vm0 = vcmp.gt.f32.partialorder %v198_v4, 0.0  ;;  %v270_v7 = vmul.f32 0.2, %v198_v4 }
  0xa2   :  { %v304_v8 = vsel %vm254_vm14, %v221_v0, %v279_v5 }
  0xa3   :  { %330 = vst.msk [vmem:[%s634_s3 + $0xa0] sm:$0xff] %vm309_vm3, %v304_v8  ;;  %v287_v9 = vsel %vm237_vm15, %v178_v3, %v262_v6  ;;  %v295_v10 = vsel %vm245_vm0, %v198_v4, %v270_v7 }
  0xa4   :  { %313 = vst.msk [vmem:[%s634_s3 + $0x18] sm:$0xff] %vm309_vm3, %v287_v9 }
  0xa5   :  { %321 = vst.msk [vmem:[%s634_s3 + $0x58] sm:$0xff] %vm309_vm3, %v295_v10  ;;  %v222_v11 = vpop.f32.mrf.mxu3 }
  0xa6   :  { %v223_v12 = vadd.f32 %v504_v22, %v222_v11  ;;  %v180_v13 = vpop.f32.mrf.mxu0  ;;  %v200_v14 = vpop.f32.mrf.mxu1 }
  0xa7   :  { %v181_v15 = vadd.f32 %v504_v22, %v180_v13  ;;  %v201_v16 = vadd.f32 %v504_v22, %v200_v14 }
  0xa8   :  { %vm255_vm1 = vcmp.gt.f32.partialorder %v223_v12, 0.0  ;;  %v280_v17 = vmul.f32 0.2, %v223_v12 }
  0xa9   :  { %vm238_vm2 = vcmp.gt.f32.partialorder %v181_v15, 0.0  ;;  %v263_v18 = vmul.f32 0.2, %v181_v15  ;;  %vm246_vm4 = vcmp.gt.f32.partialorder %v201_v16, 0.0  ;;  %v271_v19 = vmul.f32 0.2, %v201_v16 }
  0xaa   :  { %v305_v20 = vsel %vm255_vm1, %v223_v12, %v280_v17 }
  0xab   :  { %331 = vst.msk [vmem:[%s634_s3 + $0xa8] sm:$0xff] %vm309_vm3, %v305_v20  ;;  %v288_v21 = vsel %vm238_vm2, %v181_v15, %v263_v18  ;;  %v296_v23 = vsel %vm246_vm4, %v201_v16, %v271_v19 }
  0xac   :  { %314 = vst.msk [vmem:[%s634_s3 + $0x20] sm:$0xff] %vm309_vm3, %v288_v21 }
  0xad   :  { %322 = vst.msk [vmem:[%s634_s3 + $0x60] sm:$0xff] %vm309_vm3, %v296_v23  ;;  %v225_v24 = vpop.f32.mrf.mxu3 }
  0xae   :  { %v226_v25 = vadd.f32 %v504_v22, %v225_v24  ;;  %v182_v26 = vpop.f32.mrf.mxu0  ;;  %v202_v27 = vpop.f32.mrf.mxu1 }
  0xaf   :  { %v183_v28 = vadd.f32 %v504_v22, %v182_v26  ;;  %v203_v29 = vadd.f32 %v504_v22, %v202_v27 }
  0xb0   :  { %vm256_vm5 = vcmp.gt.f32.partialorder %v226_v25, 0.0  ;;  %v281_v30 = vmul.f32 0.2, %v226_v25 }
  0xb1   :  { %vm239_vm6 = vcmp.gt.f32.partialorder %v183_v28, 0.0  ;;  %v264_v31 = vmul.f32 0.2, %v183_v28  ;;  %vm247_vm7 = vcmp.gt.f32.partialorder %v203_v29, 0.0  ;;  %v272_v32 = vmul.f32 0.2, %v203_v29 }
  0xb2   :  { %v306_v33 = vsel %vm256_vm5, %v226_v25, %v281_v30 }
  0xb3   :  { %332 = vst.msk [vmem:[%s634_s3 + $0xb0] sm:$0xff] %vm309_vm3, %v306_v33  ;;  %v289_v34 = vsel %vm239_vm6, %v183_v28, %v264_v31  ;;  %v297_v35 = vsel %vm247_vm7, %v203_v29, %v272_v32 }
  0xb4   :  { %315 = vst.msk [vmem:[%s634_s3 + $0x28] sm:$0xff] %vm309_vm3, %v289_v34 }
  0xb5   :  { %323 = vst.msk [vmem:[%s634_s3 + $0x68] sm:$0xff] %vm309_vm3, %v297_v35  ;;  %v227_v36 = vpop.f32.mrf.mxu3 }
  0xb6   :  { %v228_v37 = vadd.f32 %v504_v22, %v227_v36  ;;  %v185_v38 = vpop.f32.mrf.mxu0  ;;  %v205_v39 = vpop.f32.mrf.mxu1 }
  0xb7   :  { %v186_v40 = vadd.f32 %v504_v22, %v185_v38  ;;  %v206_v41 = vadd.f32 %v504_v22, %v205_v39 }
  0xb8   :  { %vm257_vm8 = vcmp.gt.f32.partialorder %v228_v37, 0.0  ;;  %v282_v42 = vmul.f32 0.2, %v228_v37 }
  0xb9   :  { %vm240_vm9 = vcmp.gt.f32.partialorder %v186_v40, 0.0  ;;  %v265_v43 = vmul.f32 0.2, %v186_v40  ;;  %vm248_vm10 = vcmp.gt.f32.partialorder %v206_v41, 0.0  ;;  %v273_v44 = vmul.f32 0.2, %v206_v41 }
  0xba   :  { %v307_v45 = vsel %vm257_vm8, %v228_v37, %v282_v42 }
  0xbb   :  { %333 = vst.msk [vmem:[%s634_s3 + $0xb8] sm:$0xff] %vm309_vm3, %v307_v45  ;;  %v290_v46 = vsel %vm240_vm9, %v186_v40, %v265_v43  ;;  %v298_v47 = vsel %vm248_vm10, %v206_v41, %v273_v44 }
  0xbc   :  { %316 = vst.msk [vmem:[%s634_s3 + $0x30] sm:$0xff] %vm309_vm3, %v290_v46 }
  0xbd   :  { %324 = vst.msk [vmem:[%s634_s3 + $0x70] sm:$0xff] %vm309_vm3, %v298_v47  ;;  %v230_v48 = vpop.f32.mrf.mxu3 }
  0xbe   :  { %v231_v49 = vadd.f32 %v504_v22, %v230_v48  ;;  %v187_v50 = vpop.f32.mrf.mxu0  ;;  %v207_v51 = vpop.f32.mrf.mxu1 }
  0xbf   :  { %v188_v52 = vadd.f32 %v504_v22, %v187_v50  ;;  %v208_v53 = vadd.f32 %v504_v22, %v207_v51 }
  0xc0   :  { %vm258_vm11 = vcmp.gt.f32.partialorder %v231_v49, 0.0  ;;  %v283_v54 = vmul.f32 0.2, %v231_v49 }
  0xc1   :  { %vm241_vm12 = vcmp.gt.f32.partialorder %v188_v52, 0.0  ;;  %v266_v55 = vmul.f32 0.2, %v188_v52  ;;  %vm249_vm13 = vcmp.gt.f32.partialorder %v208_v53, 0.0  ;;  %v274_v56 = vmul.f32 0.2, %v208_v53 }
  0xc2   :  { %v308_v57 = vsel %vm258_vm11, %v231_v49, %v283_v54 }
  0xc3   :  { %334 = vst.msk [vmem:[%s634_s3 + $0xc0] sm:$0xff] %vm309_vm3, %v308_v57  ;;  %v291_v58 = vsel %vm241_vm12, %v188_v52, %v266_v55  ;;  %v299_v59 = vsel %vm249_vm13, %v208_v53, %v274_v56 }
  0xc4   :  { %317 = vst.msk [vmem:[%s634_s3 + $0x38] sm:$0xff] %vm309_vm3, %v291_v58 }
  0xc5   :  { %325 = vst.msk [vmem:[%s634_s3 + $0x78] sm:$0xff] %vm309_vm3, %v299_v59  ;;  %v232_v22 = vpop.f32.mrf.mxu3 }

// kernel: discriminator_c_forward.12
= control target key start
LH: loop header
LB: loop body
LE: loop exit
PB: predicated region body
PF: predicated region fallthrough
CT: control target
= control target key end

     0   :  { %vm148_vm0 = vcmask 1041408   ;;  %vm108_vm1 = vcmask 31744   ;;  %vm225_vm2 = vcmask 105472   ;;  %s537_s1 = inlined_call_operand.vmem [shape: bf16[4,13], index: 1, kind: input, shape index: {}]   ;;  %s538_s0 = inlined_call_operand.vmem [shape: bf16[200,4], index: 0, kind: input, shape index: {}]   ;;  %s539_s2 = inlined_call_operand.vmem [shape: f32[1,13], index: 2, kind: input, shape index: {}]   ;;  %s540_s3 = inlined_call_operand.vmem [shape: f32[200,13], index: 3, kind: output, shape index: {}]  }
   0x1   :  { %v40_v0 = vld [vmem:[%s537_s1] sm:$0x3]  ;;  %v325_v4 = vld [vmem:[%s538_s0 + $0x48] sm:$0xff]  ;;  %v326_v8 = vld [vmem:[%s538_s0 + $0x50] sm:$0xff] }
   0x2   :  { %v150_v1 = vsel %vm148_vm0, %v40_v0, 0  ;;  %v316_v2 = vld [vmem:[%s538_s0] sm:$0xff]  ;;  %v317_v6 = vld [vmem:[%s538_s0 + $0x8] sm:$0xff]  ;;  %v318_v9 = vld [vmem:[%s538_s0 + $0x10] sm:$0xff] }
   0x3   :  { %v320_v3 = vld [vmem:[%s538_s0 + $0x20] sm:$0xff]  ;;  %159 = vmatpush.bf16.msra.mxu0 %v150_v1  ;;  %328 = vmatpush.bf16.msra.mxu1 %v150_v1  ;;  %v321_v7 = vld [vmem:[%s538_s0 + $0x28] sm:$0xff]  ;;  %v322_v10 = vld [vmem:[%s538_s0 + $0x30] sm:$0xff] }
   0x4   :  { %330 = vmatpush.bf16.msra.mxu3 %v150_v1  ;;  %329 = vmatpush.bf16.msra.mxu2 %v150_v1  ;;  %v324_v5 = vld [vmem:[%s538_s0 + $0x40] sm:$0xff]  ;;  %v327_v11 = vld [vmem:[%s538_s0 + $0x58] sm:$0xff] }
   0x5   :  { %v39_v12 = vld [vmem:[%s538_s0 + $0x60] sm:$0xf]  ;;  %v319_v14 = vld [vmem:[%s538_s0 + $0x18] sm:$0xff] }
   0x6   :  { %303 = vmatmul.msk.bf16.vlgmr.msra.gmra.mxu0 %vm108_vm1, %v316_v2  ;;  %307 = vmatmul.msk.bf16.vlgmr.msra.gmra.mxu1 %vm108_vm1, %v320_v3  ;;  %v94_v13 = vunpack.c.l.b16 %v39_v12  ;;  %v323_v15 = vld [vmem:[%s538_s0 + $0x38] sm:$0xff]  ;;  %v410_v17 = vld [vmem:[%s539_s2] ss:$0 sm:$0xff] }
   0x7   :  { %312 = vmatmul.msk.bf16.vlgmr.msra.gmra.mxu3 %vm108_vm1, %v325_v4  ;;  %311 = vmatmul.msk.bf16.vlgmr.msra.gmra.mxu2 %vm108_vm1, %v324_v5 }
   0x8   :  { %v107_v16 = vpack.c.b16 %v94_v13, %v94_v13 }
  0x16   :  { %304 = vmatmul.msk.bf16.gmra.mxu0 %vm108_vm1, %v317_v6  ;;  %308 = vmatmul.msk.bf16.gmra.mxu1 %vm108_vm1, %v321_v7 }
  0x17   :  { %313 = vmatmul.msk.bf16.gmra.mxu3 %vm108_vm1, %v326_v8 }
  0x26   :  { %305 = vmatmul.msk.bf16.gmra.mxu0 %vm108_vm1, %v318_v9  ;;  %309 = vmatmul.msk.bf16.gmra.mxu1 %vm108_vm1, %v322_v10 }
  0x27   :  { %314 = vmatmul.msk.bf16.gmra.mxu3 %vm108_vm1, %v327_v11 }
  0x36   :  { %306 = vmatmul.msk.bf16.gmra.mxu0 %vm108_vm1, %v319_v14  ;;  %310 = vmatmul.msk.bf16.gmra.mxu1 %vm108_vm1, %v323_v15 }
  0x37   :  { %315 = vmatmul.msk.bf16.gmra.mxu3 %vm108_vm1, %v107_v16 }
  0x83   :  { %v161_v18 = vpop.f32.mrf.mxu0  ;;  %v181_v19 = vpop.f32.mrf.mxu1 }
  0x84   :  { %v162_v20 = vadd.f32 %v410_v17, %v161_v18  ;;  %v182_v21 = vadd.f32 %v410_v17, %v181_v19 }
  0x86   :  { %226 = vst.msk [vmem:[%s540_s3] sm:$0xff] %vm225_vm2, %v162_v20 }
  0x87   :  { %234 = vst.msk [vmem:[%s540_s3 + $0x40] sm:$0xff] %vm225_vm2, %v182_v21 }
  0x8a   :  { %v206_v22 = vpop.f32.mrf.mxu3  ;;  %v201_v28 = vpop.f32.mrf.mxu2 }
  0x8b   :  { %v207_v23 = vadd.f32 %v410_v17, %v206_v22  ;;  %v163_v24 = vpop.f32.mrf.mxu0  ;;  %v183_v25 = vpop.f32.mrf.mxu1  ;;  %v202_v29 = vadd.f32 %v410_v17, %v201_v28 }
  0x8c   :  { %v164_v26 = vadd.f32 %v410_v17, %v163_v24  ;;  %v184_v27 = vadd.f32 %v410_v17, %v183_v25 }
  0x8d   :  { %244 = vst.msk [vmem:[%s540_s3 + $0x90] sm:$0xff] %vm225_vm2, %v207_v23 }
  0x8e   :  { %227 = vst.msk [vmem:[%s540_s3 + $0x8] sm:$0xff] %vm225_vm2, %v164_v26 }
  0x8f   :  { %235 = vst.msk [vmem:[%s540_s3 + $0x48] sm:$0xff] %vm225_vm2, %v184_v27 }
  0x90   :  { %242 = vst.msk [vmem:[%s540_s3 + $0x80] sm:$0xff] %vm225_vm2, %v202_v29 }
  0x92   :  { %v208_v30 = vpop.f32.mrf.mxu3  ;;  %v203_v36 = vpop.f32.mrf.mxu2 }
  0x93   :  { %v209_v31 = vadd.f32 %v410_v17, %v208_v30  ;;  %v166_v32 = vpop.f32.mrf.mxu0  ;;  %v186_v33 = vpop.f32.mrf.mxu1  ;;  %v204_v37 = vadd.f32 %v410_v17, %v203_v36 }
  0x94   :  { %v167_v34 = vadd.f32 %v410_v17, %v166_v32  ;;  %v187_v35 = vadd.f32 %v410_v17, %v186_v33 }
  0x95   :  { %245 = vst.msk [vmem:[%s540_s3 + $0x98] sm:$0xff] %vm225_vm2, %v209_v31 }
  0x96   :  { %228 = vst.msk [vmem:[%s540_s3 + $0x10] sm:$0xff] %vm225_vm2, %v167_v34 }
  0x97   :  { %236 = vst.msk [vmem:[%s540_s3 + $0x50] sm:$0xff] %vm225_vm2, %v187_v35 }
  0x98   :  { %243 = vst.msk [vmem:[%s540_s3 + $0x88] sm:$0xff] %vm225_vm2, %v204_v37 }
  0x9a   :  { %v211_v38 = vpop.f32.mrf.mxu3 }
  0x9b   :  { %v212_v39 = vadd.f32 %v410_v17, %v211_v38  ;;  %v168_v40 = vpop.f32.mrf.mxu0  ;;  %v188_v41 = vpop.f32.mrf.mxu1 }
  0x9c   :  { %v169_v42 = vadd.f32 %v410_v17, %v168_v40  ;;  %v189_v43 = vadd.f32 %v410_v17, %v188_v41 }
  0x9d   :  { %246 = vst.msk [vmem:[%s540_s3 + $0xa0] sm:$0xff] %vm225_vm2, %v212_v39 }
  0x9e   :  { %229 = vst.msk [vmem:[%s540_s3 + $0x18] sm:$0xff] %vm225_vm2, %v169_v42 }
  0x9f   :  { %237 = vst.msk [vmem:[%s540_s3 + $0x58] sm:$0xff] %vm225_vm2, %v189_v43 }
  0xa2   :  { %v213_v44 = vpop.f32.mrf.mxu3 }
  0xa3   :  { %v214_v45 = vadd.f32 %v410_v17, %v213_v44  ;;  %v171_v46 = vpop.f32.mrf.mxu0  ;;  %v191_v47 = vpop.f32.mrf.mxu1 }
  0xa4   :  { %v172_v48 = vadd.f32 %v410_v17, %v171_v46  ;;  %v192_v49 = vadd.f32 %v410_v17, %v191_v47 }
  0xa5   :  { %247 = vst.msk [vmem:[%s540_s3 + $0xa8] sm:$0xff] %vm225_vm2, %v214_v45 }
  0xa6   :  { %230 = vst.msk [vmem:[%s540_s3 + $0x20] sm:$0xff] %vm225_vm2, %v172_v48 }
  0xa7   :  { %238 = vst.msk [vmem:[%s540_s3 + $0x60] sm:$0xff] %vm225_vm2, %v192_v49 }
  0xaa   :  { %v216_v50 = vpop.f32.mrf.mxu3 }
  0xab   :  { %v217_v51 = vadd.f32 %v410_v17, %v216_v50  ;;  %v173_v52 = vpop.f32.mrf.mxu0  ;;  %v193_v53 = vpop.f32.mrf.mxu1 }
  0xac   :  { %v174_v54 = vadd.f32 %v410_v17, %v173_v52  ;;  %v194_v55 = vadd.f32 %v410_v17, %v193_v53 }
  0xad   :  { %248 = vst.msk [vmem:[%s540_s3 + $0xb0] sm:$0xff] %vm225_vm2, %v217_v51 }
  0xae   :  { %231 = vst.msk [vmem:[%s540_s3 + $0x28] sm:$0xff] %vm225_vm2, %v174_v54 }
  0xaf   :  { %239 = vst.msk [vmem:[%s540_s3 + $0x68] sm:$0xff] %vm225_vm2, %v194_v55 }
  0xb2   :  { %v218_v56 = vpop.f32.mrf.mxu3 }
  0xb3   :  { %v219_v57 = vadd.f32 %v410_v17, %v218_v56  ;;  %v176_v58 = vpop.f32.mrf.mxu0  ;;  %v196_v59 = vpop.f32.mrf.mxu1 }
  0xb4   :  { %v177_v60 = vadd.f32 %v410_v17, %v176_v58  ;;  %v197_v61 = vadd.f32 %v410_v17, %v196_v59 }
  0xb5   :  { %249 = vst.msk [vmem:[%s540_s3 + $0xb8] sm:$0xff] %vm225_vm2, %v219_v57 }
  0xb6   :  { %232 = vst.msk [vmem:[%s540_s3 + $0x30] sm:$0xff] %vm225_vm2, %v177_v60 }
  0xb7   :  { %240 = vst.msk [vmem:[%s540_s3 + $0x70] sm:$0xff] %vm225_vm2, %v197_v61 }
  0xba   :  { %v221_v62 = vpop.f32.mrf.mxu3 }
  0xbb   :  { %v222_v63 = vadd.f32 %v410_v17, %v221_v62  ;;  %v178_v0 = vpop.f32.mrf.mxu0  ;;  %v198_v1 = vpop.f32.mrf.mxu1 }
  0xbc   :  { %v179_v2 = vadd.f32 %v410_v17, %v178_v0  ;;  %v199_v3 = vadd.f32 %v410_v17, %v198_v1 }
  0xbd   :  { %250 = vst.msk [vmem:[%s540_s3 + $0xc0] sm:$0xff] %vm225_vm2, %v222_v63 }
  0xbe   :  { %233 = vst.msk [vmem:[%s540_s3 + $0x38] sm:$0xff] %vm225_vm2, %v179_v2 }
  0xbf   :  { %241 = vst.msk [vmem:[%s540_s3 + $0x78] sm:$0xff] %vm225_vm2, %v199_v3 }
  0xc2   :  { %v223_v4 = vpop.f32.mrf.mxu3 }

// kernel: discriminator_c_forward.14
= control target key start
LH: loop header
LB: loop body
LE: loop exit
PB: predicated region body
PF: predicated region fallthrough
CT: control target
= control target key end

     0   :  { %vm355_vm0 = vcmask 1044480   ;;  %vm258_vm1 = vcmask 211968   ;;  %vm528_vm2 = vcmask 105472   ;;  %s1288_s1 = inlined_call_operand.vmem [shape: bf16[26,13], index: 1, kind: input, shape index: {}]   ;;  %s1289_s2 = inlined_call_operand.vmem [shape: f32[1,13], index: 2, kind: input, shape index: {}]   ;;  %s1290_s0 = inlined_call_operand.vmem [shape: bf16[512,26], index: 0, kind: input, shape index: {}]   ;;  %s1291_s3 = inlined_call_operand.vmem [shape: f32[512,13], index: 3, kind: output, shape index: {}]  }
   0x1   :  { %v731_v0 = vld [vmem:[%s1288_s1 + $0x8] sm:$0xf]  ;;  %v798_v1 = vld [vmem:[%s1288_s1 + $0x8] sm:$0x10]  ;;  %v797_v4 = vld [vmem:[%s1288_s1] sm:$0xff] }
   0x2   :  { %v732_v2 = vor.u32 %v798_v1, %v731_v0  ;;  %v765_v5 = vld [vmem:[%s1290_s0] sm:$0xff]  ;;  %v766_v9 = vld [vmem:[%s1290_s0 + $0x8] sm:$0xff]  ;;  %v767_v13 = vld [vmem:[%s1290_s0 + $0x10] sm:$0xff] }
   0x3   :  { %v773_v6 = vld [vmem:[%s1290_s0 + $0x40] sm:$0xff]  ;;  %v774_v10 = vld [vmem:[%s1290_s0 + $0x48] sm:$0xff]  ;;  %v775_v14 = vld [vmem:[%s1290_s0 + $0x50] sm:$0xff] }
   0x4   :  { %v357_v3 = vsel %vm355_vm0, %v732_v2, 0  ;;  %v781_v7 = vld [vmem:[%s1290_s0 + $0x80] sm:$0xff]  ;;  %v782_v11 = vld [vmem:[%s1290_s0 + $0x88] sm:$0xff]  ;;  %v783_v15 = vld [vmem:[%s1290_s0 + $0x90] sm:$0xff] }
   0x5   :  { %365 = vmatpush.bf16.msra.mxu0 %v357_v3  ;;  %799 = vmatpush.bf16.msra.mxu1 %v357_v3  ;;  %v789_v8 = vld [vmem:[%s1290_s0 + $0xc0] sm:$0xff]  ;;  %v790_v12 = vld [vmem:[%s1290_s0 + $0xc8] sm:$0xff]  ;;  %v791_v16 = vld [vmem:[%s1290_s0 + $0xd0] sm:$0xff] }
   0x6   :  { %800 = vmatpush.bf16.msra.mxu2 %v357_v3  ;;  %801 = vmatpush.bf16.msra.mxu3 %v357_v3  ;;  %v768_v17 = vld [vmem:[%s1290_s0 + $0x18] sm:$0xff]  ;;  %v769_v21 = vld [vmem:[%s1290_s0 + $0x20] sm:$0xff]  ;;  %v770_v25 = vld [vmem:[%s1290_s0 + $0x28] sm:$0xff] }
   0x7   :  { %v776_v18 = vld [vmem:[%s1290_s0 + $0x58] sm:$0xff]  ;;  %v777_v22 = vld [vmem:[%s1290_s0 + $0x60] sm:$0xff]  ;;  %v778_v26 = vld [vmem:[%s1290_s0 + $0x68] sm:$0xff] }
   0x8   :  { %v784_v19 = vld [vmem:[%s1290_s0 + $0x98] sm:$0xff]  ;;  %v785_v23 = vld [vmem:[%s1290_s0 + $0xa0] sm:$0xff]  ;;  %v786_v27 = vld [vmem:[%s1290_s0 + $0xa8] sm:$0xff] }
   0x9   :  { %366 = vmatpush.bf16.msra.mxu0 %v797_v4  ;;  %802 = vmatpush.bf16.msra.mxu1 %v797_v4  ;;  %v792_v20 = vld [vmem:[%s1290_s0 + $0xd8] sm:$0xff]  ;;  %v793_v24 = vld [vmem:[%s1290_s0 + $0xe0] sm:$0xff]  ;;  %v794_v28 = vld [vmem:[%s1290_s0 + $0xe8] sm:$0xff] }
   0xa   :  { %803 = vmatpush.bf16.msra.mxu2 %v797_v4  ;;  %804 = vmatpush.bf16.msra.mxu3 %v797_v4  ;;  %v771_v29 = vld [vmem:[%s1290_s0 + $0x30] sm:$0xff]  ;;  %v772_v33 = vld [vmem:[%s1290_s0 + $0x38] sm:$0xff]  ;;  %v966_v37 = vld [vmem:[%s1289_s2] ss:$0 sm:$0xff] }
   0xb   :  { %v779_v30 = vld [vmem:[%s1290_s0 + $0x70] sm:$0xff]  ;;  %v780_v34 = vld [vmem:[%s1290_s0 + $0x78] sm:$0xff] }
   0xc   :  { %733 = vmatmul.msk.bf16.vlgmr.msra.gmra.mxu0 %vm258_vm1, %v765_v5  ;;  %741 = vmatmul.msk.bf16.vlgmr.msra.gmra.mxu1 %vm258_vm1, %v773_v6  ;;  %v787_v31 = vld [vmem:[%s1290_s0 + $0xb0] sm:$0xff]  ;;  %v788_v35 = vld [vmem:[%s1290_s0 + $0xb8] sm:$0xff] }
   0xd   :  { %749 = vmatmul.msk.bf16.vlgmr.msra.gmra.mxu2 %vm258_vm1, %v781_v7  ;;  %757 = vmatmul.msk.bf16.vlgmr.msra.gmra.mxu3 %vm258_vm1, %v789_v8  ;;  %v795_v32 = vld [vmem:[%s1290_s0 + $0xf0] sm:$0xff]  ;;  %v796_v36 = vld [vmem:[%s1290_s0 + $0xf8] sm:$0xff] }
  0x1c   :  { %734 = vmatmul.msk.bf16.gmra.mxu0 %vm258_vm1, %v766_v9  ;;  %742 = vmatmul.msk.bf16.gmra.mxu1 %vm258_vm1, %v774_v10 }
  0x1d   :  { %750 = vmatmul.msk.bf16.gmra.mxu2 %vm258_vm1, %v782_v11  ;;  %758 = vmatmul.msk.bf16.gmra.mxu3 %vm258_vm1, %v790_v12 }
  0x2c   :  { %735 = vmatmul.msk.bf16.gmra.mxu0 %vm258_vm1, %v767_v13  ;;  %743 = vmatmul.msk.bf16.gmra.mxu1 %vm258_vm1, %v775_v14 }
  0x2d   :  { %751 = vmatmul.msk.bf16.gmra.mxu2 %vm258_vm1, %v783_v15  ;;  %759 = vmatmul.msk.bf16.gmra.mxu3 %vm258_vm1, %v791_v16 }
  0x3c   :  { %736 = vmatmul.msk.bf16.gmra.mxu0 %vm258_vm1, %v768_v17  ;;  %744 = vmatmul.msk.bf16.gmra.mxu1 %vm258_vm1, %v776_v18 }
  0x3d   :  { %752 = vmatmul.msk.bf16.gmra.mxu2 %vm258_vm1, %v784_v19  ;;  %760 = vmatmul.msk.bf16.gmra.mxu3 %vm258_vm1, %v792_v20 }
  0x4c   :  { %737 = vmatmul.msk.bf16.gmra.mxu0 %vm258_vm1, %v769_v21  ;;  %745 = vmatmul.msk.bf16.gmra.mxu1 %vm258_vm1, %v777_v22 }
  0x4d   :  { %753 = vmatmul.msk.bf16.gmra.mxu2 %vm258_vm1, %v785_v23  ;;  %761 = vmatmul.msk.bf16.gmra.mxu3 %vm258_vm1, %v793_v24 }
  0x5c   :  { %738 = vmatmul.msk.bf16.gmra.mxu0 %vm258_vm1, %v770_v25  ;;  %746 = vmatmul.msk.bf16.gmra.mxu1 %vm258_vm1, %v778_v26 }
  0x5d   :  { %754 = vmatmul.msk.bf16.gmra.mxu2 %vm258_vm1, %v786_v27  ;;  %762 = vmatmul.msk.bf16.gmra.mxu3 %vm258_vm1, %v794_v28 }
  0x6c   :  { %739 = vmatmul.msk.bf16.gmra.mxu0 %vm258_vm1, %v771_v29  ;;  %747 = vmatmul.msk.bf16.gmra.mxu1 %vm258_vm1, %v779_v30 }
  0x6d   :  { %755 = vmatmul.msk.bf16.gmra.mxu2 %vm258_vm1, %v787_v31  ;;  %763 = vmatmul.msk.bf16.gmra.mxu3 %vm258_vm1, %v795_v32 }
  0x7c   :  { %740 = vmatmul.msk.bf16.gmra.mxu0 %vm258_vm1, %v772_v33  ;;  %748 = vmatmul.msk.bf16.gmra.mxu1 %vm258_vm1, %v780_v34 }
  0x7d   :  { %756 = vmatmul.msk.bf16.gmra.mxu2 %vm258_vm1, %v788_v35  ;;  %764 = vmatmul.msk.bf16.gmra.mxu3 %vm258_vm1, %v796_v36 }
  0x89   :  { %v368_v38 = vpop.f32.mrf.mxu0  ;;  %v408_v39 = vpop.f32.mrf.mxu1 }
  0x8a   :  { %v369_v40 = vadd.f32 %v966_v37, %v368_v38  ;;  %v409_v41 = vadd.f32 %v966_v37, %v408_v39 }
  0x8c   :  { %529 = vst.msk [vmem:[%s1291_s3] sm:$0xff] %vm528_vm2, %v369_v40 }
  0x8d   :  { %545 = vst.msk [vmem:[%s1291_s3 + $0x80] sm:$0xff] %vm528_vm2, %v409_v41 }
  0x90   :  { %v448_v42 = vpop.f32.mrf.mxu2  ;;  %v488_v43 = vpop.f32.mrf.mxu3 }
  0x91   :  { %v449_v44 = vadd.f32 %v966_v37, %v448_v42  ;;  %v489_v45 = vadd.f32 %v966_v37, %v488_v43  ;;  %v370_v46 = vpop.f32.mrf.mxu0  ;;  %v410_v47 = vpop.f32.mrf.mxu1 }
  0x92   :  { %v371_v48 = vadd.f32 %v966_v37, %v370_v46  ;;  %v411_v49 = vadd.f32 %v966_v37, %v410_v47 }
  0x93   :  { %561 = vst.msk [vmem:[%s1291_s3 + $0x100] sm:$0xff] %vm528_vm2, %v449_v44 }
  0x94   :  { %577 = vst.msk [vmem:[%s1291_s3 + $0x180] sm:$0xff] %vm528_vm2, %v489_v45 }
  0x95   :  { %530 = vst.msk [vmem:[%s1291_s3 + $0x8] sm:$0xff] %vm528_vm2, %v371_v48 }
  0x96   :  { %546 = vst.msk [vmem:[%s1291_s3 + $0x88] sm:$0xff] %vm528_vm2, %v411_v49 }
  0x98   :  { %v450_v50 = vpop.f32.mrf.mxu2  ;;  %v490_v51 = vpop.f32.mrf.mxu3 }
  0x99   :  { %v451_v52 = vadd.f32 %v966_v37, %v450_v50  ;;  %v491_v53 = vadd.f32 %v966_v37, %v490_v51  ;;  %v373_v54 = vpop.f32.mrf.mxu0  ;;  %v413_v55 = vpop.f32.mrf.mxu1 }
  0x9a   :  { %v374_v56 = vadd.f32 %v966_v37, %v373_v54  ;;  %v414_v57 = vadd.f32 %v966_v37, %v413_v55 }
  0x9b   :  { %562 = vst.msk [vmem:[%s1291_s3 + $0x108] sm:$0xff] %vm528_vm2, %v451_v52 }
  0x9c   :  { %578 = vst.msk [vmem:[%s1291_s3 + $0x188] sm:$0xff] %vm528_vm2, %v491_v53 }
  0x9d   :  { %531 = vst.msk [vmem:[%s1291_s3 + $0x10] sm:$0xff] %vm528_vm2, %v374_v56 }
  0x9e   :  { %547 = vst.msk [vmem:[%s1291_s3 + $0x90] sm:$0xff] %vm528_vm2, %v414_v57 }
  0xa0   :  { %v453_v58 = vpop.f32.mrf.mxu2  ;;  %v493_v59 = vpop.f32.mrf.mxu3 }
  0xa1   :  { %v454_v60 = vadd.f32 %v966_v37, %v453_v58  ;;  %v494_v61 = vadd.f32 %v966_v37, %v493_v59  ;;  %v375_v62 = vpop.f32.mrf.mxu0  ;;  %v415_v63 = vpop.f32.mrf.mxu1 }
  0xa2   :  { %v376_v0 = vadd.f32 %v966_v37, %v375_v62  ;;  %v416_v1 = vadd.f32 %v966_v37, %v415_v63 }
  0xa3   :  { %563 = vst.msk [vmem:[%s1291_s3 + $0x110] sm:$0xff] %vm528_vm2, %v454_v60 }
  0xa4   :  { %579 = vst.msk [vmem:[%s1291_s3 + $0x190] sm:$0xff] %vm528_vm2, %v494_v61 }
  0xa5   :  { %532 = vst.msk [vmem:[%s1291_s3 + $0x18] sm:$0xff] %vm528_vm2, %v376_v0 }
  0xa6   :  { %548 = vst.msk [vmem:[%s1291_s3 + $0x98] sm:$0xff] %vm528_vm2, %v416_v1 }
  0xa8   :  { %v455_v2 = vpop.f32.mrf.mxu2  ;;  %v495_v3 = vpop.f32.mrf.mxu3 }
  0xa9   :  { %v456_v4 = vadd.f32 %v966_v37, %v455_v2  ;;  %v496_v5 = vadd.f32 %v966_v37, %v495_v3  ;;  %v378_v6 = vpop.f32.mrf.mxu0  ;;  %v418_v7 = vpop.f32.mrf.mxu1 }
  0xaa   :  { %v379_v8 = vadd.f32 %v966_v37, %v378_v6  ;;  %v419_v9 = vadd.f32 %v966_v37, %v418_v7 }
  0xab   :  { %564 = vst.msk [vmem:[%s1291_s3 + $0x118] sm:$0xff] %vm528_vm2, %v456_v4 }
  0xac   :  { %580 = vst.msk [vmem:[%s1291_s3 + $0x198] sm:$0xff] %vm528_vm2, %v496_v5 }
  0xad   :  { %533 = vst.msk [vmem:[%s1291_s3 + $0x20] sm:$0xff] %vm528_vm2, %v379_v8 }
  0xae   :  { %549 = vst.msk [vmem:[%s1291_s3 + $0xa0] sm:$0xff] %vm528_vm2, %v419_v9 }
  0xb0   :  { %v458_v10 = vpop.f32.mrf.mxu2  ;;  %v498_v11 = vpop.f32.mrf.mxu3 }
  0xb1   :  { %v459_v12 = vadd.f32 %v966_v37, %v458_v10  ;;  %v499_v13 = vadd.f32 %v966_v37, %v498_v11  ;;  %v380_v14 = vpop.f32.mrf.mxu0  ;;  %v420_v15 = vpop.f32.mrf.mxu1 }
  0xb2   :  { %v381_v16 = vadd.f32 %v966_v37, %v380_v14  ;;  %v421_v17 = vadd.f32 %v966_v37, %v420_v15 }
  0xb3   :  { %565 = vst.msk [vmem:[%s1291_s3 + $0x120] sm:$0xff] %vm528_vm2, %v459_v12 }
  0xb4   :  { %581 = vst.msk [vmem:[%s1291_s3 + $0x1a0] sm:$0xff] %vm528_vm2, %v499_v13 }
  0xb5   :  { %534 = vst.msk [vmem:[%s1291_s3 + $0x28] sm:$0xff] %vm528_vm2, %v381_v16 }
  0xb6   :  { %550 = vst.msk [vmem:[%s1291_s3 + $0xa8] sm:$0xff] %vm528_vm2, %v421_v17 }
  0xb8   :  { %v460_v18 = vpop.f32.mrf.mxu2  ;;  %v500_v19 = vpop.f32.mrf.mxu3 }
  0xb9   :  { %v461_v20 = vadd.f32 %v966_v37, %v460_v18  ;;  %v501_v21 = vadd.f32 %v966_v37, %v500_v19  ;;  %v383_v22 = vpop.f32.mrf.mxu0  ;;  %v423_v23 = vpop.f32.mrf.mxu1 }
  0xba   :  { %v384_v24 = vadd.f32 %v966_v37, %v383_v22  ;;  %v424_v25 = vadd.f32 %v966_v37, %v423_v23 }
  0xbb   :  { %566 = vst.msk [vmem:[%s1291_s3 + $0x128] sm:$0xff] %vm528_vm2, %v461_v20 }
  0xbc   :  { %582 = vst.msk [vmem:[%s1291_s3 + $0x1a8] sm:$0xff] %vm528_vm2, %v501_v21 }
  0xbd   :  { %535 = vst.msk [vmem:[%s1291_s3 + $0x30] sm:$0xff] %vm528_vm2, %v384_v24 }
  0xbe   :  { %551 = vst.msk [vmem:[%s1291_s3 + $0xb0] sm:$0xff] %vm528_vm2, %v424_v25 }
  0xc0   :  { %v463_v26 = vpop.f32.mrf.mxu2  ;;  %v503_v27 = vpop.f32.mrf.mxu3 }
  0xc1   :  { %v464_v28 = vadd.f32 %v966_v37, %v463_v26  ;;  %v504_v29 = vadd.f32 %v966_v37, %v503_v27  ;;  %v385_v30 = vpop.f32.mrf.mxu0  ;;  %v425_v31 = vpop.f32.mrf.mxu1 }
  0xc2   :  { %v386_v32 = vadd.f32 %v966_v37, %v385_v30  ;;  %v426_v33 = vadd.f32 %v966_v37, %v425_v31 }
  0xc3   :  { %567 = vst.msk [vmem:[%s1291_s3 + $0x130] sm:$0xff] %vm528_vm2, %v464_v28 }
  0xc4   :  { %583 = vst.msk [vmem:[%s1291_s3 + $0x1b0] sm:$0xff] %vm528_vm2, %v504_v29 }
  0xc5   :  { %536 = vst.msk [vmem:[%s1291_s3 + $0x38] sm:$0xff] %vm528_vm2, %v386_v32 }
  0xc6   :  { %552 = vst.msk [vmem:[%s1291_s3 + $0xb8] sm:$0xff] %vm528_vm2, %v426_v33 }
  0xc8   :  { %v465_v34 = vpop.f32.mrf.mxu2  ;;  %v505_v35 = vpop.f32.mrf.mxu3 }
  0xc9   :  { %v466_v36 = vadd.f32 %v966_v37, %v465_v34  ;;  %v506_v38 = vadd.f32 %v966_v37, %v505_v35  ;;  %v388_v39 = vpop.f32.mrf.mxu0  ;;  %v428_v40 = vpop.f32.mrf.mxu1 }
  0xca   :  { %v389_v41 = vadd.f32 %v966_v37, %v388_v39  ;;  %v429_v42 = vadd.f32 %v966_v37, %v428_v40 }
  0xcb   :  { %568 = vst.msk [vmem:[%s1291_s3 + $0x138] sm:$0xff] %vm528_vm2, %v466_v36 }
  0xcc   :  { %584 = vst.msk [vmem:[%s1291_s3 + $0x1b8] sm:$0xff] %vm528_vm2, %v506_v38 }
  0xcd   :  { %537 = vst.msk [vmem:[%s1291_s3 + $0x40] sm:$0xff] %vm528_vm2, %v389_v41 }
  0xce   :  { %553 = vst.msk [vmem:[%s1291_s3 + $0xc0] sm:$0xff] %vm528_vm2, %v429_v42 }
  0xd0   :  { %v468_v43 = vpop.f32.mrf.mxu2  ;;  %v508_v44 = vpop.f32.mrf.mxu3 }
  0xd1   :  { %v469_v45 = vadd.f32 %v966_v37, %v468_v43  ;;  %v509_v46 = vadd.f32 %v966_v37, %v508_v44  ;;  %v390_v47 = vpop.f32.mrf.mxu0  ;;  %v430_v48 = vpop.f32.mrf.mxu1 }
  0xd2   :  { %v391_v49 = vadd.f32 %v966_v37, %v390_v47  ;;  %v431_v50 = vadd.f32 %v966_v37, %v430_v48 }
  0xd3   :  { %569 = vst.msk [vmem:[%s1291_s3 + $0x140] sm:$0xff] %vm528_vm2, %v469_v45 }
  0xd4   :  { %585 = vst.msk [vmem:[%s1291_s3 + $0x1c0] sm:$0xff] %vm528_vm2, %v509_v46 }
  0xd5   :  { %538 = vst.msk [vmem:[%s1291_s3 + $0x48] sm:$0xff] %vm528_vm2, %v391_v49 }
  0xd6   :  { %554 = vst.msk [vmem:[%s1291_s3 + $0xc8] sm:$0xff] %vm528_vm2, %v431_v50 }
  0xd8   :  { %v470_v51 = vpop.f32.mrf.mxu2  ;;  %v510_v52 = vpop.f32.mrf.mxu3 }
  0xd9   :  { %v471_v53 = vadd.f32 %v966_v37, %v470_v51  ;;  %v511_v54 = vadd.f32 %v966_v37, %v510_v52  ;;  %v393_v55 = vpop.f32.mrf.mxu0  ;;  %v433_v56 = vpop.f32.mrf.mxu1 }
  0xda   :  { %v394_v57 = vadd.f32 %v966_v37, %v393_v55  ;;  %v434_v58 = vadd.f32 %v966_v37, %v433_v56 }
  0xdb   :  { %570 = vst.msk [vmem:[%s1291_s3 + $0x148] sm:$0xff] %vm528_vm2, %v471_v53 }
  0xdc   :  { %586 = vst.msk [vmem:[%s1291_s3 + $0x1c8] sm:$0xff] %vm528_vm2, %v511_v54 }
  0xdd   :  { %539 = vst.msk [vmem:[%s1291_s3 + $0x50] sm:$0xff] %vm528_vm2, %v394_v57 }
  0xde   :  { %555 = vst.msk [vmem:[%s1291_s3 + $0xd0] sm:$0xff] %vm528_vm2, %v434_v58 }
  0xe0   :  { %v473_v59 = vpop.f32.mrf.mxu2  ;;  %v513_v60 = vpop.f32.mrf.mxu3 }
  0xe1   :  { %v474_v61 = vadd.f32 %v966_v37, %v473_v59  ;;  %v514_v62 = vadd.f32 %v966_v37, %v513_v60  ;;  %v395_v63 = vpop.f32.mrf.mxu0  ;;  %v435_v0 = vpop.f32.mrf.mxu1 }
  0xe2   :  { %v396_v1 = vadd.f32 %v966_v37, %v395_v63  ;;  %v436_v2 = vadd.f32 %v966_v37, %v435_v0 }
  0xe3   :  { %571 = vst.msk [vmem:[%s1291_s3 + $0x150] sm:$0xff] %vm528_vm2, %v474_v61 }
  0xe4   :  { %587 = vst.msk [vmem:[%s1291_s3 + $0x1d0] sm:$0xff] %vm528_vm2, %v514_v62 }
  0xe5   :  { %540 = vst.msk [vmem:[%s1291_s3 + $0x58] sm:$0xff] %vm528_vm2, %v396_v1 }
  0xe6   :  { %556 = vst.msk [vmem:[%s1291_s3 + $0xd8] sm:$0xff] %vm528_vm2, %v436_v2 }
  0xe8   :  { %v475_v3 = vpop.f32.mrf.mxu2  ;;  %v515_v4 = vpop.f32.mrf.mxu3 }
  0xe9   :  { %v476_v5 = vadd.f32 %v966_v37, %v475_v3  ;;  %v516_v6 = vadd.f32 %v966_v37, %v515_v4  ;;  %v398_v7 = vpop.f32.mrf.mxu0  ;;  %v438_v8 = vpop.f32.mrf.mxu1 }
  0xea   :  { %v399_v9 = vadd.f32 %v966_v37, %v398_v7  ;;  %v439_v10 = vadd.f32 %v966_v37, %v438_v8 }
  0xeb   :  { %572 = vst.msk [vmem:[%s1291_s3 + $0x158] sm:$0xff] %vm528_vm2, %v476_v5 }
  0xec   :  { %588 = vst.msk [vmem:[%s1291_s3 + $0x1d8] sm:$0xff] %vm528_vm2, %v516_v6 }
  0xed   :  { %541 = vst.msk [vmem:[%s1291_s3 + $0x60] sm:$0xff] %vm528_vm2, %v399_v9 }
  0xee   :  { %557 = vst.msk [vmem:[%s1291_s3 + $0xe0] sm:$0xff] %vm528_vm2, %v439_v10 }
  0xf0   :  { %v478_v11 = vpop.f32.mrf.mxu2  ;;  %v518_v12 = vpop.f32.mrf.mxu3 }
  0xf1   :  { %v479_v13 = vadd.f32 %v966_v37, %v478_v11  ;;  %v519_v14 = vadd.f32 %v966_v37, %v518_v12  ;;  %v400_v15 = vpop.f32.mrf.mxu0  ;;  %v440_v16 = vpop.f32.mrf.mxu1 }
  0xf2   :  { %v401_v17 = vadd.f32 %v966_v37, %v400_v15  ;;  %v441_v18 = vadd.f32 %v966_v37, %v440_v16 }
  0xf3   :  { %573 = vst.msk [vmem:[%s1291_s3 + $0x160] sm:$0xff] %vm528_vm2, %v479_v13 }
  0xf4   :  { %589 = vst.msk [vmem:[%s1291_s3 + $0x1e0] sm:$0xff] %vm528_vm2, %v519_v14 }
  0xf5   :  { %542 = vst.msk [vmem:[%s1291_s3 + $0x68] sm:$0xff] %vm528_vm2, %v401_v17 }
  0xf6   :  { %558 = vst.msk [vmem:[%s1291_s3 + $0xe8] sm:$0xff] %vm528_vm2, %v441_v18 }
  0xf8   :  { %v480_v19 = vpop.f32.mrf.mxu2  ;;  %v520_v20 = vpop.f32.mrf.mxu3 }
  0xf9   :  { %v481_v21 = vadd.f32 %v966_v37, %v480_v19  ;;  %v521_v22 = vadd.f32 %v966_v37, %v520_v20  ;;  %v403_v23 = vpop.f32.mrf.mxu0  ;;  %v443_v24 = vpop.f32.mrf.mxu1 }
  0xfa   :  { %v404_v25 = vadd.f32 %v966_v37, %v403_v23  ;;  %v444_v26 = vadd.f32 %v966_v37, %v443_v24 }
  0xfb   :  { %574 = vst.msk [vmem:[%s1291_s3 + $0x168] sm:$0xff] %vm528_vm2, %v481_v21 }
  0xfc   :  { %590 = vst.msk [vmem:[%s1291_s3 + $0x1e8] sm:$0xff] %vm528_vm2, %v521_v22 }
  0xfd   :  { %543 = vst.msk [vmem:[%s1291_s3 + $0x70] sm:$0xff] %vm528_vm2, %v404_v25 }
  0xfe   :  { %559 = vst.msk [vmem:[%s1291_s3 + $0xf0] sm:$0xff] %vm528_vm2, %v444_v26 }
 0x100   :  { %v483_v27 = vpop.f32.mrf.mxu2  ;;  %v523_v28 = vpop.f32.mrf.mxu3 }
 0x101   :  { %v484_v29 = vadd.f32 %v966_v37, %v483_v27  ;;  %v524_v30 = vadd.f32 %v966_v37, %v523_v28  ;;  %v405_v31 = vpop.f32.mrf.mxu0  ;;  %v445_v32 = vpop.f32.mrf.mxu1 }
 0x102   :  { %v406_v33 = vadd.f32 %v966_v37, %v405_v31  ;;  %v446_v34 = vadd.f32 %v966_v37, %v445_v32 }
 0x103   :  { %575 = vst.msk [vmem:[%s1291_s3 + $0x170] sm:$0xff] %vm528_vm2, %v484_v29 }
 0x104   :  { %591 = vst.msk [vmem:[%s1291_s3 + $0x1f0] sm:$0xff] %vm528_vm2, %v524_v30 }
 0x105   :  { %544 = vst.msk [vmem:[%s1291_s3 + $0x78] sm:$0xff] %vm528_vm2, %v406_v33 }
 0x106   :  { %560 = vst.msk [vmem:[%s1291_s3 + $0xf8] sm:$0xff] %vm528_vm2, %v446_v34 }
 0x108   :  { %v485_v35 = vpop.f32.mrf.mxu2  ;;  %v525_v36 = vpop.f32.mrf.mxu3 }
 0x109   :  { %v486_v38 = vadd.f32 %v966_v37, %v485_v35  ;;  %v526_v39 = vadd.f32 %v966_v37, %v525_v36 }
 0x10b   :  { %576 = vst.msk [vmem:[%s1291_s3 + $0x178] sm:$0xff] %vm528_vm2, %v486_v38 }
 0x10c   :  { %592 = vst.msk [vmem:[%s1291_s3 + $0x1f8] sm:$0xff] %vm528_vm2, %v526_v39 }

// kernel: discriminator_c_forward.15
= control target key start
LH: loop header
LB: loop body
LE: loop exit
PB: predicated region body
PF: predicated region fallthrough
CT: control target
= control target key end

     0   :  { %vm347_vm0 = vcmask 1045504   ;;  %vm348_vm1 = vcmask 1046528   ;;  %v986_v2 = vmov 65535   ;;  %vm250_vm2 = vcmask 105472   ;;  %s1466_s1 = inlined_call_operand.vmem [shape: bf16[13,32], index: 1, kind: input, shape index: {}]   ;;  %s1467_s0 = inlined_call_operand.vmem [shape: bf16[512,13], index: 0, kind: input, shape index: {}]   ;;  %s1468_s2 = inlined_call_operand.vmem [shape: f32[1,32], index: 2, kind: input, shape index: {}]   ;;  %s1469_s3 = inlined_call_operand.vmem [shape: f32[512,32], index: 3, kind: output, shape index: {}]  }
   0x1   :  { %v914_v0 = vld [vmem:[%s1466_s1] sm:$0xf]  ;;  %v980_v1 = vld [vmem:[%s1466_s1] sm:$0x70]  ;;  %v349_v3 = vsel %vm347_vm0, 4294967295, %v986_v2  ;;  %v949_v11 = vld [vmem:[%s1467_s0 + $0x8] sm:$0xff] }
   0x2   :  { %v915_v4 = vor.u32 %v980_v1, %v914_v0  ;;  %v350_v5 = vsel %vm348_vm1, %v349_v3, 0  ;;  %v948_v7 = vld [vmem:[%s1467_s0] sm:$0xff]  ;;  %v957_v12 = vld [vmem:[%s1467_s0 + $0x48] sm:$0xff]  ;;  %v950_v15 = vld [vmem:[%s1467_s0 + $0x10] sm:$0xff]  ;;  %vm715_vm3 = vcmask 261120  }
   0x3   :  { %v956_v8 = vld [vmem:[%s1467_s0 + $0x40] sm:$0xff]  ;;  %v965_v13 = vld [vmem:[%s1467_s0 + $0x88] sm:$0xff]  ;;  %v958_v16 = vld [vmem:[%s1467_s0 + $0x50] sm:$0xff] }
   0x4   :  { %v352_v6 = vand.u32 %v915_v4, %v350_v5  ;;  %v964_v9 = vld [vmem:[%s1467_s0 + $0x80] sm:$0xff]  ;;  %v973_v14 = vld [vmem:[%s1467_s0 + $0xc8] sm:$0xff]  ;;  %v966_v17 = vld [vmem:[%s1467_s0 + $0x90] sm:$0xff] }
   0x5   :  { %v972_v10 = vld [vmem:[%s1467_s0 + $0xc0] sm:$0xff]  ;;  %v974_v18 = vld [vmem:[%s1467_s0 + $0xd0] sm:$0xff]  ;;  %v951_v19 = vld [vmem:[%s1467_s0 + $0x18] sm:$0xff] }
   0x6   :  { %361 = vmatpush.bf16.msra.mxu0 %v352_v6  ;;  %981 = vmatpush.bf16.msra.mxu1 %v352_v6  ;;  %v959_v20 = vld [vmem:[%s1467_s0 + $0x58] sm:$0xff]  ;;  %v952_v23 = vld [vmem:[%s1467_s0 + $0x20] sm:$0xff]  ;;  %v953_v27 = vld [vmem:[%s1467_s0 + $0x28] sm:$0xff] }
   0x7   :  { %982 = vmatpush.bf16.msra.mxu2 %v352_v6  ;;  %983 = vmatpush.bf16.msra.mxu3 %v352_v6  ;;  %v967_v21 = vld [vmem:[%s1467_s0 + $0x98] sm:$0xff]  ;;  %v960_v24 = vld [vmem:[%s1467_s0 + $0x60] sm:$0xff]  ;;  %v961_v28 = vld [vmem:[%s1467_s0 + $0x68] sm:$0xff] }
   0x8   :  { %v975_v22 = vld [vmem:[%s1467_s0 + $0xd8] sm:$0xff]  ;;  %v968_v25 = vld [vmem:[%s1467_s0 + $0xa0] sm:$0xff]  ;;  %v969_v29 = vld [vmem:[%s1467_s0 + $0xa8] sm:$0xff] }
   0x9   :  { %916 = vmatmul.msk.bf16.vlgmr.msra.gmra.mxu0 %vm250_vm2, %v948_v7  ;;  %924 = vmatmul.msk.bf16.vlgmr.msra.gmra.mxu1 %vm250_vm2, %v956_v8  ;;  %v976_v26 = vld [vmem:[%s1467_s0 + $0xe0] sm:$0xff]  ;;  %v977_v30 = vld [vmem:[%s1467_s0 + $0xe8] sm:$0xff]  ;;  %v954_v31 = vld [vmem:[%s1467_s0 + $0x30] sm:$0xff] }
   0xa   :  { %932 = vmatmul.msk.bf16.vlgmr.msra.gmra.mxu2 %vm250_vm2, %v964_v9  ;;  %940 = vmatmul.msk.bf16.vlgmr.msra.gmra.mxu3 %vm250_vm2, %v972_v10  ;;  %v962_v32 = vld [vmem:[%s1467_s0 + $0x70] sm:$0xff]  ;;  %v955_v35 = vld [vmem:[%s1467_s0 + $0x38] sm:$0xff]  ;;  %v1144_v39 = vld [vmem:[%s1468_s2] ss:$0 sm:$0xff] }
   0xb   :  { %v970_v33 = vld [vmem:[%s1467_s0 + $0xb0] sm:$0xff]  ;;  %v963_v36 = vld [vmem:[%s1467_s0 + $0x78] sm:$0xff] }
   0xc   :  { %v978_v34 = vld [vmem:[%s1467_s0 + $0xf0] sm:$0xff]  ;;  %v971_v37 = vld [vmem:[%s1467_s0 + $0xb8] sm:$0xff] }
   0xd   :  { %v979_v38 = vld [vmem:[%s1467_s0 + $0xf8] sm:$0xff] }
  0x19   :  { %917 = vmatmul.msk.bf16.gmra.mxu0 %vm250_vm2, %v949_v11  ;;  %925 = vmatmul.msk.bf16.gmra.mxu1 %vm250_vm2, %v957_v12 }
  0x1a   :  { %933 = vmatmul.msk.bf16.gmra.mxu2 %vm250_vm2, %v965_v13  ;;  %941 = vmatmul.msk.bf16.gmra.mxu3 %vm250_vm2, %v973_v14 }
  0x29   :  { %918 = vmatmul.msk.bf16.gmra.mxu0 %vm250_vm2, %v950_v15  ;;  %926 = vmatmul.msk.bf16.gmra.mxu1 %vm250_vm2, %v958_v16 }
  0x2a   :  { %934 = vmatmul.msk.bf16.gmra.mxu2 %vm250_vm2, %v966_v17  ;;  %942 = vmatmul.msk.bf16.gmra.mxu3 %vm250_vm2, %v974_v18 }
  0x39   :  { %919 = vmatmul.msk.bf16.gmra.mxu0 %vm250_vm2, %v951_v19  ;;  %927 = vmatmul.msk.bf16.gmra.mxu1 %vm250_vm2, %v959_v20 }
  0x3a   :  { %935 = vmatmul.msk.bf16.gmra.mxu2 %vm250_vm2, %v967_v21  ;;  %943 = vmatmul.msk.bf16.gmra.mxu3 %vm250_vm2, %v975_v22 }
  0x49   :  { %920 = vmatmul.msk.bf16.gmra.mxu0 %vm250_vm2, %v952_v23  ;;  %928 = vmatmul.msk.bf16.gmra.mxu1 %vm250_vm2, %v960_v24 }
  0x4a   :  { %936 = vmatmul.msk.bf16.gmra.mxu2 %vm250_vm2, %v968_v25  ;;  %944 = vmatmul.msk.bf16.gmra.mxu3 %vm250_vm2, %v976_v26 }
  0x59   :  { %921 = vmatmul.msk.bf16.gmra.mxu0 %vm250_vm2, %v953_v27  ;;  %929 = vmatmul.msk.bf16.gmra.mxu1 %vm250_vm2, %v961_v28 }
  0x5a   :  { %937 = vmatmul.msk.bf16.gmra.mxu2 %vm250_vm2, %v969_v29  ;;  %945 = vmatmul.msk.bf16.gmra.mxu3 %vm250_vm2, %v977_v30 }
  0x69   :  { %922 = vmatmul.msk.bf16.gmra.mxu0 %vm250_vm2, %v954_v31  ;;  %930 = vmatmul.msk.bf16.gmra.mxu1 %vm250_vm2, %v962_v32 }
  0x6a   :  { %938 = vmatmul.msk.bf16.gmra.mxu2 %vm250_vm2, %v970_v33  ;;  %946 = vmatmul.msk.bf16.gmra.mxu3 %vm250_vm2, %v978_v34 }
  0x79   :  { %923 = vmatmul.msk.bf16.gmra.mxu0 %vm250_vm2, %v955_v35  ;;  %931 = vmatmul.msk.bf16.gmra.mxu1 %vm250_vm2, %v963_v36 }
  0x7a   :  { %939 = vmatmul.msk.bf16.gmra.mxu2 %vm250_vm2, %v971_v37  ;;  %947 = vmatmul.msk.bf16.gmra.mxu3 %vm250_vm2, %v979_v38 }
  0x86   :  { %v363_v40 = vpop.f32.mrf.mxu0  ;;  %v403_v41 = vpop.f32.mrf.mxu1 }
  0x87   :  { %v364_v42 = vadd.f32 %v1144_v39, %v363_v40  ;;  %v404_v43 = vadd.f32 %v1144_v39, %v403_v41 }
  0x89   :  { %vm523_vm4 = vcmp.gt.f32.partialorder %v364_v42, 0.0  ;;  %v587_v44 = vmul.f32 0.2, %v364_v42  ;;  %vm539_vm5 = vcmp.gt.f32.partialorder %v404_v43, 0.0  ;;  %v603_v45 = vmul.f32 0.2, %v404_v43 }
  0x8b   :  { %v651_v46 = vsel %vm523_vm4, %v364_v42, %v587_v44  ;;  %v667_v47 = vsel %vm539_vm5, %v404_v43, %v603_v45 }
  0x8c   :  { %716 = vst.msk [vmem:[%s1469_s3] sm:$0xff] %vm715_vm3, %v651_v46 }
  0x8d   :  { %732 = vst.msk [vmem:[%s1469_s3 + $0x80] sm:$0xff] %vm715_vm3, %v667_v47  ;;  %v443_v48 = vpop.f32.mrf.mxu2  ;;  %v483_v49 = vpop.f32.mrf.mxu3 }
  0x8e   :  { %v444_v50 = vadd.f32 %v1144_v39, %v443_v48  ;;  %v484_v51 = vadd.f32 %v1144_v39, %v483_v49  ;;  %v365_v52 = vpop.f32.mrf.mxu0  ;;  %v405_v53 = vpop.f32.mrf.mxu1 }
  0x8f   :  { %v366_v54 = vadd.f32 %v1144_v39, %v365_v52  ;;  %v406_v55 = vadd.f32 %v1144_v39, %v405_v53 }
  0x90   :  { %vm555_vm6 = vcmp.gt.f32.partialorder %v444_v50, 0.0  ;;  %v619_v56 = vmul.f32 0.2, %v444_v50  ;;  %vm571_vm7 = vcmp.gt.f32.partialorder %v484_v51, 0.0  ;;  %v635_v57 = vmul.f32 0.2, %v484_v51 }
  0x91   :  { %vm524_vm8 = vcmp.gt.f32.partialorder %v366_v54, 0.0  ;;  %v588_v58 = vmul.f32 0.2, %v366_v54  ;;  %vm540_vm9 = vcmp.gt.f32.partialorder %v406_v55, 0.0  ;;  %v604_v59 = vmul.f32 0.2, %v406_v55 }
  0x92   :  { %v683_v60 = vsel %vm555_vm6, %v444_v50, %v619_v56  ;;  %v699_v61 = vsel %vm571_vm7, %v484_v51, %v635_v57 }
  0x93   :  { %748 = vst.msk [vmem:[%s1469_s3 + $0x100] sm:$0xff] %vm715_vm3, %v683_v60  ;;  %v652_v62 = vsel %vm524_vm8, %v366_v54, %v588_v58  ;;  %v668_v63 = vsel %vm540_vm9, %v406_v55, %v604_v59 }
  0x94   :  { %764 = vst.msk [vmem:[%s1469_s3 + $0x180] sm:$0xff] %vm715_vm3, %v699_v61 }
  0x95   :  { %717 = vst.msk [vmem:[%s1469_s3 + $0x8] sm:$0xff] %vm715_vm3, %v652_v62  ;;  %v445_v0 = vpop.f32.mrf.mxu2  ;;  %v485_v1 = vpop.f32.mrf.mxu3 }
  0x96   :  { %733 = vst.msk [vmem:[%s1469_s3 + $0x88] sm:$0xff] %vm715_vm3, %v668_v63  ;;  %v446_v2 = vadd.f32 %v1144_v39, %v445_v0  ;;  %v486_v3 = vadd.f32 %v1144_v39, %v485_v1  ;;  %v368_v4 = vpop.f32.mrf.mxu0  ;;  %v408_v5 = vpop.f32.mrf.mxu1 }
  0x97   :  { %v369_v6 = vadd.f32 %v1144_v39, %v368_v4  ;;  %v409_v7 = vadd.f32 %v1144_v39, %v408_v5 }
  0x98   :  { %vm556_vm10 = vcmp.gt.f32.partialorder %v446_v2, 0.0  ;;  %v620_v8 = vmul.f32 0.2, %v446_v2  ;;  %vm572_vm11 = vcmp.gt.f32.partialorder %v486_v3, 0.0  ;;  %v636_v9 = vmul.f32 0.2, %v486_v3 }
  0x99   :  { %vm525_vm12 = vcmp.gt.f32.partialorder %v369_v6, 0.0  ;;  %v589_v10 = vmul.f32 0.2, %v369_v6  ;;  %vm541_vm13 = vcmp.gt.f32.partialorder %v409_v7, 0.0  ;;  %v605_v11 = vmul.f32 0.2, %v409_v7 }
  0x9a   :  { %v684_v12 = vsel %vm556_vm10, %v446_v2, %v620_v8  ;;  %v700_v13 = vsel %vm572_vm11, %v486_v3, %v636_v9 }
  0x9b   :  { %749 = vst.msk [vmem:[%s1469_s3 + $0x108] sm:$0xff] %vm715_vm3, %v684_v12  ;;  %v653_v14 = vsel %vm525_vm12, %v369_v6, %v589_v10  ;;  %v669_v15 = vsel %vm541_vm13, %v409_v7, %v605_v11 }
  0x9c   :  { %765 = vst.msk [vmem:[%s1469_s3 + $0x188] sm:$0xff] %vm715_vm3, %v700_v13 }
  0x9d   :  { %718 = vst.msk [vmem:[%s1469_s3 + $0x10] sm:$0xff] %vm715_vm3, %v653_v14  ;;  %v448_v16 = vpop.f32.mrf.mxu2  ;;  %v488_v17 = vpop.f32.mrf.mxu3 }
  0x9e   :  { %734 = vst.msk [vmem:[%s1469_s3 + $0x90] sm:$0xff] %vm715_vm3, %v669_v15  ;;  %v449_v18 = vadd.f32 %v1144_v39, %v448_v16  ;;  %v489_v19 = vadd.f32 %v1144_v39, %v488_v17  ;;  %v370_v20 = vpop.f32.mrf.mxu0  ;;  %v410_v21 = vpop.f32.mrf.mxu1 }
  0x9f   :  { %v371_v22 = vadd.f32 %v1144_v39, %v370_v20  ;;  %v411_v23 = vadd.f32 %v1144_v39, %v410_v21 }
  0xa0   :  { %vm557_vm14 = vcmp.gt.f32.partialorder %v449_v18, 0.0  ;;  %v621_v24 = vmul.f32 0.2, %v449_v18  ;;  %vm573_vm15 = vcmp.gt.f32.partialorder %v489_v19, 0.0  ;;  %v637_v25 = vmul.f32 0.2, %v489_v19 }
  0xa1   :  { %vm526_vm0 = vcmp.gt.f32.partialorder %v371_v22, 0.0  ;;  %v590_v26 = vmul.f32 0.2, %v371_v22  ;;  %vm542_vm1 = vcmp.gt.f32.partialorder %v411_v23, 0.0  ;;  %v606_v27 = vmul.f32 0.2, %v411_v23 }
  0xa2   :  { %v685_v28 = vsel %vm557_vm14, %v449_v18, %v621_v24  ;;  %v701_v29 = vsel %vm573_vm15, %v489_v19, %v637_v25 }
  0xa3   :  { %750 = vst.msk [vmem:[%s1469_s3 + $0x110] sm:$0xff] %vm715_vm3, %v685_v28  ;;  %v654_v30 = vsel %vm526_vm0, %v371_v22, %v590_v26  ;;  %v670_v31 = vsel %vm542_vm1, %v411_v23, %v606_v27 }
  0xa4   :  { %766 = vst.msk [vmem:[%s1469_s3 + $0x190] sm:$0xff] %vm715_vm3, %v701_v29 }
  0xa5   :  { %719 = vst.msk [vmem:[%s1469_s3 + $0x18] sm:$0xff] %vm715_vm3, %v654_v30  ;;  %v450_v32 = vpop.f32.mrf.mxu2  ;;  %v490_v33 = vpop.f32.mrf.mxu3 }
  0xa6   :  { %735 = vst.msk [vmem:[%s1469_s3 + $0x98] sm:$0xff] %vm715_vm3, %v670_v31  ;;  %v451_v34 = vadd.f32 %v1144_v39, %v450_v32  ;;  %v491_v35 = vadd.f32 %v1144_v39, %v490_v33  ;;  %v373_v36 = vpop.f32.mrf.mxu0  ;;  %v413_v37 = vpop.f32.mrf.mxu1 }
  0xa7   :  { %v374_v38 = vadd.f32 %v1144_v39, %v373_v36  ;;  %v414_v40 = vadd.f32 %v1144_v39, %v413_v37 }
  0xa8   :  { %vm558_vm2 = vcmp.gt.f32.partialorder %v451_v34, 0.0  ;;  %v622_v41 = vmul.f32 0.2, %v451_v34  ;;  %vm574_vm4 = vcmp.gt.f32.partialorder %v491_v35, 0.0  ;;  %v638_v42 = vmul.f32 0.2, %v491_v35 }
  0xa9   :  { %vm527_vm5 = vcmp.gt.f32.partialorder %v374_v38, 0.0  ;;  %v591_v43 = vmul.f32 0.2, %v374_v38  ;;  %vm543_vm6 = vcmp.gt.f32.partialorder %v414_v40, 0.0  ;;  %v607_v44 = vmul.f32 0.2, %v414_v40 }
  0xaa   :  { %v686_v45 = vsel %vm558_vm2, %v451_v34, %v622_v41  ;;  %v702_v46 = vsel %vm574_vm4, %v491_v35, %v638_v42 }
  0xab   :  { %751 = vst.msk [vmem:[%s1469_s3 + $0x118] sm:$0xff] %vm715_vm3, %v686_v45  ;;  %v655_v47 = vsel %vm527_vm5, %v374_v38, %v591_v43  ;;  %v671_v48 = vsel %vm543_vm6, %v414_v40, %v607_v44 }
  0xac   :  { %767 = vst.msk [vmem:[%s1469_s3 + $0x198] sm:$0xff] %vm715_vm3, %v702_v46 }
  0xad   :  { %720 = vst.msk [vmem:[%s1469_s3 + $0x20] sm:$0xff] %vm715_vm3, %v655_v47  ;;  %v453_v49 = vpop.f32.mrf.mxu2  ;;  %v493_v50 = vpop.f32.mrf.mxu3 }
  0xae   :  { %736 = vst.msk [vmem:[%s1469_s3 + $0xa0] sm:$0xff] %vm715_vm3, %v671_v48  ;;  %v454_v51 = vadd.f32 %v1144_v39, %v453_v49  ;;  %v494_v52 = vadd.f32 %v1144_v39, %v493_v50  ;;  %v375_v53 = vpop.f32.mrf.mxu0  ;;  %v415_v54 = vpop.f32.mrf.mxu1 }
  0xaf   :  { %v376_v55 = vadd.f32 %v1144_v39, %v375_v53  ;;  %v416_v56 = vadd.f32 %v1144_v39, %v415_v54 }
  0xb0   :  { %vm559_vm7 = vcmp.gt.f32.partialorder %v454_v51, 0.0  ;;  %v623_v57 = vmul.f32 0.2, %v454_v51  ;;  %vm575_vm8 = vcmp.gt.f32.partialorder %v494_v52, 0.0  ;;  %v639_v58 = vmul.f32 0.2, %v494_v52 }
  0xb1   :  { %vm528_vm9 = vcmp.gt.f32.partialorder %v376_v55, 0.0  ;;  %v592_v59 = vmul.f32 0.2, %v376_v55  ;;  %vm544_vm10 = vcmp.gt.f32.partialorder %v416_v56, 0.0  ;;  %v608_v60 = vmul.f32 0.2, %v416_v56 }
  0xb2   :  { %v687_v61 = vsel %vm559_vm7, %v454_v51, %v623_v57  ;;  %v703_v62 = vsel %vm575_vm8, %v494_v52, %v639_v58 }
  0xb3   :  { %752 = vst.msk [vmem:[%s1469_s3 + $0x120] sm:$0xff] %vm715_vm3, %v687_v61  ;;  %v656_v63 = vsel %vm528_vm9, %v376_v55, %v592_v59  ;;  %v672_v0 = vsel %vm544_vm10, %v416_v56, %v608_v60 }
  0xb4   :  { %768 = vst.msk [vmem:[%s1469_s3 + $0x1a0] sm:$0xff] %vm715_vm3, %v703_v62 }
  0xb5   :  { %721 = vst.msk [vmem:[%s1469_s3 + $0x28] sm:$0xff] %vm715_vm3, %v656_v63  ;;  %v455_v1 = vpop.f32.mrf.mxu2  ;;  %v495_v2 = vpop.f32.mrf.mxu3 }
  0xb6   :  { %737 = vst.msk [vmem:[%s1469_s3 + $0xa8] sm:$0xff] %vm715_vm3, %v672_v0  ;;  %v456_v3 = vadd.f32 %v1144_v39, %v455_v1  ;;  %v496_v4 = vadd.f32 %v1144_v39, %v495_v2  ;;  %v378_v5 = vpop.f32.mrf.mxu0  ;;  %v418_v6 = vpop.f32.mrf.mxu1 }
  0xb7   :  { %v379_v7 = vadd.f32 %v1144_v39, %v378_v5  ;;  %v419_v8 = vadd.f32 %v1144_v39, %v418_v6 }
  0xb8   :  { %vm560_vm11 = vcmp.gt.f32.partialorder %v456_v3, 0.0  ;;  %v624_v9 = vmul.f32 0.2, %v456_v3  ;;  %vm576_vm12 = vcmp.gt.f32.partialorder %v496_v4, 0.0  ;;  %v640_v10 = vmul.f32 0.2, %v496_v4 }
  0xb9   :  { %vm529_vm13 = vcmp.gt.f32.partialorder %v379_v7, 0.0  ;;  %v593_v11 = vmul.f32 0.2, %v379_v7  ;;  %vm545_vm14 = vcmp.gt.f32.partialorder %v419_v8, 0.0  ;;  %v609_v12 = vmul.f32 0.2, %v419_v8 }
  0xba   :  { %v688_v13 = vsel %vm560_vm11, %v456_v3, %v624_v9  ;;  %v704_v14 = vsel %vm576_vm12, %v496_v4, %v640_v10 }
  0xbb   :  { %753 = vst.msk [vmem:[%s1469_s3 + $0x128] sm:$0xff] %vm715_vm3, %v688_v13  ;;  %v657_v15 = vsel %vm529_vm13, %v379_v7, %v593_v11  ;;  %v673_v16 = vsel %vm545_vm14, %v419_v8, %v609_v12 }
  0xbc   :  { %769 = vst.msk [vmem:[%s1469_s3 + $0x1a8] sm:$0xff] %vm715_vm3, %v704_v14 }
  0xbd   :  { %722 = vst.msk [vmem:[%s1469_s3 + $0x30] sm:$0xff] %vm715_vm3, %v657_v15  ;;  %v458_v17 = vpop.f32.mrf.mxu2  ;;  %v498_v18 = vpop.f32.mrf.mxu3 }
  0xbe   :  { %738 = vst.msk [vmem:[%s1469_s3 + $0xb0] sm:$0xff] %vm715_vm3, %v673_v16  ;;  %v459_v19 = vadd.f32 %v1144_v39, %v458_v17  ;;  %v499_v20 = vadd.f32 %v1144_v39, %v498_v18  ;;  %v380_v21 = vpop.f32.mrf.mxu0  ;;  %v420_v22 = vpop.f32.mrf.mxu1 }
  0xbf   :  { %v381_v23 = vadd.f32 %v1144_v39, %v380_v21  ;;  %v421_v24 = vadd.f32 %v1144_v39, %v420_v22 }
  0xc0   :  { %vm561_vm15 = vcmp.gt.f32.partialorder %v459_v19, 0.0  ;;  %v625_v25 = vmul.f32 0.2, %v459_v19  ;;  %vm577_vm0 = vcmp.gt.f32.partialorder %v499_v20, 0.0  ;;  %v641_v26 = vmul.f32 0.2, %v499_v20 }
  0xc1   :  { %vm530_vm1 = vcmp.gt.f32.partialorder %v381_v23, 0.0  ;;  %v594_v27 = vmul.f32 0.2, %v381_v23  ;;  %vm546_vm2 = vcmp.gt.f32.partialorder %v421_v24, 0.0  ;;  %v610_v28 = vmul.f32 0.2, %v421_v24 }
  0xc2   :  { %v689_v29 = vsel %vm561_vm15, %v459_v19, %v625_v25  ;;  %v705_v30 = vsel %vm577_vm0, %v499_v20, %v641_v26 }
  0xc3   :  { %754 = vst.msk [vmem:[%s1469_s3 + $0x130] sm:$0xff] %vm715_vm3, %v689_v29  ;;  %v658_v31 = vsel %vm530_vm1, %v381_v23, %v594_v27  ;;  %v674_v32 = vsel %vm546_vm2, %v421_v24, %v610_v28 }
  0xc4   :  { %770 = vst.msk [vmem:[%s1469_s3 + $0x1b0] sm:$0xff] %vm715_vm3, %v705_v30 }
  0xc5   :  { %723 = vst.msk [vmem:[%s1469_s3 + $0x38] sm:$0xff] %vm715_vm3, %v658_v31  ;;  %v460_v33 = vpop.f32.mrf.mxu2  ;;  %v500_v34 = vpop.f32.mrf.mxu3 }
  0xc6   :  { %739 = vst.msk [vmem:[%s1469_s3 + $0xb8] sm:$0xff] %vm715_vm3, %v674_v32  ;;  %v461_v35 = vadd.f32 %v1144_v39, %v460_v33  ;;  %v501_v36 = vadd.f32 %v1144_v39, %v500_v34  ;;  %v383_v37 = vpop.f32.mrf.mxu0  ;;  %v423_v38 = vpop.f32.mrf.mxu1 }
  0xc7   :  { %v384_v40 = vadd.f32 %v1144_v39, %v383_v37  ;;  %v424_v41 = vadd.f32 %v1144_v39, %v423_v38 }
  0xc8   :  { %vm562_vm4 = vcmp.gt.f32.partialorder %v461_v35, 0.0  ;;  %v626_v42 = vmul.f32 0.2, %v461_v35  ;;  %vm578_vm5 = vcmp.gt.f32.partialorder %v501_v36, 0.0  ;;  %v642_v43 = vmul.f32 0.2, %v501_v36 }
  0xc9   :  { %vm531_vm6 = vcmp.gt.f32.partialorder %v384_v40, 0.0  ;;  %v595_v44 = vmul.f32 0.2, %v384_v40  ;;  %vm547_vm7 = vcmp.gt.f32.partialorder %v424_v41, 0.0  ;;  %v611_v45 = vmul.f32 0.2, %v424_v41 }
  0xca   :  { %v690_v46 = vsel %vm562_vm4, %v461_v35, %v626_v42  ;;  %v706_v47 = vsel %vm578_vm5, %v501_v36, %v642_v43 }
  0xcb   :  { %755 = vst.msk [vmem:[%s1469_s3 + $0x138] sm:$0xff] %vm715_vm3, %v690_v46  ;;  %v659_v48 = vsel %vm531_vm6, %v384_v40, %v595_v44  ;;  %v675_v49 = vsel %vm547_vm7, %v424_v41, %v611_v45 }
  0xcc   :  { %771 = vst.msk [vmem:[%s1469_s3 + $0x1b8] sm:$0xff] %vm715_vm3, %v706_v47 }
  0xcd   :  { %724 = vst.msk [vmem:[%s1469_s3 + $0x40] sm:$0xff] %vm715_vm3, %v659_v48  ;;  %v463_v50 = vpop.f32.mrf.mxu2  ;;  %v503_v51 = vpop.f32.mrf.mxu3 }
  0xce   :  { %740 = vst.msk [vmem:[%s1469_s3 + $0xc0] sm:$0xff] %vm715_vm3, %v675_v49  ;;  %v464_v52 = vadd.f32 %v1144_v39, %v463_v50  ;;  %v504_v53 = vadd.f32 %v1144_v39, %v503_v51  ;;  %v385_v54 = vpop.f32.mrf.mxu0  ;;  %v425_v55 = vpop.f32.mrf.mxu1 }
  0xcf   :  { %v386_v56 = vadd.f32 %v1144_v39, %v385_v54  ;;  %v426_v57 = vadd.f32 %v1144_v39, %v425_v55 }
  0xd0   :  { %vm563_vm8 = vcmp.gt.f32.partialorder %v464_v52, 0.0  ;;  %v627_v58 = vmul.f32 0.2, %v464_v52  ;;  %vm579_vm9 = vcmp.gt.f32.partialorder %v504_v53, 0.0  ;;  %v643_v59 = vmul.f32 0.2, %v504_v53 }
  0xd1   :  { %vm532_vm10 = vcmp.gt.f32.partialorder %v386_v56, 0.0  ;;  %v596_v60 = vmul.f32 0.2, %v386_v56  ;;  %vm548_vm11 = vcmp.gt.f32.partialorder %v426_v57, 0.0  ;;  %v612_v61 = vmul.f32 0.2, %v426_v57 }
  0xd2   :  { %v691_v62 = vsel %vm563_vm8, %v464_v52, %v627_v58  ;;  %v707_v63 = vsel %vm579_vm9, %v504_v53, %v643_v59 }
  0xd3   :  { %756 = vst.msk [vmem:[%s1469_s3 + $0x140] sm:$0xff] %vm715_vm3, %v691_v62  ;;  %v660_v0 = vsel %vm532_vm10, %v386_v56, %v596_v60  ;;  %v676_v1 = vsel %vm548_vm11, %v426_v57, %v612_v61 }
  0xd4   :  { %772 = vst.msk [vmem:[%s1469_s3 + $0x1c0] sm:$0xff] %vm715_vm3, %v707_v63 }
  0xd5   :  { %725 = vst.msk [vmem:[%s1469_s3 + $0x48] sm:$0xff] %vm715_vm3, %v660_v0  ;;  %v465_v2 = vpop.f32.mrf.mxu2  ;;  %v505_v3 = vpop.f32.mrf.mxu3 }
  0xd6   :  { %741 = vst.msk [vmem:[%s1469_s3 + $0xc8] sm:$0xff] %vm715_vm3, %v676_v1  ;;  %v466_v4 = vadd.f32 %v1144_v39, %v465_v2  ;;  %v506_v5 = vadd.f32 %v1144_v39, %v505_v3  ;;  %v388_v6 = vpop.f32.mrf.mxu0  ;;  %v428_v7 = vpop.f32.mrf.mxu1 }
  0xd7   :  { %v389_v8 = vadd.f32 %v1144_v39, %v388_v6  ;;  %v429_v9 = vadd.f32 %v1144_v39, %v428_v7 }
  0xd8   :  { %vm564_vm12 = vcmp.gt.f32.partialorder %v466_v4, 0.0  ;;  %v628_v10 = vmul.f32 0.2, %v466_v4  ;;  %vm580_vm13 = vcmp.gt.f32.partialorder %v506_v5, 0.0  ;;  %v644_v11 = vmul.f32 0.2, %v506_v5 }
  0xd9   :  { %vm533_vm14 = vcmp.gt.f32.partialorder %v389_v8, 0.0  ;;  %v597_v12 = vmul.f32 0.2, %v389_v8  ;;  %vm549_vm15 = vcmp.gt.f32.partialorder %v429_v9, 0.0  ;;  %v613_v13 = vmul.f32 0.2, %v429_v9 }
  0xda   :  { %v692_v14 = vsel %vm564_vm12, %v466_v4, %v628_v10  ;;  %v708_v15 = vsel %vm580_vm13, %v506_v5, %v644_v11 }
  0xdb   :  { %757 = vst.msk [vmem:[%s1469_s3 + $0x148] sm:$0xff] %vm715_vm3, %v692_v14  ;;  %v661_v16 = vsel %vm533_vm14, %v389_v8, %v597_v12  ;;  %v677_v17 = vsel %vm549_vm15, %v429_v9, %v613_v13 }
  0xdc   :  { %773 = vst.msk [vmem:[%s1469_s3 + $0x1c8] sm:$0xff] %vm715_vm3, %v708_v15 }
  0xdd   :  { %726 = vst.msk [vmem:[%s1469_s3 + $0x50] sm:$0xff] %vm715_vm3, %v661_v16  ;;  %v468_v18 = vpop.f32.mrf.mxu2  ;;  %v508_v19 = vpop.f32.mrf.mxu3 }
  0xde   :  { %742 = vst.msk [vmem:[%s1469_s3 + $0xd0] sm:$0xff] %vm715_vm3, %v677_v17  ;;  %v469_v20 = vadd.f32 %v1144_v39, %v468_v18  ;;  %v509_v21 = vadd.f32 %v1144_v39, %v508_v19  ;;  %v390_v22 = vpop.f32.mrf.mxu0  ;;  %v430_v23 = vpop.f32.mrf.mxu1 }
  0xdf   :  { %v391_v24 = vadd.f32 %v1144_v39, %v390_v22  ;;  %v431_v25 = vadd.f32 %v1144_v39, %v430_v23 }
  0xe0   :  { %vm565_vm0 = vcmp.gt.f32.partialorder %v469_v20, 0.0  ;;  %v629_v26 = vmul.f32 0.2, %v469_v20  ;;  %vm581_vm1 = vcmp.gt.f32.partialorder %v509_v21, 0.0  ;;  %v645_v27 = vmul.f32 0.2, %v509_v21 }
  0xe1   :  { %vm534_vm2 = vcmp.gt.f32.partialorder %v391_v24, 0.0  ;;  %v598_v28 = vmul.f32 0.2, %v391_v24  ;;  %vm550_vm4 = vcmp.gt.f32.partialorder %v431_v25, 0.0  ;;  %v614_v29 = vmul.f32 0.2, %v431_v25 }
  0xe2   :  { %v693_v30 = vsel %vm565_vm0, %v469_v20, %v629_v26  ;;  %v709_v31 = vsel %vm581_vm1, %v509_v21, %v645_v27 }
  0xe3   :  { %758 = vst.msk [vmem:[%s1469_s3 + $0x150] sm:$0xff] %vm715_vm3, %v693_v30  ;;  %v662_v32 = vsel %vm534_vm2, %v391_v24, %v598_v28  ;;  %v678_v33 = vsel %vm550_vm4, %v431_v25, %v614_v29 }
  0xe4   :  { %774 = vst.msk [vmem:[%s1469_s3 + $0x1d0] sm:$0xff] %vm715_vm3, %v709_v31 }
  0xe5   :  { %727 = vst.msk [vmem:[%s1469_s3 + $0x58] sm:$0xff] %vm715_vm3, %v662_v32  ;;  %v470_v34 = vpop.f32.mrf.mxu2  ;;  %v510_v35 = vpop.f32.mrf.mxu3 }
  0xe6   :  { %743 = vst.msk [vmem:[%s1469_s3 + $0xd8] sm:$0xff] %vm715_vm3, %v678_v33  ;;  %v471_v36 = vadd.f32 %v1144_v39, %v470_v34  ;;  %v511_v37 = vadd.f32 %v1144_v39, %v510_v35  ;;  %v393_v38 = vpop.f32.mrf.mxu0  ;;  %v433_v40 = vpop.f32.mrf.mxu1 }
  0xe7   :  { %v394_v41 = vadd.f32 %v1144_v39, %v393_v38  ;;  %v434_v42 = vadd.f32 %v1144_v39, %v433_v40 }
  0xe8   :  { %vm566_vm5 = vcmp.gt.f32.partialorder %v471_v36, 0.0  ;;  %v630_v43 = vmul.f32 0.2, %v471_v36  ;;  %vm582_vm6 = vcmp.gt.f32.partialorder %v511_v37, 0.0  ;;  %v646_v44 = vmul.f32 0.2, %v511_v37 }
  0xe9   :  { %vm535_vm7 = vcmp.gt.f32.partialorder %v394_v41, 0.0  ;;  %v599_v45 = vmul.f32 0.2, %v394_v41  ;;  %vm551_vm8 = vcmp.gt.f32.partialorder %v434_v42, 0.0  ;;  %v615_v46 = vmul.f32 0.2, %v434_v42 }
  0xea   :  { %v694_v47 = vsel %vm566_vm5, %v471_v36, %v630_v43  ;;  %v710_v48 = vsel %vm582_vm6, %v511_v37, %v646_v44 }
  0xeb   :  { %759 = vst.msk [vmem:[%s1469_s3 + $0x158] sm:$0xff] %vm715_vm3, %v694_v47  ;;  %v663_v49 = vsel %vm535_vm7, %v394_v41, %v599_v45  ;;  %v679_v50 = vsel %vm551_vm8, %v434_v42, %v615_v46 }
  0xec   :  { %775 = vst.msk [vmem:[%s1469_s3 + $0x1d8] sm:$0xff] %vm715_vm3, %v710_v48 }
  0xed   :  { %728 = vst.msk [vmem:[%s1469_s3 + $0x60] sm:$0xff] %vm715_vm3, %v663_v49  ;;  %v473_v51 = vpop.f32.mrf.mxu2  ;;  %v513_v52 = vpop.f32.mrf.mxu3 }
  0xee   :  { %744 = vst.msk [vmem:[%s1469_s3 + $0xe0] sm:$0xff] %vm715_vm3, %v679_v50  ;;  %v474_v53 = vadd.f32 %v1144_v39, %v473_v51  ;;  %v514_v54 = vadd.f32 %v1144_v39, %v513_v52  ;;  %v395_v55 = vpop.f32.mrf.mxu0  ;;  %v435_v56 = vpop.f32.mrf.mxu1 }
  0xef   :  { %v396_v57 = vadd.f32 %v1144_v39, %v395_v55  ;;  %v436_v58 = vadd.f32 %v1144_v39, %v435_v56 }
  0xf0   :  { %vm567_vm9 = vcmp.gt.f32.partialorder %v474_v53, 0.0  ;;  %v631_v59 = vmul.f32 0.2, %v474_v53  ;;  %vm583_vm10 = vcmp.gt.f32.partialorder %v514_v54, 0.0  ;;  %v647_v60 = vmul.f32 0.2, %v514_v54 }
  0xf1   :  { %vm536_vm11 = vcmp.gt.f32.partialorder %v396_v57, 0.0  ;;  %v600_v61 = vmul.f32 0.2, %v396_v57  ;;  %vm552_vm12 = vcmp.gt.f32.partialorder %v436_v58, 0.0  ;;  %v616_v62 = vmul.f32 0.2, %v436_v58 }
  0xf2   :  { %v695_v63 = vsel %vm567_vm9, %v474_v53, %v631_v59  ;;  %v711_v0 = vsel %vm583_vm10, %v514_v54, %v647_v60 }
  0xf3   :  { %760 = vst.msk [vmem:[%s1469_s3 + $0x160] sm:$0xff] %vm715_vm3, %v695_v63  ;;  %v664_v1 = vsel %vm536_vm11, %v396_v57, %v600_v61  ;;  %v680_v2 = vsel %vm552_vm12, %v436_v58, %v616_v62 }
  0xf4   :  { %776 = vst.msk [vmem:[%s1469_s3 + $0x1e0] sm:$0xff] %vm715_vm3, %v711_v0 }
  0xf5   :  { %729 = vst.msk [vmem:[%s1469_s3 + $0x68] sm:$0xff] %vm715_vm3, %v664_v1  ;;  %v475_v3 = vpop.f32.mrf.mxu2  ;;  %v515_v4 = vpop.f32.mrf.mxu3 }
  0xf6   :  { %745 = vst.msk [vmem:[%s1469_s3 + $0xe8] sm:$0xff] %vm715_vm3, %v680_v2  ;;  %v476_v5 = vadd.f32 %v1144_v39, %v475_v3  ;;  %v516_v6 = vadd.f32 %v1144_v39, %v515_v4  ;;  %v398_v7 = vpop.f32.mrf.mxu0  ;;  %v438_v8 = vpop.f32.mrf.mxu1 }
  0xf7   :  { %v399_v9 = vadd.f32 %v1144_v39, %v398_v7  ;;  %v439_v10 = vadd.f32 %v1144_v39, %v438_v8 }
  0xf8   :  { %vm568_vm13 = vcmp.gt.f32.partialorder %v476_v5, 0.0  ;;  %v632_v11 = vmul.f32 0.2, %v476_v5  ;;  %vm584_vm14 = vcmp.gt.f32.partialorder %v516_v6, 0.0  ;;  %v648_v12 = vmul.f32 0.2, %v516_v6 }
  0xf9   :  { %vm537_vm15 = vcmp.gt.f32.partialorder %v399_v9, 0.0  ;;  %v601_v13 = vmul.f32 0.2, %v399_v9  ;;  %vm553_vm0 = vcmp.gt.f32.partialorder %v439_v10, 0.0  ;;  %v617_v14 = vmul.f32 0.2, %v439_v10 }
  0xfa   :  { %v696_v15 = vsel %vm568_vm13, %v476_v5, %v632_v11  ;;  %v712_v16 = vsel %vm584_vm14, %v516_v6, %v648_v12 }
  0xfb   :  { %761 = vst.msk [vmem:[%s1469_s3 + $0x168] sm:$0xff] %vm715_vm3, %v696_v15  ;;  %v665_v17 = vsel %vm537_vm15, %v399_v9, %v601_v13  ;;  %v681_v18 = vsel %vm553_vm0, %v439_v10, %v617_v14 }
  0xfc   :  { %777 = vst.msk [vmem:[%s1469_s3 + $0x1e8] sm:$0xff] %vm715_vm3, %v712_v16 }
  0xfd   :  { %730 = vst.msk [vmem:[%s1469_s3 + $0x70] sm:$0xff] %vm715_vm3, %v665_v17  ;;  %v478_v19 = vpop.f32.mrf.mxu2  ;;  %v518_v20 = vpop.f32.mrf.mxu3 }
  0xfe   :  { %746 = vst.msk [vmem:[%s1469_s3 + $0xf0] sm:$0xff] %vm715_vm3, %v681_v18  ;;  %v479_v21 = vadd.f32 %v1144_v39, %v478_v19  ;;  %v519_v22 = vadd.f32 %v1144_v39, %v518_v20  ;;  %v400_v23 = vpop.f32.mrf.mxu0  ;;  %v440_v24 = vpop.f32.mrf.mxu1 }
  0xff   :  { %v401_v25 = vadd.f32 %v1144_v39, %v400_v23  ;;  %v441_v26 = vadd.f32 %v1144_v39, %v440_v24 }
 0x100   :  { %vm569_vm1 = vcmp.gt.f32.partialorder %v479_v21, 0.0  ;;  %v633_v27 = vmul.f32 0.2, %v479_v21  ;;  %vm585_vm2 = vcmp.gt.f32.partialorder %v519_v22, 0.0  ;;  %v649_v28 = vmul.f32 0.2, %v519_v22 }
 0x101   :  { %vm538_vm4 = vcmp.gt.f32.partialorder %v401_v25, 0.0  ;;  %v602_v29 = vmul.f32 0.2, %v401_v25  ;;  %vm554_vm5 = vcmp.gt.f32.partialorder %v441_v26, 0.0  ;;  %v618_v30 = vmul.f32 0.2, %v441_v26 }
 0x102   :  { %v697_v31 = vsel %vm569_vm1, %v479_v21, %v633_v27  ;;  %v713_v32 = vsel %vm585_vm2, %v519_v22, %v649_v28 }
 0x103   :  { %762 = vst.msk [vmem:[%s1469_s3 + $0x170] sm:$0xff] %vm715_vm3, %v697_v31  ;;  %v666_v33 = vsel %vm538_vm4, %v401_v25, %v602_v29  ;;  %v682_v34 = vsel %vm554_vm5, %v441_v26, %v618_v30 }
 0x104   :  { %778 = vst.msk [vmem:[%s1469_s3 + $0x1f0] sm:$0xff] %vm715_vm3, %v713_v32 }
 0x105   :  { %731 = vst.msk [vmem:[%s1469_s3 + $0x78] sm:$0xff] %vm715_vm3, %v666_v33  ;;  %v480_v35 = vpop.f32.mrf.mxu2  ;;  %v520_v36 = vpop.f32.mrf.mxu3 }
 0x106   :  { %747 = vst.msk [vmem:[%s1469_s3 + $0xf8] sm:$0xff] %vm715_vm3, %v682_v34  ;;  %v481_v37 = vadd.f32 %v1144_v39, %v480_v35  ;;  %v521_v38 = vadd.f32 %v1144_v39, %v520_v36 }
 0x108   :  { %vm570_vm6 = vcmp.gt.f32.partialorder %v481_v37, 0.0  ;;  %v634_v40 = vmul.f32 0.2, %v481_v37  ;;  %vm586_vm7 = vcmp.gt.f32.partialorder %v521_v38, 0.0  ;;  %v650_v41 = vmul.f32 0.2, %v521_v38 }
 0x10a   :  { %v698_v42 = vsel %vm570_vm6, %v481_v37, %v634_v40  ;;  %v714_v43 = vsel %vm586_vm7, %v521_v38, %v650_v41 }
 0x10b   :  { %763 = vst.msk [vmem:[%s1469_s3 + $0x178] sm:$0xff] %vm715_vm3, %v698_v42 }
 0x10c   :  { %779 = vst.msk [vmem:[%s1469_s3 + $0x1f8] sm:$0xff] %vm715_vm3, %v714_v43 }

// kernel: discriminator_c_forward.18
= control target key start
LH: loop header
LB: loop body
LE: loop exit
PB: predicated region body
PF: predicated region fallthrough
CT: control target
= control target key end

     0   :  { %vm115_vm0 = vcmask 1045504   ;;  %vm116_vm1 = vcmask 1046528   ;;  %v379_v2 = vmov 65535   ;;  %v380_v7 = vmov 0   ;;  %s621_s1 = inlined_call_operand.vmem [shape: bf16[13,32], index: 1, kind: input, shape index: {}]   ;;  %s622_s4 = inlined_call_operand.<no memory space> [shape: f32[1,1], index: 4, kind: input, shape index: {}]   ;;  %s623_s0 = inlined_call_operand.vmem [shape: bf16[128,13], index: 0, kind: input, shape index: {}]   ;;  %s624_s2 = inlined_call_operand.vmem [shape: f32[1,32], index: 2, kind: input, shape index: {}]   ;;  %s625_s3 = inlined_call_operand.vmem [shape: f32[128,32], index: 3, kind: input, shape index: {}]   ;;  %s626_s5 = inlined_call_operand.vmem [shape: f32[128,32], index: 5, kind: output, shape index: {}]  }
   0x1   :  { %v352_v0 = vld [vmem:[%s621_s1] sm:$0xf]  ;;  %v370_v1 = vld [vmem:[%s621_s1] sm:$0x70]  ;;  %v117_v3 = vsel %vm115_vm0, 4294967295, %v379_v2  ;;  %v10_v4 = vstv %s622_s4  ;;  %376 = vset.pattern.permute.xlu0 %v380_v7  ;;  %v364_v10 = vld [vmem:[%s623_s0 + $0x10] sm:$0xff] }
   0x2   :  { %v353_v5 = vor.u32 %v370_v1, %v352_v0  ;;  %v118_v6 = vsel %vm116_vm1, %v117_v3, 0  ;;  %11 = vst [vmem:[#allocation2] sm:$0x1] %v10_v4  ;;  %v362_v9 = vld [vmem:[%s623_s0] sm:$0xff]  ;;  %vm90_vm2 = vcmask 105472   ;;  %v368_v12 = vld [vmem:[%s623_s0 + $0x30] sm:$0xff] }
   0x3   :  { %v366_v11 = vld [vmem:[%s623_s0 + $0x20] sm:$0xff]  ;;  %v363_v17 = vld [vmem:[%s623_s0 + $0x8] sm:$0xff]  ;;  %v365_v18 = vld [vmem:[%s623_s0 + $0x18] sm:$0xff]  ;;  %vm297_vm5 = vcmask 261120  }
   0x4   :  { %v120_v8 = vand.u32 %v353_v5, %v118_v6  ;;  %v367_v19 = vld [vmem:[%s623_s0 + $0x28] sm:$0xff]  ;;  %v369_v20 = vld [vmem:[%s623_s0 + $0x38] sm:$0xff]  ;;  %v457_v22 = vld [vmem:[%s624_s2] ss:$0 sm:$0xff] }
   0x5   :  { %v220_v27 = vld [vmem:[%s625_s3] sm:$0xff]  ;;  %v221_v50 = vld [vmem:[%s625_s3 + $0x8] sm:$0xff] }
   0x6   :  { %129 = vmatpush.bf16.msra.mxu0 %v120_v8  ;;  %371 = vmatpush.bf16.msra.mxu1 %v120_v8  ;;  %v224_v28 = vld [vmem:[%s625_s3 + $0x20] sm:$0xff]  ;;  %v225_v51 = vld [vmem:[%s625_s3 + $0x28] sm:$0xff] }
   0x7   :  { %372 = vmatpush.bf16.msra.mxu2 %v120_v8  ;;  %373 = vmatpush.bf16.msra.mxu3 %v120_v8  ;;  %v228_v35 = vld [vmem:[%s625_s3 + $0x40] sm:$0xff]  ;;  %v229_v7 = vld [vmem:[%s625_s3 + $0x48] sm:$0xff] }
   0x8   :  { %v232_v37 = vld [vmem:[%s625_s3 + $0x60] sm:$0xff] }
   0x9   :  { %354 = vmatmul.msk.bf16.vlgmr.msra.gmra.mxu0 %vm90_vm2, %v362_v9  ;;  %356 = vmatmul.msk.bf16.vlgmr.msra.gmra.mxu1 %vm90_vm2, %v364_v10  ;;  %v219_v13 = vld [vmem:[#allocation2] sm:$0x1] }
   0xa   :  { %358 = vmatmul.msk.bf16.vlgmr.msra.gmra.mxu2 %vm90_vm2, %v366_v11  ;;  %360 = vmatmul.msk.bf16.vlgmr.msra.gmra.mxu3 %vm90_vm2, %v368_v12  ;;  %v377_v14 = vld [vmem:[#allocation2] ss:$0 sm:$0xff]  ;;  %v258_v15 = vsub.f32 1.0, %v219_v13  ;;  %v233_v13 = vld [vmem:[%s625_s3 + $0x68] sm:$0xff] }
   0xb   :  { %239 = vperm.xlu0 %376, %v377_v14  }
   0xc   :  { %v260_v16 = vperm.slane %v258_v15, 0 }
  0x13   :  { %262 = vperm.xlu0 %376, %v260_v16  }
  0x19   :  { %355 = vmatmul.msk.bf16.gmra.mxu0 %vm90_vm2, %v363_v17  ;;  %357 = vmatmul.msk.bf16.gmra.mxu1 %vm90_vm2, %v365_v18  ;;  %v222_v17 = vld [vmem:[%s625_s3 + $0x10] sm:$0xff] }
  0x1a   :  { %359 = vmatmul.msk.bf16.gmra.mxu2 %vm90_vm2, %v367_v19  ;;  %361 = vmatmul.msk.bf16.gmra.mxu3 %vm90_vm2, %v369_v20 }
  0x7d   :  { %v452_v21 = vpop.permute.xlu0 %239 }
  0x7e   :  { %v242_v32 = vmul.f32 %v452_v21, %v220_v27  ;;  %v246_v36 = vmul.f32 %v452_v21, %v224_v28  ;;  %v250_v46 = vmul.f32 %v452_v21, %v228_v35  ;;  %v254_v52 = vmul.f32 %v452_v21, %v232_v37 }
  0x7f   :  { %v243_v60 = vmul.f32 %v452_v21, %v221_v50  ;;  %v247_v61 = vmul.f32 %v452_v21, %v225_v51  ;;  %v251_v20 = vmul.f32 %v452_v21, %v229_v7  ;;  %v244_v28 = vmul.f32 %v452_v21, %v222_v17  ;;  %v234_v50 = vld [vmem:[%s625_s3 + $0x70] sm:$0xff]  ;;  %v235_v17 = vld [vmem:[%s625_s3 + $0x78] sm:$0xff] }
  0x85   :  { %v467_v31 = vpop.permute.xlu0 %262 }
  0x86   :  { %v131_v23 = vpop.f32.mrf.mxu0  ;;  %v141_v24 = vpop.f32.mrf.mxu1 }
  0x87   :  { %v132_v25 = vadd.f32 %v457_v22, %v131_v23  ;;  %v142_v26 = vadd.f32 %v457_v22, %v141_v24  ;;  %v226_v23 = vld [vmem:[%s625_s3 + $0x30] sm:$0xff] }
  0x89   :  { %vm171_vm3 = vcmp.gt.f32.partialorder %v132_v25, 0.0  ;;  %v187_v29 = vmul.f32 0.2, %v132_v25  ;;  %vm175_vm4 = vcmp.gt.f32.partialorder %v142_v26, 0.0  ;;  %v191_v30 = vmul.f32 0.2, %v142_v26 }
  0x8b   :  { %v203_v33 = vsel %vm171_vm3, %v132_v25, %v187_v29  ;;  %v207_v34 = vsel %vm175_vm4, %v142_v26, %v191_v30  ;;  %v255_v25 = vmul.f32 %v452_v21, %v233_v13 }
  0x8c   :  { %v265_v38 = vmul.f32 %v467_v31, %v203_v33  ;;  %v269_v39 = vmul.f32 %v467_v31, %v207_v34  ;;  %v248_v34 = vmul.f32 %v452_v21, %v226_v23 }
  0x8d   :  { %v151_v40 = vpop.f32.mrf.mxu2  ;;  %v161_v41 = vpop.f32.mrf.mxu3 }
  0x8e   :  { %v152_v42 = vadd.f32 %v457_v22, %v151_v40  ;;  %v162_v43 = vadd.f32 %v457_v22, %v161_v41  ;;  %v133_v44 = vpop.f32.mrf.mxu0  ;;  %v143_v45 = vpop.f32.mrf.mxu1  ;;  %v281_v47 = vadd.f32 %v265_v38, %v242_v32  ;;  %v285_v53 = vadd.f32 %v269_v39, %v246_v36 }
  0x8f   :  { %v134_v48 = vadd.f32 %v457_v22, %v133_v44  ;;  %v144_v49 = vadd.f32 %v457_v22, %v143_v45  ;;  %v230_v45 = vld [vmem:[%s625_s3 + $0x50] sm:$0xff] }
  0x90   :  { %vm179_vm6 = vcmp.gt.f32.partialorder %v152_v42, 0.0  ;;  %v195_v54 = vmul.f32 0.2, %v152_v42  ;;  %vm183_vm7 = vcmp.gt.f32.partialorder %v162_v43, 0.0  ;;  %v199_v55 = vmul.f32 0.2, %v162_v43 }
  0x91   :  { %vm172_vm8 = vcmp.gt.f32.partialorder %v134_v48, 0.0  ;;  %v188_v56 = vmul.f32 0.2, %v134_v48  ;;  %vm176_vm9 = vcmp.gt.f32.partialorder %v144_v49, 0.0  ;;  %v192_v57 = vmul.f32 0.2, %v144_v49 }
  0x92   :  { %v211_v58 = vsel %vm179_vm6, %v152_v42, %v195_v54  ;;  %v215_v59 = vsel %vm183_vm7, %v162_v43, %v199_v55  ;;  %298 = vst.msk [vmem:[%s626_s5] sm:$0xff] %vm297_vm5, %v281_v47  ;;  %v223_v54 = vld [vmem:[%s625_s3 + $0x18] sm:$0xff]  ;;  %v252_v55 = vmul.f32 %v452_v21, %v230_v45 }
  0x93   :  { %v204_v62 = vsel %vm172_vm8, %v134_v48, %v188_v56  ;;  %v208_v63 = vsel %vm176_vm9, %v144_v49, %v192_v57  ;;  %v273_v0 = vmul.f32 %v467_v31, %v211_v58  ;;  %v277_v1 = vmul.f32 %v467_v31, %v215_v59  ;;  %302 = vst.msk [vmem:[%s626_s5 + $0x20] sm:$0xff] %vm297_vm5, %v285_v53 }
  0x94   :  { %v266_v2 = vmul.f32 %v467_v31, %v204_v62  ;;  %v270_v3 = vmul.f32 %v467_v31, %v208_v63  ;;  %v256_v59 = vmul.f32 %v452_v21, %v234_v50 }
  0x95   :  { %v289_v4 = vadd.f32 %v273_v0, %v250_v46  ;;  %v293_v5 = vadd.f32 %v277_v1, %v254_v52  ;;  %v153_v6 = vpop.f32.mrf.mxu2  ;;  %v163_v8 = vpop.f32.mrf.mxu3 }
  0x96   :  { %v282_v9 = vadd.f32 %v266_v2, %v243_v60  ;;  %v286_v10 = vadd.f32 %v270_v3, %v247_v61  ;;  %v154_v11 = vadd.f32 %v457_v22, %v153_v6  ;;  %v164_v12 = vadd.f32 %v457_v22, %v163_v8  ;;  %v136_v14 = vpop.f32.mrf.mxu0  ;;  %v146_v15 = vpop.f32.mrf.mxu1  ;;  %v227_v61 = vld [vmem:[%s625_s3 + $0x38] sm:$0xff] }
  0x97   :  { %306 = vst.msk [vmem:[%s626_s5 + $0x40] sm:$0xff] %vm297_vm5, %v289_v4  ;;  %v137_v16 = vadd.f32 %v457_v22, %v136_v14  ;;  %v147_v18 = vadd.f32 %v457_v22, %v146_v15  ;;  %v245_v2 = vmul.f32 %v452_v21, %v223_v54  ;;  %v249_v6 = vmul.f32 %v452_v21, %v227_v61 }
  0x98   :  { %299 = vst.msk [vmem:[%s626_s5 + $0x8] sm:$0xff] %vm297_vm5, %v282_v9  ;;  %vm180_vm10 = vcmp.gt.f32.partialorder %v154_v11, 0.0  ;;  %v196_v19 = vmul.f32 0.2, %v154_v11  ;;  %vm184_vm11 = vcmp.gt.f32.partialorder %v164_v12, 0.0 }
  0x99   :  { %303 = vst.msk [vmem:[%s626_s5 + $0x28] sm:$0xff] %vm297_vm5, %v286_v10  ;;  %v200_v24 = vmul.f32 0.2, %v164_v12  ;;  %vm173_vm12 = vcmp.gt.f32.partialorder %v137_v16, 0.0  ;;  %v189_v26 = vmul.f32 0.2, %v137_v16 }
  0x9a   :  { %310 = vst.msk [vmem:[%s626_s5 + $0x60] sm:$0xff] %vm297_vm5, %v293_v5  ;;  %v212_v27 = vsel %vm180_vm10, %v154_v11, %v196_v19  ;;  %vm177_vm13 = vcmp.gt.f32.partialorder %v147_v18, 0.0  ;;  %v193_v29 = vmul.f32 0.2, %v147_v18 }
  0x9b   :  { %v274_v30 = vmul.f32 %v467_v31, %v212_v27  ;;  %v216_v32 = vsel %vm184_vm11, %v164_v12, %v200_v24  ;;  %v205_v33 = vsel %vm173_vm12, %v137_v16, %v189_v26  ;;  %v231_v16 = vld [vmem:[%s625_s3 + $0x58] sm:$0xff]  ;;  %v257_v24 = vmul.f32 %v452_v21, %v235_v17 }
  0x9c   :  { %v278_v35 = vmul.f32 %v467_v31, %v216_v32  ;;  %v267_v36 = vmul.f32 %v467_v31, %v205_v33  ;;  %v209_v37 = vsel %vm177_vm13, %v147_v18, %v193_v29  ;;  %v253_v19 = vmul.f32 %v452_v21, %v231_v16 }
  0x9d   :  { %v290_v38 = vadd.f32 %v274_v30, %v251_v20  ;;  %v271_v39 = vmul.f32 %v467_v31, %v209_v37  ;;  %v156_v40 = vpop.f32.mrf.mxu2  ;;  %v166_v41 = vpop.f32.mrf.mxu3 }
  0x9e   :  { %v294_v42 = vadd.f32 %v278_v35, %v255_v25  ;;  %v283_v43 = vadd.f32 %v267_v36, %v244_v28  ;;  %v157_v44 = vadd.f32 %v457_v22, %v156_v40  ;;  %v167_v46 = vadd.f32 %v457_v22, %v166_v41  ;;  %v138_v47 = vpop.f32.mrf.mxu0  ;;  %v148_v48 = vpop.f32.mrf.mxu1 }
  0x9f   :  { %307 = vst.msk [vmem:[%s626_s5 + $0x48] sm:$0xff] %vm297_vm5, %v290_v38  ;;  %v287_v49 = vadd.f32 %v271_v39, %v248_v34  ;;  %v139_v51 = vadd.f32 %v457_v22, %v138_v47  ;;  %v149_v52 = vadd.f32 %v457_v22, %v148_v48 }
  0xa0   :  { %311 = vst.msk [vmem:[%s626_s5 + $0x68] sm:$0xff] %vm297_vm5, %v294_v42  ;;  %vm181_vm14 = vcmp.gt.f32.partialorder %v157_v44, 0.0  ;;  %v197_v53 = vmul.f32 0.2, %v157_v44  ;;  %vm185_vm15 = vcmp.gt.f32.partialorder %v167_v46, 0.0 }
  0xa1   :  { %300 = vst.msk [vmem:[%s626_s5 + $0x10] sm:$0xff] %vm297_vm5, %v283_v43  ;;  %v201_v56 = vmul.f32 0.2, %v167_v46  ;;  %vm174_vm0 = vcmp.gt.f32.partialorder %v139_v51, 0.0  ;;  %v190_v57 = vmul.f32 0.2, %v139_v51 }
  0xa2   :  { %304 = vst.msk [vmem:[%s626_s5 + $0x30] sm:$0xff] %vm297_vm5, %v287_v49  ;;  %v213_v58 = vsel %vm181_vm14, %v157_v44, %v197_v53  ;;  %vm178_vm1 = vcmp.gt.f32.partialorder %v149_v52, 0.0  ;;  %v194_v60 = vmul.f32 0.2, %v149_v52 }
  0xa3   :  { %v275_v62 = vmul.f32 %v467_v31, %v213_v58  ;;  %v217_v63 = vsel %vm185_vm15, %v167_v46, %v201_v56  ;;  %v206_v0 = vsel %vm174_vm0, %v139_v51, %v190_v57 }
  0xa4   :  { %v279_v1 = vmul.f32 %v467_v31, %v217_v63  ;;  %v268_v3 = vmul.f32 %v467_v31, %v206_v0  ;;  %v210_v4 = vsel %vm178_vm1, %v149_v52, %v194_v60 }
  0xa5   :  { %v291_v5 = vadd.f32 %v275_v62, %v252_v55  ;;  %v272_v7 = vmul.f32 %v467_v31, %v210_v4  ;;  %v158_v8 = vpop.f32.mrf.mxu2  ;;  %v168_v9 = vpop.f32.mrf.mxu3 }
  0xa6   :  { %v295_v10 = vadd.f32 %v279_v1, %v256_v59  ;;  %v284_v11 = vadd.f32 %v268_v3, %v245_v2  ;;  %v159_v12 = vadd.f32 %v457_v22, %v158_v8  ;;  %v169_v13 = vadd.f32 %v457_v22, %v168_v9 }
  0xa7   :  { %308 = vst.msk [vmem:[%s626_s5 + $0x50] sm:$0xff] %vm297_vm5, %v291_v5  ;;  %v288_v14 = vadd.f32 %v272_v7, %v249_v6 }
  0xa8   :  { %312 = vst.msk [vmem:[%s626_s5 + $0x70] sm:$0xff] %vm297_vm5, %v295_v10  ;;  %vm182_vm2 = vcmp.gt.f32.partialorder %v159_v12, 0.0  ;;  %v198_v15 = vmul.f32 0.2, %v159_v12  ;;  %vm186_vm3 = vcmp.gt.f32.partialorder %v169_v13, 0.0 }
  0xa9   :  { %301 = vst.msk [vmem:[%s626_s5 + $0x18] sm:$0xff] %vm297_vm5, %v284_v11  ;;  %v202_v22 = vmul.f32 0.2, %v169_v13 }
  0xaa   :  { %305 = vst.msk [vmem:[%s626_s5 + $0x38] sm:$0xff] %vm297_vm5, %v288_v14  ;;  %v214_v18 = vsel %vm182_vm2, %v159_v12, %v198_v15 }
  0xab   :  { %v276_v20 = vmul.f32 %v467_v31, %v214_v18  ;;  %v218_v23 = vsel %vm186_vm3, %v169_v13, %v202_v22 }
  0xac   :  { %v280_v25 = vmul.f32 %v467_v31, %v218_v23 }
  0xad   :  { %v292_v26 = vadd.f32 %v276_v20, %v253_v19 }
  0xae   :  { %v296_v27 = vadd.f32 %v280_v25, %v257_v24 }
  0xaf   :  { %309 = vst.msk [vmem:[%s626_s5 + $0x58] sm:$0xff] %vm297_vm5, %v292_v26 }
  0xb0   :  { %313 = vst.msk [vmem:[%s626_s5 + $0x78] sm:$0xff] %vm297_vm5, %v296_v27 }

// kernel: discriminator_c_forward.16
= control target key start
LH: loop header
LB: loop body
LE: loop exit
PB: predicated region body
PF: predicated region fallthrough
CT: control target
= control target key end

     0   :  { %s3545_s12 = smov 0   ;;  %s4592_s0 = inlined_call_operand.vmem [shape: f32[2,328,32], index: 0, kind: input, shape index: {}]   ;;  %s4593_s1 = inlined_call_operand.vmem [shape: f32[9,32,32], index: 1, kind: input, shape index: {}]   ;;  %s4594_s2 = inlined_call_operand.vmem [shape: f32[1,32], index: 2, kind: input, shape index: {}]   ;;  %s4595_s3 = inlined_call_operand.vmem [shape: f32[2,288,32], index: 3, kind: output, shape index: {}]  }
   0x1 LB: > { %s3128_s13 = sadd.s32 4294967295, %s3523_s12   ;;  %p3132_p0 = scmp.ge.s32.totalorder %s3523_s12, 1  ;;  %s3523_s12 = sphi %s3545_s12, %s13_s12  }
   0x2   : > { %p137_p1 = scmp.lt.s32.totalorder %s3523_s12, 3 }
   0x4   : > { %p138_p2 = pnand %p3132_p0, %p137_p1 }
   0x5   : > { %p161_p3 = scmp.lt.s32.totalorder (!%p138_p2), %s3128_s13, 1 }
   0x6   : > { %141 = sbr.rel (%p138_p2) target bundleno = 803 (0x323), region = 32 }
   0xb   : > { %v3138_v0 = vld [vmem:[%s4593_s1 + $0x38] sm:$0xff]  ;;  %v3137_v1 = vld [vmem:[%s4593_s1 + $0x30] sm:$0xff]  ;;  %v3136_v2 = vld [vmem:[%s4593_s1 + $0x28] sm:$0xff]  ;;  %s4597_s13 = smov (!%p161_p3, %s3128_s13), 1  ;;  %vm252_vm0 = vcmask 261120  }
   0xc   : > { %3493 = vmatpush.msra.mxu1 %v3138_v0  ;;  %3494 = vmatpush.msra.mxu2 %v3138_v0  ;;  %v3135_v3 = vld [vmem:[%s4593_s1 + $0x20] sm:$0xff]  ;;  %s3505_s22 = smul.u32 328, %s4597_s13  ;;  %v3214_v4 = vld [vmem:[%s4593_s1 + $0x58] sm:$0xff]  ;;  %v3213_v11 = vld [vmem:[%s4593_s1 + $0x50] sm:$0xff] }
   0xd   : > { %3495 = vmatpush.msra.mxu3 %v3138_v0  ;;  %373 = vmatpush.msra.mxu0 %v3138_v0  ;;  %v210_v5 = vld [vmem:[%s4593_s1 + $0x18] sm:$0xff]  ;;  %v3253_v13 = vld [vmem:[%s4593_s1 + $0x70] sm:$0xff]  ;;  %v3212_v18 = vld [vmem:[%s4593_s1 + $0x48] sm:$0xff]  ;;  %s3506_s19 = smul.u32 288, %s4597_s13 }
   0xe   : > { %3496 = vmatpush.msra.mxu1 %v3137_v1  ;;  %3497 = vmatpush.msra.mxu2 %v3137_v1  ;;  %s3571_s25 = scalar_lea.vmem %s4592_s0, %s3505_s22  ;;  %v3254_v9 = vld [vmem:[%s4593_s1 + $0x78] sm:$0xff]  ;;  %v209_v14 = vld [vmem:[%s4593_s1 + $0x10] sm:$0xff]  ;;  %v3252_v19 = vld [vmem:[%s4593_s1 + $0x68] sm:$0xff] }
   0xf   : > { %3498 = vmatpush.msra.mxu3 %v3137_v1  ;;  %374 = vmatpush.msra.mxu0 %v3137_v1  ;;  %v220_v6 = vld [vmem:[%s3571_s25 + $0x49] sm:$0xff]  ;;  %v229_v7 = vld [vmem:[%s3571_s25 + $0x91] sm:$0xff]  ;;  %v238_v8 = vld [vmem:[%s3571_s25 + $0xd9] sm:$0xff]  ;;  %s4314_s13 = scalar_lea.vmem %s4595_s3, %s3506_s19 }
  0x10   : > { %3499 = vmatpush.msra.mxu1 %v3136_v2  ;;  %3500 = vmatpush.msra.mxu2 %v3136_v2  ;;  %v211_v10 = vld [vmem:[%s3571_s25 + $0x1] sm:$0xff]  ;;  %v3294_v12 = vld [vmem:[%s4593_s1 + $0x98] sm:$0xff]  ;;  %v3293_v16 = vld [vmem:[%s4593_s1 + $0x90] sm:$0xff] }
  0x11   : > { %3501 = vmatpush.msra.mxu3 %v3136_v2  ;;  %375 = vmatpush.msra.mxu0 %v3136_v2  ;;  %v221_v15 = vld [vmem:[%s3571_s25 + $0x51] sm:$0xff]  ;;  %v230_v17 = vld [vmem:[%s3571_s25 + $0x99] sm:$0xff]  ;;  %v239_v20 = vld [vmem:[%s3571_s25 + $0xe1] sm:$0xff] }
  0x12   : > { %3502 = vmatpush.msra.mxu1 %v3135_v3  ;;  %3503 = vmatpush.msra.mxu2 %v3135_v3  ;;  %v208_v21 = vld [vmem:[%s4593_s1 + $0x8] sm:$0xff]  ;;  %v222_v24 = vld [vmem:[%s3571_s25 + $0x59] sm:$0xff]  ;;  %v213_v27 = vld [vmem:[%s3571_s25 + $0x11] sm:$0xff] }
  0x13   : > { %3148 = vmatmul.msk.f32.vlgmr.msra.gmra.mxu1 %vm252_vm0, %v220_v6  ;;  %3157 = vmatmul.msk.f32.vlgmr.msra.gmra.mxu2 %vm252_vm0, %v229_v7  ;;  %v212_v22 = vld [vmem:[%s3571_s25 + $0x9] sm:$0xff]  ;;  %v231_v25 = vld [vmem:[%s3571_s25 + $0xa1] sm:$0xff]  ;;  %v241_v31 = vld [vmem:[%s3571_s25 + $0xf1] sm:$0xff] }
  0x14   : > { %880 = vmatpush.msrb.mxu2 %v3214_v4  ;;  %3504 = vmatpush.msra.mxu3 %v3135_v3  ;;  %v3292_v23 = vld [vmem:[%s4593_s1 + $0x88] sm:$0xff]  ;;  %v3211_v28 = vld [vmem:[%s4593_s1 + $0x40] sm:$0xff]  ;;  %v233_v36 = vld [vmem:[%s3571_s25 + $0xb1] sm:$0xff] }
  0x15   : > { %3166 = vmatmul.msk.f32.vlgmr.msra.gmra.mxu3 %vm252_vm0, %v238_v8  ;;  %606 = vmatpush.msrb.mxu1 %v210_v5  ;;  %v240_v26 = vld [vmem:[%s3571_s25 + $0xe9] sm:$0xff]  ;;  %v223_v29 = vld [vmem:[%s3571_s25 + $0x61] sm:$0xff]  ;;  %v214_v33 = vld [vmem:[%s3571_s25 + $0x19] sm:$0xff] }
  0x16   : > { %1190 = vmatpush.msrb.mxu3 %v3254_v9  ;;  %376 = vmatpush.msra.mxu0 %v3135_v3  ;;  %v232_v30 = vld [vmem:[%s3571_s25 + $0xa9] sm:$0xff]  ;;  %v3251_v32 = vld [vmem:[%s4593_s1 + $0x60] sm:$0xff]  ;;  %v225_v40 = vld [vmem:[%s3571_s25 + $0x71] sm:$0xff] }
  0x17   : > { %3139 = vmatmul.msk.f32.vlgmr.msra.gmra.mxu0 %vm252_vm0, %v211_v10  ;;  %881 = vmatpush.msrb.mxu2 %v3213_v11  ;;  %v207_v34 = vld [vmem:[%s4593_s1] sm:$0xff]  ;;  %v224_v35 = vld [vmem:[%s3571_s25 + $0x69] sm:$0xff]  ;;  %v3374_v43 = vld [vmem:[%s4593_s1 + $0xd8] sm:$0xff] }
  0x18   : > { %1500 = vmatpush.msrb.mxu0 %v3294_v12  ;;  %1191 = vmatpush.msrb.mxu3 %v3253_v13  ;;  %v242_v37 = vld [vmem:[%s3571_s25 + $0xf9] sm:$0xff]  ;;  %v215_v39 = vld [vmem:[%s3571_s25 + $0x21] sm:$0xff]  ;;  %v216_v44 = vld [vmem:[%s3571_s25 + $0x29] sm:$0xff] }
  0x19   : > { %607 = vmatpush.msrb.mxu1 %v209_v14  ;;  %882 = vmatpush.msrb.mxu2 %v3212_v18  ;;  %v3291_v38 = vld [vmem:[%s4593_s1 + $0x80] sm:$0xff]  ;;  %v3414_v45 = vld [vmem:[%s4593_s1 + $0xf8] sm:$0xff]  ;;  %v244_v49 = vld [vmem:[%s3571_s25 + $0x109] sm:$0xff] }
  0x1a   : > { %1501 = vmatpush.msrb.mxu0 %v3293_v16  ;;  %1192 = vmatpush.msrb.mxu3 %v3252_v19  ;;  %v234_v41 = vld [vmem:[%s3571_s25 + $0xb9] sm:$0xff]  ;;  %v243_v42 = vld [vmem:[%s3571_s25 + $0x101] sm:$0xff]  ;;  %v217_v50 = vld [vmem:[%s3571_s25 + $0x31] sm:$0xff] }
  0x1b   : > { %3149 = vmatmul.msk.f32.gmra.mxu1 %vm252_vm0, %v221_v15  ;;  %3158 = vmatmul.msk.f32.gmra.mxu2 %vm252_vm0, %v230_v17  ;;  %v3334_v46 = vld [vmem:[%s4593_s1 + $0xb8] sm:$0xff]  ;;  %v235_v48 = vld [vmem:[%s3571_s25 + $0xc1] sm:$0xff]  ;;  %v236_v53 = vld [vmem:[%s3571_s25 + $0xc9] sm:$0xff] }
  0x1c   : > { %608 = vmatpush.msrb.mxu1 %v208_v21  ;;  %1502 = vmatpush.msrb.mxu0 %v3292_v23  ;;  %v226_v47 = vld [vmem:[%s3571_s25 + $0x79] sm:$0xff]  ;;  %v227_v52 = vld [vmem:[%s3571_s25 + $0x81] sm:$0xff]  ;;  %v245_v54 = vld [vmem:[%s3571_s25 + $0x111] sm:$0xff] }
  0x1d   : > { %3167 = vmatmul.msk.f32.gmra.mxu3 %vm252_vm0, %v239_v20  ;;  %883 = vmatpush.msrb.mxu2 %v3211_v28  ;;  %v3454_v51 = vld [vmem:[%s4593_s1 + $0x118] sm:$0xff]  ;;  %v228_v56 = vld [vmem:[%s3571_s25 + $0x89] sm:$0xff]  ;;  %v219_v59 = vld [vmem:[%s3571_s25 + $0x41] sm:$0xff] }
  0x1e   : > { %1193 = vmatpush.msrb.mxu3 %v3251_v32  ;;  %609 = vmatpush.msrb.mxu1 %v207_v34  ;;  %v218_v55 = vld [vmem:[%s3571_s25 + $0x39] sm:$0xff]  ;;  %v237_v57 = vld [vmem:[%s3571_s25 + $0xd1] sm:$0xff]  ;;  %v719_v61 = vld [vmem:[%s3571_s25 + $0x2] sm:$0xff] }
  0x1f   : > { %3140 = vmatmul.msk.f32.gmra.mxu0 %vm252_vm0, %v212_v22  ;;  %2120 = vmatpush.msra.mxu2 %v3374_v43  ;;  %v246_v58 = vld [vmem:[%s3571_s25 + $0x119] sm:$0xff]  ;;  %v172_v0 = vld [vmem:[%s3571_s25 + $0x8] sm:$0xff]  ;;  %v173_v4 = vld [vmem:[%s3571_s25 + $0x10] sm:$0xff] }
  0x20   : > { %1503 = vmatpush.msrb.mxu0 %v3291_v38  ;;  %2430 = vmatpush.msra.mxu3 %v3414_v45  ;;  %v171_v60 = vld [vmem:[%s3571_s25] sm:$0xff]  ;;  %v1029_v62 = vld [vmem:[%s3571_s25 + $0x12] sm:$0xff]  ;;  %v720_v1 = vld [vmem:[%s3571_s25 + $0xa] sm:$0xff] }
  0x21   : > { %1810 = vmatpush.msra.mxu1 %v3334_v46  ;;  %v1339_v63 = vld [vmem:[%s3571_s25 + $0x13] sm:$0xff]  ;;  %v1340_v3 = vld [vmem:[%s3571_s25 + $0x1b] sm:$0xff]  ;;  %v1341_v6 = vld [vmem:[%s3571_s25 + $0x23] sm:$0xff] }
  0x22   : > { %2740 = vmatpush.msra.mxu0 %v3454_v51  ;;  %v1030_v2 = vld [vmem:[%s3571_s25 + $0x1a] sm:$0xff]  ;;  %v1031_v5 = vld [vmem:[%s3571_s25 + $0x22] sm:$0xff]  ;;  %v1032_v8 = vld [vmem:[%s3571_s25 + $0x2a] sm:$0xff] }
  0x23   : > { %3150 = vmatmul.msk.f32.gmra.mxu1 %vm252_vm0, %v222_v24  ;;  %3159 = vmatmul.msk.f32.gmra.mxu2 %vm252_vm0, %v231_v25  ;;  %v174_v7 = vld [vmem:[%s3571_s25 + $0x18] sm:$0xff]  ;;  %v1342_v9 = vld [vmem:[%s3571_s25 + $0x2b] sm:$0xff]  ;;  %v175_v10 = vld [vmem:[%s3571_s25 + $0x20] sm:$0xff] }
  0x24   : > { %v1033_v11 = vld [vmem:[%s3571_s25 + $0x32] sm:$0xff]  ;;  %v176_v13 = vld [vmem:[%s3571_s25 + $0x28] sm:$0xff]  ;;  %v1034_v14 = vld [vmem:[%s3571_s25 + $0x3a] sm:$0xff] }
  0x25   : > { %3168 = vmatmul.msk.f32.gmra.mxu3 %vm252_vm0, %v240_v26  ;;  %v1343_v12 = vld [vmem:[%s3571_s25 + $0x33] sm:$0xff]  ;;  %v1344_v16 = vld [vmem:[%s3571_s25 + $0x3b] sm:$0xff]  ;;  %v1345_v21 = vld [vmem:[%s3571_s25 + $0x43] sm:$0xff] }
  0x26   : > { %v3373_v15 = vld [vmem:[%s4593_s1 + $0xd0] sm:$0xff]  ;;  %v1035_v20 = vld [vmem:[%s3571_s25 + $0x42] sm:$0xff]  ;;  %v178_v24 = vld [vmem:[%s3571_s25 + $0x38] sm:$0xff] }
  0x27   : > { %3141 = vmatmul.msk.f32.gmra.mxu0 %vm252_vm0, %v213_v27  ;;  %2121 = vmatpush.msra.mxu2 %v3373_v15  ;;  %v3413_v17 = vld [vmem:[%s4593_s1 + $0xf0] sm:$0xff]  ;;  %v180_v38 = vld [vmem:[%s3571_s25 + $0x48] sm:$0xff] }
  0x28   : > { %2431 = vmatpush.msra.mxu3 %v3413_v17  ;;  %v3333_v18 = vld [vmem:[%s4593_s1 + $0xb0] sm:$0xff]  ;;  %v1039_v46 = vld [vmem:[%s3571_s25 + $0x62] sm:$0xff] }
  0x29   : > { %1811 = vmatpush.msra.mxu1 %v3333_v18  ;;  %v177_v19 = vld [vmem:[%s3571_s25 + $0x30] sm:$0xff] }
  0x2a   : > { %v3453_v22 = vld [vmem:[%s4593_s1 + $0x110] sm:$0xff] }
  0x2b   : > { %3151 = vmatmul.msk.f32.gmra.mxu1 %vm252_vm0, %v223_v29  ;;  %3160 = vmatmul.msk.f32.gmra.mxu2 %vm252_vm0, %v232_v30  ;;  %v1036_v25 = vld [vmem:[%s3571_s25 + $0x4a] sm:$0xff]  ;;  %v1037_v32 = vld [vmem:[%s3571_s25 + $0x52] sm:$0xff] }
  0x2c   : > { %2741 = vmatpush.msra.mxu0 %v3453_v22  ;;  %v1346_v27 = vld [vmem:[%s3571_s25 + $0x4b] sm:$0xff]  ;;  %v1347_v34 = vld [vmem:[%s3571_s25 + $0x53] sm:$0xff] }
  0x2d   : > { %3169 = vmatmul.msk.f32.gmra.mxu3 %vm252_vm0, %v241_v31  ;;  %v179_v31 = vld [vmem:[%s3571_s25 + $0x40] sm:$0xff]  ;;  %v181_v45 = vld [vmem:[%s3571_s25 + $0x50] sm:$0xff] }
  0x2e   : > { %v1354_v22 = vld [vmem:[%s3571_s25 + $0x8b] sm:$0xff] }
  0x2f   : > { %3142 = vmatmul.msk.f32.gmra.mxu0 %vm252_vm0, %v214_v33 }
  0x33   : > { %3152 = vmatmul.msk.f32.gmra.mxu1 %vm252_vm0, %v224_v35  ;;  %3161 = vmatmul.msk.f32.gmra.mxu2 %vm252_vm0, %v233_v36 }
  0x35   : > { %3170 = vmatmul.msk.f32.gmra.mxu3 %vm252_vm0, %v242_v37 }
  0x37   : > { %3143 = vmatmul.msk.f32.gmra.mxu0 %vm252_vm0, %v215_v39  ;;  %v1038_v39 = vld [vmem:[%s3571_s25 + $0x5a] sm:$0xff] }
  0x3b   : > { %3153 = vmatmul.msk.f32.gmra.mxu1 %vm252_vm0, %v225_v40  ;;  %3162 = vmatmul.msk.f32.gmra.mxu2 %vm252_vm0, %v234_v41  ;;  %v1348_v41 = vld [vmem:[%s3571_s25 + $0x5b] sm:$0xff] }
  0x3d   : > { %3171 = vmatmul.msk.f32.gmra.mxu3 %vm252_vm0, %v243_v42 }
  0x3f   : > { %3144 = vmatmul.msk.f32.gmra.mxu0 %vm252_vm0, %v216_v44 }
  0x43   : > { %3154 = vmatmul.msk.f32.gmra.mxu1 %vm252_vm0, %v226_v47  ;;  %3163 = vmatmul.msk.f32.gmra.mxu2 %vm252_vm0, %v235_v48  ;;  %v1349_v48 = vld [vmem:[%s3571_s25 + $0x63] sm:$0xff] }
  0x45   : > { %3172 = vmatmul.msk.f32.gmra.mxu3 %vm252_vm0, %v244_v49 }
  0x47   : > { %3145 = vmatmul.msk.f32.gmra.mxu0 %vm252_vm0, %v217_v50 }
  0x4b   : > { %3155 = vmatmul.msk.f32.gmra.mxu1 %vm252_vm0, %v227_v52  ;;  %3164 = vmatmul.msk.f32.gmra.mxu2 %vm252_vm0, %v236_v53  ;;  %v182_v52 = vld [vmem:[%s3571_s25 + $0x58] sm:$0xff]  ;;  %v1040_v53 = vld [vmem:[%s3571_s25 + $0x6a] sm:$0xff] }
  0x4d   : > { %3173 = vmatmul.msk.f32.gmra.mxu3 %vm252_vm0, %v245_v54 }
  0x4f   : > { %3146 = vmatmul.msk.f32.gmra.mxu0 %vm252_vm0, %v218_v55  ;;  %v1350_v55 = vld [vmem:[%s3571_s25 + $0x6b] sm:$0xff] }
  0x53   : > { %3156 = vmatmul.msk.f32.gmra.mxu1 %vm252_vm0, %v228_v56  ;;  %3165 = vmatmul.msk.f32.gmra.mxu2 %vm252_vm0, %v237_v57 }
  0x55   : > { %3174 = vmatmul.msk.f32.gmra.mxu3 %vm252_vm0, %v246_v58 }
  0x57   : > { %3147 = vmatmul.msk.f32.gmra.mxu0 %vm252_vm0, %v219_v59  ;;  %v183_v59 = vld [vmem:[%s3571_s25 + $0x60] sm:$0xff] }
  0x5b   : > { %3175 = vmatmul.msk.f32.vlgmr.msrb.gmra.mxu1 %vm252_vm0, %v171_v60  ;;  %3215 = vmatmul.msk.f32.vlgmr.msrb.gmra.mxu2 %vm252_vm0, %v719_v61  ;;  %v1041_v60 = vld [vmem:[%s3571_s25 + $0x72] sm:$0xff] }
  0x5d   : > { %3255 = vmatmul.msk.f32.vlgmr.msrb.gmra.mxu3 %vm252_vm0, %v1029_v62 }
  0x5f   : > { %3295 = vmatmul.msk.f32.vlgmr.msrb.gmra.mxu0 %vm252_vm0, %v1339_v63 }
  0x63   : > { %3176 = vmatmul.msk.f32.gmra.mxu1 %vm252_vm0, %v172_v0  ;;  %3216 = vmatmul.msk.f32.gmra.mxu2 %vm252_vm0, %v720_v1 }
  0x65   : > { %3256 = vmatmul.msk.f32.gmra.mxu3 %vm252_vm0, %v1030_v2 }
  0x67   : > { %3296 = vmatmul.msk.f32.gmra.mxu0 %vm252_vm0, %v1340_v3  ;;  %v1042_v3 = vld [vmem:[%s3571_s25 + $0x7a] sm:$0xff] }
  0x6b   : > { %3177 = vmatmul.msk.f32.gmra.mxu1 %vm252_vm0, %v173_v4  ;;  %3217 = vmatmul.msk.f32.gmra.mxu2 %vm252_vm0, %v1029_v62  ;;  %v1351_v62 = vld [vmem:[%s3571_s25 + $0x73] sm:$0xff] }
  0x6d   : > { %3257 = vmatmul.msk.f32.gmra.mxu3 %vm252_vm0, %v1031_v5 }
  0x6f   : > { %3297 = vmatmul.msk.f32.gmra.mxu0 %vm252_vm0, %v1341_v6 }
  0x73   : > { %3178 = vmatmul.msk.f32.gmra.mxu1 %vm252_vm0, %v174_v7  ;;  %3218 = vmatmul.msk.f32.gmra.mxu2 %vm252_vm0, %v1030_v2  ;;  %v184_v2 = vld [vmem:[%s3571_s25 + $0x68] sm:$0xff] }
  0x75   : > { %3258 = vmatmul.msk.f32.gmra.mxu3 %vm252_vm0, %v1032_v8 }
  0x77   : > { %3298 = vmatmul.msk.f32.gmra.mxu0 %vm252_vm0, %v1342_v9  ;;  %v185_v9 = vld [vmem:[%s3571_s25 + $0x70] sm:$0xff] }
  0x7b   : > { %3179 = vmatmul.msk.f32.gmra.mxu1 %vm252_vm0, %v175_v10  ;;  %3219 = vmatmul.msk.f32.gmra.mxu2 %vm252_vm0, %v1031_v5  ;;  %v1352_v5 = vld [vmem:[%s3571_s25 + $0x7b] sm:$0xff] }
  0x7c   : > { %v1043_v10 = vld [vmem:[%s3571_s25 + $0x82] sm:$0xff] }
  0x7d   : > { %3259 = vmatmul.msk.f32.gmra.mxu3 %vm252_vm0, %v1033_v11 }
  0x7f   : > { %3299 = vmatmul.msk.f32.gmra.mxu0 %vm252_vm0, %v1343_v12 }
  0x83   : > { %3180 = vmatmul.msk.f32.gmra.mxu1 %vm252_vm0, %v176_v13  ;;  %3220 = vmatmul.msk.f32.gmra.mxu2 %vm252_vm0, %v1032_v8  ;;  %v1353_v13 = vld [vmem:[%s3571_s25 + $0x83] sm:$0xff] }
  0x85   : > { %3260 = vmatmul.msk.f32.gmra.mxu3 %vm252_vm0, %v1034_v14 }
  0x87   : > { %3300 = vmatmul.msk.f32.gmra.mxu0 %vm252_vm0, %v1344_v16  ;;  %v3332_v16 = vld [vmem:[%s4593_s1 + $0xa8] sm:$0xff] }
  0x88   : > { %1812 = vmatpush.msra.mxu1 %v3332_v16 }
  0x8b   : > { %3181 = vmatmul.msk.f32.gmra.mxu1 %vm252_vm0, %v177_v19  ;;  %3221 = vmatmul.msk.f32.gmra.mxu2 %vm252_vm0, %v1033_v11  ;;  %v3372_v11 = vld [vmem:[%s4593_s1 + $0xc8] sm:$0xff]  ;;  %v186_v19 = vld [vmem:[%s3571_s25 + $0x78] sm:$0xff] }
  0x8c   : > { %2122 = vmatpush.msra.mxu2 %v3372_v11  ;;  %v189_v11 = vld [vmem:[%s3571_s25 + $0x90] sm:$0xff] }
  0x8d   : > { %3261 = vmatmul.msk.f32.gmra.mxu3 %vm252_vm0, %v1035_v20 }
  0x8f   : > { %3301 = vmatmul.msk.f32.gmra.mxu0 %vm252_vm0, %v1345_v21 }
  0x90   : > { %v3768_v23 = vpop.f32.mrf.mxu1 }
  0x93   : > { %3182 = vmatmul.msk.f32.gmra.mxu1 %vm252_vm0, %v178_v24  ;;  %3222 = vmatmul.msk.f32.gmra.mxu2 %vm252_vm0, %v1034_v14  ;;  %v3412_v14 = vld [vmem:[%s4593_s1 + $0xe8] sm:$0xff] }
  0x94   : > { %v3774_v26 = vpop.f32.mrf.mxu0  ;;  %2432 = vmatpush.msra.mxu3 %v3412_v14  ;;  %v3452_v24 = vld [vmem:[%s4593_s1 + $0x108] sm:$0xff] }
  0x95   : > { %3262 = vmatmul.msk.f32.gmra.mxu3 %vm252_vm0, %v1036_v25  ;;  %2742 = vmatpush.msra.mxu0 %v3452_v24  ;;  %v1047_v14 = vld [vmem:[%s3571_s25 + $0xa2] sm:$0xff] }
  0x96   : > { %v3778_v28 = vpop.f32.mrf.mxu2 }
  0x97   : > { %3302 = vmatmul.msk.f32.gmra.mxu0 %vm252_vm0, %v1346_v27 }
  0x98   : > { %v3781_v29 = vpop.f32.mrf.mxu1  ;;  %v3783_v30 = vpop.f32.mrf.mxu3 }
  0x9b   : > { %3183 = vmatmul.msk.f32.gmra.mxu1 %vm252_vm0, %v179_v31  ;;  %3223 = vmatmul.msk.f32.gmra.mxu2 %vm252_vm0, %v1035_v20  ;;  %v1044_v20 = vld [vmem:[%s3571_s25 + $0x8a] sm:$0xff] }
  0x9c   : > { %v3789_v33 = vpop.f32.mrf.mxu0 }
  0x9d   : > { %3263 = vmatmul.msk.f32.gmra.mxu3 %vm252_vm0, %v1037_v32 }
  0x9e   : > { %v3793_v35 = vpop.f32.mrf.mxu2 }
  0x9f   : > { %3303 = vmatmul.msk.f32.gmra.mxu0 %vm252_vm0, %v1347_v34  ;;  %v1045_v34 = vld [vmem:[%s3571_s25 + $0x92] sm:$0xff] }
  0xa0   : > { %v3796_v36 = vpop.f32.mrf.mxu1  ;;  %v3798_v37 = vpop.f32.mrf.mxu3 }
  0xa3   : > { %3184 = vmatmul.msk.f32.gmra.mxu1 %vm252_vm0, %v180_v38  ;;  %3224 = vmatmul.msk.f32.gmra.mxu2 %vm252_vm0, %v1036_v25 }
  0xa4   : > { %v3804_v40 = vpop.f32.mrf.mxu0 }
  0xa5   : > { %3264 = vmatmul.msk.f32.gmra.mxu3 %vm252_vm0, %v1038_v39 }
  0xa6   : > { %v3808_v42 = vpop.f32.mrf.mxu2 }
  0xa7   : > { %3304 = vmatmul.msk.f32.gmra.mxu0 %vm252_vm0, %v1348_v41 }
  0xa8   : > { %v3811_v43 = vpop.f32.mrf.mxu1  ;;  %v3813_v44 = vpop.f32.mrf.mxu3 }
  0xab   : > { %3185 = vmatmul.msk.f32.gmra.mxu1 %vm252_vm0, %v181_v45  ;;  %3225 = vmatmul.msk.f32.gmra.mxu2 %vm252_vm0, %v1037_v32  ;;  %v187_v32 = vld [vmem:[%s3571_s25 + $0x80] sm:$0xff] }
  0xac   : > { %v3819_v47 = vpop.f32.mrf.mxu0 }
  0xad   : > { %3265 = vmatmul.msk.f32.gmra.mxu3 %vm252_vm0, %v1039_v46 }
  0xae   : > { %v3823_v49 = vpop.f32.mrf.mxu2 }
  0xaf   : > { %3305 = vmatmul.msk.f32.gmra.mxu0 %vm252_vm0, %v1349_v48 }
  0xb0   : > { %v3826_v50 = vpop.f32.mrf.mxu1  ;;  %v3828_v51 = vpop.f32.mrf.mxu3 }
  0xb3   : > { %3186 = vmatmul.msk.f32.gmra.mxu1 %vm252_vm0, %v182_v52  ;;  %3226 = vmatmul.msk.f32.gmra.mxu2 %vm252_vm0, %v1038_v39  ;;  %v1355_v39 = vld [vmem:[%s3571_s25 + $0x93] sm:$0xff] }
  0xb4   : > { %v3834_v54 = vpop.f32.mrf.mxu0 }
  0xb5   : > { %3266 = vmatmul.msk.f32.gmra.mxu3 %vm252_vm0, %v1040_v53 }
  0xb6   : > { %v3838_v56 = vpop.f32.mrf.mxu2 }
  0xb7   : > { %3306 = vmatmul.msk.f32.gmra.mxu0 %vm252_vm0, %v1350_v55 }
  0xb8   : > { %v3841_v57 = vpop.f32.mrf.mxu1  ;;  %v3843_v58 = vpop.f32.mrf.mxu3 }
  0xbb   : > { %3187 = vmatmul.msk.f32.gmra.mxu1 %vm252_vm0, %v183_v59  ;;  %3227 = vmatmul.msk.f32.gmra.mxu2 %vm252_vm0, %v1039_v46  ;;  %v1046_v59 = vld [vmem:[%s3571_s25 + $0x9a] sm:$0xff] }
  0xbc   : > { %v3849_v61 = vpop.f32.mrf.mxu0 }
  0xbd   : > { %3267 = vmatmul.msk.f32.gmra.mxu3 %vm252_vm0, %v1041_v60 }
  0xbe   : > { %v3853_v63 = vpop.f32.mrf.mxu2 }
  0xbf   : > { %3307 = vmatmul.msk.f32.gmra.mxu0 %vm252_vm0, %v1351_v62  ;;  %v1356_v62 = vld [vmem:[%s3571_s25 + $0x9b] sm:$0xff] }
  0xc0   : > { %v3856_v0 = vpop.f32.mrf.mxu1  ;;  %v3858_v1 = vpop.f32.mrf.mxu3 }
  0xc3   : > { %3188 = vmatmul.msk.f32.gmra.mxu1 %vm252_vm0, %v184_v2  ;;  %3228 = vmatmul.msk.f32.gmra.mxu2 %vm252_vm0, %v1040_v53  ;;  %v188_v53 = vld [vmem:[%s3571_s25 + $0x88] sm:$0xff] }
  0xc4   : > { %v3864_v4 = vpop.f32.mrf.mxu0 }
  0xc5   : > { %3268 = vmatmul.msk.f32.gmra.mxu3 %vm252_vm0, %v1042_v3 }
  0xc6   : > { %v3868_v6 = vpop.f32.mrf.mxu2 }
  0xc7   : > { %3308 = vmatmul.msk.f32.gmra.mxu0 %vm252_vm0, %v1352_v5 }
  0xc8   : > { %v3871_v7 = vpop.f32.mrf.mxu1  ;;  %v3873_v8 = vpop.f32.mrf.mxu3 }
  0xcb   : > { %3189 = vmatmul.msk.f32.gmra.mxu1 %vm252_vm0, %v185_v9  ;;  %3229 = vmatmul.msk.f32.gmra.mxu2 %vm252_vm0, %v1041_v60 }
  0xcc   : > { %v3882_v12 = vpop.f32.mrf.mxu0 }
  0xcd   : > { %3269 = vmatmul.msk.f32.gmra.mxu3 %vm252_vm0, %v1043_v10 }
  0xce   : > { %v3889_v15 = vpop.f32.mrf.mxu2 }
  0xcf   : > { %3309 = vmatmul.msk.f32.gmra.mxu0 %vm252_vm0, %v1353_v13 }
  0xd0   : > { %v3895_v17 = vpop.f32.mrf.mxu1  ;;  %v3897_v18 = vpop.f32.mrf.mxu3 }
  0xd3   : > { %3190 = vmatmul.msk.f32.gmra.mxu1 %vm252_vm0, %v186_v19  ;;  %3230 = vmatmul.msk.f32.gmra.mxu2 %vm252_vm0, %v1042_v3  ;;  %v1357_v19 = vld [vmem:[%s3571_s25 + $0xa3] sm:$0xff] }
  0xd4   : > { %v3903_v21 = vpop.f32.mrf.mxu0 }
  0xd5   : > { %3270 = vmatmul.msk.f32.gmra.mxu3 %vm252_vm0, %v1044_v20 }
  0xd6   : > { %v3910_v25 = vpop.f32.mrf.mxu2 }
  0xd7   : > { %3310 = vmatmul.msk.f32.gmra.mxu0 %vm252_vm0, %v1354_v22 }
  0xd8   : > { %v3913_v27 = vpop.f32.mrf.mxu3  ;;  %v611_v31 = vpop.f32.mrf.mxu1 }
  0xd9   : > { %v612_v41 = vadd.f32 %v611_v31, %v3774_v26 }
  0xdb   : > { %3191 = vmatmul.msk.f32.gmra.mxu1 %vm252_vm0, %v187_v32  ;;  %3231 = vmatmul.msk.f32.gmra.mxu2 %vm252_vm0, %v1043_v10 }
  0xdc   : > { %v1505_v38 = vpop.f32.mrf.mxu0 }
  0xdd   : > { %3271 = vmatmul.msk.f32.gmra.mxu3 %vm252_vm0, %v1045_v34 }
  0xde   : > { %v885_v45 = vpop.f32.mrf.mxu2 }
  0xdf   : > { %v993_v46 = vadd.f32 %v885_v45, %v612_v41  ;;  %3311 = vmatmul.msk.f32.gmra.mxu0 %vm252_vm0, %v1355_v39  ;;  %v1048_v41 = vld [vmem:[%s3571_s25 + $0xaa] sm:$0xff] }
  0xe0   : > { %v614_v48 = vpop.f32.mrf.mxu1  ;;  %v1195_v52 = vpop.f32.mrf.mxu3 }
  0xe1   : > { %v1303_v55 = vadd.f32 %v1195_v52, %v993_v46  ;;  %v615_v2 = vadd.f32 %v614_v48, %v3789_v33 }
  0xe3   : > { %v3925_v60 = vadd.f32 %v1505_v38, %v1303_v55  ;;  %3192 = vmatmul.msk.f32.gmra.mxu1 %vm252_vm0, %v188_v53  ;;  %3232 = vmatmul.msk.f32.gmra.mxu2 %vm252_vm0, %v1044_v20  ;;  %v190_v38 = vld [vmem:[%s3571_s25 + $0x98] sm:$0xff] }
  0xe4   : > { %v1508_v26 = vpop.f32.mrf.mxu0 }
  0xe5   : > { %3272 = vmatmul.msk.f32.gmra.mxu3 %vm252_vm0, %v1046_v59 }
  0xe6   : > { %v888_v3 = vpop.f32.mrf.mxu2 }
  0xe7   : > { %v994_v5 = vadd.f32 %v888_v3, %v615_v2  ;;  %3312 = vmatmul.msk.f32.gmra.mxu0 %vm252_vm0, %v1356_v62  ;;  %v1049_v2 = vld [vmem:[%s3571_s25 + $0xb2] sm:$0xff] }
  0xe8   : > { %v617_v9 = vpop.f32.mrf.mxu1  ;;  %v1198_v10 = vpop.f32.mrf.mxu3 }
  0xe9   : > { %v1304_v13 = vadd.f32 %v1198_v10, %v994_v5  ;;  %v618_v20 = vadd.f32 %v617_v9, %v3804_v40 }
  0xeb   : > { %v3935_v16 = vadd.f32 %v1508_v26, %v1304_v13  ;;  %3193 = vmatmul.msk.f32.gmra.mxu1 %vm252_vm0, %v189_v11  ;;  %3233 = vmatmul.msk.f32.gmra.mxu2 %vm252_vm0, %v1045_v34  ;;  %v1358_v34 = vld [vmem:[%s3571_s25 + $0xab] sm:$0xff]  ;;  %v191_v26 = vld [vmem:[%s3571_s25 + $0xa0] sm:$0xff] }
  0xec   : > { %v1511_v33 = vpop.f32.mrf.mxu0 }
  0xed   : > { %3273 = vmatmul.msk.f32.gmra.mxu3 %vm252_vm0, %v1047_v14 }
  0xee   : > { %v891_v22 = vpop.f32.mrf.mxu2 }
  0xef   : > { %v995_v24 = vadd.f32 %v891_v22, %v618_v20  ;;  %3313 = vmatmul.msk.f32.gmra.mxu0 %vm252_vm0, %v1357_v19  ;;  %v1050_v20 = vld [vmem:[%s3571_s25 + $0xba] sm:$0xff] }
  0xf0   : > { %v620_v31 = vpop.f32.mrf.mxu1  ;;  %v1201_v32 = vpop.f32.mrf.mxu3 }
  0xf1   : > { %v1305_v39 = vadd.f32 %v1201_v32, %v995_v24  ;;  %v621_v46 = vadd.f32 %v620_v31, %v3819_v47 }
  0xf3   : > { %v3945_v45 = vadd.f32 %v1511_v33, %v1305_v39  ;;  %3194 = vmatmul.msk.f32.gmra.mxu1 %vm252_vm0, %v190_v38  ;;  %3234 = vmatmul.msk.f32.gmra.mxu2 %vm252_vm0, %v1046_v59  ;;  %v1359_v59 = vld [vmem:[%s3571_s25 + $0xb3] sm:$0xff]  ;;  %v192_v33 = vld [vmem:[%s3571_s25 + $0xa8] sm:$0xff] }
  0xf4   : > { %v1514_v40 = vpop.f32.mrf.mxu0 }
  0xf5   : > { %3274 = vmatmul.msk.f32.gmra.mxu3 %vm252_vm0, %v1048_v41 }
  0xf6   : > { %v894_v48 = vpop.f32.mrf.mxu2 }
  0xf7   : > { %v996_v52 = vadd.f32 %v894_v48, %v621_v46  ;;  %3314 = vmatmul.msk.f32.gmra.mxu0 %vm252_vm0, %v1358_v34  ;;  %v1051_v46 = vld [vmem:[%s3571_s25 + $0xc2] sm:$0xff] }
  0xf8   : > { %v623_v53 = vpop.f32.mrf.mxu1  ;;  %v1204_v55 = vpop.f32.mrf.mxu3 }
  0xf9   : > { %v1306_v62 = vadd.f32 %v1204_v55, %v996_v52  ;;  %v624_v5 = vadd.f32 %v623_v53, %v3834_v54 }
  0xfb   : > { %v3955_v3 = vadd.f32 %v1514_v40, %v1306_v62  ;;  %3195 = vmatmul.msk.f32.gmra.mxu1 %vm252_vm0, %v191_v26  ;;  %3235 = vmatmul.msk.f32.gmra.mxu2 %vm252_vm0, %v1047_v14  ;;  %v1360_v14 = vld [vmem:[%s3571_s25 + $0xbb] sm:$0xff]  ;;  %v193_v40 = vld [vmem:[%s3571_s25 + $0xb0] sm:$0xff] }
  0xfc   : > { %v1517_v47 = vpop.f32.mrf.mxu0 }
  0xfd   : > { %3275 = vmatmul.msk.f32.gmra.mxu3 %vm252_vm0, %v1049_v2 }
  0xfe   : > { %v897_v9 = vpop.f32.mrf.mxu2 }
  0xff   : > { %v997_v10 = vadd.f32 %v897_v9, %v624_v5  ;;  %3315 = vmatmul.msk.f32.gmra.mxu0 %vm252_vm0, %v1359_v59  ;;  %v1052_v5 = vld [vmem:[%s3571_s25 + $0xca] sm:$0xff] }
 0x100   : > { %v626_v11 = vpop.f32.mrf.mxu1  ;;  %v1207_v13 = vpop.f32.mrf.mxu3 }
 0x101   : > { %v1307_v19 = vadd.f32 %v1207_v13, %v997_v10  ;;  %v627_v24 = vadd.f32 %v626_v11, %v3849_v61  ;;  %v1362_v10 = vld [vmem:[%s3571_s25 + $0xcb] sm:$0xff]  ;;  %v3411_v13 = vld [vmem:[%s4593_s1 + $0xe0] sm:$0xff] }
 0x102   : > { %2433 = vmatpush.msra.mxu3 %v3411_v13  ;;  %v197_v13 = vld [vmem:[%s3571_s25 + $0xd0] sm:$0xff] }
 0x103   : > { %v3965_v22 = vadd.f32 %v1517_v47, %v1307_v19  ;;  %3196 = vmatmul.msk.f32.gmra.mxu1 %vm252_vm0, %v192_v33  ;;  %3236 = vmatmul.msk.f32.gmra.mxu2 %vm252_vm0, %v1048_v41  ;;  %v1361_v41 = vld [vmem:[%s3571_s25 + $0xc3] sm:$0xff]  ;;  %v194_v47 = vld [vmem:[%s3571_s25 + $0xb8] sm:$0xff] }
 0x104   : > { %v1520_v54 = vpop.f32.mrf.mxu0 }
 0x105   : > { %3276 = vmatmul.msk.f32.gmra.mxu3 %vm252_vm0, %v1050_v20 }
 0x106   : > { %v900_v31 = vpop.f32.mrf.mxu2 }
 0x107   : > { %v998_v32 = vadd.f32 %v900_v31, %v627_v24  ;;  %3316 = vmatmul.msk.f32.gmra.mxu0 %vm252_vm0, %v1360_v14  ;;  %v195_v24 = vld [vmem:[%s3571_s25 + $0xc0] sm:$0xff]  ;;  %v1053_v31 = vld [vmem:[%s3571_s25 + $0xd2] sm:$0xff] }
 0x108   : > { %v629_v38 = vpop.f32.mrf.mxu1  ;;  %v1210_v39 = vpop.f32.mrf.mxu3 }
 0x109   : > { %v1308_v34 = vadd.f32 %v1210_v39, %v998_v32  ;;  %v630_v52 = vadd.f32 %v629_v38, %v3864_v4  ;;  %v3371_v4 = vld [vmem:[%s4593_s1 + $0xc0] sm:$0xff]  ;;  %v1363_v39 = vld [vmem:[%s3571_s25 + $0xd3] sm:$0xff] }
 0x10a   : > { %2123 = vmatpush.msra.mxu2 %v3371_v4 }
 0x10b   : > { %v3975_v48 = vadd.f32 %v1520_v54, %v1308_v34  ;;  %3197 = vmatmul.msk.f32.gmra.mxu1 %vm252_vm0, %v193_v40  ;;  %3237 = vmatmul.msk.f32.gmra.mxu2 %vm252_vm0, %v1049_v2  ;;  %v3451_v34 = vld [vmem:[%s4593_s1 + $0x100] sm:$0xff] }
 0x10c   : > { %v1523_v61 = vpop.f32.mrf.mxu0  ;;  %2743 = vmatpush.msra.mxu0 %v3451_v34  ;;  %v1056_v34 = vld [vmem:[%s3571_s25 + $0xea] sm:$0xff] }
 0x10d   : > { %3277 = vmatmul.msk.f32.gmra.mxu3 %vm252_vm0, %v1051_v46 }
 0x10e   : > { %v903_v53 = vpop.f32.mrf.mxu2 }
 0x10f   : > { %v999_v55 = vadd.f32 %v903_v53, %v630_v52  ;;  %3317 = vmatmul.msk.f32.gmra.mxu0 %vm252_vm0, %v1361_v41 }
 0x110   : > { %v632_v26 = vpop.f32.mrf.mxu1  ;;  %v1213_v62 = vpop.f32.mrf.mxu3 }
 0x111   : > { %v1309_v59 = vadd.f32 %v1213_v62, %v999_v55  ;;  %v633_v11 = vadd.f32 %v632_v26, %v3882_v12  ;;  %v1054_v26 = vld [vmem:[%s3571_s25 + $0xda] sm:$0xff] }
 0x113   : > { %v3985_v9 = vadd.f32 %v1523_v61, %v1309_v59  ;;  %3198 = vmatmul.msk.f32.gmra.mxu1 %vm252_vm0, %v194_v47  ;;  %3238 = vmatmul.msk.f32.gmra.mxu2 %vm252_vm0, %v1050_v20  ;;  %v3331_v20 = vld [vmem:[%s4593_s1 + $0xa0] sm:$0xff] }
 0x114   : > { %v1526_v2 = vpop.f32.mrf.mxu0  ;;  %1813 = vmatpush.msra.mxu1 %v3331_v20  ;;  %v1364_v47 = vld [vmem:[%s3571_s25 + $0xdb] sm:$0xff] }
 0x115   : > { %3278 = vmatmul.msk.f32.gmra.mxu3 %vm252_vm0, %v1052_v5 }
 0x116   : > { %v906_v33 = vpop.f32.mrf.mxu2 }
 0x117   : > { %v1000_v19 = vadd.f32 %v906_v33, %v633_v11  ;;  %3318 = vmatmul.msk.f32.gmra.mxu0 %vm252_vm0, %v1362_v10 }
 0x118   : > { %v635_v54 = vpop.f32.mrf.mxu1  ;;  %v1216_v14 = vpop.f32.mrf.mxu3 }
 0x119   : > { %v1310_v12 = vadd.f32 %v1216_v14, %v1000_v19  ;;  %v636_v40 = vadd.f32 %v635_v54, %v3903_v21  ;;  %v1055_v19 = vld [vmem:[%s3571_s25 + $0xe2] sm:$0xff] }
 0x11b   : > { %v4004_v32 = vadd.f32 %v1526_v2, %v1310_v12  ;;  %3199 = vmatmul.msk.f32.gmra.mxu1 %vm252_vm0, %v195_v24  ;;  %3239 = vmatmul.msk.f32.gmra.mxu2 %vm252_vm0, %v1051_v46  ;;  %v196_v46 = vld [vmem:[%s3571_s25 + $0xc8] sm:$0xff] }
 0x11c   : > { %v1529_v38 = vpop.f32.mrf.mxu0 }
 0x11d   : > { %3279 = vmatmul.msk.f32.gmra.mxu3 %vm252_vm0, %v1053_v31 }
 0x11e   : > { %v909_v61 = vpop.f32.mrf.mxu2 }
 0x11f   : > { %v1001_v41 = vadd.f32 %v909_v61, %v636_v40  ;;  %3319 = vmatmul.msk.f32.gmra.mxu0 %vm252_vm0, %v1363_v39  ;;  %v198_v39 = vld [vmem:[%s3571_s25 + $0xd8] sm:$0xff] }
 0x120   : > { %v638_v52 = vpop.f32.mrf.mxu1  ;;  %v1219_v53 = vpop.f32.mrf.mxu3 }
 0x121   : > { %v1311_v55 = vadd.f32 %v1219_v53, %v1001_v41  ;;  %v639_v59 = vadd.f32 %v638_v52, %v3768_v23 }
 0x123   : > { %v4017_v21 = vadd.f32 %v1529_v38, %v1311_v55  ;;  %3200 = vmatmul.msk.f32.gmra.mxu1 %vm252_vm0, %v196_v46  ;;  %3240 = vmatmul.msk.f32.gmra.mxu2 %vm252_vm0, %v1052_v5  ;;  %v1365_v5 = vld [vmem:[%s3571_s25 + $0xe3] sm:$0xff] }
 0x124   : > { %v1532_v62 = vpop.f32.mrf.mxu0 }
 0x125   : > { %3280 = vmatmul.msk.f32.gmra.mxu3 %vm252_vm0, %v1054_v26 }
 0x126   : > { %v912_v4 = vpop.f32.mrf.mxu2 }
 0x127   : > { %v1002_v2 = vadd.f32 %v912_v4, %v639_v59  ;;  %3320 = vmatmul.msk.f32.gmra.mxu0 %vm252_vm0, %v1364_v47  ;;  %v1057_v59 = vld [vmem:[%s3571_s25 + $0xf2] sm:$0xff] }
 0x128   : > { %v641_v10 = vpop.f32.mrf.mxu1  ;;  %v1222_v11 = vpop.f32.mrf.mxu3 }
 0x129   : > { %v1312_v33 = vadd.f32 %v1222_v11, %v1002_v2  ;;  %v642_v54 = vadd.f32 %v641_v10, %v3781_v29 }
 0x12b   : > { %v4027_v20 = vadd.f32 %v1532_v62, %v1312_v33  ;;  %3201 = vmatmul.msk.f32.gmra.mxu1 %vm252_vm0, %v197_v13  ;;  %3241 = vmatmul.msk.f32.gmra.mxu2 %vm252_vm0, %v1053_v31  ;;  %v1366_v31 = vld [vmem:[%s3571_s25 + $0xeb] sm:$0xff]  ;;  %v199_v62 = vld [vmem:[%s3571_s25 + $0xe0] sm:$0xff] }
 0x12c   : > { %v1535_v23 = vpop.f32.mrf.mxu0 }
 0x12d   : > { %3281 = vmatmul.msk.f32.gmra.mxu3 %vm252_vm0, %v1055_v19 }
 0x12e   : > { %v915_v14 = vpop.f32.mrf.mxu2 }
 0x12f   : > { %v1003_v24 = vadd.f32 %v915_v14, %v642_v54  ;;  %3321 = vmatmul.msk.f32.gmra.mxu0 %vm252_vm0, %v1365_v5  ;;  %v1058_v54 = vld [vmem:[%s3571_s25 + $0xfa] sm:$0xff] }
 0x130   : > { %v644_v12 = vpop.f32.mrf.mxu1  ;;  %v1225_v38 = vpop.f32.mrf.mxu3 }
 0x131   : > { %v1313_v40 = vadd.f32 %v1225_v38, %v1003_v24  ;;  %v645_v41 = vadd.f32 %v644_v12, %v3796_v36 }
 0x133   : > { %v4037_v61 = vadd.f32 %v1535_v23, %v1313_v40  ;;  %3202 = vmatmul.msk.f32.gmra.mxu1 %vm252_vm0, %v198_v39  ;;  %3242 = vmatmul.msk.f32.gmra.mxu2 %vm252_vm0, %v1054_v26  ;;  %v1367_v26 = vld [vmem:[%s3571_s25 + $0xf3] sm:$0xff]  ;;  %v200_v23 = vld [vmem:[%s3571_s25 + $0xe8] sm:$0xff] }
 0x134   : > { %v1538_v29 = vpop.f32.mrf.mxu0 }
 0x135   : > { %3282 = vmatmul.msk.f32.gmra.mxu3 %vm252_vm0, %v1056_v34 }
 0x136   : > { %v918_v52 = vpop.f32.mrf.mxu2 }
 0x137   : > { %v1004_v53 = vadd.f32 %v918_v52, %v645_v41  ;;  %3322 = vmatmul.msk.f32.gmra.mxu0 %vm252_vm0, %v1366_v31  ;;  %v1059_v41 = vld [vmem:[%s3571_s25 + $0x102] sm:$0xff] }
 0x138   : > { %v647_v46 = vpop.f32.mrf.mxu1  ;;  %v1228_v55 = vpop.f32.mrf.mxu3 }
 0x139   : > { %v1314_v47 = vadd.f32 %v1228_v55, %v1004_v53  ;;  %v648_v2 = vadd.f32 %v647_v46, %v3811_v43 }
 0x13b   : > { %v4047_v4 = vadd.f32 %v1538_v29, %v1314_v47  ;;  %3203 = vmatmul.msk.f32.gmra.mxu1 %vm252_vm0, %v199_v62  ;;  %3243 = vmatmul.msk.f32.gmra.mxu2 %vm252_vm0, %v1055_v19  ;;  %v1368_v19 = vld [vmem:[%s3571_s25 + $0xfb] sm:$0xff]  ;;  %v201_v29 = vld [vmem:[%s3571_s25 + $0xf0] sm:$0xff] }
 0x13c   : > { %v1541_v36 = vpop.f32.mrf.mxu0 }
 0x13d   : > { %3283 = vmatmul.msk.f32.gmra.mxu3 %vm252_vm0, %v1057_v59 }
 0x13e   : > { %v921_v10 = vpop.f32.mrf.mxu2 }
 0x13f   : > { %v1005_v11 = vadd.f32 %v921_v10, %v648_v2  ;;  %3323 = vmatmul.msk.f32.gmra.mxu0 %vm252_vm0, %v1367_v26  ;;  %v1060_v2 = vld [vmem:[%s3571_s25 + $0x10a] sm:$0xff] }
 0x140   : > { %v650_v13 = vpop.f32.mrf.mxu1  ;;  %v1231_v33 = vpop.f32.mrf.mxu3 }
 0x141   : > { %v1315_v5 = vadd.f32 %v1231_v33, %v1005_v11  ;;  %v651_v24 = vadd.f32 %v650_v13, %v3826_v50 }
 0x143   : > { %v4057_v14 = vadd.f32 %v1541_v36, %v1315_v5  ;;  %3204 = vmatmul.msk.f32.gmra.mxu1 %vm252_vm0, %v200_v23  ;;  %3244 = vmatmul.msk.f32.gmra.mxu2 %vm252_vm0, %v1056_v34  ;;  %v1369_v34 = vld [vmem:[%s3571_s25 + $0x103] sm:$0xff]  ;;  %v202_v36 = vld [vmem:[%s3571_s25 + $0xf8] sm:$0xff] }
 0x144   : > { %v1544_v43 = vpop.f32.mrf.mxu0 }
 0x145   : > { %3284 = vmatmul.msk.f32.gmra.mxu3 %vm252_vm0, %v1058_v54 }
 0x146   : > { %v924_v12 = vpop.f32.mrf.mxu2 }
 0x147   : > { %v1006_v38 = vadd.f32 %v924_v12, %v651_v24  ;;  %3324 = vmatmul.msk.f32.gmra.mxu0 %vm252_vm0, %v1368_v19  ;;  %v1061_v24 = vld [vmem:[%s3571_s25 + $0x112] sm:$0xff] }
 0x148   : > { %v653_v39 = vpop.f32.mrf.mxu1  ;;  %v1234_v40 = vpop.f32.mrf.mxu3 }
 0x149   : > { %v1316_v31 = vadd.f32 %v1234_v40, %v1006_v38  ;;  %v654_v53 = vadd.f32 %v653_v39, %v3841_v57 }
 0x14b   : > { %v4067_v52 = vadd.f32 %v1544_v43, %v1316_v31  ;;  %3205 = vmatmul.msk.f32.gmra.mxu1 %vm252_vm0, %v201_v29  ;;  %3245 = vmatmul.msk.f32.gmra.mxu2 %vm252_vm0, %v1057_v59  ;;  %v1370_v59 = vld [vmem:[%s3571_s25 + $0x10b] sm:$0xff]  ;;  %v203_v43 = vld [vmem:[%s3571_s25 + $0x100] sm:$0xff] }
 0x14c   : > { %v1547_v50 = vpop.f32.mrf.mxu0 }
 0x14d   : > { %3285 = vmatmul.msk.f32.gmra.mxu3 %vm252_vm0, %v1059_v41 }
 0x14e   : > { %v927_v46 = vpop.f32.mrf.mxu2 }
 0x14f   : > { %v1007_v55 = vadd.f32 %v927_v46, %v654_v53  ;;  %3325 = vmatmul.msk.f32.gmra.mxu0 %vm252_vm0, %v1369_v34  ;;  %v1062_v53 = vld [vmem:[%s3571_s25 + $0x11a] sm:$0xff] }
 0x150   : > { %v656_v62 = vpop.f32.mrf.mxu1  ;;  %v1237_v47 = vpop.f32.mrf.mxu3 }
 0x151   : > { %v1317_v26 = vadd.f32 %v1237_v47, %v1007_v55  ;;  %v657_v11 = vadd.f32 %v656_v62, %v3856_v0 }
 0x153   : > { %v4077_v10 = vadd.f32 %v1547_v50, %v1317_v26  ;;  %3206 = vmatmul.msk.f32.gmra.mxu1 %vm252_vm0, %v202_v36  ;;  %3246 = vmatmul.msk.f32.gmra.mxu2 %vm252_vm0, %v1058_v54  ;;  %v1371_v54 = vld [vmem:[%s3571_s25 + $0x113] sm:$0xff]  ;;  %v204_v50 = vld [vmem:[%s3571_s25 + $0x108] sm:$0xff] }
 0x154   : > { %v1550_v57 = vpop.f32.mrf.mxu0 }
 0x155   : > { %3286 = vmatmul.msk.f32.gmra.mxu3 %vm252_vm0, %v1060_v2 }
 0x156   : > { %v930_v13 = vpop.f32.mrf.mxu2 }
 0x157   : > { %v1008_v33 = vadd.f32 %v930_v13, %v657_v11  ;;  %3326 = vmatmul.msk.f32.gmra.mxu0 %vm252_vm0, %v1370_v59  ;;  %v1063_v11 = vld [vmem:[%s3571_s25 + $0x122] sm:$0xff] }
 0x158   : > { %v659_v23 = vpop.f32.mrf.mxu1  ;;  %v1240_v5 = vpop.f32.mrf.mxu3 }
 0x159   : > { %v1318_v19 = vadd.f32 %v1240_v5, %v1008_v33  ;;  %v660_v38 = vadd.f32 %v659_v23, %v3871_v7 }
 0x15b   : > { %v4087_v12 = vadd.f32 %v1550_v57, %v1318_v19  ;;  %3207 = vmatmul.msk.f32.gmra.mxu1 %vm252_vm0, %v203_v43  ;;  %3247 = vmatmul.msk.f32.gmra.mxu2 %vm252_vm0, %v1059_v41  ;;  %v1372_v41 = vld [vmem:[%s3571_s25 + $0x11b] sm:$0xff]  ;;  %v205_v57 = vld [vmem:[%s3571_s25 + $0x110] sm:$0xff] }
 0x15c   : > { %v1553_v0 = vpop.f32.mrf.mxu0 }
 0x15d   : > { %3287 = vmatmul.msk.f32.gmra.mxu3 %vm252_vm0, %v1061_v24 }
 0x15e   : > { %v933_v39 = vpop.f32.mrf.mxu2 }
 0x15f   : > { %v1009_v40 = vadd.f32 %v933_v39, %v660_v38  ;;  %3327 = vmatmul.msk.f32.gmra.mxu0 %vm252_vm0, %v1371_v54  ;;  %v1064_v38 = vld [vmem:[%s3571_s25 + $0x12a] sm:$0xff] }
 0x160   : > { %v662_v29 = vpop.f32.mrf.mxu1  ;;  %v1243_v31 = vpop.f32.mrf.mxu3  ;;  %v1374_v39 = vld [vmem:[%s3571_s25 + $0x12b] sm:$0xff] }
 0x161   : > { %v1319_v34 = vadd.f32 %v1243_v31, %v1009_v40  ;;  %v663_v55 = vadd.f32 %v662_v29, %v3895_v17 }
 0x163   : > { %v4097_v46 = vadd.f32 %v1553_v0, %v1319_v34  ;;  %3208 = vmatmul.msk.f32.gmra.mxu1 %vm252_vm0, %v204_v50  ;;  %3248 = vmatmul.msk.f32.gmra.mxu2 %vm252_vm0, %v1060_v2  ;;  %v1373_v2 = vld [vmem:[%s3571_s25 + $0x123] sm:$0xff]  ;;  %v206_v0 = vld [vmem:[%s3571_s25 + $0x118] sm:$0xff] }
 0x164   : > { %v1556_v7 = vpop.f32.mrf.mxu0 }
 0x165   : > { %3288 = vmatmul.msk.f32.gmra.mxu3 %vm252_vm0, %v1062_v53 }
 0x166   : > { %v936_v62 = vpop.f32.mrf.mxu2 }
 0x167   : > { %v1010_v47 = vadd.f32 %v936_v62, %v663_v55  ;;  %3328 = vmatmul.msk.f32.gmra.mxu0 %vm252_vm0, %v1372_v41  ;;  %v1959_v41 = vld [vmem:[%s3571_s25 + $0x24] sm:$0xff] }
 0x168   : > { %v665_v36 = vpop.f32.mrf.mxu1  ;;  %v1246_v26 = vpop.f32.mrf.mxu3  ;;  %v2269_v62 = vld [vmem:[%s3571_s25 + $0x25] sm:$0xff] }
 0x169   : > { %v1320_v59 = vadd.f32 %v1246_v26, %v1010_v47  ;;  %v666_v33 = vadd.f32 %v665_v36, %v3778_v28  ;;  %v2579_v47 = vld [vmem:[%s3571_s25 + $0x26] sm:$0xff] }
 0x16b   : > { %v4107_v13 = vadd.f32 %v1556_v7, %v1320_v59  ;;  %3209 = vmatmul.msk.f32.gmra.mxu1 %vm252_vm0, %v205_v57  ;;  %3249 = vmatmul.msk.f32.gmra.mxu2 %vm252_vm0, %v1061_v24  ;;  %v1649_v7 = vld [vmem:[%s3571_s25 + $0x14] sm:$0xff] }
 0x16c   : > { %v1559_v17 = vpop.f32.mrf.mxu0 }
 0x16d   : > { %3289 = vmatmul.msk.f32.gmra.mxu3 %vm252_vm0, %v1063_v11 }
 0x16e   : > { %v939_v23 = vpop.f32.mrf.mxu2 }
 0x16f   : > { %v1011_v5 = vadd.f32 %v939_v23, %v666_v33  ;;  %3329 = vmatmul.msk.f32.gmra.mxu0 %vm252_vm0, %v1373_v2  ;;  %v1960_v2 = vld [vmem:[%s3571_s25 + $0x2c] sm:$0xff] }
 0x170   : > { %v668_v43 = vpop.f32.mrf.mxu1  ;;  %v1249_v19 = vpop.f32.mrf.mxu3  ;;  %v2270_v23 = vld [vmem:[%s3571_s25 + $0x2d] sm:$0xff] }
 0x171   : > { %v1321_v54 = vadd.f32 %v1249_v19, %v1011_v5  ;;  %v669_v40 = vadd.f32 %v668_v43, %v3793_v35  ;;  %v2580_v43 = vld [vmem:[%s3571_s25 + $0x2e] sm:$0xff] }
 0x173   : > { %v4117_v24 = vadd.f32 %v1559_v17, %v1321_v54  ;;  %3210 = vmatmul.msk.f32.gmra.mxu1 %vm252_vm0, %v206_v0  ;;  %3250 = vmatmul.msk.f32.gmra.mxu2 %vm252_vm0, %v1062_v53  ;;  %v1650_v17 = vld [vmem:[%s3571_s25 + $0x1c] sm:$0xff] }
 0x174   : > { %v1562_v28 = vpop.f32.mrf.mxu0 }
 0x175   : > { %3290 = vmatmul.msk.f32.gmra.mxu3 %vm252_vm0, %v1064_v38 }
 0x176   : > { %v942_v29 = vpop.f32.mrf.mxu2 }
 0x177   : > { %v1012_v31 = vadd.f32 %v942_v29, %v669_v40  ;;  %3330 = vmatmul.msk.f32.gmra.mxu0 %vm252_vm0, %v1374_v39  ;;  %v1961_v39 = vld [vmem:[%s3571_s25 + $0x34] sm:$0xff] }
 0x178   : > { %v671_v50 = vpop.f32.mrf.mxu1  ;;  %v1252_v34 = vpop.f32.mrf.mxu3  ;;  %v2271_v29 = vld [vmem:[%s3571_s25 + $0x35] sm:$0xff] }
 0x179   : > { %v1322_v55 = vadd.f32 %v1252_v34, %v1012_v31  ;;  %v672_v36 = vadd.f32 %v671_v50, %v3808_v42  ;;  %v2581_v50 = vld [vmem:[%s3571_s25 + $0x36] sm:$0xff] }
 0x17b   : > { %v4128_v53 = vadd.f32 %v1562_v28, %v1322_v55  ;;  %3335 = vmatmul.msk.f32.vlgmr.msra.gmra.mxu1 %vm252_vm0, %v1649_v7  ;;  %3375 = vmatmul.msk.f32.vlgmr.msra.gmra.mxu2 %vm252_vm0, %v1959_v41 }
 0x17c   : > { %v1565_v35 = vpop.f32.mrf.mxu0 }
 0x17d   : > { %3415 = vmatmul.msk.f32.vlgmr.msra.gmra.mxu3 %vm252_vm0, %v2269_v62 }
 0x17e   : > { %v945_v26 = vpop.f32.mrf.mxu2 }
 0x17f   : > { %v1013_v57 = vadd.f32 %v945_v26, %v672_v36  ;;  %3455 = vmatmul.msk.f32.vlgmr.msra.gmra.mxu0 %vm252_vm0, %v2579_v47  ;;  %v1962_v47 = vld [vmem:[%s3571_s25 + $0x3c] sm:$0xff] }
 0x180   : > { %v674_v59 = vpop.f32.mrf.mxu1  ;;  %v1255_v11 = vpop.f32.mrf.mxu3 }
 0x181   : > { %v1323_v33 = vadd.f32 %v1255_v11, %v1013_v57  ;;  %v675_v19 = vadd.f32 %v674_v59, %v3823_v49  ;;  %v2582_v57 = vld [vmem:[%s3571_s25 + $0x3e] sm:$0xff] }
 0x183   : > { %v4139_v5 = vadd.f32 %v1565_v35, %v1323_v33  ;;  %3336 = vmatmul.msk.f32.gmra.mxu1 %vm252_vm0, %v1650_v17  ;;  %3376 = vmatmul.msk.f32.gmra.mxu2 %vm252_vm0, %v1960_v2 }
 0x184   : > { %v1568_v42 = vpop.f32.mrf.mxu0 }
 0x185   : > { %3416 = vmatmul.msk.f32.gmra.mxu3 %vm252_vm0, %v2270_v23 }
 0x186   : > { %v948_v0 = vpop.f32.mrf.mxu2 }
 0x187   : > { %v1014_v54 = vadd.f32 %v948_v0, %v675_v19  ;;  %3456 = vmatmul.msk.f32.gmra.mxu0 %vm252_vm0, %v2580_v43  ;;  %v2583_v0 = vld [vmem:[%s3571_s25 + $0x46] sm:$0xff] }
 0x188   : > { %v677_v38 = vpop.f32.mrf.mxu1  ;;  %v1258_v28 = vpop.f32.mrf.mxu3 }
 0x189   : > { %v1324_v40 = vadd.f32 %v1258_v28, %v1014_v54  ;;  %v678_v34 = vadd.f32 %v677_v38, %v3838_v56 }
 0x18b   : > { %v4149_v31 = vadd.f32 %v1568_v42, %v1324_v40  ;;  %3337 = vmatmul.msk.f32.gmra.mxu1 %vm252_vm0, %v1959_v41  ;;  %3377 = vmatmul.msk.f32.gmra.mxu2 %vm252_vm0, %v1961_v39  ;;  %v2272_v41 = vld [vmem:[%s3571_s25 + $0x3d] sm:$0xff] }
 0x18c   : > { %v1571_v49 = vpop.f32.mrf.mxu0  ;;  %v1963_v42 = vld [vmem:[%s3571_s25 + $0x44] sm:$0xff] }
 0x18d   : > { %3417 = vmatmul.msk.f32.gmra.mxu3 %vm252_vm0, %v2271_v29 }
 0x18e   : > { %v951_v7 = vpop.f32.mrf.mxu2 }
 0x18f   : > { %v1015_v55 = vadd.f32 %v951_v7, %v678_v34  ;;  %3457 = vmatmul.msk.f32.gmra.mxu0 %vm252_vm0, %v2581_v50  ;;  %v2584_v7 = vld [vmem:[%s3571_s25 + $0x4e] sm:$0xff] }
 0x190   : > { %v680_v62 = vpop.f32.mrf.mxu1  ;;  %v1261_v35 = vpop.f32.mrf.mxu3 }
 0x191   : > { %v1325_v36 = vadd.f32 %v1261_v35, %v1015_v55  ;;  %v681_v59 = vadd.f32 %v680_v62, %v3853_v63 }
 0x193   : > { %v4159_v26 = vadd.f32 %v1571_v49, %v1325_v36  ;;  %3338 = vmatmul.msk.f32.gmra.mxu1 %vm252_vm0, %v1960_v2  ;;  %3378 = vmatmul.msk.f32.gmra.mxu2 %vm252_vm0, %v1962_v47  ;;  %v2273_v2 = vld [vmem:[%s3571_s25 + $0x45] sm:$0xff] }
 0x194   : > { %v1574_v56 = vpop.f32.mrf.mxu0  ;;  %v1964_v49 = vld [vmem:[%s3571_s25 + $0x4c] sm:$0xff] }
 0x195   : > { %3418 = vmatmul.msk.f32.gmra.mxu3 %vm252_vm0, %v2272_v41 }
 0x196   : > { %v954_v11 = vpop.f32.mrf.mxu2 }
 0x197   : > { %v1016_v17 = vadd.f32 %v954_v11, %v681_v59  ;;  %3458 = vmatmul.msk.f32.gmra.mxu0 %vm252_vm0, %v2582_v57  ;;  %v2585_v11 = vld [vmem:[%s3571_s25 + $0x56] sm:$0xff] }
 0x198   : > { %v683_v33 = vpop.f32.mrf.mxu1  ;;  %v1264_v23 = vpop.f32.mrf.mxu3 }
 0x199   : > { %v1326_v43 = vadd.f32 %v1264_v23, %v1016_v17  ;;  %v684_v54 = vadd.f32 %v683_v33, %v3868_v6 }
 0x19b   : > { %v4169_v19 = vadd.f32 %v1574_v56, %v1326_v43  ;;  %3339 = vmatmul.msk.f32.gmra.mxu1 %vm252_vm0, %v1961_v39  ;;  %3379 = vmatmul.msk.f32.gmra.mxu2 %vm252_vm0, %v1963_v42  ;;  %v2274_v39 = vld [vmem:[%s3571_s25 + $0x4d] sm:$0xff] }
 0x19c   : > { %v1577_v63 = vpop.f32.mrf.mxu0  ;;  %v1965_v56 = vld [vmem:[%s3571_s25 + $0x54] sm:$0xff] }
 0x19d   : > { %3419 = vmatmul.msk.f32.gmra.mxu3 %vm252_vm0, %v2273_v2 }
 0x19e   : > { %v957_v38 = vpop.f32.mrf.mxu2 }
 0x19f   : > { %v1017_v28 = vadd.f32 %v957_v38, %v684_v54  ;;  %3459 = vmatmul.msk.f32.gmra.mxu0 %vm252_vm0, %v2583_v0  ;;  %v2586_v38 = vld [vmem:[%s3571_s25 + $0x5e] sm:$0xff] }
 0x1a0   : > { %v686_v40 = vpop.f32.mrf.mxu1  ;;  %v1267_v29 = vpop.f32.mrf.mxu3 }
 0x1a1   : > { %v1327_v50 = vadd.f32 %v1267_v29, %v1017_v28  ;;  %v687_v55 = vadd.f32 %v686_v40, %v3889_v15 }
 0x1a3   : > { %v4179_v34 = vadd.f32 %v1577_v63, %v1327_v50  ;;  %3340 = vmatmul.msk.f32.gmra.mxu1 %vm252_vm0, %v1962_v47  ;;  %3380 = vmatmul.msk.f32.gmra.mxu2 %vm252_vm0, %v1964_v49  ;;  %v2275_v47 = vld [vmem:[%s3571_s25 + $0x55] sm:$0xff] }
 0x1a4   : > { %v1580_v6 = vpop.f32.mrf.mxu0  ;;  %v1966_v63 = vld [vmem:[%s3571_s25 + $0x5c] sm:$0xff] }
 0x1a5   : > { %3420 = vmatmul.msk.f32.gmra.mxu3 %vm252_vm0, %v2274_v39 }
 0x1a6   : > { %v960_v62 = vpop.f32.mrf.mxu2 }
 0x1a7   : > { %v1018_v35 = vadd.f32 %v960_v62, %v687_v55  ;;  %3460 = vmatmul.msk.f32.gmra.mxu0 %vm252_vm0, %v2584_v7  ;;  %v2587_v62 = vld [vmem:[%s3571_s25 + $0x66] sm:$0xff] }
 0x1a8   : > { %v689_v36 = vpop.f32.mrf.mxu1  ;;  %v1270_v41 = vpop.f32.mrf.mxu3 }
 0x1a9   : > { %v1328_v57 = vadd.f32 %v1270_v41, %v1018_v35  ;;  %v690_v17 = vadd.f32 %v689_v36, %v3910_v25 }
 0x1ab   : > { %v4189_v59 = vadd.f32 %v1580_v6, %v1328_v57  ;;  %3341 = vmatmul.msk.f32.gmra.mxu1 %vm252_vm0, %v1963_v42  ;;  %3381 = vmatmul.msk.f32.gmra.mxu2 %vm252_vm0, %v1965_v56  ;;  %v2276_v42 = vld [vmem:[%s3571_s25 + $0x5d] sm:$0xff] }
 0x1ac   : > { %v1583_v15 = vpop.f32.mrf.mxu0  ;;  %v1967_v6 = vld [vmem:[%s3571_s25 + $0x64] sm:$0xff] }
 0x1ad   : > { %3421 = vmatmul.msk.f32.gmra.mxu3 %vm252_vm0, %v2275_v47 }
 0x1ae   : > { %v963_v33 = vpop.f32.mrf.mxu2 }
 0x1af   : > { %v1019_v23 = vadd.f32 %v963_v33, %v690_v17  ;;  %3461 = vmatmul.msk.f32.gmra.mxu0 %vm252_vm0, %v2585_v11  ;;  %v2588_v33 = vld [vmem:[%s3571_s25 + $0x6e] sm:$0xff] }
 0x1b0   : > { %v692_v43 = vpop.f32.mrf.mxu1  ;;  %v1273_v2 = vpop.f32.mrf.mxu3 }
 0x1b1   : > { %v1329_v0 = vadd.f32 %v1273_v2, %v1019_v23  ;;  %v693_v28 = vadd.f32 %v692_v43, %v3783_v30 }
 0x1b3   : > { %v4199_v54 = vadd.f32 %v1583_v15, %v1329_v0  ;;  %3342 = vmatmul.msk.f32.gmra.mxu1 %vm252_vm0, %v1964_v49  ;;  %3382 = vmatmul.msk.f32.gmra.mxu2 %vm252_vm0, %v1966_v63  ;;  %v2277_v49 = vld [vmem:[%s3571_s25 + $0x65] sm:$0xff] }
 0x1b4   : > { %v1586_v25 = vpop.f32.mrf.mxu0  ;;  %v1968_v15 = vld [vmem:[%s3571_s25 + $0x6c] sm:$0xff] }
 0x1b5   : > { %3422 = vmatmul.msk.f32.gmra.mxu3 %vm252_vm0, %v2276_v42 }
 0x1b6   : > { %v966_v40 = vpop.f32.mrf.mxu2 }
 0x1b7   : > { %v1020_v29 = vadd.f32 %v966_v40, %v693_v28  ;;  %3462 = vmatmul.msk.f32.gmra.mxu0 %vm252_vm0, %v2586_v38  ;;  %v2589_v40 = vld [vmem:[%s3571_s25 + $0x76] sm:$0xff] }
 0x1b8   : > { %v695_v50 = vpop.f32.mrf.mxu1  ;;  %v1276_v39 = vpop.f32.mrf.mxu3 }
 0x1b9   : > { %v1330_v7 = vadd.f32 %v1276_v39, %v1020_v29  ;;  %v696_v35 = vadd.f32 %v695_v50, %v3798_v37 }
 0x1bb   : > { %v4209_v55 = vadd.f32 %v1586_v25, %v1330_v7  ;;  %3343 = vmatmul.msk.f32.gmra.mxu1 %vm252_vm0, %v1965_v56  ;;  %3383 = vmatmul.msk.f32.gmra.mxu2 %vm252_vm0, %v1967_v6  ;;  %v2278_v56 = vld [vmem:[%s3571_s25 + $0x6d] sm:$0xff] }
 0x1bc   : > { %v1589_v30 = vpop.f32.mrf.mxu0  ;;  %v1969_v25 = vld [vmem:[%s3571_s25 + $0x74] sm:$0xff] }
 0x1bd   : > { %3423 = vmatmul.msk.f32.gmra.mxu3 %vm252_vm0, %v2277_v49 }
 0x1be   : > { %v969_v36 = vpop.f32.mrf.mxu2 }
 0x1bf   : > { %v1021_v41 = vadd.f32 %v969_v36, %v696_v35  ;;  %3463 = vmatmul.msk.f32.gmra.mxu0 %vm252_vm0, %v2587_v62  ;;  %v2590_v36 = vld [vmem:[%s3571_s25 + $0x7e] sm:$0xff] }
 0x1c0   : > { %v698_v57 = vpop.f32.mrf.mxu1  ;;  %v1279_v47 = vpop.f32.mrf.mxu3 }
 0x1c1   : > { %v1331_v11 = vadd.f32 %v1279_v47, %v1021_v41  ;;  %v699_v23 = vadd.f32 %v698_v57, %v3813_v44 }
 0x1c3   : > { %v4219_v17 = vadd.f32 %v1589_v30, %v1331_v11  ;;  %3344 = vmatmul.msk.f32.gmra.mxu1 %vm252_vm0, %v1966_v63  ;;  %3384 = vmatmul.msk.f32.gmra.mxu2 %vm252_vm0, %v1968_v15  ;;  %v2279_v63 = vld [vmem:[%s3571_s25 + $0x75] sm:$0xff] }
 0x1c4   : > { %v1592_v37 = vpop.f32.mrf.mxu0  ;;  %v1970_v30 = vld [vmem:[%s3571_s25 + $0x7c] sm:$0xff] }
 0x1c5   : > { %3424 = vmatmul.msk.f32.gmra.mxu3 %vm252_vm0, %v2278_v56 }
 0x1c6   : > { %v972_v43 = vpop.f32.mrf.mxu2 }
 0x1c7   : > { %v1022_v2 = vadd.f32 %v972_v43, %v699_v23  ;;  %3464 = vmatmul.msk.f32.gmra.mxu0 %vm252_vm0, %v2588_v33  ;;  %v2591_v43 = vld [vmem:[%s3571_s25 + $0x86] sm:$0xff] }
 0x1c8   : > { %v701_v0 = vpop.f32.mrf.mxu1  ;;  %v1282_v42 = vpop.f32.mrf.mxu3 }
 0x1c9   : > { %v1332_v38 = vadd.f32 %v1282_v42, %v1022_v2  ;;  %v702_v29 = vadd.f32 %v701_v0, %v3828_v51 }
 0x1cb   : > { %v4229_v28 = vadd.f32 %v1592_v37, %v1332_v38  ;;  %3345 = vmatmul.msk.f32.gmra.mxu1 %vm252_vm0, %v1967_v6  ;;  %3385 = vmatmul.msk.f32.gmra.mxu2 %vm252_vm0, %v1969_v25  ;;  %v2280_v6 = vld [vmem:[%s3571_s25 + $0x7d] sm:$0xff] }
 0x1cc   : > { %v1595_v44 = vpop.f32.mrf.mxu0  ;;  %v1971_v37 = vld [vmem:[%s3571_s25 + $0x84] sm:$0xff] }
 0x1cd   : > { %3425 = vmatmul.msk.f32.gmra.mxu3 %vm252_vm0, %v2279_v63 }
 0x1ce   : > { %v975_v50 = vpop.f32.mrf.mxu2 }
 0x1cf   : > { %v1023_v39 = vadd.f32 %v975_v50, %v702_v29  ;;  %3465 = vmatmul.msk.f32.gmra.mxu0 %vm252_vm0, %v2589_v40  ;;  %v2592_v50 = vld [vmem:[%s3571_s25 + $0x8e] sm:$0xff] }
 0x1d0   : > { %v704_v7 = vpop.f32.mrf.mxu1  ;;  %v1285_v49 = vpop.f32.mrf.mxu3 }
 0x1d1   : > { %v1333_v62 = vadd.f32 %v1285_v49, %v1023_v39  ;;  %v705_v41 = vadd.f32 %v704_v7, %v3843_v58 }
 0x1d3   : > { %v4239_v35 = vadd.f32 %v1595_v44, %v1333_v62  ;;  %3346 = vmatmul.msk.f32.gmra.mxu1 %vm252_vm0, %v1968_v15  ;;  %3386 = vmatmul.msk.f32.gmra.mxu2 %vm252_vm0, %v1970_v30  ;;  %v2281_v15 = vld [vmem:[%s3571_s25 + $0x85] sm:$0xff] }
 0x1d4   : > { %v1598_v51 = vpop.f32.mrf.mxu0  ;;  %v1972_v44 = vld [vmem:[%s3571_s25 + $0x8c] sm:$0xff] }
 0x1d5   : > { %3426 = vmatmul.msk.f32.gmra.mxu3 %vm252_vm0, %v2280_v6 }
 0x1d6   : > { %v978_v57 = vpop.f32.mrf.mxu2 }
 0x1d7   : > { %v1024_v47 = vadd.f32 %v978_v57, %v705_v41  ;;  %3466 = vmatmul.msk.f32.gmra.mxu0 %vm252_vm0, %v2590_v36  ;;  %v2593_v57 = vld [vmem:[%s3571_s25 + $0x96] sm:$0xff] }
 0x1d8   : > { %v707_v11 = vpop.f32.mrf.mxu1  ;;  %v1288_v56 = vpop.f32.mrf.mxu3 }
 0x1d9   : > { %v1334_v33 = vadd.f32 %v1288_v56, %v1024_v47  ;;  %v708_v2 = vadd.f32 %v707_v11, %v3858_v1 }
 0x1db   : > { %v4249_v23 = vadd.f32 %v1598_v51, %v1334_v33  ;;  %3347 = vmatmul.msk.f32.gmra.mxu1 %vm252_vm0, %v1969_v25  ;;  %3387 = vmatmul.msk.f32.gmra.mxu2 %vm252_vm0, %v1971_v37  ;;  %v2282_v25 = vld [vmem:[%s3571_s25 + $0x8d] sm:$0xff] }
 0x1dc   : > { %v1601_v58 = vpop.f32.mrf.mxu0  ;;  %v1973_v51 = vld [vmem:[%s3571_s25 + $0x94] sm:$0xff] }
 0x1dd   : > { %3427 = vmatmul.msk.f32.gmra.mxu3 %vm252_vm0, %v2281_v15 }
 0x1de   : > { %v981_v0 = vpop.f32.mrf.mxu2 }
 0x1df   : > { %v1025_v42 = vadd.f32 %v981_v0, %v708_v2  ;;  %3467 = vmatmul.msk.f32.gmra.mxu0 %vm252_vm0, %v2591_v43  ;;  %v2594_v0 = vld [vmem:[%s3571_s25 + $0x9e] sm:$0xff] }
 0x1e0   : > { %v710_v38 = vpop.f32.mrf.mxu1  ;;  %v1291_v63 = vpop.f32.mrf.mxu3 }
 0x1e1   : > { %v1335_v40 = vadd.f32 %v1291_v63, %v1025_v42  ;;  %v711_v39 = vadd.f32 %v710_v38, %v3873_v8 }
 0x1e3   : > { %v4259_v29 = vadd.f32 %v1601_v58, %v1335_v40  ;;  %3348 = vmatmul.msk.f32.gmra.mxu1 %vm252_vm0, %v1970_v30  ;;  %3388 = vmatmul.msk.f32.gmra.mxu2 %vm252_vm0, %v1972_v44  ;;  %v2283_v30 = vld [vmem:[%s3571_s25 + $0x95] sm:$0xff] }
 0x1e4   : > { %v1604_v1 = vpop.f32.mrf.mxu0  ;;  %v1974_v58 = vld [vmem:[%s3571_s25 + $0x9c] sm:$0xff] }
 0x1e5   : > { %3428 = vmatmul.msk.f32.gmra.mxu3 %vm252_vm0, %v2282_v25 }
 0x1e6   : > { %v984_v7 = vpop.f32.mrf.mxu2 }
 0x1e7   : > { %v1026_v49 = vadd.f32 %v984_v7, %v711_v39  ;;  %3468 = vmatmul.msk.f32.gmra.mxu0 %vm252_vm0, %v2592_v50  ;;  %v2285_v39 = vld [vmem:[%s3571_s25 + $0xa5] sm:$0xff] }
 0x1e8   : > { %v713_v62 = vpop.f32.mrf.mxu1  ;;  %v1294_v6 = vpop.f32.mrf.mxu3  ;;  %v2595_v7 = vld [vmem:[%s3571_s25 + $0xa6] sm:$0xff] }
 0x1e9   : > { %v1336_v36 = vadd.f32 %v1294_v6, %v1026_v49  ;;  %v714_v47 = vadd.f32 %v713_v62, %v3897_v18 }
 0x1eb   : > { %v4269_v41 = vadd.f32 %v1604_v1, %v1336_v36  ;;  %3349 = vmatmul.msk.f32.gmra.mxu1 %vm252_vm0, %v1971_v37  ;;  %3389 = vmatmul.msk.f32.gmra.mxu2 %vm252_vm0, %v1973_v51  ;;  %v2284_v37 = vld [vmem:[%s3571_s25 + $0x9d] sm:$0xff] }
 0x1ec   : > { %v1607_v8 = vpop.f32.mrf.mxu0  ;;  %v1975_v1 = vld [vmem:[%s3571_s25 + $0xa4] sm:$0xff] }
 0x1ed   : > { %3429 = vmatmul.msk.f32.gmra.mxu3 %vm252_vm0, %v2283_v30 }
 0x1ee   : > { %v987_v11 = vpop.f32.mrf.mxu2 }
 0x1ef   : > { %v1027_v56 = vadd.f32 %v987_v11, %v714_v47  ;;  %3469 = vmatmul.msk.f32.gmra.mxu0 %vm252_vm0, %v2593_v57  ;;  %v2286_v47 = vld [vmem:[%s3571_s25 + $0xad] sm:$0xff] }
 0x1f0   : > { %v716_v33 = vpop.f32.mrf.mxu1  ;;  %v1297_v15 = vpop.f32.mrf.mxu3 }
 0x1f1   : > { %v1337_v43 = vadd.f32 %v1297_v15, %v1027_v56  ;;  %v717_v42 = vadd.f32 %v716_v33, %v3913_v27  ;;  %v2596_v56 = vld [vmem:[%s3571_s25 + $0xae] sm:$0xff] }
 0x1f3   : > { %v4279_v2 = vadd.f32 %v1607_v8, %v1337_v43  ;;  %3350 = vmatmul.msk.f32.gmra.mxu1 %vm252_vm0, %v1972_v44  ;;  %3390 = vmatmul.msk.f32.gmra.mxu2 %vm252_vm0, %v1974_v58  ;;  %v1976_v8 = vld [vmem:[%s3571_s25 + $0xac] sm:$0xff] }
 0x1f4   : > { %v1610_v18 = vpop.f32.mrf.mxu0 }
 0x1f5   : > { %3430 = vmatmul.msk.f32.gmra.mxu3 %vm252_vm0, %v2284_v37 }
 0x1f6   : > { %v990_v38 = vpop.f32.mrf.mxu2 }
 0x1f7   : > { %v1028_v63 = vadd.f32 %v990_v38, %v717_v42  ;;  %3470 = vmatmul.msk.f32.gmra.mxu0 %vm252_vm0, %v2594_v0 }
 0x1f8   : > { %v1300_v40 = vpop.f32.mrf.mxu3  ;;  %v1815_v25 = vpop.f32.mrf.mxu1 }
 0x1f9   : > { %v1338_v50 = vadd.f32 %v1300_v40, %v1028_v63  ;;  %v1923_v49 = vadd.f32 %v1815_v25, %v3925_v60  ;;  %v2287_v63 = vld [vmem:[%s3571_s25 + $0xb5] sm:$0xff] }
 0x1fb   : > { %v4289_v44 = vadd.f32 %v1610_v18, %v1338_v50  ;;  %3351 = vmatmul.msk.f32.gmra.mxu1 %vm252_vm0, %v1973_v51  ;;  %3391 = vmatmul.msk.f32.gmra.mxu2 %vm252_vm0, %v1975_v1  ;;  %v4301_v51 = vld [vmem:[%s4594_s2] ss:$0 sm:$0xff]  ;;  %v2597_v50 = vld [vmem:[%s3571_s25 + $0xb6] sm:$0xff] }
 0x1fc   : > { %v2745_v27 = vpop.f32.mrf.mxu0 }
 0x1fd   : > { %3431 = vmatmul.msk.f32.gmra.mxu3 %vm252_vm0, %v2285_v39 }
 0x1fe   : > { %v2125_v62 = vpop.f32.mrf.mxu2 }
 0x1ff   : > { %v2233_v6 = vadd.f32 %v2125_v62, %v1923_v49  ;;  %3471 = vmatmul.msk.f32.gmra.mxu0 %vm252_vm0, %v2595_v7 }
 0x200   : > { %v1818_v36 = vpop.f32.mrf.mxu1  ;;  %v2435_v30 = vpop.f32.mrf.mxu3 }
 0x201   : > { %v2543_v57 = vadd.f32 %v2435_v30, %v2233_v6  ;;  %v1924_v33 = vadd.f32 %v1818_v36, %v3935_v16  ;;  %v1977_v16 = vld [vmem:[%s3571_s25 + $0xb4] sm:$0xff]  ;;  %v1978_v36 = vld [vmem:[%s3571_s25 + $0xbc] sm:$0xff] }
 0x203   : > { %v2853_v11 = vadd.f32 %v2745_v27, %v2543_v57  ;;  %3352 = vmatmul.msk.f32.gmra.mxu1 %vm252_vm0, %v1974_v58  ;;  %3392 = vmatmul.msk.f32.gmra.mxu2 %vm252_vm0, %v1976_v8 }
 0x204   : > { %v2748_v60 = vpop.f32.mrf.mxu0 }
 0x205   : > { %v2893_v15 = vadd.f32 %v4301_v51, %v2853_v11  ;;  %3432 = vmatmul.msk.f32.gmra.mxu3 %vm252_vm0, %v2286_v47  ;;  %v2288_v47 = vld [vmem:[%s3571_s25 + $0xbd] sm:$0xff] }
 0x206   : > { %v2128_v43 = vpop.f32.mrf.mxu2 }
 0x207   : > { %vm2929_vm1 = vcmp.gt.f32.partialorder %v2893_v15, 0.0  ;;  %v2965_v58 = vmul.f32 0.2, %v2893_v15  ;;  %v2234_v37 = vadd.f32 %v2128_v43, %v1924_v33  ;;  %3472 = vmatmul.msk.f32.gmra.mxu0 %vm252_vm0, %v2596_v56 }
 0x208   : > { %v1821_v18 = vpop.f32.mrf.mxu1  ;;  %v2438_v0 = vpop.f32.mrf.mxu3 }
 0x209   : > { %v3001_v42 = vsel %vm2929_vm1, %v2893_v15, %v2965_v58  ;;  %v2544_v38 = vadd.f32 %v2438_v0, %v2234_v37  ;;  %v1925_v39 = vadd.f32 %v1821_v18, %v3945_v45  ;;  %v1979_v18 = vld [vmem:[%s3571_s25 + $0xc4] sm:$0xff] }
 0x20a   : > { %3037 = vst.msk [vmem:[%s4314_s13] sm:$0xff] %vm252_vm0, %v3001_v42 }
 0x20b   : > { %v2854_v40 = vadd.f32 %v2748_v60, %v2544_v38  ;;  %3353 = vmatmul.msk.f32.gmra.mxu1 %vm252_vm0, %v1975_v1  ;;  %3393 = vmatmul.msk.f32.gmra.mxu2 %vm252_vm0, %v1977_v16  ;;  %v2598_v60 = vld [vmem:[%s3571_s25 + $0xbe] sm:$0xff] }
 0x20c   : > { %v2751_v25 = vpop.f32.mrf.mxu0  ;;  %v2289_v38 = vld [vmem:[%s3571_s25 + $0xc5] sm:$0xff] }
 0x20d   : > { %v2894_v27 = vadd.f32 %v4301_v51, %v2854_v40  ;;  %3433 = vmatmul.msk.f32.gmra.mxu3 %vm252_vm0, %v2287_v63  ;;  %v2599_v40 = vld [vmem:[%s3571_s25 + $0xc6] sm:$0xff] }
 0x20e   : > { %v2131_v7 = vpop.f32.mrf.mxu2 }
 0x20f   : > { %vm2930_vm2 = vcmp.gt.f32.partialorder %v2894_v27, 0.0  ;;  %v2966_v49 = vmul.f32 0.2, %v2894_v27  ;;  %v2235_v62 = vadd.f32 %v2131_v7, %v1925_v39  ;;  %3473 = vmatmul.msk.f32.gmra.mxu0 %vm252_vm0, %v2597_v50 }
 0x210   : > { %v1824_v1 = vpop.f32.mrf.mxu1  ;;  %v2441_v6 = vpop.f32.mrf.mxu3 }
 0x211   : > { %v3002_v30 = vsel %vm2930_vm2, %v2894_v27, %v2966_v49  ;;  %v2545_v57 = vadd.f32 %v2441_v6, %v2235_v62  ;;  %v1926_v56 = vadd.f32 %v1824_v1, %v3955_v3  ;;  %v1980_v62 = vld [vmem:[%s3571_s25 + $0xcc] sm:$0xff] }
 0x212   : > { %3038 = vst.msk [vmem:[%s4314_s13 + $0x8] sm:$0xff] %vm252_vm0, %v3002_v30  ;;  %v2290_v30 = vld [vmem:[%s3571_s25 + $0xcd] sm:$0xff] }
 0x213   : > { %v2855_v45 = vadd.f32 %v2751_v25, %v2545_v57  ;;  %3354 = vmatmul.msk.f32.gmra.mxu1 %vm252_vm0, %v1976_v8  ;;  %3394 = vmatmul.msk.f32.gmra.mxu2 %vm252_vm0, %v1978_v36 }
 0x214   : > { %v2754_v11 = vpop.f32.mrf.mxu0 }
 0x215   : > { %v2895_v33 = vadd.f32 %v4301_v51, %v2855_v45  ;;  %3434 = vmatmul.msk.f32.gmra.mxu3 %vm252_vm0, %v2288_v47  ;;  %v2600_v47 = vld [vmem:[%s3571_s25 + $0xce] sm:$0xff] }
 0x216   : > { %v2134_v15 = vpop.f32.mrf.mxu2 }
 0x217   : > { %vm2931_vm3 = vcmp.gt.f32.partialorder %v2895_v33, 0.0  ;;  %v2967_v43 = vmul.f32 0.2, %v2895_v33  ;;  %v2236_v58 = vadd.f32 %v2134_v15, %v1926_v56  ;;  %3474 = vmatmul.msk.f32.gmra.mxu0 %vm252_vm0, %v2598_v60 }
 0x218   : > { %v1827_v8 = vpop.f32.mrf.mxu1  ;;  %v2444_v37 = vpop.f32.mrf.mxu3 }
 0x219   : > { %v3003_v0 = vsel %vm2931_vm3, %v2895_v33, %v2967_v43  ;;  %v2546_v42 = vadd.f32 %v2444_v37, %v2236_v58  ;;  %v1927_v25 = vadd.f32 %v1827_v8, %v3965_v22  ;;  %v1981_v43 = vld [vmem:[%s3571_s25 + $0xd4] sm:$0xff] }
 0x21a   : > { %3039 = vst.msk [vmem:[%s4314_s13 + $0x10] sm:$0xff] %vm252_vm0, %v3003_v0  ;;  %v2291_v37 = vld [vmem:[%s3571_s25 + $0xd5] sm:$0xff] }
 0x21b   : > { %v2856_v3 = vadd.f32 %v2754_v11, %v2546_v42  ;;  %3355 = vmatmul.msk.f32.gmra.mxu1 %vm252_vm0, %v1977_v16  ;;  %3395 = vmatmul.msk.f32.gmra.mxu2 %vm252_vm0, %v1979_v18  ;;  %v2601_v42 = vld [vmem:[%s3571_s25 + $0xd6] sm:$0xff] }
 0x21c   : > { %v2757_v63 = vpop.f32.mrf.mxu0 }
 0x21d   : > { %v2896_v50 = vadd.f32 %v4301_v51, %v2856_v3  ;;  %3435 = vmatmul.msk.f32.gmra.mxu3 %vm252_vm0, %v2289_v38 }
 0x21e   : > { %v2137_v39 = vpop.f32.mrf.mxu2 }
 0x21f   : > { %vm2932_vm4 = vcmp.gt.f32.partialorder %v2896_v50, 0.0  ;;  %v2968_v27 = vmul.f32 0.2, %v2896_v50  ;;  %v2237_v7 = vadd.f32 %v2137_v39, %v1927_v25  ;;  %3475 = vmatmul.msk.f32.gmra.mxu0 %vm252_vm0, %v2599_v40  ;;  %v1982_v39 = vld [vmem:[%s3571_s25 + $0xdc] sm:$0xff] }
 0x220   : > { %v1830_v16 = vpop.f32.mrf.mxu1  ;;  %v2447_v49 = vpop.f32.mrf.mxu3 }
 0x221   : > { %v3004_v1 = vsel %vm2932_vm4, %v2896_v50, %v2968_v27  ;;  %v2547_v6 = vadd.f32 %v2447_v49, %v2237_v7  ;;  %v1928_v45 = vadd.f32 %v1830_v16, %v3975_v48  ;;  %v2292_v16 = vld [vmem:[%s3571_s25 + $0xdd] sm:$0xff] }
 0x222   : > { %3040 = vst.msk [vmem:[%s4314_s13 + $0x18] sm:$0xff] %vm252_vm0, %v3004_v1  ;;  %v2602_v1 = vld [vmem:[%s3571_s25 + $0xde] sm:$0xff] }
 0x223   : > { %v2857_v22 = vadd.f32 %v2757_v63, %v2547_v6  ;;  %3356 = vmatmul.msk.f32.gmra.mxu1 %vm252_vm0, %v1978_v36  ;;  %3396 = vmatmul.msk.f32.gmra.mxu2 %vm252_vm0, %v1980_v62 }
 0x224   : > { %v2760_v57 = vpop.f32.mrf.mxu0 }
 0x225   : > { %v2897_v11 = vadd.f32 %v4301_v51, %v2857_v22  ;;  %3436 = vmatmul.msk.f32.gmra.mxu3 %vm252_vm0, %v2290_v30 }
 0x226   : > { %v2140_v60 = vpop.f32.mrf.mxu2 }
 0x227   : > { %vm2933_vm5 = vcmp.gt.f32.partialorder %v2897_v11, 0.0  ;;  %v2969_v56 = vmul.f32 0.2, %v2897_v11  ;;  %v2238_v33 = vadd.f32 %v2140_v60, %v1928_v45  ;;  %3476 = vmatmul.msk.f32.gmra.mxu0 %vm252_vm0, %v2600_v47 }
 0x228   : > { %v1833_v36 = vpop.f32.mrf.mxu1  ;;  %v2450_v15 = vpop.f32.mrf.mxu3 }
 0x229   : > { %v3005_v58 = vsel %vm2933_vm5, %v2897_v11, %v2969_v56  ;;  %v2548_v8 = vadd.f32 %v2450_v15, %v2238_v33  ;;  %v1929_v38 = vadd.f32 %v1833_v36, %v3985_v9  ;;  %v1983_v11 = vld [vmem:[%s3571_s25 + $0xe4] sm:$0xff] }
 0x22a   : > { %3041 = vst.msk [vmem:[%s4314_s13 + $0x20] sm:$0xff] %vm252_vm0, %v3005_v58  ;;  %v2293_v33 = vld [vmem:[%s3571_s25 + $0xe5] sm:$0xff] }
 0x22b   : > { %v2858_v48 = vadd.f32 %v2760_v57, %v2548_v8  ;;  %3357 = vmatmul.msk.f32.gmra.mxu1 %vm252_vm0, %v1979_v18  ;;  %3397 = vmatmul.msk.f32.gmra.mxu2 %vm252_vm0, %v1981_v43  ;;  %v2603_v15 = vld [vmem:[%s3571_s25 + $0xe6] sm:$0xff] }
 0x22c   : > { %v2763_v0 = vpop.f32.mrf.mxu0 }
 0x22d   : > { %v2898_v3 = vadd.f32 %v4301_v51, %v2858_v48  ;;  %3437 = vmatmul.msk.f32.gmra.mxu3 %vm252_vm0, %v2291_v37 }
 0x22e   : > { %v2143_v63 = vpop.f32.mrf.mxu2 }
 0x22f   : > { %vm2934_vm6 = vcmp.gt.f32.partialorder %v2898_v3, 0.0  ;;  %v2970_v40 = vmul.f32 0.2, %v2898_v3  ;;  %v2239_v25 = vadd.f32 %v2143_v63, %v1929_v38  ;;  %3477 = vmatmul.msk.f32.gmra.mxu0 %vm252_vm0, %v2601_v42  ;;  %v1984_v38 = vld [vmem:[%s3571_s25 + $0xec] sm:$0xff] }
 0x230   : > { %v1836_v18 = vpop.f32.mrf.mxu1  ;;  %v2453_v50 = vpop.f32.mrf.mxu3 }
 0x231   : > { %v3006_v27 = vsel %vm2934_vm6, %v2898_v3, %v2970_v40  ;;  %v2549_v7 = vadd.f32 %v2453_v50, %v2239_v25  ;;  %v1930_v6 = vadd.f32 %v1836_v18, %v4004_v32  ;;  %v2294_v40 = vld [vmem:[%s3571_s25 + $0xed] sm:$0xff] }
 0x232   : > { %3042 = vst.msk [vmem:[%s4314_s13 + $0x28] sm:$0xff] %vm252_vm0, %v3006_v27  ;;  %v2604_v18 = vld [vmem:[%s3571_s25 + $0xee] sm:$0xff] }
 0x233   : > { %v2859_v9 = vadd.f32 %v2763_v0, %v2549_v7  ;;  %3358 = vmatmul.msk.f32.gmra.mxu1 %vm252_vm0, %v1980_v62  ;;  %3398 = vmatmul.msk.f32.gmra.mxu2 %vm252_vm0, %v1982_v39 }
 0x234   : > { %v2766_v49 = vpop.f32.mrf.mxu0 }
 0x235   : > { %v2899_v30 = vadd.f32 %v4301_v51, %v2859_v9  ;;  %3438 = vmatmul.msk.f32.gmra.mxu3 %vm252_vm0, %v2292_v16 }
 0x236   : > { %v2146_v22 = vpop.f32.mrf.mxu2 }
 0x237   : > { %vm2935_vm7 = vcmp.gt.f32.partialorder %v2899_v30, 0.0  ;;  %v2971_v57 = vmul.f32 0.2, %v2899_v30  ;;  %v2240_v47 = vadd.f32 %v2146_v22, %v1930_v6  ;;  %3478 = vmatmul.msk.f32.gmra.mxu0 %vm252_vm0, %v2602_v1  ;;  %v1985_v1 = vld [vmem:[%s3571_s25 + $0xf4] sm:$0xff] }
 0x238   : > { %v1839_v62 = vpop.f32.mrf.mxu1  ;;  %v2456_v45 = vpop.f32.mrf.mxu3  ;;  %v2295_v22 = vld [vmem:[%s3571_s25 + $0xf5] sm:$0xff] }
 0x239   : > { %v3007_v60 = vsel %vm2935_vm7, %v2899_v30, %v2971_v57  ;;  %v2550_v56 = vadd.f32 %v2456_v45, %v2240_v47  ;;  %v1931_v58 = vadd.f32 %v1839_v62, %v4017_v21  ;;  %v2605_v47 = vld [vmem:[%s3571_s25 + $0xf6] sm:$0xff] }
 0x23a   : > { %3043 = vst.msk [vmem:[%s4314_s13 + $0x30] sm:$0xff] %vm252_vm0, %v3007_v60 }
 0x23b   : > { %v2860_v32 = vadd.f32 %v2766_v49, %v2550_v56  ;;  %3359 = vmatmul.msk.f32.gmra.mxu1 %vm252_vm0, %v1981_v43  ;;  %3399 = vmatmul.msk.f32.gmra.mxu2 %vm252_vm0, %v1983_v11 }
 0x23c   : > { %v2769_v36 = vpop.f32.mrf.mxu0 }
 0x23d   : > { %v2900_v8 = vadd.f32 %v4301_v51, %v2860_v32  ;;  %3439 = vmatmul.msk.f32.gmra.mxu3 %vm252_vm0, %v2293_v33 }
 0x23e   : > { %v2149_v37 = vpop.f32.mrf.mxu2 }
 0x23f   : > { %vm2936_vm8 = vcmp.gt.f32.partialorder %v2900_v8, 0.0  ;;  %v2972_v48 = vmul.f32 0.2, %v2900_v8  ;;  %v2241_v0 = vadd.f32 %v2149_v37, %v1931_v58  ;;  %3479 = vmatmul.msk.f32.gmra.mxu0 %vm252_vm0, %v2603_v15 }
 0x240   : > { %v1842_v43 = vpop.f32.mrf.mxu1  ;;  %v2459_v42 = vpop.f32.mrf.mxu3 }
 0x241   : > { %v3008_v3 = vsel %vm2936_vm8, %v2900_v8, %v2972_v48  ;;  %v2551_v63 = vadd.f32 %v2459_v42, %v2241_v0  ;;  %v1932_v50 = vadd.f32 %v1842_v43, %v4027_v20  ;;  %v2296_v8 = vld [vmem:[%s3571_s25 + $0xfd] sm:$0xff] }
 0x242   : > { %3044 = vst.msk [vmem:[%s4314_s13 + $0x38] sm:$0xff] %vm252_vm0, %v3008_v3  ;;  %v2606_v48 = vld [vmem:[%s3571_s25 + $0xfe] sm:$0xff] }
 0x243   : > { %v2861_v21 = vadd.f32 %v2769_v36, %v2551_v63  ;;  %3360 = vmatmul.msk.f32.gmra.mxu1 %vm252_vm0, %v1982_v39  ;;  %3400 = vmatmul.msk.f32.gmra.mxu2 %vm252_vm0, %v1984_v38  ;;  %v1986_v36 = vld [vmem:[%s3571_s25 + $0xfc] sm:$0xff] }
 0x244   : > { %v2772_v25 = vpop.f32.mrf.mxu0 }
 0x245   : > { %v2901_v27 = vadd.f32 %v4301_v51, %v2861_v21  ;;  %3440 = vmatmul.msk.f32.gmra.mxu3 %vm252_vm0, %v2294_v40  ;;  %v1987_v21 = vld [vmem:[%s3571_s25 + $0x104] sm:$0xff] }
 0x246   : > { %v2152_v7 = vpop.f32.mrf.mxu2 }
 0x247   : > { %vm2937_vm9 = vcmp.gt.f32.partialorder %v2901_v27, 0.0  ;;  %v2973_v16 = vmul.f32 0.2, %v2901_v27  ;;  %v2242_v9 = vadd.f32 %v2152_v7, %v1932_v50  ;;  %3480 = vmatmul.msk.f32.gmra.mxu0 %vm252_vm0, %v2604_v18  ;;  %v2297_v50 = vld [vmem:[%s3571_s25 + $0x105] sm:$0xff] }
 0x248   : > { %v1845_v39 = vpop.f32.mrf.mxu1  ;;  %v2462_v49 = vpop.f32.mrf.mxu3  ;;  %v2607_v7 = vld [vmem:[%s3571_s25 + $0x106] sm:$0xff] }
 0x249   : > { %v3009_v6 = vsel %vm2937_vm9, %v2901_v27, %v2973_v16  ;;  %v2552_v30 = vadd.f32 %v2462_v49, %v2242_v9  ;;  %v1933_v62 = vadd.f32 %v1845_v39, %v4037_v61 }
 0x24a   : > { %3045 = vst.msk [vmem:[%s4314_s13 + $0x40] sm:$0xff] %vm252_vm0, %v3009_v6 }
 0x24b   : > { %v2862_v20 = vadd.f32 %v2772_v25, %v2552_v30  ;;  %3361 = vmatmul.msk.f32.gmra.mxu1 %vm252_vm0, %v1983_v11  ;;  %3401 = vmatmul.msk.f32.gmra.mxu2 %vm252_vm0, %v1985_v1 }
 0x24c   : > { %v2775_v57 = vpop.f32.mrf.mxu0 }
 0x24d   : > { %v2902_v45 = vadd.f32 %v4301_v51, %v2862_v20  ;;  %3441 = vmatmul.msk.f32.gmra.mxu3 %vm252_vm0, %v2295_v22  ;;  %v1988_v22 = vld [vmem:[%s3571_s25 + $0x10c] sm:$0xff] }
 0x24e   : > { %v2155_v60 = vpop.f32.mrf.mxu2 }
 0x24f   : > { %vm2938_vm10 = vcmp.gt.f32.partialorder %v2902_v45, 0.0  ;;  %v2974_v56 = vmul.f32 0.2, %v2902_v45  ;;  %v2243_v33 = vadd.f32 %v2155_v60, %v1933_v62  ;;  %3481 = vmatmul.msk.f32.gmra.mxu0 %vm252_vm0, %v2605_v47  ;;  %v2298_v47 = vld [vmem:[%s3571_s25 + $0x10d] sm:$0xff] }
 0x250   : > { %v1848_v11 = vpop.f32.mrf.mxu1  ;;  %v2465_v32 = vpop.f32.mrf.mxu3 }
 0x251   : > { %v3010_v15 = vsel %vm2938_vm10, %v2902_v45, %v2974_v56  ;;  %v2553_v58 = vadd.f32 %v2465_v32, %v2243_v33  ;;  %v1934_v0 = vadd.f32 %v1848_v11, %v4047_v4  ;;  %v2608_v45 = vld [vmem:[%s3571_s25 + $0x10e] sm:$0xff] }
 0x252   : > { %3046 = vst.msk [vmem:[%s4314_s13 + $0x48] sm:$0xff] %vm252_vm0, %v3010_v15 }
 0x253   : > { %v2863_v61 = vadd.f32 %v2775_v57, %v2553_v58  ;;  %3362 = vmatmul.msk.f32.gmra.mxu1 %vm252_vm0, %v1984_v38  ;;  %3402 = vmatmul.msk.f32.gmra.mxu2 %vm252_vm0, %v1986_v36  ;;  %v1989_v58 = vld [vmem:[%s3571_s25 + $0x114] sm:$0xff] }
 0x254   : > { %v2778_v37 = vpop.f32.mrf.mxu0 }
 0x255   : > { %v2903_v43 = vadd.f32 %v4301_v51, %v2863_v61  ;;  %3442 = vmatmul.msk.f32.gmra.mxu3 %vm252_vm0, %v2296_v8 }
 0x256   : > { %v2158_v42 = vpop.f32.mrf.mxu2 }
 0x257   : > { %vm2939_vm11 = vcmp.gt.f32.partialorder %v2903_v43, 0.0  ;;  %v2975_v3 = vmul.f32 0.2, %v2903_v43  ;;  %v2244_v63 = vadd.f32 %v2158_v42, %v1934_v0  ;;  %3482 = vmatmul.msk.f32.gmra.mxu0 %vm252_vm0, %v2606_v48  ;;  %v2609_v0 = vld [vmem:[%s3571_s25 + $0x116] sm:$0xff] }
 0x258   : > { %v1851_v38 = vpop.f32.mrf.mxu1  ;;  %v2468_v40 = vpop.f32.mrf.mxu3 }
 0x259   : > { %v3011_v25 = vsel %vm2939_vm11, %v2903_v43, %v2975_v3  ;;  %v2554_v18 = vadd.f32 %v2468_v40, %v2244_v63  ;;  %v1935_v16 = vadd.f32 %v1851_v38, %v4057_v14 }
 0x25a   : > { %3047 = vst.msk [vmem:[%s4314_s13 + $0x50] sm:$0xff] %vm252_vm0, %v3011_v25  ;;  %v1990_v25 = vld [vmem:[%s3571_s25 + $0x11c] sm:$0xff] }
 0x25b   : > { %v2864_v4 = vadd.f32 %v2778_v37, %v2554_v18  ;;  %3363 = vmatmul.msk.f32.gmra.mxu1 %vm252_vm0, %v1985_v1  ;;  %3403 = vmatmul.msk.f32.gmra.mxu2 %vm252_vm0, %v1987_v21  ;;  %v2299_v37 = vld [vmem:[%s3571_s25 + $0x115] sm:$0xff] }
 0x25c   : > { %v2781_v27 = vpop.f32.mrf.mxu0 }
 0x25d   : > { %v2904_v9 = vadd.f32 %v4301_v51, %v2864_v4  ;;  %3443 = vmatmul.msk.f32.gmra.mxu3 %vm252_vm0, %v2297_v50  ;;  %v2300_v4 = vld [vmem:[%s3571_s25 + $0x11d] sm:$0xff] }
 0x25e   : > { %v2161_v39 = vpop.f32.mrf.mxu2 }
 0x25f   : > { %vm2940_vm12 = vcmp.gt.f32.partialorder %v2904_v9, 0.0  ;;  %v2976_v49 = vmul.f32 0.2, %v2904_v9  ;;  %v2245_v6 = vadd.f32 %v2161_v39, %v1935_v16  ;;  %3483 = vmatmul.msk.f32.gmra.mxu0 %vm252_vm0, %v2607_v7  ;;  %v2610_v7 = vld [vmem:[%s3571_s25 + $0x11e] sm:$0xff] }
 0x260   : > { %v1854_v1 = vpop.f32.mrf.mxu1  ;;  %v2471_v30 = vpop.f32.mrf.mxu3 }
 0x261   : > { %v3012_v20 = vsel %vm2940_vm12, %v2904_v9, %v2976_v49  ;;  %v2555_v57 = vadd.f32 %v2471_v30, %v2245_v6  ;;  %v1936_v60 = vadd.f32 %v1854_v1, %v4067_v52 }
 0x262   : > { %3048 = vst.msk [vmem:[%s4314_s13 + $0x58] sm:$0xff] %vm252_vm0, %v3012_v20 }
 0x263   : > { %v2865_v14 = vadd.f32 %v2781_v27, %v2555_v57  ;;  %3364 = vmatmul.msk.f32.gmra.mxu1 %vm252_vm0, %v1986_v36  ;;  %3404 = vmatmul.msk.f32.gmra.mxu2 %vm252_vm0, %v1988_v22 }
 0x264   : > { %v2784_v62 = vpop.f32.mrf.mxu0 }
 0x265   : > { %v2905_v56 = vadd.f32 %v4301_v51, %v2865_v14  ;;  %3444 = vmatmul.msk.f32.gmra.mxu3 %vm252_vm0, %v2298_v47  ;;  %v2301_v47 = vld [vmem:[%s3571_s25 + $0x125] sm:$0xff] }
 0x266   : > { %v2164_v33 = vpop.f32.mrf.mxu2 }
 0x267   : > { %vm2941_vm13 = vcmp.gt.f32.partialorder %v2905_v56, 0.0  ;;  %v2977_v11 = vmul.f32 0.2, %v2905_v56  ;;  %v2246_v32 = vadd.f32 %v2164_v33, %v1936_v60  ;;  %3484 = vmatmul.msk.f32.gmra.mxu0 %vm252_vm0, %v2608_v45 }
 0x268   : > { %v1857_v36 = vpop.f32.mrf.mxu1  ;;  %v2474_v15 = vpop.f32.mrf.mxu3 }
 0x269   : > { %v3013_v8 = vsel %vm2941_vm13, %v2905_v56, %v2977_v11  ;;  %v2556_v61 = vadd.f32 %v2474_v15, %v2246_v32  ;;  %v1937_v43 = vadd.f32 %v1857_v36, %v4077_v10  ;;  %v1992_v15 = vld [vmem:[%s3571_s25 + $0x12c] sm:$0xff] }
 0x26a   : > { %3049 = vst.msk [vmem:[%s4314_s13 + $0x60] sm:$0xff] %vm252_vm0, %v3013_v8 }
 0x26b   : > { %v2866_v52 = vadd.f32 %v2784_v62, %v2556_v61  ;;  %3365 = vmatmul.msk.f32.gmra.mxu1 %vm252_vm0, %v1987_v21  ;;  %3405 = vmatmul.msk.f32.gmra.mxu2 %vm252_vm0, %v1989_v58  ;;  %v2611_v62 = vld [vmem:[%s3571_s25 + $0x126] sm:$0xff] }
 0x26c   : > { %v2787_v48 = vpop.f32.mrf.mxu0  ;;  %v2302_v61 = vld [vmem:[%s3571_s25 + $0x12d] sm:$0xff] }
 0x26d   : > { %v2906_v42 = vadd.f32 %v4301_v51, %v2866_v52  ;;  %3445 = vmatmul.msk.f32.gmra.mxu3 %vm252_vm0, %v2299_v37  ;;  %v2612_v52 = vld [vmem:[%s3571_s25 + $0x12e] sm:$0xff] }
 0x26e   : > { %v2167_v3 = vpop.f32.mrf.mxu2 }
 0x26f   : > { %vm2942_vm14 = vcmp.gt.f32.partialorder %v2906_v42, 0.0  ;;  %v2978_v63 = vmul.f32 0.2, %v2906_v42  ;;  %v2247_v38 = vadd.f32 %v2167_v3, %v1937_v43  ;;  %3485 = vmatmul.msk.f32.gmra.mxu0 %vm252_vm0, %v2609_v0 }
 0x270   : > { %v1860_v40 = vpop.f32.mrf.mxu1  ;;  %v2477_v21 = vpop.f32.mrf.mxu3 }
 0x271   : > { %v3014_v18 = vsel %vm2942_vm14, %v2906_v42, %v2978_v63  ;;  %v2557_v50 = vadd.f32 %v2477_v21, %v2247_v38  ;;  %v1938_v16 = vadd.f32 %v1860_v40, %v4087_v12  ;;  %v1993_v40 = vld [vmem:[%s3571_s25 + $0x134] sm:$0xff] }
 0x272   : > { %3050 = vst.msk [vmem:[%s4314_s13 + $0x68] sm:$0xff] %vm252_vm0, %v3014_v18  ;;  %v2303_v18 = vld [vmem:[%s3571_s25 + $0x135] sm:$0xff] }
 0x273   : > { %v2867_v10 = vadd.f32 %v2787_v48, %v2557_v50  ;;  %3366 = vmatmul.msk.f32.gmra.mxu1 %vm252_vm0, %v1988_v22  ;;  %3406 = vmatmul.msk.f32.gmra.mxu2 %vm252_vm0, %v1990_v25  ;;  %v1991_v22 = vld [vmem:[%s3571_s25 + $0x124] sm:$0xff] }
 0x274   : > { %v2790_v27 = vpop.f32.mrf.mxu0 }
 0x275   : > { %v2907_v9 = vadd.f32 %v4301_v51, %v2867_v10  ;;  %3446 = vmatmul.msk.f32.gmra.mxu3 %vm252_vm0, %v2300_v4  ;;  %v2613_v4 = vld [vmem:[%s3571_s25 + $0x136] sm:$0xff] }
 0x276   : > { %v2170_v39 = vpop.f32.mrf.mxu2 }
 0x277   : > { %vm2943_vm15 = vcmp.gt.f32.partialorder %v2907_v9, 0.0  ;;  %v2979_v49 = vmul.f32 0.2, %v2907_v9  ;;  %v2248_v6 = vadd.f32 %v2170_v39, %v1938_v16  ;;  %3486 = vmatmul.msk.f32.gmra.mxu0 %vm252_vm0, %v2610_v7 }
 0x278   : > { %v1863_v1 = vpop.f32.mrf.mxu1  ;;  %v2480_v30 = vpop.f32.mrf.mxu3 }
 0x279   : > { %v3015_v20 = vsel %vm2943_vm15, %v2907_v9, %v2979_v49  ;;  %v2558_v57 = vadd.f32 %v2480_v30, %v2248_v6  ;;  %v1939_v45 = vadd.f32 %v1863_v1, %v4097_v46  ;;  %v1994_v6 = vld [vmem:[%s3571_s25 + $0x13c] sm:$0xff] }
 0x27a   : > { %3051 = vst.msk [vmem:[%s4314_s13 + $0x70] sm:$0xff] %vm252_vm0, %v3015_v20 }
 0x27b   : > { %v2868_v12 = vadd.f32 %v2790_v27, %v2558_v57  ;;  %3367 = vmatmul.msk.f32.gmra.mxu1 %vm252_vm0, %v1989_v58  ;;  %3407 = vmatmul.msk.f32.gmra.mxu2 %vm252_vm0, %v1991_v22  ;;  %v2614_v57 = vld [vmem:[%s3571_s25 + $0x13e] sm:$0xff] }
 0x27c   : > { %v2793_v14 = vpop.f32.mrf.mxu0 }
 0x27d   : > { %v2908_v60 = vadd.f32 %v4301_v51, %v2868_v12  ;;  %3447 = vmatmul.msk.f32.gmra.mxu3 %vm252_vm0, %v2301_v47 }
 0x27e   : > { %v2173_v56 = vpop.f32.mrf.mxu2 }
 0x27f   : > { %vm2944_vm1 = vcmp.gt.f32.partialorder %v2908_v60, 0.0  ;;  %v2980_v33 = vmul.f32 0.2, %v2908_v60  ;;  %v2249_v11 = vadd.f32 %v2173_v56, %v1939_v45  ;;  %3487 = vmatmul.msk.f32.gmra.mxu0 %vm252_vm0, %v2611_v62 }
 0x280   : > { %v1866_v32 = vpop.f32.mrf.mxu1  ;;  %v2483_v36 = vpop.f32.mrf.mxu3 }
 0x281   : > { %v3016_v58 = vsel %vm2944_vm1, %v2908_v60, %v2980_v33  ;;  %v2559_v8 = vadd.f32 %v2483_v36, %v2249_v11  ;;  %v1940_v48 = vadd.f32 %v1866_v32, %v4107_v13 }
 0x282   : > { %3052 = vst.msk [vmem:[%s4314_s13 + $0x78] sm:$0xff] %vm252_vm0, %v3016_v58 }
 0x283   : > { %v2869_v46 = vadd.f32 %v2793_v14, %v2559_v8  ;;  %3368 = vmatmul.msk.f32.gmra.mxu1 %vm252_vm0, %v1990_v25  ;;  %3408 = vmatmul.msk.f32.gmra.mxu2 %vm252_vm0, %v1992_v15 }
 0x284   : > { %v2796_v37 = vpop.f32.mrf.mxu0 }
 0x285   : > { %v2909_v0 = vadd.f32 %v4301_v51, %v2869_v46  ;;  %3448 = vmatmul.msk.f32.gmra.mxu3 %vm252_vm0, %v2302_v61 }
 0x286   : > { %v2176_v43 = vpop.f32.mrf.mxu2 }
 0x287   : > { %vm2945_vm2 = vcmp.gt.f32.partialorder %v2909_v0, 0.0  ;;  %v2981_v42 = vmul.f32 0.2, %v2909_v0  ;;  %v2250_v3 = vadd.f32 %v2176_v43, %v1940_v48  ;;  %3488 = vmatmul.msk.f32.gmra.mxu0 %vm252_vm0, %v2612_v52 }
 0x288   : > { %v1869_v63 = vpop.f32.mrf.mxu1  ;;  %v2486_v38 = vpop.f32.mrf.mxu3 }
 0x289   : > { %v3017_v21 = vsel %vm2945_vm2, %v2909_v0, %v2981_v42  ;;  %v2560_v25 = vadd.f32 %v2486_v38, %v2250_v3  ;;  %v1941_v10 = vadd.f32 %v1869_v63, %v4117_v24 }
 0x28a   : > { %3053 = vst.msk [vmem:[%s4314_s13 + $0x80] sm:$0xff] %vm252_vm0, %v3017_v21 }
 0x28b   : > { %v2870_v13 = vadd.f32 %v2796_v37, %v2560_v25  ;;  %3369 = vmatmul.msk.f32.gmra.mxu1 %vm252_vm0, %v1991_v22  ;;  %3409 = vmatmul.msk.f32.gmra.mxu2 %vm252_vm0, %v1993_v40  ;;  %v2304_v22 = vld [vmem:[%s3571_s25 + $0x13d] sm:$0xff] }
 0x28c   : > { %v2799_v50 = vpop.f32.mrf.mxu0 }
 0x28d   : > { %v2910_v27 = vadd.f32 %v4301_v51, %v2870_v13  ;;  %3449 = vmatmul.msk.f32.gmra.mxu3 %vm252_vm0, %v2303_v18 }
 0x28e   : > { %v2179_v7 = vpop.f32.mrf.mxu2 }
 0x28f   : > { %vm2946_vm3 = vcmp.gt.f32.partialorder %v2910_v27, 0.0  ;;  %v2982_v16 = vmul.f32 0.2, %v2910_v27  ;;  %v2251_v9 = vadd.f32 %v2179_v7, %v1941_v10  ;;  %3489 = vmatmul.msk.f32.gmra.mxu0 %vm252_vm0, %v2613_v4 }
 0x290   : > { %v1872_v39 = vpop.f32.mrf.mxu1  ;;  %v2489_v49 = vpop.f32.mrf.mxu3 }
 0x291   : > { %v3018_v1 = vsel %vm2946_vm3, %v2910_v27, %v2982_v16  ;;  %v2561_v30 = vadd.f32 %v2489_v49, %v2251_v9  ;;  %v1942_v47 = vadd.f32 %v1872_v39, %v4128_v53 }
 0x292   : > { %3054 = vst.msk [vmem:[%s4314_s13 + $0x88] sm:$0xff] %vm252_vm0, %v3018_v1 }
 0x293   : > { %v2871_v24 = vadd.f32 %v2799_v50, %v2561_v30  ;;  %3370 = vmatmul.msk.f32.gmra.mxu1 %vm252_vm0, %v1992_v15  ;;  %3410 = vmatmul.msk.f32.gmra.mxu2 %vm252_vm0, %v1994_v6 }
 0x294   : > { %v2802_v20 = vpop.f32.mrf.mxu0 }
 0x295   : > { %v2911_v12 = vadd.f32 %v4301_v51, %v2871_v24  ;;  %3450 = vmatmul.msk.f32.gmra.mxu3 %vm252_vm0, %v2304_v22 }
 0x296   : > { %v2182_v14 = vpop.f32.mrf.mxu2 }
 0x297   : > { %vm2947_vm4 = vcmp.gt.f32.partialorder %v2911_v12, 0.0  ;;  %v2983_v62 = vmul.f32 0.2, %v2911_v12  ;;  %v2252_v45 = vadd.f32 %v2182_v14, %v1942_v47  ;;  %3490 = vmatmul.msk.f32.gmra.mxu0 %vm252_vm0, %v2614_v57 }
 0x298   : > { %v1875_v60 = vpop.f32.mrf.mxu1  ;;  %v2492_v56 = vpop.f32.mrf.mxu3 }
 0x299   : > { %v3019_v33 = vsel %vm2947_vm4, %v2911_v12, %v2983_v62  ;;  %v2562_v11 = vadd.f32 %v2492_v56, %v2252_v45  ;;  %v1943_v53 = vadd.f32 %v1875_v60, %v4139_v5 }
 0x29a   : > { %3055 = vst.msk [vmem:[%s4314_s13 + $0x90] sm:$0xff] %vm252_vm0, %v3019_v33 }
 0x29b   : > { %v2872_v32 = vadd.f32 %v2802_v20, %v2562_v11 }
 0x29c   : > { %v2805_v36 = vpop.f32.mrf.mxu0 }
 0x29d   : > { %v2912_v15 = vadd.f32 %v4301_v51, %v2872_v32 }
 0x29e   : > { %v2185_v58 = vpop.f32.mrf.mxu2 }
 0x29f   : > { %vm2948_vm5 = vcmp.gt.f32.partialorder %v2912_v15, 0.0  ;;  %v2984_v8 = vmul.f32 0.2, %v2912_v15  ;;  %v2253_v61 = vadd.f32 %v2185_v58, %v1943_v53 }
 0x2a0   : > { %v1878_v46 = vpop.f32.mrf.mxu1  ;;  %v2495_v37 = vpop.f32.mrf.mxu3 }
 0x2a1   : > { %v3020_v52 = vsel %vm2948_vm5, %v2912_v15, %v2984_v8  ;;  %v2563_v48 = vadd.f32 %v2495_v37, %v2253_v61  ;;  %v1944_v42 = vadd.f32 %v1878_v46, %v4149_v31 }
 0x2a2   : > { %3056 = vst.msk [vmem:[%s4314_s13 + $0x98] sm:$0xff] %vm252_vm0, %v3020_v52 }
 0x2a3   : > { %v2873_v0 = vadd.f32 %v2805_v36, %v2563_v48 }
 0x2a4   : > { %v2808_v43 = vpop.f32.mrf.mxu0 }
 0x2a5   : > { %v2913_v3 = vadd.f32 %v4301_v51, %v2873_v0 }
 0x2a6   : > { %v2188_v5 = vpop.f32.mrf.mxu2 }
 0x2a7   : > { %vm2949_vm6 = vcmp.gt.f32.partialorder %v2913_v3, 0.0  ;;  %v2985_v63 = vmul.f32 0.2, %v2913_v3  ;;  %v2254_v38 = vadd.f32 %v2188_v5, %v1944_v42 }
 0x2a8   : > { %v1881_v40 = vpop.f32.mrf.mxu1  ;;  %v2498_v21 = vpop.f32.mrf.mxu3 }
 0x2a9   : > { %v3021_v25 = vsel %vm2949_vm6, %v2913_v3, %v2985_v63  ;;  %v2564_v18 = vadd.f32 %v2498_v21, %v2254_v38  ;;  %v1945_v4 = vadd.f32 %v1881_v40, %v4159_v26 }
 0x2aa   : > { %3057 = vst.msk [vmem:[%s4314_s13 + $0xa0] sm:$0xff] %vm252_vm0, %v3021_v25 }
 0x2ab   : > { %v2874_v13 = vadd.f32 %v2808_v43, %v2564_v18 }
 0x2ac   : > { %v2811_v50 = vpop.f32.mrf.mxu0 }
 0x2ad   : > { %v2914_v10 = vadd.f32 %v4301_v51, %v2874_v13 }
 0x2ae   : > { %v2191_v31 = vpop.f32.mrf.mxu2 }
 0x2af   : > { %vm2950_vm7 = vcmp.gt.f32.partialorder %v2914_v10, 0.0  ;;  %v2986_v27 = vmul.f32 0.2, %v2914_v10  ;;  %v2255_v7 = vadd.f32 %v2191_v31, %v1945_v4 }
 0x2b0   : > { %v1884_v16 = vpop.f32.mrf.mxu1  ;;  %v2501_v9 = vpop.f32.mrf.mxu3 }
 0x2b1   : > { %v3022_v39 = vsel %vm2950_vm7, %v2914_v10, %v2986_v27  ;;  %v2565_v49 = vadd.f32 %v2501_v9, %v2255_v7  ;;  %v1946_v30 = vadd.f32 %v1884_v16, %v4169_v19 }
 0x2b2   : > { %3058 = vst.msk [vmem:[%s4314_s13 + $0xa8] sm:$0xff] %vm252_vm0, %v3022_v39 }
 0x2b3   : > { %v2875_v6 = vadd.f32 %v2811_v50, %v2565_v49 }
 0x2b4   : > { %v2814_v1 = vpop.f32.mrf.mxu0 }
 0x2b5   : > { %v2915_v22 = vadd.f32 %v4301_v51, %v2875_v6 }
 0x2b6   : > { %v2194_v26 = vpop.f32.mrf.mxu2 }
 0x2b7   : > { %vm2951_vm8 = vcmp.gt.f32.partialorder %v2915_v22, 0.0  ;;  %v2987_v24 = vmul.f32 0.2, %v2915_v22  ;;  %v2256_v20 = vadd.f32 %v2194_v26, %v1946_v30 }
 0x2b8   : > { %v1887_v57 = vpop.f32.mrf.mxu1  ;;  %v2504_v47 = vpop.f32.mrf.mxu3 }
 0x2b9   : > { %v3023_v12 = vsel %vm2951_vm8, %v2915_v22, %v2987_v24  ;;  %v2566_v14 = vadd.f32 %v2504_v47, %v2256_v20  ;;  %v1947_v60 = vadd.f32 %v1887_v57, %v4179_v34 }
 0x2ba   : > { %3059 = vst.msk [vmem:[%s4314_s13 + $0xb0] sm:$0xff] %vm252_vm0, %v3023_v12 }
 0x2bb   : > { %v2876_v62 = vadd.f32 %v2814_v1, %v2566_v14 }
 0x2bc   : > { %v2817_v45 = vpop.f32.mrf.mxu0 }
 0x2bd   : > { %v2916_v56 = vadd.f32 %v4301_v51, %v2876_v62 }
 0x2be   : > { %v2197_v19 = vpop.f32.mrf.mxu2 }
 0x2bf   : > { %vm2952_vm9 = vcmp.gt.f32.partialorder %v2916_v56, 0.0  ;;  %v2988_v33 = vmul.f32 0.2, %v2916_v56  ;;  %v2257_v11 = vadd.f32 %v2197_v19, %v1947_v60 }
 0x2c0   : > { %v1890_v32 = vpop.f32.mrf.mxu1  ;;  %v2507_v36 = vpop.f32.mrf.mxu3 }
 0x2c1   : > { %v3024_v53 = vsel %vm2952_vm9, %v2916_v56, %v2988_v33  ;;  %v2567_v15 = vadd.f32 %v2507_v36, %v2257_v11  ;;  %v1948_v61 = vadd.f32 %v1890_v32, %v4189_v59 }
 0x2c2   : > { %3060 = vst.msk [vmem:[%s4314_s13 + $0xb8] sm:$0xff] %vm252_vm0, %v3024_v53 }
 0x2c3   : > { %v2877_v58 = vadd.f32 %v2817_v45, %v2567_v15 }
 0x2c4   : > { %v2820_v8 = vpop.f32.mrf.mxu0 }
 0x2c5   : > { %v2917_v46 = vadd.f32 %v4301_v51, %v2877_v58 }
 0x2c6   : > { %v2200_v34 = vpop.f32.mrf.mxu2 }
 0x2c7   : > { %vm2953_vm10 = vcmp.gt.f32.partialorder %v2917_v46, 0.0  ;;  %v2989_v37 = vmul.f32 0.2, %v2917_v46  ;;  %v2258_v52 = vadd.f32 %v2200_v34, %v1948_v61 }
 0x2c8   : > { %v1893_v48 = vpop.f32.mrf.mxu1  ;;  %v2510_v0 = vpop.f32.mrf.mxu3 }
 0x2c9   : > { %v3025_v43 = vsel %vm2953_vm10, %v2917_v46, %v2989_v37  ;;  %v2568_v42 = vadd.f32 %v2510_v0, %v2258_v52  ;;  %v1949_v63 = vadd.f32 %v1893_v48, %v4199_v54 }
 0x2ca   : > { %3061 = vst.msk [vmem:[%s4314_s13 + $0xc0] sm:$0xff] %vm252_vm0, %v3025_v43 }
 0x2cb   : > { %v2878_v3 = vadd.f32 %v2820_v8, %v2568_v42 }
 0x2cc   : > { %v2823_v5 = vpop.f32.mrf.mxu0 }
 0x2cd   : > { %v2918_v38 = vadd.f32 %v4301_v51, %v2878_v3 }
 0x2ce   : > { %v2203_v59 = vpop.f32.mrf.mxu2 }
 0x2cf   : > { %vm2954_vm11 = vcmp.gt.f32.partialorder %v2918_v38, 0.0  ;;  %v2990_v40 = vmul.f32 0.2, %v2918_v38  ;;  %v2259_v21 = vadd.f32 %v2203_v59, %v1949_v63 }
 0x2d0   : > { %v1896_v25 = vpop.f32.mrf.mxu1  ;;  %v2513_v18 = vpop.f32.mrf.mxu3 }
 0x2d1   : > { %v3026_v13 = vsel %vm2954_vm11, %v2918_v38, %v2990_v40  ;;  %v2569_v50 = vadd.f32 %v2513_v18, %v2259_v21  ;;  %v1950_v31 = vadd.f32 %v1896_v25, %v4209_v55 }
 0x2d2   : > { %3062 = vst.msk [vmem:[%s4314_s13 + $0xc8] sm:$0xff] %vm252_vm0, %v3026_v13 }
 0x2d3   : > { %v2879_v4 = vadd.f32 %v2823_v5, %v2569_v50 }
 0x2d4   : > { %v2826_v10 = vpop.f32.mrf.mxu0 }
 0x2d5   : > { %v2919_v27 = vadd.f32 %v4301_v51, %v2879_v4 }
 0x2d6   : > { %v2206_v54 = vpop.f32.mrf.mxu2 }
 0x2d7   : > { %vm2955_vm12 = vcmp.gt.f32.partialorder %v2919_v27, 0.0  ;;  %v2991_v7 = vmul.f32 0.2, %v2919_v27  ;;  %v2260_v16 = vadd.f32 %v2206_v54, %v1950_v31 }
 0x2d8   : > { %v1899_v9 = vpop.f32.mrf.mxu1  ;;  %v2516_v39 = vpop.f32.mrf.mxu3 }
 0x2d9   : > { %v3027_v49 = vsel %vm2955_vm12, %v2919_v27, %v2991_v7  ;;  %v2570_v6 = vadd.f32 %v2516_v39, %v2260_v16  ;;  %v1951_v22 = vadd.f32 %v1899_v9, %v4219_v17 }
 0x2da   : > { %3063 = vst.msk [vmem:[%s4314_s13 + $0xd0] sm:$0xff] %vm252_vm0, %v3027_v49 }
 0x2db   : > { %v2880_v1 = vadd.f32 %v2826_v10, %v2570_v6 }
 0x2dc   : > { %v2829_v30 = vpop.f32.mrf.mxu0 }
 0x2dd   : > { %v2920_v26 = vadd.f32 %v4301_v51, %v2880_v1 }
 0x2de   : > { %v2209_v55 = vpop.f32.mrf.mxu2 }
 0x2df   : > { %vm2956_vm13 = vcmp.gt.f32.partialorder %v2920_v26, 0.0  ;;  %v2992_v24 = vmul.f32 0.2, %v2920_v26  ;;  %v2261_v20 = vadd.f32 %v2209_v55, %v1951_v22 }
 0x2e0   : > { %v1902_v57 = vpop.f32.mrf.mxu1  ;;  %v2519_v47 = vpop.f32.mrf.mxu3 }
 0x2e1   : > { %v3028_v12 = vsel %vm2956_vm13, %v2920_v26, %v2992_v24  ;;  %v2571_v14 = vadd.f32 %v2519_v47, %v2261_v20  ;;  %v1952_v60 = vadd.f32 %v1902_v57, %v4229_v28  ;;  %v4561_v28 = vld [vmem:[%s4594_s2] ss:$0 sm:$0xff] }
 0x2e2   : > { %3064 = vst.msk [vmem:[%s4314_s13 + $0xd8] sm:$0xff] %vm252_vm0, %v3028_v12 }
 0x2e3   : > { %v2881_v62 = vadd.f32 %v2829_v30, %v2571_v14 }
 0x2e4   : > { %v2832_v45 = vpop.f32.mrf.mxu0 }
 0x2e5   : > { %v2921_v56 = vadd.f32 %v4301_v51, %v2881_v62 }
 0x2e6   : > { %v2212_v17 = vpop.f32.mrf.mxu2 }
 0x2e7   : > { %vm2957_vm14 = vcmp.gt.f32.partialorder %v2921_v56, 0.0  ;;  %v2993_v19 = vmul.f32 0.2, %v2921_v56  ;;  %v2262_v33 = vadd.f32 %v2212_v17, %v1952_v60 }
 0x2e8   : > { %v1905_v11 = vpop.f32.mrf.mxu1  ;;  %v2522_v32 = vpop.f32.mrf.mxu3 }
 0x2e9   : > { %v3029_v36 = vsel %vm2957_vm14, %v2921_v56, %v2993_v19  ;;  %v2572_v53 = vadd.f32 %v2522_v32, %v2262_v33  ;;  %v1953_v8 = vadd.f32 %v1905_v11, %v4239_v35 }
 0x2ea   : > { %3065 = vst.msk [vmem:[%s4314_s13 + $0xe0] sm:$0xff] %vm252_vm0, %v3029_v36 }
 0x2eb   : > { %v2882_v15 = vadd.f32 %v2832_v45, %v2572_v53 }
 0x2ec   : > { %v2835_v58 = vpop.f32.mrf.mxu0 }
 0x2ed   : > { %v2922_v51 = vadd.f32 %v4561_v28, %v2882_v15 }
 0x2ee   : > { %v2215_v61 = vpop.f32.mrf.mxu2 }
 0x2ef   : > { %vm2958_vm15 = vcmp.gt.f32.partialorder %v2922_v51, 0.0  ;;  %v2994_v46 = vmul.f32 0.2, %v2922_v51  ;;  %v2263_v34 = vadd.f32 %v2215_v61, %v1953_v8 }
 0x2f0   : > { %v1908_v37 = vpop.f32.mrf.mxu1  ;;  %v2525_v52 = vpop.f32.mrf.mxu3 }
 0x2f1   : > { %v3030_v48 = vsel %vm2958_vm15, %v2922_v51, %v2994_v46  ;;  %v2573_v0 = vadd.f32 %v2525_v52, %v2263_v34  ;;  %v1954_v42 = vadd.f32 %v1908_v37, %v4249_v23 }
 0x2f2   : > { %3066 = vst.msk [vmem:[%s4314_s13 + $0xe8] sm:$0xff] %vm252_vm0, %v3030_v48 }
 0x2f3   : > { %v2883_v43 = vadd.f32 %v2835_v58, %v2573_v0 }
 0x2f4   : > { %v2838_v35 = vpop.f32.mrf.mxu0 }
 0x2f5   : > { %v2923_v3 = vadd.f32 %v4561_v28, %v2883_v43 }
 0x2f6   : > { %v2218_v5 = vpop.f32.mrf.mxu2 }
 0x2f7   : > { %vm2959_vm1 = vcmp.gt.f32.partialorder %v2923_v3, 0.0  ;;  %v2995_v63 = vmul.f32 0.2, %v2923_v3  ;;  %v2264_v38 = vadd.f32 %v2218_v5, %v1954_v42 }
 0x2f8   : > { %v1911_v59 = vpop.f32.mrf.mxu1  ;;  %v2528_v40 = vpop.f32.mrf.mxu3 }
 0x2f9   : > { %v3031_v21 = vsel %vm2959_vm1, %v2923_v3, %v2995_v63  ;;  %v2574_v25 = vadd.f32 %v2528_v40, %v2264_v38  ;;  %v1955_v50 = vadd.f32 %v1911_v59, %v4259_v29 }
 0x2fa   : > { %3067 = vst.msk [vmem:[%s4314_s13 + $0xf0] sm:$0xff] %vm252_vm0, %v3031_v21 }
 0x2fb   : > { %v2884_v18 = vadd.f32 %v2838_v35, %v2574_v25 }
 0x2fc   : > { %v2841_v13 = vpop.f32.mrf.mxu0 }
 0x2fd   : > { %v2924_v4 = vadd.f32 %v4561_v28, %v2884_v18 }
 0x2fe   : > { %v2221_v23 = vpop.f32.mrf.mxu2 }
 0x2ff   : > { %vm2960_vm2 = vcmp.gt.f32.partialorder %v2924_v4, 0.0  ;;  %v2996_v10 = vmul.f32 0.2, %v2924_v4  ;;  %v2265_v31 = vadd.f32 %v2221_v23, %v1955_v50 }
 0x300   : > { %v1914_v27 = vpop.f32.mrf.mxu1  ;;  %v2531_v54 = vpop.f32.mrf.mxu3 }
 0x301   : > { %v3032_v7 = vsel %vm2960_vm2, %v2924_v4, %v2996_v10  ;;  %v2575_v16 = vadd.f32 %v2531_v54, %v2265_v31  ;;  %v1956_v49 = vadd.f32 %v1914_v27, %v4269_v41 }
 0x302   : > { %3068 = vst.msk [vmem:[%s4314_s13 + $0xf8] sm:$0xff] %vm252_vm0, %v3032_v7 }
 0x303   : > { %v2885_v9 = vadd.f32 %v2841_v13, %v2575_v16 }
 0x304   : > { %v2844_v39 = vpop.f32.mrf.mxu0 }
 0x305   : > { %v2925_v6 = vadd.f32 %v4561_v28, %v2885_v9 }
 0x306   : > { %v2224_v29 = vpop.f32.mrf.mxu2 }
 0x307   : > { %vm2961_vm3 = vcmp.gt.f32.partialorder %v2925_v6, 0.0  ;;  %v2997_v1 = vmul.f32 0.2, %v2925_v6  ;;  %v2266_v30 = vadd.f32 %v2224_v29, %v1956_v49 }
 0x308   : > { %v1917_v22 = vpop.f32.mrf.mxu1  ;;  %v2534_v26 = vpop.f32.mrf.mxu3 }
 0x309   : > { %v3033_v55 = vsel %vm2961_vm3, %v2925_v6, %v2997_v1  ;;  %v2576_v24 = vadd.f32 %v2534_v26, %v2266_v30  ;;  %v1957_v57 = vadd.f32 %v1917_v22, %v4279_v2 }
 0x30a   : > { %3069 = vst.msk [vmem:[%s4314_s13 + $0x100] sm:$0xff] %vm252_vm0, %v3033_v55 }
 0x30b   : > { %v2886_v20 = vadd.f32 %v2844_v39, %v2576_v24 }
 0x30c   : > { %v2847_v41 = vpop.f32.mrf.mxu0 }
 0x30d   : > { %v2926_v47 = vadd.f32 %v4561_v28, %v2886_v20 }
 0x30e   : > { %v2227_v12 = vpop.f32.mrf.mxu2 }
 0x30f   : > { %vm2962_vm4 = vcmp.gt.f32.partialorder %v2926_v47, 0.0  ;;  %v2998_v14 = vmul.f32 0.2, %v2926_v47  ;;  %v2267_v62 = vadd.f32 %v2227_v12, %v1957_v57 }
 0x310   : > { %v2537_v45 = vpop.f32.mrf.mxu3  ;;  %v1920_v17 = vpop.f32.mrf.mxu1 }
 0x311   : > { %v3034_v60 = vsel %vm2962_vm4, %v2926_v47, %v2998_v14  ;;  %v2577_v56 = vadd.f32 %v2537_v45, %v2267_v62  ;;  %v1958_v33 = vadd.f32 %v1920_v17, %v4289_v44 }
 0x312   : > { %3070 = vst.msk [vmem:[%s4314_s13 + $0x108] sm:$0xff] %vm252_vm0, %v3034_v60 }
 0x313   : > { %v2887_v19 = vadd.f32 %v2847_v41, %v2577_v56 }
 0x314   : > { %v2850_v15 = vpop.f32.mrf.mxu0 }
 0x315   : > { %v2927_v2 = vadd.f32 %v4561_v28, %v2887_v19 }
 0x316   : > { %v2230_v11 = vpop.f32.mrf.mxu2 }
 0x317   : > { %vm2963_vm5 = vcmp.gt.f32.partialorder %v2927_v2, 0.0  ;;  %v2999_v32 = vmul.f32 0.2, %v2927_v2  ;;  %v2268_v36 = vadd.f32 %v2230_v11, %v1958_v33 }
 0x318   : > { %v2540_v53 = vpop.f32.mrf.mxu3 }
 0x319   : > { %v3035_v58 = vsel %vm2963_vm5, %v2927_v2, %v2999_v32  ;;  %v2578_v8 = vadd.f32 %v2540_v53, %v2268_v36 }
 0x31a   : > { %3071 = vst.msk [vmem:[%s4314_s13 + $0x110] sm:$0xff] %vm252_vm0, %v3035_v58 }
 0x31b   : > { %v2888_v51 = vadd.f32 %v2850_v15, %v2578_v8 }
 0x31d   : > { %v2928_v61 = vadd.f32 %v4561_v28, %v2888_v51 }
 0x31f   : > { %vm2964_vm6 = vcmp.gt.f32.partialorder %v2928_v61, 0.0  ;;  %v3000_v46 = vmul.f32 0.2, %v2928_v61 }
 0x321   : > { %v3036_v34 = vsel %vm2964_vm6, %v2928_v61, %v3000_v46 }
 0x322   : > { %3072 = vst.msk [vmem:[%s4314_s13 + $0x118] sm:$0xff] %vm252_vm0, %v3036_v34 }
 0x323 PF: > { %s13_s12 = sadd.s32 1, %s3523_s12  }
 0x324   : > { %p10_p4 = scmp.ge.s32.totalorder %s13_s12, 4  }
 0x326   :  { %12 = sbr.rel (!%p10_p4) target bundleno = 1 (0x1), region = 70 }

// kernel: discriminator_c_forward.19
= control target key start
LH: loop header
LB: loop body
LE: loop exit
PB: predicated region body
PF: predicated region fallthrough
CT: control target
= control target key end

     0   :  { %s1360_s12 = smov 0   ;;  %s1741_s0 = inlined_call_operand.vmem [shape: f32[2,104,32], index: 0, kind: input, shape index: {}]   ;;  %s1742_s1 = inlined_call_operand.vmem [shape: f32[9,32,32], index: 1, kind: input, shape index: {}]   ;;  %s1743_s2 = inlined_call_operand.vmem [shape: f32[1,32], index: 2, kind: input, shape index: {}]   ;;  %s1744_s3 = inlined_call_operand.vmem [shape: f32[2,80,32], index: 3, kind: output, shape index: {}]  }
   0x1 LB: > { %s1178_s13 = sadd.s32 4294967295, %s1338_s12   ;;  %p1182_p0 = scmp.ge.s32.totalorder %s1338_s12, 1  ;;  %s1338_s12 = sphi %s1360_s12, %s13_s12  }
   0x2   : > { %p137_p1 = scmp.lt.s32.totalorder %s1338_s12, 3 }
   0x4   : > { %p138_p2 = pnand %p1182_p0, %p137_p1 }
   0x5   : > { %p161_p3 = scmp.lt.s32.totalorder (!%p138_p2), %s1178_s13, 1 }
   0x6   : > { %141 = sbr.rel (%p138_p2) target bundleno = 337 (0x151), region = 32 }
   0xb   : > { %v1188_v0 = vld [vmem:[%s1742_s1 + $0x38] sm:$0xff]  ;;  %v1187_v1 = vld [vmem:[%s1742_s1 + $0x30] sm:$0xff]  ;;  %v1186_v2 = vld [vmem:[%s1742_s1 + $0x28] sm:$0xff]  ;;  %s1746_s13 = smov (!%p161_p3, %s1178_s13), 1  ;;  %vm200_vm0 = vcmask 261120  }
   0xc   : > { %1309 = vmatpush.msra.mxu1 %v1188_v0  ;;  %1311 = vmatpush.msra.mxu3 %v1188_v0  ;;  %v1185_v3 = vld [vmem:[%s1742_s1 + $0x20] sm:$0xff]  ;;  %s1321_s22 = smul.u32 104, %s1746_s13  ;;  %v1226_v4 = vld [vmem:[%s1742_s1 + $0x78] sm:$0xff]  ;;  %v1225_v8 = vld [vmem:[%s1742_s1 + $0x70] sm:$0xff] }
   0xd   : > { %243 = vmatpush.msra.mxu0 %v1188_v0  ;;  %1310 = vmatpush.msra.mxu2 %v1188_v0  ;;  %v184_v5 = vld [vmem:[%s1742_s1 + $0x18] sm:$0xff]  ;;  %v183_v10 = vld [vmem:[%s1742_s1 + $0x10] sm:$0xff]  ;;  %v1224_v13 = vld [vmem:[%s1742_s1 + $0x68] sm:$0xff]  ;;  %s1322_s18 = smul.u32 80, %s1746_s13 }
   0xe   : > { %1312 = vmatpush.msra.mxu1 %v1187_v1  ;;  %1314 = vmatpush.msra.mxu3 %v1187_v1  ;;  %s1386_s25 = scalar_lea.vmem %s1741_s0, %s1321_s22  ;;  %v1240_v11 = vld [vmem:[%s1742_s1 + $0x98] sm:$0xff]  ;;  %v182_v15 = vld [vmem:[%s1742_s1 + $0x8] sm:$0xff]  ;;  %v1239_v16 = vld [vmem:[%s1742_s1 + $0x90] sm:$0xff] }
   0xf   : > { %244 = vmatpush.msra.mxu0 %v1187_v1  ;;  %1313 = vmatpush.msra.mxu2 %v1187_v1  ;;  %v188_v6 = vld [vmem:[%s1386_s25 + $0x19] sm:$0xff]  ;;  %v185_v9 = vld [vmem:[%s1386_s25 + $0x1] sm:$0xff]  ;;  %v191_v12 = vld [vmem:[%s1386_s25 + $0x31] sm:$0xff]  ;;  %s1699_s21 = scalar_lea.vmem %s1744_s3, %s1322_s18 }
  0x10   : > { %1315 = vmatpush.msra.mxu1 %v1186_v2  ;;  %1317 = vmatpush.msra.mxu3 %v1186_v2  ;;  %v192_v7 = vld [vmem:[%s1386_s25 + $0x39] sm:$0xff]  ;;  %v189_v18 = vld [vmem:[%s1386_s25 + $0x21] sm:$0xff]  ;;  %v1211_v20 = vld [vmem:[%s1742_s1 + $0x50] sm:$0xff] }
  0x11   : > { %245 = vmatpush.msra.mxu0 %v1186_v2  ;;  %1316 = vmatpush.msra.mxu2 %v1186_v2  ;;  %v1212_v14 = vld [vmem:[%s1742_s1 + $0x58] sm:$0xff]  ;;  %v1223_v17 = vld [vmem:[%s1742_s1 + $0x60] sm:$0xff]  ;;  %v1238_v22 = vld [vmem:[%s1742_s1 + $0x88] sm:$0xff] }
  0x12   : > { %1318 = vmatpush.msra.mxu1 %v1185_v3  ;;  %1320 = vmatpush.msra.mxu3 %v1185_v3  ;;  %v193_v19 = vld [vmem:[%s1386_s25 + $0x41] sm:$0xff]  ;;  %v1282_v23 = vld [vmem:[%s1742_s1 + $0xf8] sm:$0xff]  ;;  %v186_v24 = vld [vmem:[%s1386_s25 + $0x9] sm:$0xff] }
  0x13   : > { %1192 = vmatmul.msk.f32.vlgmr.msra.gmra.mxu1 %vm200_vm0, %v188_v6  ;;  %1196 = vmatmul.msk.f32.vlgmr.msra.gmra.mxu3 %vm200_vm0, %v192_v7  ;;  %v181_v21 = vld [vmem:[%s1742_s1] sm:$0xff]  ;;  %v1210_v25 = vld [vmem:[%s1742_s1 + $0x48] sm:$0xff]  ;;  %v1254_v27 = vld [vmem:[%s1742_s1 + $0xb8] sm:$0xff] }
  0x14   : > { %514 = vmatpush.msrb.mxu3 %v1226_v4  ;;  %320 = vmatpush.msrb.mxu1 %v184_v5  ;;  %v1237_v26 = vld [vmem:[%s1742_s1 + $0x80] sm:$0xff]  ;;  %v1296_v29 = vld [vmem:[%s1742_s1 + $0x118] sm:$0xff]  ;;  %v1281_v31 = vld [vmem:[%s1742_s1 + $0xf0] sm:$0xff] }
  0x15   : > { %246 = vmatpush.msra.mxu0 %v1185_v3  ;;  %1319 = vmatpush.msra.mxu2 %v1185_v3  ;;  %v1209_v28 = vld [vmem:[%s1742_s1 + $0x40] sm:$0xff]  ;;  %v1268_v32 = vld [vmem:[%s1742_s1 + $0xd8] sm:$0xff]  ;;  %v1253_v33 = vld [vmem:[%s1742_s1 + $0xb0] sm:$0xff] }
  0x16   : > { %515 = vmatpush.msrb.mxu3 %v1225_v8  ;;  %1189 = vmatmul.msk.f32.vlgmr.msra.gmra.mxu0 %vm200_vm0, %v185_v9  ;;  %v355_v30 = vld [vmem:[%s1386_s25 + $0x2] sm:$0xff]  ;;  %v1267_v36 = vld [vmem:[%s1742_s1 + $0xd0] sm:$0xff]  ;;  %v459_v49 = vld [vmem:[%s1386_s25 + $0x1a] sm:$0xff] }
  0x17   : > { %321 = vmatpush.msrb.mxu1 %v183_v10  ;;  %616 = vmatpush.msrb.mxu0 %v1240_v11  ;;  %v190_v34 = vld [vmem:[%s1386_s25 + $0x29] sm:$0xff]  ;;  %v187_v37 = vld [vmem:[%s1386_s25 + $0x11] sm:$0xff]  ;;  %v171_v39 = vld [vmem:[%s1386_s25] sm:$0xff] }
  0x18   : > { %1195 = vmatmul.msk.f32.vlgmr.msra.gmra.mxu2 %vm200_vm0, %v191_v12  ;;  %516 = vmatpush.msrb.mxu3 %v1224_v13  ;;  %v194_v35 = vld [vmem:[%s1386_s25 + $0x49] sm:$0xff]  ;;  %v458_v44 = vld [vmem:[%s1386_s25 + $0x12] sm:$0xff]  ;;  %v561_v50 = vld [vmem:[%s1386_s25 + $0x1b] sm:$0xff] }
  0x19   : > { %412 = vmatpush.msrb.mxu2 %v1212_v14  ;;  %322 = vmatpush.msrb.mxu1 %v182_v15  ;;  %v1295_v38 = vld [vmem:[%s1742_s1 + $0x110] sm:$0xff]  ;;  %v1266_v42 = vld [vmem:[%s1742_s1 + $0xc8] sm:$0xff]  ;;  %v174_v52 = vld [vmem:[%s1386_s25 + $0x18] sm:$0xff] }
  0x1a   : > { %617 = vmatpush.msrb.mxu0 %v1239_v16  ;;  %517 = vmatpush.msrb.mxu3 %v1223_v17  ;;  %v457_v40 = vld [vmem:[%s1386_s25 + $0xa] sm:$0xff]  ;;  %v560_v45 = vld [vmem:[%s1386_s25 + $0x13] sm:$0xff]  ;;  %v460_v53 = vld [vmem:[%s1386_s25 + $0x22] sm:$0xff] }
  0x1b   : > { %1193 = vmatmul.msk.f32.gmra.mxu1 %vm200_vm0, %v189_v18  ;;  %1197 = vmatmul.msk.f32.gmra.mxu3 %vm200_vm0, %v193_v19  ;;  %v559_v41 = vld [vmem:[%s1386_s25 + $0xb] sm:$0xff]  ;;  %v562_v54 = vld [vmem:[%s1386_s25 + $0x23] sm:$0xff]  ;;  %v564_v0 = vld [vmem:[%s1386_s25 + $0x33] sm:$0xff] }
  0x1c   : > { %413 = vmatpush.msrb.mxu2 %v1211_v20  ;;  %323 = vmatpush.msrb.mxu1 %v181_v21  ;;  %v172_v43 = vld [vmem:[%s1386_s25 + $0x8] sm:$0xff]  ;;  %v173_v48 = vld [vmem:[%s1386_s25 + $0x10] sm:$0xff]  ;;  %v1265_v55 = vld [vmem:[%s1742_s1 + $0xc0] sm:$0xff] }
  0x1d   : > { %618 = vmatpush.msrb.mxu0 %v1238_v22  ;;  %922 = vmatpush.msra.mxu3 %v1282_v23  ;;  %v1280_v46 = vld [vmem:[%s1742_s1 + $0xe8] sm:$0xff]  ;;  %v1279_v56 = vld [vmem:[%s1742_s1 + $0xe0] sm:$0xff]  ;;  %v462_v63 = vld [vmem:[%s1386_s25 + $0x32] sm:$0xff] }
  0x1e   : > { %1190 = vmatmul.msk.f32.gmra.mxu0 %vm200_vm0, %v186_v24  ;;  %414 = vmatpush.msrb.mxu2 %v1210_v25  ;;  %v1252_v47 = vld [vmem:[%s1742_s1 + $0xa8] sm:$0xff]  ;;  %v1251_v57 = vld [vmem:[%s1742_s1 + $0xa0] sm:$0xff]  ;;  %v177_v1 = vld [vmem:[%s1386_s25 + $0x30] sm:$0xff] }
  0x1f   : > { %619 = vmatpush.msrb.mxu0 %v1237_v26  ;;  %718 = vmatpush.msra.mxu1 %v1254_v27  ;;  %v1294_v51 = vld [vmem:[%s1742_s1 + $0x108] sm:$0xff]  ;;  %v175_v58 = vld [vmem:[%s1386_s25 + $0x20] sm:$0xff]  ;;  %v178_v4 = vld [vmem:[%s1386_s25 + $0x38] sm:$0xff] }
  0x20   : > { %415 = vmatpush.msrb.mxu2 %v1209_v28  ;;  %923 = vmatpush.msra.mxu3 %v1281_v31  ;;  %v461_v59 = vld [vmem:[%s1386_s25 + $0x2a] sm:$0xff]  ;;  %v1293_v61 = vld [vmem:[%s1742_s1 + $0x100] sm:$0xff]  ;;  %v763_v10 = vld [vmem:[%s1386_s25 + $0x14] sm:$0xff] }
  0x21   : > { %1024 = vmatpush.msra.mxu0 %v1296_v29  ;;  %1213 = vmatmul.msk.f32.vlgmr.msrb.gmra.mxu2 %vm200_vm0, %v355_v30  ;;  %v563_v60 = vld [vmem:[%s1386_s25 + $0x2b] sm:$0xff]  ;;  %v463_v2 = vld [vmem:[%s1386_s25 + $0x3a] sm:$0xff]  ;;  %v464_v5 = vld [vmem:[%s1386_s25 + $0x42] sm:$0xff] }
  0x22   : > { %820 = vmatpush.msra.mxu2 %v1268_v32  ;;  %719 = vmatpush.msra.mxu1 %v1253_v33  ;;  %v176_v62 = vld [vmem:[%s1386_s25 + $0x28] sm:$0xff]  ;;  %v565_v3 = vld [vmem:[%s1386_s25 + $0x3b] sm:$0xff]  ;;  %v466_v12 = vld [vmem:[%s1386_s25 + $0x52] sm:$0xff] }
  0x23   : > { %1194 = vmatmul.msk.f32.gmra.mxu1 %vm200_vm0, %v190_v34  ;;  %1198 = vmatmul.msk.f32.gmra.mxu3 %vm200_vm0, %v194_v35  ;;  %v566_v6 = vld [vmem:[%s1386_s25 + $0x43] sm:$0xff]  ;;  %v567_v9 = vld [vmem:[%s1386_s25 + $0x4b] sm:$0xff]  ;;  %v568_v13 = vld [vmem:[%s1386_s25 + $0x53] sm:$0xff] }
  0x24   : > { %821 = vmatpush.msra.mxu2 %v1267_v36  ;;  %1025 = vmatpush.msra.mxu0 %v1295_v38  ;;  %v179_v7 = vld [vmem:[%s1386_s25 + $0x40] sm:$0xff]  ;;  %v465_v8 = vld [vmem:[%s1386_s25 + $0x4a] sm:$0xff]  ;;  %v865_v16 = vld [vmem:[%s1386_s25 + $0x15] sm:$0xff] }
  0x25   : > { %924 = vmatpush.msra.mxu3 %v1280_v46  ;;  %720 = vmatpush.msra.mxu1 %v1252_v47  ;;  %v180_v11 = vld [vmem:[%s1386_s25 + $0x48] sm:$0xff]  ;;  %v764_v14 = vld [vmem:[%s1386_s25 + $0x1c] sm:$0xff]  ;;  %v767_v24 = vld [vmem:[%s1386_s25 + $0x34] sm:$0xff] }
  0x26   : > { %1191 = vmatmul.msk.f32.gmra.mxu0 %vm200_vm0, %v187_v37  ;;  %822 = vmatpush.msra.mxu2 %v1266_v42  ;;  %v661_v15 = vld [vmem:[%s1386_s25 + $0xc] sm:$0xff]  ;;  %v967_v17 = vld [vmem:[%s1386_s25 + $0x16] sm:$0xff]  ;;  %v765_v18 = vld [vmem:[%s1386_s25 + $0x24] sm:$0xff] }
  0x27   : > { %1026 = vmatpush.msra.mxu0 %v1294_v51  ;;  %925 = vmatpush.msra.mxu3 %v1279_v56  ;;  %v866_v19 = vld [vmem:[%s1386_s25 + $0x1d] sm:$0xff]  ;;  %v766_v21 = vld [vmem:[%s1386_s25 + $0x2c] sm:$0xff]  ;;  %v869_v32 = vld [vmem:[%s1386_s25 + $0x35] sm:$0xff] }
  0x28   : > { %823 = vmatpush.msra.mxu2 %v1265_v55  ;;  %721 = vmatpush.msra.mxu1 %v1251_v57  ;;  %v968_v20 = vld [vmem:[%s1386_s25 + $0x1e] sm:$0xff]  ;;  %v969_v23 = vld [vmem:[%s1386_s25 + $0x26] sm:$0xff]  ;;  %v970_v28 = vld [vmem:[%s1386_s25 + $0x2e] sm:$0xff] }
  0x29   : > { %1214 = vmatmul.msk.f32.gmra.mxu2 %vm200_vm0, %v457_v40  ;;  %1027 = vmatpush.msra.mxu0 %v1293_v61  ;;  %v867_v22 = vld [vmem:[%s1386_s25 + $0x25] sm:$0xff]  ;;  %v868_v26 = vld [vmem:[%s1386_s25 + $0x2d] sm:$0xff]  ;;  %v768_v30 = vld [vmem:[%s1386_s25 + $0x3c] sm:$0xff] }
  0x2a   : > { %v971_v35 = vld [vmem:[%s1386_s25 + $0x36] sm:$0xff]  ;;  %v769_v37 = vld [vmem:[%s1386_s25 + $0x44] sm:$0xff]  ;;  %v872_v56 = vld [vmem:[%s1386_s25 + $0x4d] sm:$0xff] }
  0x2b   : > { %1199 = vmatmul.msk.f32.vlgmr.msrb.gmra.mxu1 %vm200_vm0, %v171_v39  ;;  %1227 = vmatmul.msk.f32.vlgmr.msrb.gmra.mxu3 %vm200_vm0, %v457_v40  ;;  %v870_v39 = vld [vmem:[%s1386_s25 + $0x3d] sm:$0xff]  ;;  %v871_v46 = vld [vmem:[%s1386_s25 + $0x45] sm:$0xff]  ;;  %v974_v61 = vld [vmem:[%s1386_s25 + $0x4e] sm:$0xff] }
  0x2e   : > { %1241 = vmatmul.msk.f32.vlgmr.msrb.gmra.mxu0 %vm200_vm0, %v559_v41  ;;  %v972_v41 = vld [vmem:[%s1386_s25 + $0x3e] sm:$0xff] }
  0x31   : > { %1215 = vmatmul.msk.f32.gmra.mxu2 %vm200_vm0, %v458_v44 }
  0x33   : > { %1200 = vmatmul.msk.f32.gmra.mxu1 %vm200_vm0, %v172_v43  ;;  %1228 = vmatmul.msk.f32.gmra.mxu3 %vm200_vm0, %v458_v44  ;;  %v770_v44 = vld [vmem:[%s1386_s25 + $0x4c] sm:$0xff] }
  0x36   : > { %1242 = vmatmul.msk.f32.gmra.mxu0 %vm200_vm0, %v560_v45 }
  0x39   : > { %1216 = vmatmul.msk.f32.gmra.mxu2 %vm200_vm0, %v459_v49 }
  0x3b   : > { %1201 = vmatmul.msk.f32.gmra.mxu1 %vm200_vm0, %v173_v48  ;;  %1229 = vmatmul.msk.f32.gmra.mxu3 %vm200_vm0, %v459_v49 }
  0x3e   : > { %1243 = vmatmul.msk.f32.gmra.mxu0 %vm200_vm0, %v561_v50  ;;  %v973_v50 = vld [vmem:[%s1386_s25 + $0x46] sm:$0xff] }
  0x41   : > { %1217 = vmatmul.msk.f32.gmra.mxu2 %vm200_vm0, %v460_v53 }
  0x43   : > { %1202 = vmatmul.msk.f32.gmra.mxu1 %vm200_vm0, %v174_v52  ;;  %1230 = vmatmul.msk.f32.gmra.mxu3 %vm200_vm0, %v460_v53  ;;  %v771_v53 = vld [vmem:[%s1386_s25 + $0x54] sm:$0xff] }
  0x46   : > { %1244 = vmatmul.msk.f32.gmra.mxu0 %vm200_vm0, %v562_v54 }
  0x49   : > { %1218 = vmatmul.msk.f32.gmra.mxu2 %vm200_vm0, %v461_v59 }
  0x4b   : > { %1203 = vmatmul.msk.f32.gmra.mxu1 %vm200_vm0, %v175_v58  ;;  %1231 = vmatmul.msk.f32.gmra.mxu3 %vm200_vm0, %v461_v59 }
  0x4e   : > { %1245 = vmatmul.msk.f32.gmra.mxu0 %vm200_vm0, %v563_v60 }
  0x51   : > { %1219 = vmatmul.msk.f32.gmra.mxu2 %vm200_vm0, %v462_v63 }
  0x53   : > { %1204 = vmatmul.msk.f32.gmra.mxu1 %vm200_vm0, %v176_v62  ;;  %1232 = vmatmul.msk.f32.gmra.mxu3 %vm200_vm0, %v462_v63 }
  0x56   : > { %1246 = vmatmul.msk.f32.gmra.mxu0 %vm200_vm0, %v564_v0  ;;  %v772_v0 = vld [vmem:[%s1386_s25 + $0x5c] sm:$0xff] }
  0x59   : > { %1220 = vmatmul.msk.f32.gmra.mxu2 %vm200_vm0, %v463_v2 }
  0x5b   : > { %1205 = vmatmul.msk.f32.gmra.mxu1 %vm200_vm0, %v177_v1  ;;  %1233 = vmatmul.msk.f32.gmra.mxu3 %vm200_vm0, %v463_v2 }
  0x5e   : > { %1247 = vmatmul.msk.f32.gmra.mxu0 %vm200_vm0, %v565_v3  ;;  %v873_v3 = vld [vmem:[%s1386_s25 + $0x55] sm:$0xff] }
  0x61   : > { %1221 = vmatmul.msk.f32.gmra.mxu2 %vm200_vm0, %v464_v5 }
  0x63   : > { %1206 = vmatmul.msk.f32.gmra.mxu1 %vm200_vm0, %v178_v4  ;;  %1234 = vmatmul.msk.f32.gmra.mxu3 %vm200_vm0, %v464_v5 }
  0x66   : > { %1248 = vmatmul.msk.f32.gmra.mxu0 %vm200_vm0, %v566_v6 }
  0x69   : > { %1222 = vmatmul.msk.f32.gmra.mxu2 %vm200_vm0, %v465_v8 }
  0x6b   : > { %1207 = vmatmul.msk.f32.gmra.mxu1 %vm200_vm0, %v179_v7  ;;  %1235 = vmatmul.msk.f32.gmra.mxu3 %vm200_vm0, %v465_v8  ;;  %v975_v8 = vld [vmem:[%s1386_s25 + $0x56] sm:$0xff] }
  0x6e   : > { %1249 = vmatmul.msk.f32.gmra.mxu0 %vm200_vm0, %v567_v9 }
  0x71   : > { %1269 = vmatmul.msk.f32.vlgmr.msra.gmra.mxu2 %vm200_vm0, %v763_v10 }
  0x73   : > { %1208 = vmatmul.msk.f32.gmra.mxu1 %vm200_vm0, %v180_v11  ;;  %1236 = vmatmul.msk.f32.gmra.mxu3 %vm200_vm0, %v466_v12 }
  0x76   : > { %1250 = vmatmul.msk.f32.gmra.mxu0 %vm200_vm0, %v568_v13  ;;  %v874_v13 = vld [vmem:[%s1386_s25 + $0x5d] sm:$0xff] }
  0x79   : > { %1270 = vmatmul.msk.f32.gmra.mxu2 %vm200_vm0, %v764_v14 }
  0x7b   : > { %1255 = vmatmul.msk.f32.vlgmr.msra.gmra.mxu1 %vm200_vm0, %v661_v15  ;;  %1283 = vmatmul.msk.f32.vlgmr.msra.gmra.mxu3 %vm200_vm0, %v865_v16 }
  0x7e   : > { %1297 = vmatmul.msk.f32.vlgmr.msra.gmra.mxu0 %vm200_vm0, %v967_v17 }
  0x81   : > { %1271 = vmatmul.msk.f32.gmra.mxu2 %vm200_vm0, %v765_v18 }
  0x83   : > { %1256 = vmatmul.msk.f32.gmra.mxu1 %vm200_vm0, %v763_v10  ;;  %1284 = vmatmul.msk.f32.gmra.mxu3 %vm200_vm0, %v866_v19 }
  0x86   : > { %1298 = vmatmul.msk.f32.gmra.mxu0 %vm200_vm0, %v968_v20 }
  0x89   : > { %1272 = vmatmul.msk.f32.gmra.mxu2 %vm200_vm0, %v766_v21 }
  0x8b   : > { %1257 = vmatmul.msk.f32.gmra.mxu1 %vm200_vm0, %v764_v14  ;;  %1285 = vmatmul.msk.f32.gmra.mxu3 %vm200_vm0, %v867_v22 }
  0x8e   : > { %1299 = vmatmul.msk.f32.gmra.mxu0 %vm200_vm0, %v969_v23 }
  0x90   : > { %v1600_v25 = vpop.f32.mrf.mxu1 }
  0x91   : > { %1273 = vmatmul.msk.f32.gmra.mxu2 %vm200_vm0, %v767_v24 }
  0x93   : > { %1258 = vmatmul.msk.f32.gmra.mxu1 %vm200_vm0, %v765_v18  ;;  %1286 = vmatmul.msk.f32.gmra.mxu3 %vm200_vm0, %v868_v26  ;;  %v248_v27 = vpop.f32.mrf.mxu0  ;;  %v976_v18 = vld [vmem:[%s1386_s25 + $0x5e] sm:$0xff] }
  0x96   : > { %v1607_v29 = vpop.f32.mrf.mxu3  ;;  %1300 = vmatmul.msk.f32.gmra.mxu0 %vm200_vm0, %v970_v28 }
  0x98   : > { %v1611_v31 = vpop.f32.mrf.mxu1 }
  0x99   : > { %1274 = vmatmul.msk.f32.gmra.mxu2 %vm200_vm0, %v768_v30 }
  0x9b   : > { %1259 = vmatmul.msk.f32.gmra.mxu1 %vm200_vm0, %v766_v21  ;;  %1287 = vmatmul.msk.f32.gmra.mxu3 %vm200_vm0, %v869_v32  ;;  %v251_v33 = vpop.f32.mrf.mxu0  ;;  %v1617_v34 = vpop.f32.mrf.mxu2 }
  0x9e   : > { %v1620_v36 = vpop.f32.mrf.mxu3  ;;  %1301 = vmatmul.msk.f32.gmra.mxu0 %vm200_vm0, %v971_v35 }
  0xa0   : > { %v1624_v38 = vpop.f32.mrf.mxu1 }
  0xa1   : > { %1275 = vmatmul.msk.f32.gmra.mxu2 %vm200_vm0, %v769_v37 }
  0xa3   : > { %1260 = vmatmul.msk.f32.gmra.mxu1 %vm200_vm0, %v767_v24  ;;  %1288 = vmatmul.msk.f32.gmra.mxu3 %vm200_vm0, %v870_v39  ;;  %v254_v40 = vpop.f32.mrf.mxu0 }
  0xa4   : > { %v417_v42 = vpop.f32.mrf.mxu2 }
  0xa6   : > { %v1631_v43 = vpop.f32.mrf.mxu3  ;;  %1302 = vmatmul.msk.f32.gmra.mxu0 %vm200_vm0, %v972_v41 }
  0xa8   : > { %v325_v45 = vpop.f32.mrf.mxu1 }
  0xa9   : > { %v326_v47 = vadd.f32 %v325_v45, %v248_v27  ;;  %1276 = vmatmul.msk.f32.gmra.mxu2 %vm200_vm0, %v770_v44 }
  0xab   : > { %v447_v48 = vadd.f32 %v417_v42, %v326_v47  ;;  %1261 = vmatmul.msk.f32.gmra.mxu1 %vm200_vm0, %v768_v30  ;;  %1289 = vmatmul.msk.f32.gmra.mxu3 %vm200_vm0, %v871_v46  ;;  %v621_v49 = vpop.f32.mrf.mxu0 }
  0xac   : > { %v420_v51 = vpop.f32.mrf.mxu2 }
  0xae   : > { %v519_v52 = vpop.f32.mrf.mxu3  ;;  %1303 = vmatmul.msk.f32.gmra.mxu0 %vm200_vm0, %v973_v50 }
  0xaf   : > { %v549_v54 = vadd.f32 %v519_v52, %v447_v48 }
  0xb0   : > { %v328_v55 = vpop.f32.mrf.mxu1 }
  0xb1   : > { %v329_v57 = vadd.f32 %v328_v55, %v251_v33  ;;  %v1643_v58 = vadd.f32 %v621_v49, %v549_v54  ;;  %1277 = vmatmul.msk.f32.gmra.mxu2 %vm200_vm0, %v771_v53 }
  0xb3   : > { %v448_v59 = vadd.f32 %v420_v51, %v329_v57  ;;  %1262 = vmatmul.msk.f32.gmra.mxu1 %vm200_vm0, %v769_v37  ;;  %1290 = vmatmul.msk.f32.gmra.mxu3 %vm200_vm0, %v872_v56  ;;  %v624_v60 = vpop.f32.mrf.mxu0 }
  0xb4   : > { %v423_v62 = vpop.f32.mrf.mxu2 }
  0xb6   : > { %v522_v63 = vpop.f32.mrf.mxu3  ;;  %1304 = vmatmul.msk.f32.gmra.mxu0 %vm200_vm0, %v974_v61 }
  0xb7   : > { %v550_v1 = vadd.f32 %v522_v63, %v448_v59 }
  0xb8   : > { %v331_v2 = vpop.f32.mrf.mxu1 }
  0xb9   : > { %v332_v4 = vadd.f32 %v331_v2, %v254_v40  ;;  %v1652_v5 = vadd.f32 %v624_v60, %v550_v1  ;;  %1278 = vmatmul.msk.f32.gmra.mxu2 %vm200_vm0, %v772_v0 }
  0xbb   : > { %v449_v6 = vadd.f32 %v423_v62, %v332_v4  ;;  %1263 = vmatmul.msk.f32.gmra.mxu1 %vm200_vm0, %v770_v44  ;;  %1291 = vmatmul.msk.f32.gmra.mxu3 %vm200_vm0, %v873_v3  ;;  %v627_v7 = vpop.f32.mrf.mxu0 }
  0xbc   : > { %v426_v9 = vpop.f32.mrf.mxu2 }
  0xbe   : > { %v525_v10 = vpop.f32.mrf.mxu3  ;;  %1305 = vmatmul.msk.f32.gmra.mxu0 %vm200_vm0, %v975_v8 }
  0xbf   : > { %v551_v11 = vadd.f32 %v525_v10, %v449_v6 }
  0xc0   : > { %v334_v12 = vpop.f32.mrf.mxu1 }
  0xc1   : > { %v335_v14 = vadd.f32 %v334_v12, %v1600_v25  ;;  %v1661_v15 = vadd.f32 %v627_v7, %v551_v11 }
  0xc3   : > { %v450_v16 = vadd.f32 %v426_v9, %v335_v14  ;;  %1264 = vmatmul.msk.f32.gmra.mxu1 %vm200_vm0, %v771_v53  ;;  %1292 = vmatmul.msk.f32.gmra.mxu3 %vm200_vm0, %v874_v13  ;;  %v630_v17 = vpop.f32.mrf.mxu0 }
  0xc4   : > { %v429_v19 = vpop.f32.mrf.mxu2 }
  0xc6   : > { %v528_v20 = vpop.f32.mrf.mxu3  ;;  %1306 = vmatmul.msk.f32.gmra.mxu0 %vm200_vm0, %v976_v18 }
  0xc7   : > { %v552_v21 = vadd.f32 %v528_v20, %v450_v16 }
  0xc8   : > { %v337_v22 = vpop.f32.mrf.mxu1 }
  0xc9   : > { %v338_v23 = vadd.f32 %v337_v22, %v1611_v31  ;;  %v1668_v24 = vadd.f32 %v630_v17, %v552_v21 }
  0xcb   : > { %v451_v25 = vadd.f32 %v429_v19, %v338_v23  ;;  %v633_v26 = vpop.f32.mrf.mxu0 }
  0xcc   : > { %v432_v27 = vpop.f32.mrf.mxu2 }
  0xce   : > { %v531_v28 = vpop.f32.mrf.mxu3 }
  0xcf   : > { %v553_v30 = vadd.f32 %v531_v28, %v451_v25 }
  0xd0   : > { %v340_v32 = vpop.f32.mrf.mxu1 }
  0xd1   : > { %v341_v33 = vadd.f32 %v340_v32, %v1624_v38  ;;  %v1671_v35 = vadd.f32 %v633_v26, %v553_v30 }
  0xd3   : > { %v452_v37 = vadd.f32 %v432_v27, %v341_v33  ;;  %v636_v39 = vpop.f32.mrf.mxu0 }
  0xd4   : > { %v435_v40 = vpop.f32.mrf.mxu2 }
  0xd6   : > { %v534_v41 = vpop.f32.mrf.mxu3 }
  0xd7   : > { %v554_v42 = vadd.f32 %v534_v41, %v452_v37 }
  0xd8   : > { %v343_v44 = vpop.f32.mrf.mxu1 }
  0xd9   : > { %v344_v31 = vadd.f32 %v343_v44, %v1617_v34  ;;  %v1674_v45 = vadd.f32 %v636_v39, %v554_v42 }
  0xdb   : > { %v453_v46 = vadd.f32 %v435_v40, %v344_v31  ;;  %v639_v47 = vpop.f32.mrf.mxu0 }
  0xdc   : > { %v438_v48 = vpop.f32.mrf.mxu2 }
  0xde   : > { %v537_v49 = vpop.f32.mrf.mxu3 }
  0xdf   : > { %v555_v50 = vadd.f32 %v537_v49, %v453_v46 }
  0xe0   : > { %v346_v51 = vpop.f32.mrf.mxu1 }
  0xe1   : > { %v347_v38 = vadd.f32 %v346_v51, %v1607_v29  ;;  %v1677_v52 = vadd.f32 %v639_v47, %v555_v50 }
  0xe3   : > { %v454_v53 = vadd.f32 %v438_v48, %v347_v38  ;;  %v642_v54 = vpop.f32.mrf.mxu0 }
  0xe4   : > { %v441_v55 = vpop.f32.mrf.mxu2 }
  0xe6   : > { %v540_v56 = vpop.f32.mrf.mxu3 }
  0xe7   : > { %v556_v57 = vadd.f32 %v540_v56, %v454_v53 }
  0xe8   : > { %v349_v59 = vpop.f32.mrf.mxu1 }
  0xe9   : > { %v350_v34 = vadd.f32 %v349_v59, %v1620_v36  ;;  %v1680_v60 = vadd.f32 %v642_v54, %v556_v57 }
  0xeb   : > { %v455_v61 = vadd.f32 %v441_v55, %v350_v34  ;;  %v645_v62 = vpop.f32.mrf.mxu0 }
  0xec   : > { %v444_v63 = vpop.f32.mrf.mxu2 }
  0xee   : > { %v543_v0 = vpop.f32.mrf.mxu3 }
  0xef   : > { %v557_v1 = vadd.f32 %v543_v0, %v455_v61 }
  0xf0   : > { %v352_v2 = vpop.f32.mrf.mxu1 }
  0xf1   : > { %v353_v29 = vadd.f32 %v352_v2, %v1631_v43  ;;  %v1683_v3 = vadd.f32 %v645_v62, %v557_v1  ;;  %v1691_v43 = vld [vmem:[%s1743_s2] ss:$0 sm:$0xff] }
  0xf3   : > { %v456_v4 = vadd.f32 %v444_v63, %v353_v29  ;;  %v648_v6 = vpop.f32.mrf.mxu0 }
  0xf4   : > { %v825_v7 = vpop.f32.mrf.mxu2 }
  0xf6   : > { %v546_v8 = vpop.f32.mrf.mxu3 }
  0xf7   : > { %v558_v9 = vadd.f32 %v546_v8, %v456_v4 }
  0xf8   : > { %v723_v10 = vpop.f32.mrf.mxu1 }
  0xf9   : > { %v1685_v36 = vadd.f32 %v648_v6, %v558_v9  ;;  %v753_v11 = vadd.f32 %v723_v10, %v1643_v58 }
  0xfb   : > { %v1029_v12 = vpop.f32.mrf.mxu0  ;;  %v855_v14 = vadd.f32 %v825_v7, %v753_v11 }
  0xfc   : > { %v828_v13 = vpop.f32.mrf.mxu2 }
  0xfe   : > { %v927_v16 = vpop.f32.mrf.mxu3 }
  0xff   : > { %v957_v17 = vadd.f32 %v927_v16, %v855_v14 }
 0x100   : > { %v726_v18 = vpop.f32.mrf.mxu1 }
 0x101   : > { %v754_v19 = vadd.f32 %v726_v18, %v1652_v5  ;;  %v1059_v20 = vadd.f32 %v1029_v12, %v957_v17 }
 0x103   : > { %v1073_v21 = vadd.f32 %v1691_v43, %v1059_v20  ;;  %v1032_v22 = vpop.f32.mrf.mxu0  ;;  %v856_v25 = vadd.f32 %v828_v13, %v754_v19 }
 0x104   : > { %v831_v23 = vpop.f32.mrf.mxu2 }
 0x105   : > { %vm1083_vm1 = vcmp.gt.f32.partialorder %v1073_v21, 0.0  ;;  %v1093_v58 = vmul.f32 0.2, %v1073_v21 }
 0x106   : > { %v930_v26 = vpop.f32.mrf.mxu3 }
 0x107   : > { %v1103_v27 = vsel %vm1083_vm1, %v1073_v21, %v1093_v58  ;;  %v958_v28 = vadd.f32 %v930_v26, %v856_v25 }
 0x108   : > { %1113 = vst.msk [vmem:[%s1699_s21] sm:$0xff] %vm200_vm0, %v1103_v27  ;;  %v729_v5 = vpop.f32.mrf.mxu1 }
 0x109   : > { %v755_v30 = vadd.f32 %v729_v5, %v1661_v15  ;;  %v1060_v32 = vadd.f32 %v1032_v22, %v958_v28 }
 0x10b   : > { %v1074_v33 = vadd.f32 %v1691_v43, %v1060_v32  ;;  %v1035_v37 = vpop.f32.mrf.mxu0  ;;  %v857_v41 = vadd.f32 %v831_v23, %v755_v30 }
 0x10c   : > { %v834_v39 = vpop.f32.mrf.mxu2 }
 0x10d   : > { %vm1084_vm2 = vcmp.gt.f32.partialorder %v1074_v33, 0.0  ;;  %v1094_v40 = vmul.f32 0.2, %v1074_v33 }
 0x10e   : > { %v933_v42 = vpop.f32.mrf.mxu3 }
 0x10f   : > { %v1104_v44 = vsel %vm1084_vm2, %v1074_v33, %v1094_v40  ;;  %v959_v31 = vadd.f32 %v933_v42, %v857_v41 }
 0x110   : > { %1114 = vst.msk [vmem:[%s1699_s21 + $0x8] sm:$0xff] %vm200_vm0, %v1104_v44  ;;  %v732_v46 = vpop.f32.mrf.mxu1 }
 0x111   : > { %v756_v47 = vadd.f32 %v732_v46, %v1668_v24  ;;  %v1061_v48 = vadd.f32 %v1035_v37, %v959_v31 }
 0x113   : > { %v1075_v15 = vadd.f32 %v1691_v43, %v1061_v48  ;;  %v1038_v49 = vpop.f32.mrf.mxu0  ;;  %v858_v38 = vadd.f32 %v834_v39, %v756_v47 }
 0x114   : > { %v837_v50 = vpop.f32.mrf.mxu2 }
 0x115   : > { %vm1085_vm3 = vcmp.gt.f32.partialorder %v1075_v15, 0.0  ;;  %v1095_v51 = vmul.f32 0.2, %v1075_v15 }
 0x116   : > { %v936_v53 = vpop.f32.mrf.mxu3 }
 0x117   : > { %v1105_v54 = vsel %vm1085_vm3, %v1075_v15, %v1095_v51  ;;  %v960_v55 = vadd.f32 %v936_v53, %v858_v38 }
 0x118   : > { %1115 = vst.msk [vmem:[%s1699_s21 + $0x10] sm:$0xff] %vm200_vm0, %v1105_v54  ;;  %v735_v56 = vpop.f32.mrf.mxu1 }
 0x119   : > { %v757_v57 = vadd.f32 %v735_v56, %v1671_v35  ;;  %v1062_v59 = vadd.f32 %v1038_v49, %v960_v55 }
 0x11b   : > { %v1076_v24 = vadd.f32 %v1691_v43, %v1062_v59  ;;  %v1041_v34 = vpop.f32.mrf.mxu0  ;;  %v859_v63 = vadd.f32 %v837_v50, %v757_v57 }
 0x11c   : > { %v840_v61 = vpop.f32.mrf.mxu2 }
 0x11d   : > { %vm1086_vm4 = vcmp.gt.f32.partialorder %v1076_v24, 0.0  ;;  %v1096_v62 = vmul.f32 0.2, %v1076_v24 }
 0x11e   : > { %v939_v0 = vpop.f32.mrf.mxu3 }
 0x11f   : > { %v1106_v1 = vsel %vm1086_vm4, %v1076_v24, %v1096_v62  ;;  %v961_v2 = vadd.f32 %v939_v0, %v859_v63 }
 0x120   : > { %1116 = vst.msk [vmem:[%s1699_s21 + $0x18] sm:$0xff] %vm200_vm0, %v1106_v1  ;;  %v738_v29 = vpop.f32.mrf.mxu1 }
 0x121   : > { %v758_v4 = vadd.f32 %v738_v29, %v1674_v45  ;;  %v1063_v6 = vadd.f32 %v1041_v34, %v961_v2 }
 0x123   : > { %v1077_v35 = vadd.f32 %v1691_v43, %v1063_v6  ;;  %v1044_v7 = vpop.f32.mrf.mxu0  ;;  %v860_v10 = vadd.f32 %v840_v61, %v758_v4 }
 0x124   : > { %v843_v8 = vpop.f32.mrf.mxu2 }
 0x125   : > { %vm1087_vm5 = vcmp.gt.f32.partialorder %v1077_v35, 0.0  ;;  %v1097_v9 = vmul.f32 0.2, %v1077_v35 }
 0x126   : > { %v942_v11 = vpop.f32.mrf.mxu3 }
 0x127   : > { %v1107_v12 = vsel %vm1087_vm5, %v1077_v35, %v1097_v9  ;;  %v962_v13 = vadd.f32 %v942_v11, %v860_v10 }
 0x128   : > { %1117 = vst.msk [vmem:[%s1699_s21 + $0x20] sm:$0xff] %vm200_vm0, %v1107_v12  ;;  %v741_v14 = vpop.f32.mrf.mxu1 }
 0x129   : > { %v759_v16 = vadd.f32 %v741_v14, %v1677_v52  ;;  %v1064_v17 = vadd.f32 %v1044_v7, %v962_v13 }
 0x12b   : > { %v1078_v45 = vadd.f32 %v1691_v43, %v1064_v17  ;;  %v1047_v18 = vpop.f32.mrf.mxu0  ;;  %v861_v20 = vadd.f32 %v843_v8, %v759_v16 }
 0x12c   : > { %v846_v22 = vpop.f32.mrf.mxu2 }
 0x12d   : > { %vm1088_vm6 = vcmp.gt.f32.partialorder %v1078_v45, 0.0  ;;  %v1098_v19 = vmul.f32 0.2, %v1078_v45 }
 0x12e   : > { %v945_v21 = vpop.f32.mrf.mxu3 }
 0x12f   : > { %v1108_v23 = vsel %vm1088_vm6, %v1078_v45, %v1098_v19  ;;  %v963_v58 = vadd.f32 %v945_v21, %v861_v20 }
 0x130   : > { %1118 = vst.msk [vmem:[%s1699_s21 + $0x28] sm:$0xff] %vm200_vm0, %v1108_v23  ;;  %v744_v25 = vpop.f32.mrf.mxu1 }
 0x131   : > { %v760_v26 = vadd.f32 %v744_v25, %v1680_v60  ;;  %v1065_v27 = vadd.f32 %v1047_v18, %v963_v58 }
 0x133   : > { %v1079_v52 = vadd.f32 %v1691_v43, %v1065_v27  ;;  %v1050_v28 = vpop.f32.mrf.mxu0  ;;  %v862_v30 = vadd.f32 %v846_v22, %v760_v26 }
 0x134   : > { %v849_v40 = vpop.f32.mrf.mxu2 }
 0x135   : > { %vm1089_vm7 = vcmp.gt.f32.partialorder %v1079_v52, 0.0  ;;  %v1099_v5 = vmul.f32 0.2, %v1079_v52 }
 0x136   : > { %v948_v32 = vpop.f32.mrf.mxu3 }
 0x137   : > { %v1109_v33 = vsel %vm1089_vm7, %v1079_v52, %v1099_v5  ;;  %v964_v37 = vadd.f32 %v948_v32, %v862_v30 }
 0x138   : > { %1119 = vst.msk [vmem:[%s1699_s21 + $0x30] sm:$0xff] %vm200_vm0, %v1109_v33  ;;  %v747_v39 = vpop.f32.mrf.mxu1 }
 0x139   : > { %v761_v41 = vadd.f32 %v747_v39, %v1683_v3  ;;  %v1066_v42 = vadd.f32 %v1050_v28, %v964_v37 }
 0x13b   : > { %v1080_v60 = vadd.f32 %v1691_v43, %v1066_v42  ;;  %v1053_v44 = vpop.f32.mrf.mxu0  ;;  %v863_v46 = vadd.f32 %v849_v40, %v761_v41 }
 0x13c   : > { %v852_v38 = vpop.f32.mrf.mxu2 }
 0x13d   : > { %vm1090_vm8 = vcmp.gt.f32.partialorder %v1080_v60, 0.0  ;;  %v1100_v31 = vmul.f32 0.2, %v1080_v60 }
 0x13e   : > { %v951_v47 = vpop.f32.mrf.mxu3 }
 0x13f   : > { %v1110_v48 = vsel %vm1090_vm8, %v1080_v60, %v1100_v31  ;;  %v965_v15 = vadd.f32 %v951_v47, %v863_v46 }
 0x140   : > { %1120 = vst.msk [vmem:[%s1699_s21 + $0x38] sm:$0xff] %vm200_vm0, %v1110_v48  ;;  %v750_v49 = vpop.f32.mrf.mxu1 }
 0x141   : > { %v762_v50 = vadd.f32 %v750_v49, %v1685_v36  ;;  %v1067_v51 = vadd.f32 %v1053_v44, %v965_v15 }
 0x143   : > { %v1081_v3 = vadd.f32 %v1691_v43, %v1067_v51  ;;  %v864_v54 = vadd.f32 %v852_v38, %v762_v50  ;;  %v1056_v56 = vpop.f32.mrf.mxu0 }
 0x145   : > { %vm1091_vm9 = vcmp.gt.f32.partialorder %v1081_v3, 0.0  ;;  %v1101_v53 = vmul.f32 0.2, %v1081_v3 }
 0x146   : > { %v954_v55 = vpop.f32.mrf.mxu3 }
 0x147   : > { %v1111_v57 = vsel %vm1091_vm9, %v1081_v3, %v1101_v53  ;;  %v966_v59 = vadd.f32 %v954_v55, %v864_v54 }
 0x148   : > { %1121 = vst.msk [vmem:[%s1699_s21 + $0x40] sm:$0xff] %vm200_vm0, %v1111_v57 }
 0x149   : > { %v1068_v24 = vadd.f32 %v1056_v56, %v966_v59 }
 0x14b   : > { %v1082_v34 = vadd.f32 %v1691_v43, %v1068_v24 }
 0x14d   : > { %vm1092_vm10 = vcmp.gt.f32.partialorder %v1082_v34, 0.0  ;;  %v1102_v61 = vmul.f32 0.2, %v1082_v34 }
 0x14f   : > { %v1112_v36 = vsel %vm1092_vm10, %v1082_v34, %v1102_v61 }
 0x150   : > { %1122 = vst.msk [vmem:[%s1699_s21 + $0x48] sm:$0xff] %vm200_vm0, %v1112_v36 }
 0x151 PF: > { %s13_s12 = sadd.s32 1, %s1338_s12  }
 0x152   : > { %p10_p4 = scmp.ge.s32.totalorder %s13_s12, 4  }
 0x154   :  { %12 = sbr.rel (!%p10_p4) target bundleno = 1 (0x1), region = 70 }

// kernel: discriminator_c_forward.21
= control target key start
LH: loop header
LB: loop body
LE: loop exit
PB: predicated region body
PF: predicated region fallthrough
CT: control target
= control target key end

     0   :  { %s825_s12 = smov 0   ;;  %s1050_s0 = inlined_call_operand.vmem [shape: f32[2,40,33], index: 0, kind: input, shape index: {}]   ;;  %s1051_s1 = inlined_call_operand.vmem [shape: f32[9,33,32], index: 1, kind: input, shape index: {}]   ;;  %s1052_s2 = inlined_call_operand.vmem [shape: f32[1,32], index: 2, kind: input, shape index: {}]   ;;  %s1053_s3 = inlined_call_operand.vmem [shape: f32[2,24,32], index: 3, kind: output, shape index: {}]  }
   0x1 LB: > { %s691_s13 = sadd.s32 4294967295, %s803_s12   ;;  %p695_p0 = scmp.ge.s32.totalorder %s803_s12, 1  ;;  %s803_s12 = sphi %s825_s12, %s13_s12  }
   0x2   : > { %p137_p1 = scmp.lt.s32.totalorder %s803_s12, 3 }
   0x4   : > { %p138_p2 = pnand %p695_p0, %p137_p1 }
   0x5   : > { %p161_p3 = scmp.lt.s32.totalorder (!%p138_p2), %s691_s13, 1 }
   0x6   : > { %141 = sbr.rel (%p138_p2) target bundleno = 211 (0xd3), region = 32 }
   0xb   : > { %v702_v0 = vld [vmem:[%s1051_s1 + $0x48] sm:$0x1]  ;;  %vm198_vm0 = vcmask 1040384   ;;  %v715_v1 = vld [vmem:[%s1051_s1 + $0x70] sm:$0x1]  ;;  %v701_v2 = vld [vmem:[%s1051_s1 + $0x40] sm:$0xff] }
   0xc   : > { %703 = vmatpush.msk.msra.mxu0 %vm198_vm0, %v702_v0  ;;  %776 = vmatpush.msk.msra.mxu1 %vm198_vm0, %v702_v0  ;;  %v714_v3 = vld [vmem:[%s1051_s1 + $0x68] sm:$0xff]  ;;  %v700_v4 = vld [vmem:[%s1051_s1 + $0x38] sm:$0xff]  ;;  %v713_v6 = vld [vmem:[%s1051_s1 + $0x60] sm:$0xff]  ;;  %s1055_s13 = smov (!%p161_p3, %s691_s13), 1  ;;  %vm188_vm1 = vcmask 269312   ;;  %vm632_vm3 = vcmask 261120  }
   0xd   : > { %716 = vmatpush.msk.msra.mxu2 %vm198_vm0, %v715_v1  ;;  %v724_v5 = vld [vmem:[%s1051_s1 + $0x98] sm:$0x1]  ;;  %v699_v7 = vld [vmem:[%s1051_s1 + $0x30] sm:$0xff]  ;;  %s786_s7 = smul.u32 40, %s1055_s13  ;;  %v722_v10 = vld [vmem:[%s1051_s1 + $0x88] sm:$0xff] }
   0xe   : > { %214 = vmatpush.msra.mxu0 %v701_v2  ;;  %777 = vmatpush.msra.mxu1 %v701_v2  ;;  %v723_v8 = vld [vmem:[%s1051_s1 + $0x90] sm:$0xff]  ;;  %v712_v9 = vld [vmem:[%s1051_s1 + $0x58] sm:$0xff]  ;;  %v698_v11 = vld [vmem:[%s1051_s1 + $0x28] sm:$0xff]  ;;  %s787_s9 = smul.u32 24, %s1055_s13 }
   0xf   : > { %299 = vmatpush.msra.mxu2 %v714_v3  ;;  %725 = vmatpush.msk.msra.mxu3 %vm198_vm0, %v724_v5  ;;  %s879_s16 = scalar_lea.vmem %s1050_s0, %s786_s7  ;;  %v178_v12 = vld [vmem:[%s1051_s1 + $0x20] sm:$0x1]  ;;  %v711_v14 = vld [vmem:[%s1051_s1 + $0x50] sm:$0xff]  ;;  %v177_v17 = vld [vmem:[%s1051_s1 + $0x18] sm:$0xff] }
  0x10   : > { %215 = vmatpush.msra.mxu0 %v700_v4  ;;  %778 = vmatpush.msra.mxu1 %v700_v4  ;;  %v179_v13 = vld [vmem:[%s879_s16 + $0x1] sm:$0xff]  ;;  %v181_v15 = vld [vmem:[%s879_s16 + $0x11] sm:$0xff]  ;;  %v751_v18 = vld [vmem:[%s1051_s1 + $0x110] sm:$0x1]  ;;  %s170_s14 = scalar_lea.vmem %s1053_s3, %s787_s9 }
  0x11   : > { %300 = vmatpush.msra.mxu2 %v713_v6  ;;  %349 = vmatpush.msra.mxu3 %v723_v8  ;;  %v266_v16 = vld [vmem:[%s879_s16 + $0x2] sm:$0xff]  ;;  %v176_v20 = vld [vmem:[%s1051_s1 + $0x10] sm:$0xff]  ;;  %v733_v21 = vld [vmem:[%s1051_s1 + $0xc0] sm:$0x1] }
  0x12   : > { %216 = vmatpush.msra.mxu0 %v699_v7  ;;  %779 = vmatpush.msra.mxu1 %v699_v7  ;;  %v721_v19 = vld [vmem:[%s1051_s1 + $0x80] sm:$0xff]  ;;  %v720_v22 = vld [vmem:[%s1051_s1 + $0x78] sm:$0xff]  ;;  %v750_v23 = vld [vmem:[%s1051_s1 + $0x108] sm:$0xff] }
  0x13   : > { %301 = vmatpush.msra.mxu2 %v712_v9  ;;  %350 = vmatpush.msra.mxu3 %v722_v10  ;;  %v175_v24 = vld [vmem:[%s1051_s1 + $0x8] sm:$0xff]  ;;  %v760_v26 = vld [vmem:[%s1051_s1 + $0x138] sm:$0x1]  ;;  %v174_v29 = vld [vmem:[%s1051_s1] sm:$0xff] }
  0x14   : > { %217 = vmatpush.msra.mxu0 %v698_v11  ;;  %780 = vmatpush.msra.mxu1 %v698_v11  ;;  %v316_v25 = vld [vmem:[%s879_s16 + $0x6] sm:$0xff]  ;;  %v732_v27 = vld [vmem:[%s1051_s1 + $0xb8] sm:$0xff]  ;;  %v731_v31 = vld [vmem:[%s1051_s1 + $0xb0] sm:$0xff] }
  0x15   : > { %704 = vmatmul.msk.f32.vlgmr.msra.gmra.mxu0 %vm188_vm1, %v179_v13  ;;  %302 = vmatpush.msra.mxu2 %v711_v14  ;;  %v180_v28 = vld [vmem:[%s879_s16 + $0x9] sm:$0xff]  ;;  %v171_v30 = vld [vmem:[%s879_s16] sm:$0xff]  ;;  %v742_v33 = vld [vmem:[%s1051_s1 + $0xe8] sm:$0x1] }
  0x16   : > { %707 = vmatpush.msk.msrb.mxu1 %vm198_vm0, %v178_v12  ;;  %717 = vmatmul.msk.f32.vlgmr.msra.gmra.mxu2 %vm188_vm1, %v266_v16  ;;  %v267_v32 = vld [vmem:[%s879_s16 + $0xa] sm:$0xff]  ;;  %v749_v34 = vld [vmem:[%s1051_s1 + $0x100] sm:$0xff]  ;;  %v748_v38 = vld [vmem:[%s1051_s1 + $0xf8] sm:$0xff] }
  0x17   : > { %706 = vmatmul.msk.f32.vlgmr.msra.gmra.mxu1 %vm188_vm1, %v181_v15  ;;  %752 = vmatpush.msk.msrb.mxu2 %vm198_vm0, %v751_v18  ;;  %v759_v35 = vld [vmem:[%s1051_s1 + $0x130] sm:$0xff]  ;;  %v730_v36 = vld [vmem:[%s1051_s1 + $0xa8] sm:$0xff]  ;;  %v741_v37 = vld [vmem:[%s1051_s1 + $0xe0] sm:$0xff] }
  0x18   : > { %252 = vmatpush.msrb.mxu1 %v177_v17  ;;  %351 = vmatpush.msra.mxu3 %v721_v19  ;;  %v758_v39 = vld [vmem:[%s1051_s1 + $0x128] sm:$0xff]  ;;  %v729_v41 = vld [vmem:[%s1051_s1 + $0xa0] sm:$0xff]  ;;  %v740_v42 = vld [vmem:[%s1051_s1 + $0xd8] sm:$0xff] }
  0x19   : > { %734 = vmatpush.msk.msrb.mxu0 %vm198_vm0, %v733_v21  ;;  %499 = vmatpush.msrb.mxu2 %v750_v23  ;;  %v317_v40 = vld [vmem:[%s879_s16 + $0xe] sm:$0xff]  ;;  %v757_v45 = vld [vmem:[%s1051_s1 + $0x120] sm:$0xff]  ;;  %v756_v50 = vld [vmem:[%s1051_s1 + $0x118] sm:$0xff] }
  0x1a   : > { %253 = vmatpush.msrb.mxu1 %v176_v20  ;;  %352 = vmatpush.msra.mxu3 %v720_v22  ;;  %v747_v43 = vld [vmem:[%s1051_s1 + $0xf0] sm:$0xff]  ;;  %v366_v44 = vld [vmem:[%s879_s16 + $0x7] sm:$0xff]  ;;  %v769_v47 = vld [vmem:[%s1051_s1 + $0x160] sm:$0x1] }
  0x1b   : > { %726 = vmatmul.msk.f32.vlgmr.msra.gmra.mxu3 %vm188_vm1, %v316_v25  ;;  %399 = vmatpush.msrb.mxu0 %v732_v27  ;;  %v172_v46 = vld [vmem:[%s879_s16 + $0x8] sm:$0xff]  ;;  %v268_v48 = vld [vmem:[%s879_s16 + $0x12] sm:$0xff]  ;;  %v765_v59 = vld [vmem:[%s1051_s1 + $0x140] sm:$0xff] }
  0x1c   : > { %254 = vmatpush.msrb.mxu1 %v175_v24  ;;  %761 = vmatpush.msk.msrb.mxu3 %vm198_vm0, %v760_v26  ;;  %v739_v49 = vld [vmem:[%s1051_s1 + $0xd0] sm:$0xff]  ;;  %v768_v51 = vld [vmem:[%s1051_s1 + $0x158] sm:$0xff]  ;;  %v738_v52 = vld [vmem:[%s1051_s1 + $0xc8] sm:$0xff] }
  0x1d   : > { %705 = vmatmul.msk.f32.gmra.mxu0 %vm188_vm1, %v180_v28  ;;  %500 = vmatpush.msrb.mxu2 %v749_v34  ;;  %v318_v53 = vld [vmem:[%s879_s16 + $0x16] sm:$0xff]  ;;  %v766_v57 = vld [vmem:[%s1051_s1 + $0x148] sm:$0xff]  ;;  %v568_v3 = vld [vmem:[%s879_s16 + $0x1e] sm:$0xff] }
  0x1e   : > { %255 = vmatpush.msrb.mxu1 %v174_v29  ;;  %400 = vmatpush.msrb.mxu0 %v731_v31  ;;  %v767_v54 = vld [vmem:[%s1051_s1 + $0x150] sm:$0xff]  ;;  %v468_v0 = vld [vmem:[%s879_s16 + $0x1c] sm:$0xff] }
  0x1f   : > { %708 = vmatmul.msk.f32.vlgmr.msrb.gmra.mxu1 %vm188_vm1, %v171_v30  ;;  %718 = vmatmul.msk.f32.gmra.mxu2 %vm188_vm1, %v267_v32  ;;  %v367_v55 = vld [vmem:[%s879_s16 + $0xf] sm:$0xff]  ;;  %v368_v61 = vld [vmem:[%s879_s16 + $0x17] sm:$0xff] }
  0x20   : > { %743 = vmatpush.msk.msra.mxu1 %vm198_vm0, %v742_v33  ;;  %549 = vmatpush.msrb.mxu3 %v759_v35  ;;  %v173_v56 = vld [vmem:[%s879_s16 + $0x10] sm:$0xff]  ;;  %v518_v1 = vld [vmem:[%s879_s16 + $0x1d] sm:$0xff] }
  0x21   : > { %401 = vmatpush.msrb.mxu0 %v730_v36  ;;  %501 = vmatpush.msrb.mxu2 %v748_v38  ;;  %v466_v58 = vld [vmem:[%s879_s16 + $0xc] sm:$0xff]  ;;  %v467_v62 = vld [vmem:[%s879_s16 + $0x14] sm:$0xff]  ;;  %v796_v33 = vld [vmem:[%s1052_s2] ss:$0 sm:$0xff] }
  0x22   : > { %449 = vmatpush.msra.mxu1 %v741_v37  ;;  %550 = vmatpush.msrb.mxu3 %v758_v39  ;;  %v516_v60 = vld [vmem:[%s879_s16 + $0xd] sm:$0xff]  ;;  %v517_v63 = vld [vmem:[%s879_s16 + $0x15] sm:$0xff] }
  0x23   : > { %727 = vmatmul.msk.f32.gmra.mxu3 %vm188_vm1, %v317_v40  ;;  %402 = vmatpush.msrb.mxu0 %v729_v41  ;;  %v418_v2 = vld [vmem:[%s879_s16 + $0x18] sm:$0xff] }
  0x24   : > { %450 = vmatpush.msra.mxu1 %v740_v42  ;;  %502 = vmatpush.msrb.mxu2 %v747_v43 }
  0x25   : > { %735 = vmatmul.msk.f32.vlgmr.msrb.gmra.mxu0 %vm188_vm1, %v366_v44  ;;  %551 = vmatpush.msrb.mxu3 %v757_v45 }
  0x26   : > { %770 = vmatpush.msk.msra.mxu0 %vm198_vm0, %v769_v47  ;;  %451 = vmatpush.msra.mxu1 %v739_v49 }
  0x27   : > { %709 = vmatmul.msk.f32.gmra.mxu1 %vm188_vm1, %v172_v46  ;;  %719 = vmatmul.msk.f32.gmra.mxu2 %vm188_vm1, %v268_v48 }
  0x28   : > { %781 = vmatpush.msk.msra.mxu2 %vm198_vm0, %v769_v47  ;;  %552 = vmatpush.msrb.mxu3 %v756_v50 }
  0x29   : > { %599 = vmatpush.msra.mxu0 %v768_v51  ;;  %452 = vmatpush.msra.mxu1 %v738_v52 }
  0x2a   : > { %782 = vmatpush.msra.mxu2 %v768_v51 }
  0x2b   : > { %728 = vmatmul.msk.f32.gmra.mxu3 %vm188_vm1, %v318_v53  ;;  %600 = vmatpush.msra.mxu0 %v767_v54 }
  0x2c   : > { %783 = vmatpush.msra.mxu2 %v767_v54 }
  0x2d   : > { %736 = vmatmul.msk.f32.gmra.mxu0 %vm188_vm1, %v367_v55 }
  0x2e   : > { %601 = vmatpush.msra.mxu0 %v766_v57  ;;  %784 = vmatpush.msra.mxu2 %v766_v57 }
  0x2f   : > { %710 = vmatmul.msk.f32.gmra.mxu1 %vm188_vm1, %v173_v56  ;;  %753 = vmatmul.msk.f32.vlgmr.msrb.gmra.mxu2 %vm188_vm1, %v466_v58 }
  0x30   : > { %602 = vmatpush.msra.mxu0 %v765_v59  ;;  %785 = vmatpush.msra.mxu2 %v765_v59 }
  0x33   : > { %762 = vmatmul.msk.f32.vlgmr.msrb.gmra.mxu3 %vm188_vm1, %v516_v60 }
  0x35   : > { %737 = vmatmul.msk.f32.gmra.mxu0 %vm188_vm1, %v368_v61 }
  0x37   : > { %744 = vmatmul.msk.f32.vlgmr.msra.gmra.mxu1 %vm188_vm1, %v172_v46  ;;  %754 = vmatmul.msk.f32.gmra.mxu2 %vm188_vm1, %v467_v62 }
  0x3b   : > { %763 = vmatmul.msk.f32.gmra.mxu3 %vm188_vm1, %v517_v63 }
  0x3d   : > { %771 = vmatmul.msk.f32.vlgmr.msra.gmra.mxu0 %vm188_vm1, %v317_v40 }
  0x3f   : > { %745 = vmatmul.msk.f32.gmra.mxu1 %vm188_vm1, %v173_v56  ;;  %755 = vmatmul.msk.f32.gmra.mxu2 %vm188_vm1, %v468_v0 }
  0x43   : > { %764 = vmatmul.msk.f32.gmra.mxu3 %vm188_vm1, %v518_v1 }
  0x45   : > { %772 = vmatmul.msk.f32.gmra.mxu0 %vm188_vm1, %v318_v53 }
  0x47   : > { %746 = vmatmul.msk.f32.gmra.mxu1 %vm188_vm1, %v418_v2  ;;  %773 = vmatmul.msk.f32.vlgmr.msra.gmra.mxu2 %vm188_vm1, %v568_v3 }
  0x92   : > { %v219_v4 = vpop.f32.mrf.mxu0 }
  0x94   : > { %v225_v5 = vpop.f32.mrf.mxu1 }
  0x99   : > { %v304_v6 = vpop.f32.mrf.mxu2 }
  0x9a   : > { %v222_v7 = vpop.f32.mrf.mxu0 }
  0x9c   : > { %v257_v8 = vpop.f32.mrf.mxu1 }
  0x9d   : > { %v258_v13 = vadd.f32 %v257_v8, %v219_v4 }
  0x9e   : > { %v354_v9 = vpop.f32.mrf.mxu3 }
  0x9f   : > { %v313_v15 = vadd.f32 %v304_v6, %v258_v13 }
  0xa1   : > { %v363_v19 = vadd.f32 %v354_v9, %v313_v15 }
  0xa2   : > { %v307_v10 = vpop.f32.mrf.mxu2  ;;  %v404_v11 = vpop.f32.mrf.mxu0 }
  0xa3   : > { %v413_v22 = vadd.f32 %v404_v11, %v363_v19 }
  0xa4   : > { %v260_v12 = vpop.f32.mrf.mxu1 }
  0xa5   : > { %v261_v20 = vadd.f32 %v260_v12, %v222_v7 }
  0xa6   : > { %v357_v14 = vpop.f32.mrf.mxu3 }
  0xa7   : > { %v314_v23 = vadd.f32 %v307_v10, %v261_v20 }
  0xa9   : > { %v364_v28 = vadd.f32 %v357_v14, %v314_v23 }
  0xaa   : > { %v310_v16 = vpop.f32.mrf.mxu2  ;;  %v407_v17 = vpop.f32.mrf.mxu0 }
  0xab   : > { %v414_v34 = vadd.f32 %v407_v17, %v364_v28 }
  0xac   : > { %v263_v18 = vpop.f32.mrf.mxu1 }
  0xad   : > { %v264_v29 = vadd.f32 %v263_v18, %v225_v5 }
  0xae   : > { %v360_v21 = vpop.f32.mrf.mxu3 }
  0xaf   : > { %v315_v35 = vadd.f32 %v310_v16, %v264_v29 }
  0xb1   : > { %v365_v42 = vadd.f32 %v360_v21, %v315_v35 }
  0xb2   : > { %v504_v24 = vpop.f32.mrf.mxu2  ;;  %v410_v25 = vpop.f32.mrf.mxu0 }
  0xb3   : > { %v415_v48 = vadd.f32 %v410_v25, %v365_v42 }
  0xb4   : > { %v454_v26 = vpop.f32.mrf.mxu1 }
  0xb5   : > { %v463_v27 = vadd.f32 %v454_v26, %v413_v22 }
  0xb6   : > { %v554_v31 = vpop.f32.mrf.mxu3 }
  0xb7   : > { %v513_v30 = vadd.f32 %v504_v24, %v463_v27 }
  0xb9   : > { %v563_v32 = vadd.f32 %v554_v31, %v513_v30 }
  0xba   : > { %v507_v36 = vpop.f32.mrf.mxu2  ;;  %v604_v37 = vpop.f32.mrf.mxu0 }
  0xbb   : > { %v613_v38 = vadd.f32 %v604_v37, %v563_v32 }
  0xbc   : > { %v457_v39 = vpop.f32.mrf.mxu1 }
  0xbd   : > { %v464_v40 = vadd.f32 %v457_v39, %v414_v34  ;;  %v620_v41 = vadd.f32 %v796_v33, %v613_v38 }
  0xbe   : > { %v557_v44 = vpop.f32.mrf.mxu3 }
  0xbf   : > { %v514_v43 = vadd.f32 %v507_v36, %v464_v40  ;;  %vm623_vm2 = vcmp.gt.f32.partialorder %v620_v41, 0.0  ;;  %v626_v45 = vmul.f32 0.2, %v620_v41 }
  0xc1   : > { %v564_v46 = vadd.f32 %v557_v44, %v514_v43  ;;  %v629_v47 = vsel %vm623_vm2, %v620_v41, %v626_v45 }
  0xc2   : > { %633 = vst.msk [vmem:[%s170_s14] sm:$0xff] %vm632_vm3, %v629_v47  ;;  %v510_v49 = vpop.f32.mrf.mxu2  ;;  %v607_v50 = vpop.f32.mrf.mxu0 }
  0xc3   : > { %v614_v51 = vadd.f32 %v607_v50, %v564_v46 }
  0xc4   : > { %v460_v52 = vpop.f32.mrf.mxu1 }
  0xc5   : > { %v465_v53 = vadd.f32 %v460_v52, %v415_v48  ;;  %v621_v54 = vadd.f32 %v796_v33, %v614_v51 }
  0xc6   : > { %v560_v56 = vpop.f32.mrf.mxu3 }
  0xc7   : > { %v515_v55 = vadd.f32 %v510_v49, %v465_v53  ;;  %vm624_vm4 = vcmp.gt.f32.partialorder %v621_v54, 0.0  ;;  %v627_v57 = vmul.f32 0.2, %v621_v54 }
  0xc9   : > { %v565_v58 = vadd.f32 %v560_v56, %v515_v55  ;;  %v630_v59 = vsel %vm624_vm4, %v621_v54, %v627_v57 }
  0xca   : > { %634 = vst.msk [vmem:[%s170_s14 + $0x8] sm:$0xff] %vm632_vm3, %v630_v59  ;;  %v610_v60 = vpop.f32.mrf.mxu2 }
  0xcb   : > { %v615_v61 = vadd.f32 %v610_v60, %v565_v58 }
  0xcd   : > { %v622_v62 = vadd.f32 %v796_v33, %v615_v61 }
  0xcf   : > { %vm625_vm5 = vcmp.gt.f32.partialorder %v622_v62, 0.0  ;;  %v628_v63 = vmul.f32 0.2, %v622_v62 }
  0xd1   : > { %v631_v0 = vsel %vm625_vm5, %v622_v62, %v628_v63 }
  0xd2   : > { %635 = vst.msk [vmem:[%s170_s14 + $0x10] sm:$0xff] %vm632_vm3, %v631_v0 }
  0xd3 PF: > { %s13_s12 = sadd.s32 1, %s803_s12  }
  0xd4   : > { %p10_p4 = scmp.ge.s32.totalorder %s13_s12, 4  }
  0xd6   :  { %12 = sbr.rel (!%p10_p4) target bundleno = 1 (0x1), region = 70 }

// kernel: discriminator_c_forward.22
= control target key start
LH: loop header
LB: loop body
LE: loop exit
PB: predicated region body
PF: predicated region fallthrough
CT: control target
= control target key end

     0   :  { %vm340_vm1 = vcmask 254976   ;;  %s632_s1 = inlined_call_operand.vmem [shape: bf16[512,32], index: 1, kind: input, shape index: {}]   ;;  %s633_s0 = inlined_call_operand.vmem [shape: bf16[2,512], index: 0, kind: input, shape index: {}]   ;;  %s634_s2 = inlined_call_operand.vmem [shape: f32[1,32], index: 2, kind: input, shape index: {}]   ;;  %s635_s3 = inlined_call_operand.vmem [shape: f32[2,32], index: 3, kind: output, shape index: {}]  }
   0x1   :  { %v481_v0 = vld [vmem:[%s632_s1 + $0x38] sm:$0xff]  ;;  %v480_v4 = vld [vmem:[%s632_s1 + $0x30] sm:$0xff]  ;;  %v479_v8 = vld [vmem:[%s632_s1 + $0x28] sm:$0xff] }
   0x2   :  { %v489_v1 = vld [vmem:[%s632_s1 + $0x78] sm:$0xff]  ;;  %285 = vmatpush.bf16.msra.mxu0 %v481_v0  ;;  %v488_v5 = vld [vmem:[%s632_s1 + $0x70] sm:$0xff]  ;;  %v487_v9 = vld [vmem:[%s632_s1 + $0x68] sm:$0xff] }
   0x3   :  { %v497_v2 = vld [vmem:[%s632_s1 + $0xb8] sm:$0xff]  ;;  %298 = vmatpush.bf16.msra.mxu1 %v489_v1  ;;  %v496_v6 = vld [vmem:[%s632_s1 + $0xb0] sm:$0xff]  ;;  %v495_v10 = vld [vmem:[%s632_s1 + $0xa8] sm:$0xff] }
   0x4   :  { %v505_v3 = vld [vmem:[%s632_s1 + $0xf8] sm:$0xff]  ;;  %311 = vmatpush.bf16.msra.mxu2 %v497_v2  ;;  %v504_v7 = vld [vmem:[%s632_s1 + $0xf0] sm:$0xff]  ;;  %v503_v11 = vld [vmem:[%s632_s1 + $0xe8] sm:$0xff] }
   0x5   :  { %324 = vmatpush.bf16.msra.mxu3 %v505_v3  ;;  %v478_v12 = vld [vmem:[%s632_s1 + $0x20] sm:$0xff]  ;;  %v477_v17 = vld [vmem:[%s632_s1 + $0x18] sm:$0xff]  ;;  %v476_v21 = vld [vmem:[%s632_s1 + $0x10] sm:$0xff] }
   0x6   :  { %286 = vmatpush.bf16.msra.mxu0 %v480_v4  ;;  %v486_v13 = vld [vmem:[%s632_s1 + $0x60] sm:$0xff]  ;;  %v485_v18 = vld [vmem:[%s632_s1 + $0x58] sm:$0xff]  ;;  %v484_v22 = vld [vmem:[%s632_s1 + $0x50] sm:$0xff] }
   0x7   :  { %299 = vmatpush.bf16.msra.mxu1 %v488_v5  ;;  %v14_v14 = vld [vmem:[%s633_s0] sm:$0xf]  ;;  %v493_v19 = vld [vmem:[%s632_s1 + $0x98] sm:$0xff]  ;;  %v492_v23 = vld [vmem:[%s632_s1 + $0x90] sm:$0xff] }
   0x8   :  { %312 = vmatpush.bf16.msra.mxu2 %v496_v6  ;;  %v494_v15 = vld [vmem:[%s632_s1 + $0xa0] sm:$0xff]  ;;  %84 = vst [vmem:[#allocation1] ss:$9 sm:$0xff] %v14_v14  ;;  %v501_v20 = vld [vmem:[%s632_s1 + $0xd8] sm:$0xff]  ;;  %v500_v24 = vld [vmem:[%s632_s1 + $0xd0] sm:$0xff] }
   0x9   :  { %325 = vmatpush.bf16.msra.mxu3 %v504_v7  ;;  %v502_v16 = vld [vmem:[%s632_s1 + $0xe0] sm:$0xff]  ;;  %v475_v25 = vld [vmem:[%s632_s1 + $0x8] sm:$0xff] }
   0xa   :  { %287 = vmatpush.bf16.msra.mxu0 %v479_v8  ;;  %v483_v26 = vld [vmem:[%s632_s1 + $0x48] sm:$0xff]  ;;  %v474_v29 = vld [vmem:[%s632_s1] sm:$0xff] }
   0xb   :  { %300 = vmatpush.bf16.msra.mxu1 %v487_v9  ;;  %v491_v27 = vld [vmem:[%s632_s1 + $0x88] sm:$0xff]  ;;  %v482_v30 = vld [vmem:[%s632_s1 + $0x40] sm:$0xff] }
   0xc   :  { %313 = vmatpush.bf16.msra.mxu2 %v495_v10  ;;  %v499_v28 = vld [vmem:[%s632_s1 + $0xc8] sm:$0xff]  ;;  %v490_v31 = vld [vmem:[%s632_s1 + $0x80] sm:$0xff] }
   0xd   :  { %326 = vmatpush.bf16.msra.mxu3 %v503_v11  ;;  %v498_v32 = vld [vmem:[%s632_s1 + $0xc0] sm:$0xff] }
   0xe   :  { %288 = vmatpush.bf16.msra.mxu0 %v478_v12  ;;  %v506_v37 = vld [vmem:[%s634_s2] ss:$0 sm:$0xff] }
   0xf   :  { %301 = vmatpush.bf16.msra.mxu1 %v486_v13  ;;  %v85_v33 = vld [vmem:[#allocation1] sm:$0xff]  ;;  %v86_v34 = vld [vmem:[#allocation1 + $0x9] sm:$0xff]  ;;  %v87_v35 = vld [vmem:[#allocation1 + $0x12] sm:$0xff] }
  0x10   :  { %314 = vmatpush.bf16.msra.mxu2 %v494_v15  ;;  %v88_v36 = vld [vmem:[#allocation1 + $0x1b] sm:$0xff] }
  0x11   :  { %327 = vmatpush.bf16.msra.mxu3 %v502_v16 }
  0x12   :  { %289 = vmatpush.bf16.msra.mxu0 %v477_v17 }
  0x13   :  { %302 = vmatpush.bf16.msra.mxu1 %v485_v18 }
  0x14   :  { %315 = vmatpush.bf16.msra.mxu2 %v493_v19 }
  0x15   :  { %328 = vmatpush.bf16.msra.mxu3 %v501_v20 }
  0x16   :  { %290 = vmatpush.bf16.msra.mxu0 %v476_v21 }
  0x17   :  { %303 = vmatpush.bf16.msra.mxu1 %v484_v22 }
  0x18   :  { %316 = vmatpush.bf16.msra.mxu2 %v492_v23 }
  0x19   :  { %329 = vmatpush.bf16.msra.mxu3 %v500_v24 }
  0x1a   :  { %291 = vmatpush.bf16.msra.mxu0 %v475_v25 }
  0x1b   :  { %304 = vmatpush.bf16.msra.mxu1 %v483_v26 }
  0x1c   :  { %317 = vmatpush.bf16.msra.mxu2 %v491_v27 }
  0x1d   :  { %330 = vmatpush.bf16.msra.mxu3 %v499_v28 }
  0x1e   :  { %292 = vmatpush.bf16.msra.mxu0 %v474_v29 }
  0x1f   :  { %305 = vmatpush.bf16.msra.mxu1 %v482_v30 }
  0x20   :  { %318 = vmatpush.bf16.msra.mxu2 %v490_v31 }
  0x21   :  { %331 = vmatpush.bf16.msra.mxu3 %v498_v32  ;;  %293 = vmatmul.bf16.vlgmr.msra.gmra.mxu0 %v85_v33 }
  0x22   :  { %306 = vmatmul.bf16.vlgmr.msra.gmra.mxu1 %v86_v34 }
  0x23   :  { %319 = vmatmul.bf16.vlgmr.msra.gmra.mxu2 %v87_v35 }
  0x24   :  { %332 = vmatmul.bf16.vlgmr.msra.gmra.mxu3 %v88_v36 }
  0x9e   :  { %v294_v38 = vpop.f32.mrf.mxu0 }
  0x9f   :  { %v307_v39 = vpop.f32.mrf.mxu1  ;;  %v295_v40 = vadd.f32 %v506_v37, %v294_v38 }
  0xa1   :  { %v308_v41 = vadd.f32 %v307_v39, %v295_v40 }
  0xa6   :  { %v320_v42 = vpop.f32.mrf.mxu2  ;;  %v296_v45 = vpop.f32.mrf.mxu0 }
  0xa7   :  { %v333_v43 = vpop.f32.mrf.mxu3  ;;  %v321_v44 = vadd.f32 %v320_v42, %v308_v41  ;;  %v309_v46 = vpop.f32.mrf.mxu1 }
  0xa9   :  { %v334_v47 = vadd.f32 %v333_v43, %v321_v44 }
  0xab   :  { %vm337_vm0 = vcmp.gt.f32.partialorder %v334_v47, 0.0  ;;  %v338_v48 = vmul.f32 0.2, %v334_v47 }
  0xad   :  { %v339_v49 = vsel %vm337_vm0, %v334_v47, %v338_v48 }
  0xae   :  { %341 = vst.msk [vmem:[%s635_s3] sm:$0x3] %vm340_vm1, %v339_v49  ;;  %v322_v50 = vpop.f32.mrf.mxu2 }
  0xaf   :  { %v335_v51 = vpop.f32.mrf.mxu3 }

// kernel: discriminator_c_forward.23
= control target key start
LH: loop header
LB: loop body
LE: loop exit
PB: predicated region body
PF: predicated region fallthrough
CT: control target
= control target key end

     0   :  { %vm38_vm0 = vcmask 261120   ;;  %vm55_vm1 = vcmask 1024   ;;  %s108_s1 = inlined_call_operand.vmem [shape: bf16[32,1], index: 1, kind: input, shape index: {}]   ;;  %s109_s2 = inlined_call_operand.<no memory space> [shape: f32[1,1], index: 2, kind: input, shape index: {}]   ;;  %s110_s0 = inlined_call_operand.vmem [shape: bf16[2,32], index: 0, kind: input, shape index: {}]   ;;  %s111_s3 = inlined_call_operand.vmem [shape: f32[2,1], index: 3, kind: output, shape index: {}]  }
   0x1   :  { %v71_v0 = vld [vmem:[%s108_s1 + $0x8] sm:$0xff]  ;;  %v8_v1 = vstv %s109_s2  ;;  %v70_v2 = vld [vmem:[%s108_s1] sm:$0xff] }
   0x2   :  { %9 = vst [vmem:[#allocation2] sm:$0x1] %v8_v1  ;;  %48 = vmatpush.bf16.msra.mxu0 %v71_v0  ;;  %v17_v3 = vld [vmem:[%s110_s0] sm:$0x1] }
   0x6   :  { %49 = vmatpush.bf16.msra.mxu0 %v70_v2 }
   0x9   :  { %69 = vmatmul.msk.bf16.vlgmr.msra.gmra.mxu0 %vm38_vm0, %v17_v3  ;;  %v72_v4 = vld [vmem:[#allocation2] ss:$0 sm:$0xff] }
  0x86   :  { %v51_v5 = vpop.f32.mrf.mxu0 }
  0x87   :  { %v52_v6 = vadd.f32 %v72_v4, %v51_v5 }
  0x89   :  { %56 = vst.msk [vmem:[%s111_s3] sm:$0x3] %vm55_vm1, %v52_v6 }
  0x8e   :  { %v53_v7 = vpop.f32.mrf.mxu0 }

</bundles_post_ra>
